<compile_context>
chip_gen: v7x
topology: tpu7x:2x2x1
jax: 0.10.0
libtpu: 0.0.40
codegen_flags: <defaults>
</compile_context>

<pallas_src>
import functools

import jax
import jax.numpy as jnp
from jax import lax
from jax.experimental import pallas as pl
from jax.experimental.pallas import tpu as pltpu

F32 = jnp.float32
BF16 = jnp.bfloat16
EPS = 1e-5

_VMEM = pl.BlockSpec(memory_space=pltpu.MemorySpace.VMEM)
_ANY = pl.BlockSpec(memory_space=pl.ANY)
_CPARAMS = pltpu.CompilerParams(vmem_limit_bytes=32 * 1024 * 1024)


# ----------------------------------------------------------------------------
# In-kernel helpers (trace-time; operate on values / VMEM refs)
# ----------------------------------------------------------------------------
def _col_stats(x):
    """Per-channel stats of x:[R, C] over axis 0 (torch unbiased var + eps).

    Normalization uses a [1, C] reciprocal + broadcast multiply (VPU) instead
    of a full [R, C] divide (EUP-serial).  (perf review #5)
    """
    r = x.shape[0]
    mean = jnp.mean(x, axis=0, keepdims=True)                        # [1, C]
    d = x - mean
    var = jnp.sum(d * d, axis=0, keepdims=True) * (1.0 / float(max(r - 1, 1)))
    std = jnp.sqrt(var + EPS)                                        # [1, C]
    norm = d * (1.0 / std)
    return norm, mean, std


def _linear(x, w_ref, b_ref, relu=False):
    """f32 x:[M,K] @ bf16 w_ref:[K,N] + f32 b_ref:[1,N], f32 accumulation."""
    y = jnp.dot(x.astype(BF16), w_ref[...],
                preferred_element_type=F32) + b_ref[...]
    return jnp.maximum(y, 0.0) if relu else y


def _conv3x3(act, w_ref, b_ref, H, W, relu, m_left, m_right, fold_k):
    """3x3 / stride 1 / pad 1 conv on act:[H*W, Cin] (row-major spatial grid).

    w_ref: [9*Cin, Cout] bf16; tap t = kh*3+kw occupies rows [t*Cin, (t+1)*Cin).
    Sublane-aligned tap construction (perf review #2): pad with W (multiple of
    8) zero rows per side, build the two horizontal-neighbour copies once
    (h[dw][r] == padded[r+dw]; the wrapped rows land in the zero padding), mask
    image-row-boundary crossings with the precomputed m_left / m_right, then
    the 9 taps are aligned slices at offsets {0, W, 2W}.
    """
    HW, cin = act.shape
    P = W                                       # pad rows per side, % 8 == 0
    zpad = jnp.zeros((P, cin), F32)
    padded = jnp.concatenate([zpad, act, zpad], axis=0)            # [HW+2W, Cin]
    zrow = jnp.zeros((1, cin), F32)
    h = {
        # h[-1][r] = padded[r-1]; zero where the output column w == 0.
        -1: jnp.where(m_left,
                      jnp.concatenate([zrow, padded[:-1, :]], axis=0), 0.0),
        0: padded,
        # h[+1][r] = padded[r+1]; zero where the output column w == W-1.
        1: jnp.where(m_right,
                     jnp.concatenate([padded[1:, :], zrow], axis=0), 0.0),
    }
    taps = []
    for kh in range(3):
        for kw in range(3):
            start = P + (kh - 1) * W            # 0, W or 2W -> sublane-aligned
            taps.append(h[kw - 1][start:start + HW, :])

    if fold_k:
        # One K-stacked bf16 matmul: accumulation stays in the MXU result
        # buffer instead of 8 f32 VPU adds.  (perf review #6)
        x = jnp.concatenate([t.astype(BF16) for t in taps], axis=1)  # [HW, 9*Cin]
        out = jnp.dot(x, w_ref[...], preferred_element_type=F32) + b_ref[...]
    else:
        acc = None
        for t_i, t in enumerate(taps):
            part = jnp.dot(t.astype(BF16),
                           w_ref[t_i * cin:(t_i + 1) * cin, :],
                           preferred_element_type=F32)
            acc = part if acc is None else acc + part
        out = acc + b_ref[...]
    return jnp.maximum(out, 0.0) if relu else out


# ----------------------------------------------------------------------------
# Kernels
# ----------------------------------------------------------------------------
def _adain_kernel(cf_ref, s_ref, out_ref):
    c_norm, _, _ = _col_stats(cf_ref[...].astype(F32))
    _, s_mean, s_std = _col_stats(s_ref[...].astype(F32))
    out_ref[...] = (c_norm * s_std + s_mean).astype(out_ref.dtype)


def _mul_trans_kernel(cf_ref, s_ref, rmat_ref, rmat_t_ref,
                      cw1_ref, cb1_ref, cw2_ref, cb2_ref,
                      k1w_ref, k1b_ref, k2w_ref, k2b_ref, k3w_ref, k3b_ref,
                      fcw_hbm_ref, fcb_ref,
                      uw1_ref, ub1_ref, uw2_ref, ub2_ref,
                      out_ref,
                      fc_vmem, fc_sem, *, H, W, ms):
    HW = H * W

    # --- (#1) start the big fc-weight HBM->VMEM DMA; it overlaps with the
    #     whole content MLP + 3-layer conv stack below. ---
    fc_copy = pltpu.make_async_copy(fcw_hbm_ref, fc_vmem, fc_sem)
    fc_copy.start()

    # --- content: per-channel normalize + compress MLP -> comp [N, ms] ---
    c_norm, _, _ = _col_stats(cf_ref[...].astype(F32))
    comp = _linear(_linear(c_norm, cw1_ref, cb1_ref, relu=True), cw2_ref, cb2_ref)

    # --- style: per-channel normalize + 3-layer CNN -> a [HW, ms] ---
    s_norm, s_mean, s_std = _col_stats(s_ref[...].astype(F32))
    # (#7) conv row-boundary masks, built once and shared by all three layers.
    rows = lax.broadcasted_iota(jnp.int32, (HW + 2 * W, 1), 0)
    wcol = rows % W
    m_left = wcol >= 1
    m_right = wcol <= W - 2
    a = _conv3x3(s_norm, k1w_ref, k1b_ref, H, W, True, m_left, m_right, True)
    a = _conv3x3(a, k2w_ref, k2b_ref, H, W, True, m_left, m_right, True)
    a = _conv3x3(a, k3w_ref, k3b_ref, H, W, False, m_left, m_right, False)

    # --- (#3) gram = a^T a / HW as a direct MXU contraction, then row-major
    #     flatten (index k*ms+l) with a constant 0/1 selector on the tiny
    #     [ms, ms] gram -- no [HW, ms*ms] intermediates. ---
    gram = lax.dot_general(a, a, (((0,), (0,)), ((), ())),
                           preferred_element_type=F32) * (1.0 / HW)   # [ms, ms]
    gram_flat = jnp.sum(rmat_ref[...] * jnp.tile(gram, (1, ms)),
                        axis=0, keepdims=True)                        # [1, ms*ms]

    # --- snet.fc -> flattened sMatrix [1, ms*ms]; wait on the overlapped DMA
    #     only now. ---
    fc_copy.wait()
    smat_flat = _linear(gram_flat, fc_vmem, fcb_ref)

    # --- transfeature = comp @ sMatrix.T without unflattening sMatrix:
    #     tf[n,i] = sum_j comp[n,j]*smat_flat[i*ms+j]
    #     (#4) "comp @ tmat" is an exact lane tile; rmat_t is a precomputed
    #     constant (kept f32 to preserve v1 numerics for this step). ---
    q = jnp.tile(comp, (1, ms))                                       # [N, ms*ms]
    tf = jnp.dot(q * smat_flat, rmat_t_ref[...], preferred_element_type=F32)

    # --- unzip MLP + per-channel style affine -> [N, C] ---
    u = _linear(_linear(tf, uw1_ref, ub1_ref, relu=True), uw2_ref, ub2_ref)
    out_ref[...] = (u * s_std + s_mean).astype(out_ref.dtype)


def _mul_content_kernel(cf_ref,
                        cw1_ref, cb1_ref, cw2_ref, cb2_ref,
                        uw1_ref, ub1_ref, uw2_ref, ub2_ref,
                        out_ref):
    cf = cf_ref[...].astype(F32)
    c_norm, c_mean, c_std = _col_stats(cf)
    comp = _linear(_linear(c_norm, cw1_ref, cb1_ref, relu=True), cw2_ref, cb2_ref)
    u = _linear(_linear(comp, uw1_ref, ub1_ref, relu=True), uw2_ref, ub2_ref)
    # TODO(synk): reference trans=False branch broadcasts [N,C]*[C,1]; it is
    # only well defined when N == C, reproduced here as a per-row affine.
    out_ref[...] = (u * jnp.transpose(c_std) +
                    jnp.transpose(c_mean)).astype(out_ref.dtype)


# ----------------------------------------------------------------------------
# Parameters (deterministic synthetic init; shapes from the nn.Module __init__)
# ----------------------------------------------------------------------------
def init_params(key, matrix_size=32):
    ks = list(jax.random.split(key, 16))

    def lin(k, fin, fout):          # stored as [in, out] (== torch W.T), bf16
        return (jax.random.normal(k, (fin, fout), F32) /
                jnp.sqrt(float(fin))).astype(BF16)

    def bias(k, n):                 # f32, shaped [1, n]
        return (jax.random.normal(k, (n,), F32) * 0.01).reshape(1, n)

    def conv(k, cin, cout):
        # torch [cout, cin, 3, 3] -> [kh, kw, cin, cout] -> [9*cin, cout];
        # tap t = kh*3+kw lands in rows [t*cin, (t+1)*cin).
        w = jax.random.normal(k, (cout, cin, 3, 3), F32) / jnp.sqrt(float(cin * 9))
        return jnp.transpose(w, (2, 3, 1, 0)).reshape(9 * cin, cout).astype(BF16)

    ms = matrix_size
    m2 = ms * ms
    # Precomputed constant 0/1 selectors (perf review #4 / #7):
    #   rmat  [ms, m2]:  rmat[k, k*ms+l]   = 1   (row-major gram flatten)
    #   rmat_t[m2, ms]:  rmat_t[i*ms+j, i] = 1   (group-of-ms lane reduction)
    col = jnp.arange(m2, dtype=jnp.int32)
    row = jnp.arange(ms, dtype=jnp.int32)
    rmat = (col[None, :] // ms == row[:, None]).astype(F32)
    rmat_t = (col[:, None] // ms == row[None, :]).astype(F32)

    # TODO(synk): fc_w could drop to int8 (v5e/v6e) or fp8 (v7x) with per-column
    # scales for another 2x HBM/VMEM cut; kept bf16 pending a tolerance check.
    return {
        "comp_w1": lin(ks[0], 256, 128), "comp_b1": bias(ks[1], 128),
        "comp_w2": lin(ks[2], 128, ms),  "comp_b2": bias(ks[3], ms),
        "unzip_w1": lin(ks[4], ms, 128), "unzip_b1": bias(ks[5], 128),
        "unzip_w2": lin(ks[6], 128, 256), "unzip_b2": bias(ks[7], 256),
        "conv1_w": conv(ks[8], 256, 128), "conv1_b": bias(ks[9], 128),
        "conv2_w": conv(ks[10], 128, 64), "conv2_b": bias(ks[11], 64),
        "conv3_w": conv(ks[12], 64, ms),  "conv3_b": bias(ks[13], ms),
        "fc_w": lin(ks[14], m2, m2), "fc_b": bias(ks[15], m2),
        "rmat": rmat, "rmat_t": rmat_t,
        "matrix_size": ms,
    }


# ----------------------------------------------------------------------------
# MulLayer forward
# ----------------------------------------------------------------------------
def mul_layer_forward(params, cF, sF, *, adain=False, trans=True):
    """cF: point-cloud features [N, C]; sF: style image features [1, C, H, W]."""
    N, C = cF.shape
    B, C2, H, W = sF.shape
    assert B == 1 and C == C2
    cF = cF.astype(F32)
    # XLA glue: style features lane-dense as [H*W, C] (row-major p = h*W + w).
    s_hw_c = jnp.transpose(sF.reshape(C, H * W)).astype(F32)

    if adain:
        return pl.pallas_call(
            _adain_kernel,
            out_shape=jax.ShapeDtypeStruct((N, C), F32),
            in_specs=[_VMEM, _VMEM],
            out_specs=_VMEM,
            compiler_params=_CPARAMS,
        )(cF, s_hw_c)

    ms = params["matrix_size"]
    if trans:
        assert W % 8 == 0, "sublane-aligned conv path assumes W % 8 == 0"
        kernel = functools.partial(_mul_trans_kernel, H=H, W=W, ms=ms)
        args = (cF, s_hw_c, params["rmat"], params["rmat_t"],
                params["comp_w1"], params["comp_b1"],
                params["comp_w2"], params["comp_b2"],
                params["conv1_w"], params["conv1_b"],
                params["conv2_w"], params["conv2_b"],
                params["conv3_w"], params["conv3_b"],
                params["fc_w"], params["fc_b"],
                params["unzip_w1"], params["unzip_b1"],
                params["unzip_w2"], params["unzip_b2"])
        # fc_w stays in HBM (ANY) and is DMA'd inside the kernel (overlap, #1).
        in_specs = [_ANY if a is params["fc_w"] else _VMEM for a in args]
        return pl.pallas_call(
            kernel,
            out_shape=jax.ShapeDtypeStruct((N, C), F32),
            in_specs=in_specs,
            out_specs=_VMEM,
            scratch_shapes=[pltpu.VMEM((ms * ms, ms * ms), BF16),
                            pltpu.SemaphoreType.DMA],
            compiler_params=_CPARAMS,
        )(*args)

    # trans=False: degenerate reference branch, only valid when N == C.
    assert N == C, "reference trans=False broadcast requires N == C"
    args = (cF,
            params["comp_w1"], params["comp_b1"],
            params["comp_w2"], params["comp_b2"],
            params["unzip_w1"], params["unzip_b1"],
            params["unzip_w2"], params["unzip_b2"])
    return pl.pallas_call(
        _mul_content_kernel,
        out_shape=jax.ShapeDtypeStruct((N, C), F32),
        in_specs=[_VMEM] * len(args),
        out_specs=_VMEM,
        compiler_params=_CPARAMS,
    )(*args)


# ----------------------------------------------------------------------------
if __name__ == "__main__":
    key = jax.random.PRNGKey(0)
    k_c, k_s, k_p = jax.random.split(key, 3)

    N, C, H, W = 64, 256, 8, 8                    # C=256 fixed by the module
    cF = jax.random.normal(k_c, (N, C), F32)
    sF = jax.random.normal(k_s, (1, C, H, W), F32)
    params = init_params(k_p, matrix_size=32)

    out_trans = jax.block_until_ready(
        mul_layer_forward(params, cF, sF, adain=False, trans=True))
    out_adain = jax.block_until_ready(
        mul_layer_forward(params, cF, sF, adain=True))

    assert out_trans.shape == (N, C) and out_adain.shape == (N, C)
    assert bool(jnp.all(jnp.isfinite(out_trans)))
    assert bool(jnp.all(jnp.isfinite(out_adain)))
    print("KERNEL_OK")
</pallas_src>

<mosaic_0001>
module attributes {stable_mosaic.version = 11 : i64} {
  func.func @_mul_trans_kernel(%arg0: memref<64x256xf32, #tpu.memory_space<vmem>>, %arg1: memref<64x256xf32, #tpu.memory_space<vmem>>, %arg2: memref<32x1024xf32, #tpu.memory_space<vmem>>, %arg3: memref<1024x32xf32, #tpu.memory_space<vmem>>, %arg4: memref<256x128xbf16, #tpu.memory_space<vmem>>, %arg5: memref<1x128xf32, #tpu.memory_space<vmem>>, %arg6: memref<128x32xbf16, #tpu.memory_space<vmem>>, %arg7: memref<1x32xf32, #tpu.memory_space<vmem>>, %arg8: memref<2304x128xbf16, #tpu.memory_space<vmem>>, %arg9: memref<1x128xf32, #tpu.memory_space<vmem>>, %arg10: memref<1152x64xbf16, #tpu.memory_space<vmem>>, %arg11: memref<1x64xf32, #tpu.memory_space<vmem>>, %arg12: memref<576x32xbf16, #tpu.memory_space<vmem>>, %arg13: memref<1x32xf32, #tpu.memory_space<vmem>>, %arg14: memref<1024x1024xbf16, #tpu.memory_space<any>>, %arg15: memref<1x1024xf32, #tpu.memory_space<vmem>>, %arg16: memref<32x128xbf16, #tpu.memory_space<vmem>>, %arg17: memref<1x128xf32, #tpu.memory_space<vmem>>, %arg18: memref<128x256xbf16, #tpu.memory_space<vmem>>, %arg19: memref<1x256xf32, #tpu.memory_space<vmem>>, %arg20: memref<64x256xf32, #tpu.memory_space<vmem>>, %arg21: memref<1024x1024xbf16, #tpu.memory_space<vmem>>, %arg22: memref<!tpu.dma_semaphore, #tpu.memory_space<semaphore_mem>>) attributes {dimension_semantics = [], scalar_prefetch = 0 : i64, scratch_operands = 2 : i64, tpu.core_type = #tpu.core_type<tc>} {
    tpu.enqueue_dma source(%arg14 : memref<1024x1024xbf16, #tpu.memory_space<any>>) target(%arg21 : memref<1024x1024xbf16, #tpu.memory_space<vmem>>) target_semaphore(%arg22 : memref<!tpu.dma_semaphore, #tpu.memory_space<semaphore_mem>>)
    %c0 = arith.constant 0 : index
    %c0_0 = arith.constant 0 : index
    %0 = vector.load %arg0[%c0, %c0_0] : memref<64x256xf32, #tpu.memory_space<vmem>>, vector<64x256xf32>
    %cst = arith.constant dense<0.000000e+00> : vector<256xf32>
    %1 = vector.multi_reduction <add>, %0, %cst [0] : vector<64x256xf32> to vector<256xf32>
    %2 = vector.shape_cast %1 : vector<256xf32> to vector<1x256xf32>
    %cst_1 = arith.constant 6.400000e+01 : f32
    %3 = vector.broadcast %cst_1 : f32 to vector<1x256xf32>
    %4 = arith.divf %2, %3 : vector<1x256xf32>
    %5 = vector.broadcast %4 : vector<1x256xf32> to vector<64x256xf32>
    %6 = arith.subf %0, %5 : vector<64x256xf32>
    %7 = arith.mulf %6, %6 : vector<64x256xf32>
    %cst_2 = arith.constant dense<0.000000e+00> : vector<256xf32>
    %8 = vector.multi_reduction <add>, %7, %cst_2 [0] : vector<64x256xf32> to vector<256xf32>
    %9 = vector.shape_cast %8 : vector<256xf32> to vector<1x256xf32>
    %cst_3 = arith.constant 0.0158730168 : f32
    %10 = vector.broadcast %cst_3 : f32 to vector<1x256xf32>
    %11 = arith.mulf %9, %10 : vector<1x256xf32>
    %cst_4 = arith.constant 9.99999974E-6 : f32
    %12 = vector.broadcast %cst_4 : f32 to vector<1x256xf32>
    %13 = arith.addf %11, %12 : vector<1x256xf32>
    %14 = math.sqrt %13 : vector<1x256xf32>
    %cst_5 = arith.constant 1.000000e+00 : f32
    %15 = vector.broadcast %cst_5 : f32 to vector<1x256xf32>
    %16 = arith.divf %15, %14 : vector<1x256xf32>
    %17 = vector.broadcast %16 : vector<1x256xf32> to vector<64x256xf32>
    %18 = arith.mulf %6, %17 : vector<64x256xf32>
    %19 = arith.truncf %18 : vector<64x256xf32> to vector<64x256xbf16>
    %c0_6 = arith.constant 0 : index
    %c0_7 = arith.constant 0 : index
    %20 = vector.load %arg4[%c0_6, %c0_7] : memref<256x128xbf16, #tpu.memory_space<vmem>>, vector<256x128xbf16>
    %cst_8 = arith.constant dense<0.000000e+00> : vector<64x128xf32>
    %21 = tpu.matmul %19, %20, %cst_8 {dimension_numbers = #tpu.dot_dimension_numbers<[1], [0], [0], [1], [0, 0, 1, 1], [], []>} : vector<64x256xbf16>, vector<256x128xbf16>, vector<64x128xf32> -> vector<64x128xf32>
    %c0_9 = arith.constant 0 : index
    %c0_10 = arith.constant 0 : index
    %22 = vector.load %arg5[%c0_9, %c0_10] : memref<1x128xf32, #tpu.memory_space<vmem>>, vector<1x128xf32>
    %23 = vector.broadcast %22 : vector<1x128xf32> to vector<64x128xf32>
    %24 = arith.addf %21, %23 : vector<64x128xf32>
    %cst_11 = arith.constant 0.000000e+00 : f32
    %25 = vector.broadcast %cst_11 : f32 to vector<64x128xf32>
    %26 = arith.maximumf %24, %25 : vector<64x128xf32>
    %27 = arith.truncf %26 : vector<64x128xf32> to vector<64x128xbf16>
    %c0_12 = arith.constant 0 : index
    %c0_13 = arith.constant 0 : index
    %28 = vector.load %arg6[%c0_12, %c0_13] : memref<128x32xbf16, #tpu.memory_space<vmem>>, vector<128x32xbf16>
    %cst_14 = arith.constant dense<0.000000e+00> : vector<64x32xf32>
    %29 = tpu.matmul %27, %28, %cst_14 {dimension_numbers = #tpu.dot_dimension_numbers<[1], [0], [0], [1], [0, 0, 1, 1], [], []>} : vector<64x128xbf16>, vector<128x32xbf16>, vector<64x32xf32> -> vector<64x32xf32>
    %c0_15 = arith.constant 0 : index
    %c0_16 = arith.constant 0 : index
    %30 = vector.load %arg7[%c0_15, %c0_16] : memref<1x32xf32, #tpu.memory_space<vmem>>, vector<1x32xf32>
    %31 = vector.broadcast %30 : vector<1x32xf32> to vector<64x32xf32>
    %32 = arith.addf %29, %31 : vector<64x32xf32>
    %c0_17 = arith.constant 0 : index
    %c0_18 = arith.constant 0 : index
    %33 = vector.load %arg1[%c0_17, %c0_18] : memref<64x256xf32, #tpu.memory_space<vmem>>, vector<64x256xf32>
    %cst_19 = arith.constant dense<0.000000e+00> : vector<256xf32>
    %34 = vector.multi_reduction <add>, %33, %cst_19 [0] : vector<64x256xf32> to vector<256xf32>
    %35 = vector.shape_cast %34 : vector<256xf32> to vector<1x256xf32>
    %cst_20 = arith.constant 6.400000e+01 : f32
    %36 = vector.broadcast %cst_20 : f32 to vector<1x256xf32>
    %37 = arith.divf %35, %36 : vector<1x256xf32>
    %38 = vector.broadcast %37 : vector<1x256xf32> to vector<64x256xf32>
    %39 = arith.subf %33, %38 : vector<64x256xf32>
    %40 = arith.mulf %39, %39 : vector<64x256xf32>
    %cst_21 = arith.constant dense<0.000000e+00> : vector<256xf32>
    %41 = vector.multi_reduction <add>, %40, %cst_21 [0] : vector<64x256xf32> to vector<256xf32>
    %42 = vector.shape_cast %41 : vector<256xf32> to vector<1x256xf32>
    %cst_22 = arith.constant 0.0158730168 : f32
    %43 = vector.broadcast %cst_22 : f32 to vector<1x256xf32>
    %44 = arith.mulf %42, %43 : vector<1x256xf32>
    %cst_23 = arith.constant 9.99999974E-6 : f32
    %45 = vector.broadcast %cst_23 : f32 to vector<1x256xf32>
    %46 = arith.addf %44, %45 : vector<1x256xf32>
    %47 = math.sqrt %46 : vector<1x256xf32>
    %cst_24 = arith.constant 1.000000e+00 : f32
    %48 = vector.broadcast %cst_24 : f32 to vector<1x256xf32>
    %49 = arith.divf %48, %47 : vector<1x256xf32>
    %50 = vector.broadcast %49 : vector<1x256xf32> to vector<64x256xf32>
    %51 = arith.mulf %39, %50 : vector<64x256xf32>
    %52 = tpu.iota {dimensions = array<i32: 0>} : vector<80x1xi32>
    %c8_i32 = arith.constant 8 : i32
    %c0_i32 = arith.constant 0 : i32
    %53 = arith.cmpi eq, %c8_i32, %c0_i32 : i32
    %c1_i32 = arith.constant 1 : i32
    %54 = arith.select %53, %c1_i32, %c8_i32 : i32
    %55 = vector.broadcast %54 : i32 to vector<80x1xi32>
    %56 = arith.remsi %52, %55 : vector<80x1xi32>
    %c0_i32_25 = arith.constant 0 : i32
    %57 = vector.broadcast %c0_i32_25 : i32 to vector<80x1xi32>
    %58 = arith.cmpi ne, %56, %57 : vector<80x1xi32>
    %c0_i32_26 = arith.constant 0 : i32
    %59 = vector.broadcast %c0_i32_26 : i32 to vector<80x1xi32>
    %60 = arith.cmpi slt, %56, %59 : vector<80x1xi32>
    %c0_i32_27 = arith.constant 0 : i32
    %61 = arith.cmpi slt, %54, %c0_i32_27 : i32
    %62 = vector.broadcast %61 : i1 to vector<80x1xi1>
    %63 = vector.broadcast %62 : vector<80x1xi1> to vector<80x1xi1>
    %64 = arith.xori %60, %63 : vector<80x1xi1>
    %65 = arith.andi %64, %58 : vector<80x1xi1>
    %66 = vector.broadcast %54 : i32 to vector<80x1xi32>
    %67 = arith.addi %56, %66 : vector<80x1xi32>
    %68 = arith.select %65, %67, %56 : vector<80x1xi1>, vector<80x1xi32>
    %c1_i32_28 = arith.constant 1 : i32
    %69 = vector.broadcast %c1_i32_28 : i32 to vector<80x1xi32>
    %70 = arith.cmpi sge, %68, %69 : vector<80x1xi32>
    %c6_i32 = arith.constant 6 : i32
    %71 = vector.broadcast %c6_i32 : i32 to vector<80x1xi32>
    %72 = arith.cmpi sle, %68, %71 : vector<80x1xi32>
    %cst_29 = arith.constant 0.000000e+00 : f32
    %73 = vector.broadcast %cst_29 : f32 to vector<8x256xf32>
    %74 = tpu.concatenate %73, %51, %73 in 0 : vector<8x256xf32>, vector<64x256xf32>, vector<8x256xf32> -> vector<80x256xf32>
    %cst_30 = arith.constant 0.000000e+00 : f32
    %75 = vector.broadcast %cst_30 : f32 to vector<1x256xf32>
    %76 = vector.extract_strided_slice %74 {offsets = [0, 0], sizes = [79, 256], strides = [1, 1]} : vector<80x256xf32> to vector<79x256xf32>
    %77 = tpu.concatenate %75, %76 in 0 : vector<1x256xf32>, vector<79x256xf32> -> vector<80x256xf32>
    %cst_31 = arith.constant 0.000000e+00 : f32
    %78 = vector.shape_cast %70 : vector<80x1xi1> to vector<80x1xi1>
    %79 = vector.broadcast %78 : vector<80x1xi1> to vector<80x256xi1>
    %80 = vector.broadcast %cst_31 : f32 to vector<80x256xf32>
    %81 = arith.select %79, %77, %80 : vector<80x256xi1>, vector<80x256xf32>
    %82 = vector.extract_strided_slice %74 {offsets = [1, 0], sizes = [79, 256], strides = [1, 1]} : vector<80x256xf32> to vector<79x256xf32>
    %83 = tpu.concatenate %82, %75 in 0 : vector<79x256xf32>, vector<1x256xf32> -> vector<80x256xf32>
    %cst_32 = arith.constant 0.000000e+00 : f32
    %84 = vector.shape_cast %72 : vector<80x1xi1> to vector<80x1xi1>
    %85 = vector.broadcast %84 : vector<80x1xi1> to vector<80x256xi1>
    %86 = vector.broadcast %cst_32 : f32 to vector<80x256xf32>
    %87 = arith.select %85, %83, %86 : vector<80x256xi1>, vector<80x256xf32>
    %88 = vector.extract_strided_slice %81 {offsets = [0, 0], sizes = [64, 256], strides = [1, 1]} : vector<80x256xf32> to vector<64x256xf32>
    %89 = vector.extract_strided_slice %74 {offsets = [0, 0], sizes = [64, 256], strides = [1, 1]} : vector<80x256xf32> to vector<64x256xf32>
    %90 = vector.extract_strided_slice %87 {offsets = [0, 0], sizes = [64, 256], strides = [1, 1]} : vector<80x256xf32> to vector<64x256xf32>
    %91 = vector.extract_strided_slice %81 {offsets = [8, 0], sizes = [64, 256], strides = [1, 1]} : vector<80x256xf32> to vector<64x256xf32>
    %92 = vector.extract_strided_slice %74 {offsets = [8, 0], sizes = [64, 256], strides = [1, 1]} : vector<80x256xf32> to vector<64x256xf32>
    %93 = vector.extract_strided_slice %87 {offsets = [8, 0], sizes = [64, 256], strides = [1, 1]} : vector<80x256xf32> to vector<64x256xf32>
    %94 = vector.extract_strided_slice %81 {offsets = [16, 0], sizes = [64, 256], strides = [1, 1]} : vector<80x256xf32> to vector<64x256xf32>
    %95 = vector.extract_strided_slice %74 {offsets = [16, 0], sizes = [64, 256], strides = [1, 1]} : vector<80x256xf32> to vector<64x256xf32>
    %96 = vector.extract_strided_slice %87 {offsets = [16, 0], sizes = [64, 256], strides = [1, 1]} : vector<80x256xf32> to vector<64x256xf32>
    %97 = arith.truncf %88 : vector<64x256xf32> to vector<64x256xbf16>
    %98 = arith.truncf %89 : vector<64x256xf32> to vector<64x256xbf16>
    %99 = arith.truncf %90 : vector<64x256xf32> to vector<64x256xbf16>
    %100 = arith.truncf %91 : vector<64x256xf32> to vector<64x256xbf16>
    %101 = arith.truncf %92 : vector<64x256xf32> to vector<64x256xbf16>
    %102 = arith.truncf %93 : vector<64x256xf32> to vector<64x256xbf16>
    %103 = arith.truncf %94 : vector<64x256xf32> to vector<64x256xbf16>
    %104 = arith.truncf %95 : vector<64x256xf32> to vector<64x256xbf16>
    %105 = arith.truncf %96 : vector<64x256xf32> to vector<64x256xbf16>
    %106 = tpu.concatenate %97, %98, %99, %100, %101, %102, %103, %104, %105 in 1 : vector<64x256xbf16>, vector<64x256xbf16>, vector<64x256xbf16>, vector<64x256xbf16>, vector<64x256xbf16>, vector<64x256xbf16>, vector<64x256xbf16>, vector<64x256xbf16>, vector<64x256xbf16> -> vector<64x2304xbf16>
    %c0_33 = arith.constant 0 : index
    %c0_34 = arith.constant 0 : index
    %107 = vector.load %arg8[%c0_33, %c0_34] : memref<2304x128xbf16, #tpu.memory_space<vmem>>, vector<2304x128xbf16>
    %cst_35 = arith.constant dense<0.000000e+00> : vector<64x128xf32>
    %108 = tpu.matmul %106, %107, %cst_35 {dimension_numbers = #tpu.dot_dimension_numbers<[1], [0], [0], [1], [0, 0, 1, 1], [], []>} : vector<64x2304xbf16>, vector<2304x128xbf16>, vector<64x128xf32> -> vector<64x128xf32>
    %c0_36 = arith.constant 0 : index
    %c0_37 = arith.constant 0 : index
    %109 = vector.load %arg9[%c0_36, %c0_37] : memref<1x128xf32, #tpu.memory_space<vmem>>, vector<1x128xf32>
    %110 = vector.broadcast %109 : vector<1x128xf32> to vector<64x128xf32>
    %111 = arith.addf %108, %110 : vector<64x128xf32>
    %cst_38 = arith.constant 0.000000e+00 : f32
    %112 = vector.broadcast %cst_38 : f32 to vector<64x128xf32>
    %113 = arith.maximumf %111, %112 : vector<64x128xf32>
    %cst_39 = arith.constant 0.000000e+00 : f32
    %114 = vector.broadcast %cst_39 : f32 to vector<8x128xf32>
    %115 = tpu.concatenate %114, %113, %114 in 0 : vector<8x128xf32>, vector<64x128xf32>, vector<8x128xf32> -> vector<80x128xf32>
    %cst_40 = arith.constant 0.000000e+00 : f32
    %116 = vector.broadcast %cst_40 : f32 to vector<1x128xf32>
    %117 = vector.extract_strided_slice %115 {offsets = [0, 0], sizes = [79, 128], strides = [1, 1]} : vector<80x128xf32> to vector<79x128xf32>
    %118 = tpu.concatenate %116, %117 in 0 : vector<1x128xf32>, vector<79x128xf32> -> vector<80x128xf32>
    %cst_41 = arith.constant 0.000000e+00 : f32
    %119 = vector.shape_cast %70 : vector<80x1xi1> to vector<80x1xi1>
    %120 = vector.broadcast %119 : vector<80x1xi1> to vector<80x128xi1>
    %121 = vector.broadcast %cst_41 : f32 to vector<80x128xf32>
    %122 = arith.select %120, %118, %121 : vector<80x128xi1>, vector<80x128xf32>
    %123 = vector.extract_strided_slice %115 {offsets = [1, 0], sizes = [79, 128], strides = [1, 1]} : vector<80x128xf32> to vector<79x128xf32>
    %124 = tpu.concatenate %123, %116 in 0 : vector<79x128xf32>, vector<1x128xf32> -> vector<80x128xf32>
    %cst_42 = arith.constant 0.000000e+00 : f32
    %125 = vector.shape_cast %72 : vector<80x1xi1> to vector<80x1xi1>
    %126 = vector.broadcast %125 : vector<80x1xi1> to vector<80x128xi1>
    %127 = vector.broadcast %cst_42 : f32 to vector<80x128xf32>
    %128 = arith.select %126, %124, %127 : vector<80x128xi1>, vector<80x128xf32>
    %129 = vector.extract_strided_slice %122 {offsets = [0, 0], sizes = [64, 128], strides = [1, 1]} : vector<80x128xf32> to vector<64x128xf32>
    %130 = vector.extract_strided_slice %115 {offsets = [0, 0], sizes = [64, 128], strides = [1, 1]} : vector<80x128xf32> to vector<64x128xf32>
    %131 = vector.extract_strided_slice %128 {offsets = [0, 0], sizes = [64, 128], strides = [1, 1]} : vector<80x128xf32> to vector<64x128xf32>
    %132 = vector.extract_strided_slice %122 {offsets = [8, 0], sizes = [64, 128], strides = [1, 1]} : vector<80x128xf32> to vector<64x128xf32>
    %133 = vector.extract_strided_slice %115 {offsets = [8, 0], sizes = [64, 128], strides = [1, 1]} : vector<80x128xf32> to vector<64x128xf32>
    %134 = vector.extract_strided_slice %128 {offsets = [8, 0], sizes = [64, 128], strides = [1, 1]} : vector<80x128xf32> to vector<64x128xf32>
    %135 = vector.extract_strided_slice %122 {offsets = [16, 0], sizes = [64, 128], strides = [1, 1]} : vector<80x128xf32> to vector<64x128xf32>
    %136 = vector.extract_strided_slice %115 {offsets = [16, 0], sizes = [64, 128], strides = [1, 1]} : vector<80x128xf32> to vector<64x128xf32>
    %137 = vector.extract_strided_slice %128 {offsets = [16, 0], sizes = [64, 128], strides = [1, 1]} : vector<80x128xf32> to vector<64x128xf32>
    %138 = arith.truncf %129 : vector<64x128xf32> to vector<64x128xbf16>
    %139 = arith.truncf %130 : vector<64x128xf32> to vector<64x128xbf16>
    %140 = arith.truncf %131 : vector<64x128xf32> to vector<64x128xbf16>
    %141 = arith.truncf %132 : vector<64x128xf32> to vector<64x128xbf16>
    %142 = arith.truncf %133 : vector<64x128xf32> to vector<64x128xbf16>
    %143 = arith.truncf %134 : vector<64x128xf32> to vector<64x128xbf16>
    %144 = arith.truncf %135 : vector<64x128xf32> to vector<64x128xbf16>
    %145 = arith.truncf %136 : vector<64x128xf32> to vector<64x128xbf16>
    %146 = arith.truncf %137 : vector<64x128xf32> to vector<64x128xbf16>
    %147 = tpu.concatenate %138, %139, %140, %141, %142, %143, %144, %145, %146 in 1 : vector<64x128xbf16>, vector<64x128xbf16>, vector<64x128xbf16>, vector<64x128xbf16>, vector<64x128xbf16>, vector<64x128xbf16>, vector<64x128xbf16>, vector<64x128xbf16>, vector<64x128xbf16> -> vector<64x1152xbf16>
    %c0_43 = arith.constant 0 : index
    %c0_44 = arith.constant 0 : index
    %148 = vector.load %arg10[%c0_43, %c0_44] : memref<1152x64xbf16, #tpu.memory_space<vmem>>, vector<1152x64xbf16>
    %cst_45 = arith.constant dense<0.000000e+00> : vector<64x64xf32>
    %149 = tpu.matmul %147, %148, %cst_45 {dimension_numbers = #tpu.dot_dimension_numbers<[1], [0], [0], [1], [0, 0, 1, 1], [], []>} : vector<64x1152xbf16>, vector<1152x64xbf16>, vector<64x64xf32> -> vector<64x64xf32>
    %c0_46 = arith.constant 0 : index
    %c0_47 = arith.constant 0 : index
    %150 = vector.load %arg11[%c0_46, %c0_47] : memref<1x64xf32, #tpu.memory_space<vmem>>, vector<1x64xf32>
    %151 = vector.broadcast %150 : vector<1x64xf32> to vector<64x64xf32>
    %152 = arith.addf %149, %151 : vector<64x64xf32>
    %cst_48 = arith.constant 0.000000e+00 : f32
    %153 = vector.broadcast %cst_48 : f32 to vector<64x64xf32>
    %154 = arith.maximumf %152, %153 : vector<64x64xf32>
    %cst_49 = arith.constant 0.000000e+00 : f32
    %155 = vector.broadcast %cst_49 : f32 to vector<8x64xf32>
    %156 = tpu.concatenate %155, %154, %155 in 0 : vector<8x64xf32>, vector<64x64xf32>, vector<8x64xf32> -> vector<80x64xf32>
    %cst_50 = arith.constant 0.000000e+00 : f32
    %157 = vector.broadcast %cst_50 : f32 to vector<1x64xf32>
    %158 = vector.extract_strided_slice %156 {offsets = [0, 0], sizes = [79, 64], strides = [1, 1]} : vector<80x64xf32> to vector<79x64xf32>
    %159 = tpu.concatenate %157, %158 in 0 : vector<1x64xf32>, vector<79x64xf32> -> vector<80x64xf32>
    %cst_51 = arith.constant 0.000000e+00 : f32
    %160 = vector.shape_cast %70 : vector<80x1xi1> to vector<80x1xi1>
    %161 = vector.broadcast %160 : vector<80x1xi1> to vector<80x64xi1>
    %162 = vector.broadcast %cst_51 : f32 to vector<80x64xf32>
    %163 = arith.select %161, %159, %162 : vector<80x64xi1>, vector<80x64xf32>
    %164 = vector.extract_strided_slice %156 {offsets = [1, 0], sizes = [79, 64], strides = [1, 1]} : vector<80x64xf32> to vector<79x64xf32>
    %165 = tpu.concatenate %164, %157 in 0 : vector<79x64xf32>, vector<1x64xf32> -> vector<80x64xf32>
    %cst_52 = arith.constant 0.000000e+00 : f32
    %166 = vector.shape_cast %72 : vector<80x1xi1> to vector<80x1xi1>
    %167 = vector.broadcast %166 : vector<80x1xi1> to vector<80x64xi1>
    %168 = vector.broadcast %cst_52 : f32 to vector<80x64xf32>
    %169 = arith.select %167, %165, %168 : vector<80x64xi1>, vector<80x64xf32>
    %170 = vector.extract_strided_slice %163 {offsets = [0, 0], sizes = [64, 64], strides = [1, 1]} : vector<80x64xf32> to vector<64x64xf32>
    %171 = vector.extract_strided_slice %156 {offsets = [0, 0], sizes = [64, 64], strides = [1, 1]} : vector<80x64xf32> to vector<64x64xf32>
    %172 = vector.extract_strided_slice %169 {offsets = [0, 0], sizes = [64, 64], strides = [1, 1]} : vector<80x64xf32> to vector<64x64xf32>
    %173 = vector.extract_strided_slice %163 {offsets = [8, 0], sizes = [64, 64], strides = [1, 1]} : vector<80x64xf32> to vector<64x64xf32>
    %174 = vector.extract_strided_slice %156 {offsets = [8, 0], sizes = [64, 64], strides = [1, 1]} : vector<80x64xf32> to vector<64x64xf32>
    %175 = vector.extract_strided_slice %169 {offsets = [8, 0], sizes = [64, 64], strides = [1, 1]} : vector<80x64xf32> to vector<64x64xf32>
    %176 = vector.extract_strided_slice %163 {offsets = [16, 0], sizes = [64, 64], strides = [1, 1]} : vector<80x64xf32> to vector<64x64xf32>
    %177 = vector.extract_strided_slice %156 {offsets = [16, 0], sizes = [64, 64], strides = [1, 1]} : vector<80x64xf32> to vector<64x64xf32>
    %178 = vector.extract_strided_slice %169 {offsets = [16, 0], sizes = [64, 64], strides = [1, 1]} : vector<80x64xf32> to vector<64x64xf32>
    %179 = arith.truncf %170 : vector<64x64xf32> to vector<64x64xbf16>
    %c0_53 = arith.constant 0 : index
    %c0_54 = arith.constant 0 : index
    %180 = vector.load %arg12[%c0_53, %c0_54] : memref<576x32xbf16, #tpu.memory_space<vmem>>, vector<64x32xbf16>
    %cst_55 = arith.constant dense<0.000000e+00> : vector<64x32xf32>
    %181 = tpu.matmul %179, %180, %cst_55 {dimension_numbers = #tpu.dot_dimension_numbers<[1], [0], [0], [1], [0, 0, 1, 1], [], []>} : vector<64x64xbf16>, vector<64x32xbf16>, vector<64x32xf32> -> vector<64x32xf32>
    %182 = arith.truncf %171 : vector<64x64xf32> to vector<64x64xbf16>
    %c64 = arith.constant 64 : index
    %c0_56 = arith.constant 0 : index
    %183 = vector.load %arg12[%c64, %c0_56] : memref<576x32xbf16, #tpu.memory_space<vmem>>, vector<64x32xbf16>
    %cst_57 = arith.constant dense<0.000000e+00> : vector<64x32xf32>
    %184 = tpu.matmul %182, %183, %cst_57 {dimension_numbers = #tpu.dot_dimension_numbers<[1], [0], [0], [1], [0, 0, 1, 1], [], []>} : vector<64x64xbf16>, vector<64x32xbf16>, vector<64x32xf32> -> vector<64x32xf32>
    %185 = arith.addf %181, %184 : vector<64x32xf32>
    %186 = arith.truncf %172 : vector<64x64xf32> to vector<64x64xbf16>
    %c128 = arith.constant 128 : index
    %c0_58 = arith.constant 0 : index
    %187 = vector.load %arg12[%c128, %c0_58] : memref<576x32xbf16, #tpu.memory_space<vmem>>, vector<64x32xbf16>
    %cst_59 = arith.constant dense<0.000000e+00> : vector<64x32xf32>
    %188 = tpu.matmul %186, %187, %cst_59 {dimension_numbers = #tpu.dot_dimension_numbers<[1], [0], [0], [1], [0, 0, 1, 1], [], []>} : vector<64x64xbf16>, vector<64x32xbf16>, vector<64x32xf32> -> vector<64x32xf32>
    %189 = arith.addf %185, %188 : vector<64x32xf32>
    %190 = arith.truncf %173 : vector<64x64xf32> to vector<64x64xbf16>
    %c192 = arith.constant 192 : index
    %c0_60 = arith.constant 0 : index
    %191 = vector.load %arg12[%c192, %c0_60] : memref<576x32xbf16, #tpu.memory_space<vmem>>, vector<64x32xbf16>
    %cst_61 = arith.constant dense<0.000000e+00> : vector<64x32xf32>
    %192 = tpu.matmul %190, %191, %cst_61 {dimension_numbers = #tpu.dot_dimension_numbers<[1], [0], [0], [1], [0, 0, 1, 1], [], []>} : vector<64x64xbf16>, vector<64x32xbf16>, vector<64x32xf32> -> vector<64x32xf32>
    %193 = arith.addf %189, %192 : vector<64x32xf32>
    %194 = arith.truncf %174 : vector<64x64xf32> to vector<64x64xbf16>
    %c256 = arith.constant 256 : index
    %c0_62 = arith.constant 0 : index
    %195 = vector.load %arg12[%c256, %c0_62] : memref<576x32xbf16, #tpu.memory_space<vmem>>, vector<64x32xbf16>
    %cst_63 = arith.constant dense<0.000000e+00> : vector<64x32xf32>
    %196 = tpu.matmul %194, %195, %cst_63 {dimension_numbers = #tpu.dot_dimension_numbers<[1], [0], [0], [1], [0, 0, 1, 1], [], []>} : vector<64x64xbf16>, vector<64x32xbf16>, vector<64x32xf32> -> vector<64x32xf32>
    %197 = arith.addf %193, %196 : vector<64x32xf32>
    %198 = arith.truncf %175 : vector<64x64xf32> to vector<64x64xbf16>
    %c320 = arith.constant 320 : index
    %c0_64 = arith.constant 0 : index
    %199 = vector.load %arg12[%c320, %c0_64] : memref<576x32xbf16, #tpu.memory_space<vmem>>, vector<64x32xbf16>
    %cst_65 = arith.constant dense<0.000000e+00> : vector<64x32xf32>
    %200 = tpu.matmul %198, %199, %cst_65 {dimension_numbers = #tpu.dot_dimension_numbers<[1], [0], [0], [1], [0, 0, 1, 1], [], []>} : vector<64x64xbf16>, vector<64x32xbf16>, vector<64x32xf32> -> vector<64x32xf32>
    %201 = arith.addf %197, %200 : vector<64x32xf32>
    %202 = arith.truncf %176 : vector<64x64xf32> to vector<64x64xbf16>
    %c384 = arith.constant 384 : index
    %c0_66 = arith.constant 0 : index
    %203 = vector.load %arg12[%c384, %c0_66] : memref<576x32xbf16, #tpu.memory_space<vmem>>, vector<64x32xbf16>
    %cst_67 = arith.constant dense<0.000000e+00> : vector<64x32xf32>
    %204 = tpu.matmul %202, %203, %cst_67 {dimension_numbers = #tpu.dot_dimension_numbers<[1], [0], [0], [1], [0, 0, 1, 1], [], []>} : vector<64x64xbf16>, vector<64x32xbf16>, vector<64x32xf32> -> vector<64x32xf32>
    %205 = arith.addf %201, %204 : vector<64x32xf32>
    %206 = arith.truncf %177 : vector<64x64xf32> to vector<64x64xbf16>
    %c448 = arith.constant 448 : index
    %c0_68 = arith.constant 0 : index
    %207 = vector.load %arg12[%c448, %c0_68] : memref<576x32xbf16, #tpu.memory_space<vmem>>, vector<64x32xbf16>
    %cst_69 = arith.constant dense<0.000000e+00> : vector<64x32xf32>
    %208 = tpu.matmul %206, %207, %cst_69 {dimension_numbers = #tpu.dot_dimension_numbers<[1], [0], [0], [1], [0, 0, 1, 1], [], []>} : vector<64x64xbf16>, vector<64x32xbf16>, vector<64x32xf32> -> vector<64x32xf32>
    %209 = arith.addf %205, %208 : vector<64x32xf32>
    %210 = arith.truncf %178 : vector<64x64xf32> to vector<64x64xbf16>
    %c512 = arith.constant 512 : index
    %c0_70 = arith.constant 0 : index
    %211 = vector.load %arg12[%c512, %c0_70] : memref<576x32xbf16, #tpu.memory_space<vmem>>, vector<64x32xbf16>
    %cst_71 = arith.constant dense<0.000000e+00> : vector<64x32xf32>
    %212 = tpu.matmul %210, %211, %cst_71 {dimension_numbers = #tpu.dot_dimension_numbers<[1], [0], [0], [1], [0, 0, 1, 1], [], []>} : vector<64x64xbf16>, vector<64x32xbf16>, vector<64x32xf32> -> vector<64x32xf32>
    %213 = arith.addf %209, %212 : vector<64x32xf32>
    %c0_72 = arith.constant 0 : index
    %c0_73 = arith.constant 0 : index
    %214 = vector.load %arg13[%c0_72, %c0_73] : memref<1x32xf32, #tpu.memory_space<vmem>>, vector<1x32xf32>
    %215 = vector.broadcast %214 : vector<1x32xf32> to vector<64x32xf32>
    %216 = arith.addf %213, %215 : vector<64x32xf32>
    %cst_74 = arith.constant dense<0.000000e+00> : vector<32x32xf32>
    %217 = tpu.matmul %216, %216, %cst_74 {dimension_numbers = #tpu.dot_dimension_numbers<[0], [0], [1], [1], [0, 1, 1, 1], [], []>} : vector<64x32xf32>, vector<64x32xf32>, vector<32x32xf32> -> vector<32x32xf32>
    %cst_75 = arith.constant 1.562500e-02 : f32
    %218 = vector.broadcast %cst_75 : f32 to vector<32x32xf32>
    %219 = arith.mulf %217, %218 : vector<32x32xf32>
    %c0_76 = arith.constant 0 : index
    %c0_77 = arith.constant 0 : index
    %220 = vector.load %arg2[%c0_76, %c0_77] : memref<32x1024xf32, #tpu.memory_space<vmem>>, vector<32x1024xf32>
    %221 = tpu.concatenate %219, %219, %219, %219, %219, %219, %219, %219, %219, %219, %219, %219, %219, %219, %219, %219, %219, %219, %219, %219, %219, %219, %219, %219, %219, %219, %219, %219, %219, %219, %219, %219 in 1 : vector<32x32xf32>, vector<32x32xf32>, vector<32x32xf32>, vector<32x32xf32>, vector<32x32xf32>, vector<32x32xf32>, vector<32x32xf32>, vector<32x32xf32>, vector<32x32xf32>, vector<32x32xf32>, vector<32x32xf32>, vector<32x32xf32>, vector<32x32xf32>, vector<32x32xf32>, vector<32x32xf32>, vector<32x32xf32>, vector<32x32xf32>, vector<32x32xf32>, vector<32x32xf32>, vector<32x32xf32>, vector<32x32xf32>, vector<32x32xf32>, vector<32x32xf32>, vector<32x32xf32>, vector<32x32xf32>, vector<32x32xf32>, vector<32x32xf32>, vector<32x32xf32>, vector<32x32xf32>, vector<32x32xf32>, vector<32x32xf32>, vector<32x32xf32> -> vector<32x1024xf32>
    %222 = arith.mulf %220, %221 : vector<32x1024xf32>
    %cst_78 = arith.constant dense<0.000000e+00> : vector<1024xf32>
    %223 = vector.multi_reduction <add>, %222, %cst_78 [0] : vector<32x1024xf32> to vector<1024xf32>
    %224 = vector.shape_cast %223 : vector<1024xf32> to vector<1x1024xf32>
    tpu.wait_dma2 semaphore(%arg22 : memref<!tpu.dma_semaphore, #tpu.memory_space<semaphore_mem>>) src(%arg14 : memref<1024x1024xbf16, #tpu.memory_space<any>>) dst(%arg21 : memref<1024x1024xbf16, #tpu.memory_space<vmem>>)
    %225 = arith.truncf %224 : vector<1x1024xf32> to vector<1x1024xbf16>
    %c0_79 = arith.constant 0 : index
    %c0_80 = arith.constant 0 : index
    %226 = vector.load %arg21[%c0_79, %c0_80] : memref<1024x1024xbf16, #tpu.memory_space<vmem>>, vector<1024x1024xbf16>
    %cst_81 = arith.constant dense<0.000000e+00> : vector<1x1024xf32>
    %227 = tpu.matmul %225, %226, %cst_81 {dimension_numbers = #tpu.dot_dimension_numbers<[1], [0], [0], [1], [0, 0, 1, 1], [], []>} : vector<1x1024xbf16>, vector<1024x1024xbf16>, vector<1x1024xf32> -> vector<1x1024xf32>
    %c0_82 = arith.constant 0 : index
    %c0_83 = arith.constant 0 : index
    %228 = vector.load %arg15[%c0_82, %c0_83] : memref<1x1024xf32, #tpu.memory_space<vmem>>, vector<1x1024xf32>
    %229 = arith.addf %227, %228 : vector<1x1024xf32>
    %230 = tpu.concatenate %32, %32, %32, %32, %32, %32, %32, %32, %32, %32, %32, %32, %32, %32, %32, %32, %32, %32, %32, %32, %32, %32, %32, %32, %32, %32, %32, %32, %32, %32, %32, %32 in 1 : vector<64x32xf32>, vector<64x32xf32>, vector<64x32xf32>, vector<64x32xf32>, vector<64x32xf32>, vector<64x32xf32>, vector<64x32xf32>, vector<64x32xf32>, vector<64x32xf32>, vector<64x32xf32>, vector<64x32xf32>, vector<64x32xf32>, vector<64x32xf32>, vector<64x32xf32>, vector<64x32xf32>, vector<64x32xf32>, vector<64x32xf32>, vector<64x32xf32>, vector<64x32xf32>, vector<64x32xf32>, vector<64x32xf32>, vector<64x32xf32>, vector<64x32xf32>, vector<64x32xf32>, vector<64x32xf32>, vector<64x32xf32>, vector<64x32xf32>, vector<64x32xf32>, vector<64x32xf32>, vector<64x32xf32>, vector<64x32xf32>, vector<64x32xf32> -> vector<64x1024xf32>
    %231 = vector.broadcast %229 : vector<1x1024xf32> to vector<64x1024xf32>
    %232 = arith.mulf %230, %231 : vector<64x1024xf32>
    %c0_84 = arith.constant 0 : index
    %c0_85 = arith.constant 0 : index
    %233 = vector.load %arg3[%c0_84, %c0_85] : memref<1024x32xf32, #tpu.memory_space<vmem>>, vector<1024x32xf32>
    %cst_86 = arith.constant dense<0.000000e+00> : vector<64x32xf32>
    %234 = tpu.matmul %232, %233, %cst_86 {dimension_numbers = #tpu.dot_dimension_numbers<[1], [0], [0], [1], [0, 0, 1, 1], [], []>} : vector<64x1024xf32>, vector<1024x32xf32>, vector<64x32xf32> -> vector<64x32xf32>
    %235 = arith.truncf %234 : vector<64x32xf32> to vector<64x32xbf16>
    %c0_87 = arith.constant 0 : index
    %c0_88 = arith.constant 0 : index
    %236 = vector.load %arg16[%c0_87, %c0_88] : memref<32x128xbf16, #tpu.memory_space<vmem>>, vector<32x128xbf16>
    %cst_89 = arith.constant dense<0.000000e+00> : vector<64x128xf32>
    %237 = tpu.matmul %235, %236, %cst_89 {dimension_numbers = #tpu.dot_dimension_numbers<[1], [0], [0], [1], [0, 0, 1, 1], [], []>} : vector<64x32xbf16>, vector<32x128xbf16>, vector<64x128xf32> -> vector<64x128xf32>
    %c0_90 = arith.constant 0 : index
    %c0_91 = arith.constant 0 : index
    %238 = vector.load %arg17[%c0_90, %c0_91] : memref<1x128xf32, #tpu.memory_space<vmem>>, vector<1x128xf32>
    %239 = vector.broadcast %238 : vector<1x128xf32> to vector<64x128xf32>
    %240 = arith.addf %237, %239 : vector<64x128xf32>
    %cst_92 = arith.constant 0.000000e+00 : f32
    %241 = vector.broadcast %cst_92 : f32 to vector<64x128xf32>
    %242 = arith.maximumf %240, %241 : vector<64x128xf32>
    %243 = arith.truncf %242 : vector<64x128xf32> to vector<64x128xbf16>
    %c0_93 = arith.constant 0 : index
    %c0_94 = arith.constant 0 : index
    %244 = vector.load %arg18[%c0_93, %c0_94] : memref<128x256xbf16, #tpu.memory_space<vmem>>, vector<128x256xbf16>
    %cst_95 = arith.constant dense<0.000000e+00> : vector<64x256xf32>
    %245 = tpu.matmul %243, %244, %cst_95 {dimension_numbers = #tpu.dot_dimension_numbers<[1], [0], [0], [1], [0, 0, 1, 1], [], []>} : vector<64x128xbf16>, vector<128x256xbf16>, vector<64x256xf32> -> vector<64x256xf32>
    %c0_96 = arith.constant 0 : index
    %c0_97 = arith.constant 0 : index
    %246 = vector.load %arg19[%c0_96, %c0_97] : memref<1x256xf32, #tpu.memory_space<vmem>>, vector<1x256xf32>
    %247 = vector.broadcast %246 : vector<1x256xf32> to vector<64x256xf32>
    %248 = arith.addf %245, %247 : vector<64x256xf32>
    %249 = vector.broadcast %47 : vector<1x256xf32> to vector<64x256xf32>
    %250 = arith.mulf %248, %249 : vector<64x256xf32>
    %251 = vector.broadcast %37 : vector<1x256xf32> to vector<64x256xf32>
    %252 = arith.addf %250, %251 : vector<64x256xf32>
    %c0_98 = arith.constant 0 : index
    %c0_99 = arith.constant 0 : index
    %253 = vector.load %arg20[%c0_98, %c0_99] : memref<64x256xf32, #tpu.memory_space<vmem>>, vector<64x256xf32>
    tpu.vector_store %arg20[%c0_98, %c0_99], %252 {strides = array<i32>} : memref<64x256xf32, #tpu.memory_space<vmem>>, vector<64x256xf32>,
    return
  }
}

</mosaic_0001>

<bundles_post_ra>
// kernel: tpu_custom_call.1
= control target key start
LH: loop header
LB: loop body
LE: loop exit
PB: predicated region body
PF: predicated region fallthrough
CT: control target
= control target key end

     0   :  { %s13878_s0 = inlined_call_operand.hbm [shape: f32[64,256], index: 0, kind: input, shape index: {}]   ;;  %s13879_s1 = inlined_call_operand.hbm [shape: f32[64,256], index: 1, kind: input, shape index: {}]   ;;  %s13880_s2 = inlined_call_operand.hbm [shape: f32[32,1024], index: 2, kind: input, shape index: {}]   ;;  %s13881_s3 = inlined_call_operand.vmem [shape: f32[1024,32], index: 3, kind: input, shape index: {}]   ;;  %s13882_s4 = inlined_call_operand.hbm [shape: bf16[256,128], index: 4, kind: input, shape index: {}]   ;;  %s13883_s5 = inlined_call_operand.hbm [shape: f32[1,128], index: 5, kind: input, shape index: {}]   ;;  %s13884_s6 = inlined_call_operand.vmem [shape: bf16[128,32], index: 6, kind: input, shape index: {}]   ;;  %s13885_s7 = inlined_call_operand.hbm [shape: f32[1,32], index: 7, kind: input, shape index: {}]   ;;  %s13886_s8 = inlined_call_operand.hbm [shape: bf16[2304,128], index: 8, kind: input, shape index: {}]   ;;  %s13887_s9 = inlined_call_operand.hbm [shape: f32[1,128], index: 9, kind: input, shape index: {}]   ;;  %s13888_s10 = inlined_call_operand.vmem [shape: bf16[1152,64], index: 10, kind: input, shape index: {}]   ;;  %s13889_s11 = inlined_call_operand.hbm [shape: f32[1,64], index: 11, kind: input, shape index: {}]   ;;  %s13890_s12 = inlined_call_operand.vmem [shape: bf16[576,32], index: 12, kind: input, shape index: {}]   ;;  %s13891_s13 = inlined_call_operand.hbm [shape: f32[1,32], index: 13, kind: input, shape index: {}]   ;;  %s13892_s14 = inlined_call_operand.hbm [shape: bf16[1024,1024], index: 14, kind: input, shape index: {}]   ;;  %s13893_s15 = inlined_call_operand.hbm [shape: f32[1,1024], index: 15, kind: input, shape index: {}]   ;;  %s13894_s16 = inlined_call_operand.hbm [shape: bf16[32,128], index: 16, kind: input, shape index: {}]   ;;  %s13895_s17 = inlined_call_operand.hbm [shape: f32[1,128], index: 17, kind: input, shape index: {}]   ;;  %s13896_s18 = inlined_call_operand.hbm [shape: bf16[128,256], index: 18, kind: input, shape index: {}]   ;;  %s13897_s19 = inlined_call_operand.hbm [shape: f32[1,256], index: 19, kind: input, shape index: {}]   ;;  %s13898_s20 = inlined_call_operand.hbm [shape: f32[64,256], index: 20, kind: output, shape index: {}]  }
   0x1   :  { %14058 = sst [smem:[#allocation96_spill]] %s13878_s0 }
   0x2   :  { %14059 = sst [smem:[#allocation97_spill]] %s13879_s1 }
   0x3   :  { %14060 = sst [smem:[#allocation98_spill]] %s13880_s2 }
   0x4   :  { %14061 = sst [smem:[#allocation99_spill]] %s13881_s3 }
   0x5   :  { %14062 = sst [smem:[#allocation100_spill]] %s13882_s4 }
   0x6   :  { %14063 = sst [smem:[#allocation101_spill]] %s13890_s12 }
   0x7   :  { %14064 = sst [smem:[#allocation102_spill]] %s13898_s20 }
   0x8   :  { %25 = vsyncpa [#allocation5], 0 }
   0x9   :  { %26 = vsyncpa [#allocation8], 0 }
   0xa   :  { %27 = vsyncpa [#allocation11], 0 }
   0xb   :  { %28 = vsyncpa [#allocation14], 0 }
   0xc   :  { %29 = vsyncpa [#allocation17], 0 }
   0xd   :  { %30 = vsyncpa [#allocation20], 0 }
   0xe   :  { %31 = vsyncpa [#allocation23], 0 }
   0xf   :  { %32 = vsyncpa [#allocation26], 0 }
  0x10   :  { %33 = vsyncpa [#allocation6], 0  ;;  %s10581_s1 = smov [#allocation7]   ;;  %s10582_s23 = smov [#allocation10]  }
  0x11   :  { %s51_s22 = sshll.u32 %s10581_s1, 4  ;;  %s77_s24 = sshll.u32 %s10582_s23, 4  ;;  %s52_s22 = int_to_ptr.vmem [resolvable:$true] %s51_s22  ;;  %s78_s24 = int_to_ptr.vmem [resolvable:$true] %s77_s24 }
  0x12   :  { %s14065_s3 = sld [smem:[#allocation97_spill]] }
  0x18   :  { %s10209_s26 = scalar_lea.hbm %s14065_s3, 2048 }
  0x19   :  { %p10210_p0 = scmp.ne.s32.totalorder %s14065_s3, %s10209_s26  ;;  %p10213_p1 = scmp.lt.u32.totalorder %s10209_s26, %s14065_s3 }
  0x1b   :  { %p10215_p2 = pnand %p10213_p1, %p10210_p0 }
  0x1d   :  { %10218 = shalt.err (!%p10215_p2)
}
  0x1e   :  { %s10219_s30 = scalar_lea.vmem %s52_s22, 2048  ;;  %p10224_p4 = scmp.lt.s32.totalorder %s52_s22, %s52_s22 }
  0x1f   :  { %p10220_p3 = scmp.ne.s32.totalorder %s52_s22, %s10219_s30  ;;  %p10225_p5 = scmp.lt.s32.totalorder %s10219_s30, %s10219_s30 }
  0x21   :  { %p10226_p6 = por %p10225_p5, %p10224_p4 }
  0x23   :  { %p10227_p7 = pnand %p10226_p6, %p10220_p3 }
  0x25   :  { %10230 = shalt.err (!%p10227_p7)
}
  0x26   :  { %s13905_s0 = smov 256   ;;  %s13907_s21 = smov 16  }
  0x27   :  { %57 = dma.hbm_to_vmem [thread:$0]  %s14065_s3, 2048, %s52_s22, [#allocation8], %s13905_s0, %s13905_s0, %s13907_s21  }
  0x28   :  { %s14066_s26 = sld [smem:[#allocation100_spill]] }
  0x2e   :  { %s10231_s27 = scalar_lea.hbm %s14066_s26, 2048 }
  0x2f   :  { %p10232_p8 = scmp.ne.s32.totalorder %s14066_s26, %s10231_s27  ;;  %p10235_p9 = scmp.lt.u32.totalorder %s10231_s27, %s14066_s26 }
  0x31   :  { %p10237_p10 = pnand %p10235_p9, %p10232_p8 }
  0x33   :  { %10240 = shalt.err (!%p10237_p10)
}
  0x34   :  { %s10241_s20 = scalar_lea.vmem %s78_s24, 2048  ;;  %p10246_p12 = scmp.lt.s32.totalorder %s78_s24, %s78_s24 }
  0x35   :  { %p10242_p11 = scmp.ne.s32.totalorder %s78_s24, %s10241_s20  ;;  %p10247_p13 = scmp.lt.s32.totalorder %s10241_s20, %s10241_s20 }
  0x37   :  { %p10248_p0 = por %p10247_p13, %p10246_p12 }
  0x39   :  { %p10249_p1 = pnand %p10248_p0, %p10242_p11 }
  0x3b   :  { %10252 = shalt.err (!%p10249_p1)
}
  0x3c   :  { %s10585_s22 = smov 64   ;;  %s10586_s3 = smov 4  }
  0x3d   :  { %83 = dma.hbm_to_vmem [thread:$0]  %s14066_s26, 2048, %s78_s24, [#allocation11], %s10585_s22, %s10585_s22, %s10586_s3  }
  0x3e   :  { %s10587_s2 = smov [#allocation13]   ;;  %s10588_s27 = smov [#allocation16]  }
  0x3f   :  { %s102_s25 = sshll.u32 %s10587_s2, 4  ;;  %s124_s28 = sshll.u32 %s10588_s27, 4  ;;  %s103_s25 = int_to_ptr.vmem [resolvable:$true] %s102_s25  ;;  %s125_s28 = int_to_ptr.vmem [resolvable:$true] %s124_s28 }
  0x40   :  { %s10253_s29 = scalar_lea.hbm %s13885_s7, 16 }
  0x41   :  { %p10254_p2 = scmp.ne.s32.totalorder %s13885_s7, %s10253_s29  ;;  %p10257_p3 = scmp.lt.u32.totalorder %s10253_s29, %s13885_s7 }
  0x43   :  { %p10259_p4 = pnand %p10257_p3, %p10254_p2 }
  0x45   :  { %10262 = shalt.err (!%p10259_p4)
}
  0x46   :  { %s10263_s24 = scalar_lea.vmem %s103_s25, 16  ;;  %s10267_s26 = scalar_lea.vmem %s103_s25, 32 }
  0x47   :  { %p10264_p5 = scmp.ne.s32.totalorder %s103_s25, %s10263_s24  ;;  %p10268_p6 = scmp.lt.s32.totalorder %s103_s25, %s103_s25 }
  0x48   :  { %p10269_p7 = scmp.lt.s32.totalorder %s10267_s26, %s10263_s24 }
  0x4a   :  { %p10270_p8 = por %p10269_p7, %p10268_p6 }
  0x4c   :  { %p10271_p9 = pnand %p10270_p8, %p10264_p5 }
  0x4e   :  { %10274 = shalt.err (!%p10271_p9)
}
  0x4f   :  { %105 = dma.hbm_to_vmem [thread:$0]  %s13885_s7, 16, %s103_s25, [#allocation14]  }
  0x50   :  { %s10275_s27 = scalar_lea.hbm %s13887_s9, 16 }
  0x51   :  { %p10276_p10 = scmp.ne.s32.totalorder %s13887_s9, %s10275_s27  ;;  %p10279_p11 = scmp.lt.u32.totalorder %s10275_s27, %s13887_s9 }
  0x53   :  { %p10281_p12 = pnand %p10279_p11, %p10276_p10 }
  0x55   :  { %10284 = shalt.err (!%p10281_p12)
}
  0x56   :  { %s10285_s29 = scalar_lea.vmem %s125_s28, 16  ;;  %s10289_s30 = scalar_lea.vmem %s125_s28, 32 }
  0x57   :  { %p10286_p13 = scmp.ne.s32.totalorder %s125_s28, %s10285_s29  ;;  %p10290_p0 = scmp.lt.s32.totalorder %s125_s28, %s125_s28 }
  0x58   :  { %p10291_p1 = scmp.lt.s32.totalorder %s10289_s30, %s10285_s29 }
  0x5a   :  { %p10292_p2 = por %p10291_p1, %p10290_p0 }
  0x5c   :  { %p10293_p3 = pnand %p10292_p2, %p10286_p13 }
  0x5e   :  { %10296 = shalt.err (!%p10293_p3)
}
  0x5f   :  { %127 = dma.hbm_to_vmem [thread:$0]  %s13887_s9, 16, %s125_s28, [#allocation17]  }
  0x60   :  { %s10589_s24 = smov [#allocation19]   ;;  %s10590_s1 = smov [#allocation22]  }
  0x61   :  { %s148_s26 = sshll.u32 %s10589_s24, 4  ;;  %s167_s23 = sshll.u32 %s10590_s1, 4  ;;  %s149_s26 = int_to_ptr.vmem [resolvable:$true] %s148_s26  ;;  %s10772_s23 = int_to_ptr.vmem [resolvable:$true] %s167_s23 }
  0x62   :  { %s10297_s27 = scalar_lea.hbm %s13891_s13, 16 }
  0x63   :  { %p10298_p4 = scmp.ne.s32.totalorder %s13891_s13, %s10297_s27  ;;  %p10301_p5 = scmp.lt.u32.totalorder %s10297_s27, %s13891_s13 }
  0x65   :  { %p10303_p6 = pnand %p10301_p5, %p10298_p4 }
  0x67   :  { %10306 = shalt.err (!%p10303_p6)
}
  0x68   :  { %s10307_s9 = scalar_lea.vmem %s149_s26, 16  ;;  %s10311_s28 = scalar_lea.vmem %s149_s26, 32 }
  0x69   :  { %p10308_p7 = scmp.ne.s32.totalorder %s149_s26, %s10307_s9  ;;  %p10312_p8 = scmp.lt.s32.totalorder %s149_s26, %s149_s26 }
  0x6a   :  { %p10313_p9 = scmp.lt.s32.totalorder %s10311_s28, %s10307_s9 }
  0x6c   :  { %p10314_p10 = por %p10313_p9, %p10312_p8 }
  0x6e   :  { %p10315_p11 = pnand %p10314_p10, %p10308_p7 }
  0x70   :  { %10318 = shalt.err (!%p10315_p11)
}
  0x71   :  { %151 = dma.hbm_to_vmem [thread:$0]  %s13891_s13, 16, %s149_s26, [#allocation20]  }
  0x72   :  { %s10319_s24 = scalar_lea.hbm %s13894_s16, 256 }
  0x73   :  { %p10320_p12 = scmp.ne.s32.totalorder %s13894_s16, %s10319_s24  ;;  %p10323_p13 = scmp.lt.u32.totalorder %s10319_s24, %s13894_s16 }
  0x75   :  { %p10325_p0 = pnand %p10323_p13, %p10320_p12 }
  0x77   :  { %10328 = shalt.err (!%p10325_p0)
}
  0x78   :  { %s10329_s12 = scalar_lea.vmem %s10772_s23, 256  ;;  %p10334_p2 = scmp.lt.s32.totalorder %s10772_s23, %s10772_s23 }
  0x79   :  { %p10330_p1 = scmp.ne.s32.totalorder %s10772_s23, %s10329_s12  ;;  %p10335_p3 = scmp.lt.s32.totalorder %s10329_s12, %s10329_s12 }
  0x7b   :  { %p10336_p4 = por %p10335_p3, %p10334_p2 }
  0x7d   :  { %p10337_p5 = pnand %p10336_p4, %p10330_p1 }
  0x7f   :  { %10340 = shalt.err (!%p10337_p5)
}
  0x80   :  { %173 = dma.hbm_to_vmem [thread:$0]  %s13894_s16, 256, %s10772_s23, [#allocation23], %s10585_s22, %s10585_s22, %s10586_s3  }
  0x81   :  { %s10591_s21 = smov [#allocation25]   ;;  %s10341_s28 = scalar_lea.hbm %s13896_s18, 2048 }
  0x82   :  { %s189_s4 = sshll.u32 %s10591_s21, 4  ;;  %p10342_p6 = scmp.ne.s32.totalorder %s13896_s18, %s10341_s28  ;;  %s190_s4 = int_to_ptr.vmem [resolvable:$true] %s189_s4 }
  0x83   :  { %p10345_p7 = scmp.lt.u32.totalorder %s10341_s28, %s13896_s18 }
  0x85   :  { %p10347_p8 = pnand %p10345_p7, %p10342_p6 }
  0x87   :  { %10350 = shalt.err (!%p10347_p8)
}
  0x88   :  { %s10351_s24 = scalar_lea.vmem %s190_s4, 2048  ;;  %p10356_p10 = scmp.lt.s32.totalorder %s190_s4, %s190_s4 }
  0x89   :  { %p10352_p9 = scmp.ne.s32.totalorder %s190_s4, %s10351_s24  ;;  %p10357_p11 = scmp.lt.s32.totalorder %s10351_s24, %s10351_s24 }
  0x8b   :  { %p10358_p12 = por %p10357_p11, %p10356_p10 }
  0x8d   :  { %p10359_p13 = pnand %p10358_p12, %p10352_p9 }
  0x8f   :  { %10362 = shalt.err (!%p10359_p13)
}
  0x90   :  { %s10592_s16 = smov 128   ;;  %s10593_s23 = smov 8  }
  0x91   :  { %195 = dma.hbm_to_vmem [thread:$0]  %s13896_s18, 2048, %s190_s4, [#allocation26], %s10592_s16, %s10592_s16, %s10593_s23  }
  0x92   :  { %s10594_s2 = smov [#allocation4]   ;;  %s10595_s12 = smov [#allocation9]  }
  0x93   :  { %s39_s27 = sshll.u32 %s10594_s2, 4  ;;  %s63_s13 = sshll.u32 %s10595_s12, 4  ;;  %s40_s27 = int_to_ptr.vmem [resolvable:$true] %s39_s27  ;;  %s64_s13 = int_to_ptr.vmem [resolvable:$true] %s63_s13 }
  0x94   :  { %s14067_s20 = sld [smem:[#allocation96_spill]] }
  0x9a   :  { %s10363_s9 = scalar_lea.hbm %s14067_s20, 2048 }
  0x9b   :  { %p10364_p0 = scmp.ne.s32.totalorder %s14067_s20, %s10363_s9  ;;  %p10367_p1 = scmp.lt.u32.totalorder %s10363_s9, %s14067_s20 }
  0x9d   :  { %p10369_p2 = pnand %p10367_p1, %p10364_p0 }
  0x9f   :  { %10372 = shalt.err (!%p10369_p2)
}
  0xa0   :  { %s10373_s18 = scalar_lea.vmem %s40_s27, 2048  ;;  %p10378_p4 = scmp.lt.s32.totalorder %s40_s27, %s40_s27 }
  0xa1   :  { %p10374_p3 = scmp.ne.s32.totalorder %s40_s27, %s10373_s18  ;;  %p10379_p5 = scmp.lt.s32.totalorder %s10373_s18, %s10373_s18 }
  0xa3   :  { %p10380_p6 = por %p10379_p5, %p10378_p4 }
  0xa5   :  { %p10381_p7 = pnand %p10380_p6, %p10374_p3 }
  0xa7   :  { %10384 = shalt.err (!%p10381_p7)
}
  0xa8   :  { %s14068_s4 = smov 16   ;;  %s14069_s25 = smov 256  }
  0xa9   :  { %45 = dma.hbm_to_vmem [thread:$0]  %s14067_s20, 2048, %s40_s27, [#allocation5], %s14069_s25, %s14069_s25, %s14068_s4  }
  0xaa   :  { %s14070_s12 = sld [smem:[#allocation98_spill]] }
  0xb0   :  { %s10385_s26 = scalar_lea.hbm %s14070_s12, 4096 }
  0xb1   :  { %p10386_p8 = scmp.ne.s32.totalorder %s14070_s12, %s10385_s26  ;;  %p10389_p9 = scmp.lt.u32.totalorder %s10385_s26, %s14070_s12 }
  0xb3   :  { %p10391_p10 = pnand %p10389_p9, %p10386_p8 }
  0xb5   :  { %10394 = shalt.err (!%p10391_p10)
}
  0xb6   :  { %s10395_s30 = scalar_lea.vmem %s64_s13, 4096  ;;  %p10400_p12 = scmp.lt.s32.totalorder %s64_s13, %s64_s13 }
  0xb7   :  { %p10396_p11 = scmp.ne.s32.totalorder %s64_s13, %s10395_s30  ;;  %p10401_p13 = scmp.lt.s32.totalorder %s10395_s30, %s10395_s30 }
  0xb9   :  { %p10402_p0 = por %p10401_p13, %p10400_p12 }
  0xbb   :  { %p10403_p1 = pnand %p10402_p0, %p10396_p11 }
  0xbd   :  { %10406 = shalt.err (!%p10403_p1)
}
  0xbe   :  { %s10596_s27 = smov 1024   ;;  %s10597_s18 = smov [#allocation12]  }
  0xbf   :  { %69 = dma.hbm_to_vmem [thread:$0]  %s14070_s12, 4096, %s64_s13, [#allocation8], %s10596_s27, %s10596_s27, %s10585_s22  }
  0xc0   :  { %s90_s24 = sshll.u32 %s10597_s18, 4  ;;  %s10598_s1 = smov [#allocation15]   ;;  %s91_s24 = int_to_ptr.vmem [resolvable:$true] %s90_s24 }
  0xc1   :  { %s111_s0 = sshll.u32 %s10598_s1, 4  ;;  %s10407_s21 = scalar_lea.hbm %s13883_s5, 16  ;;  %s10851_s0 = int_to_ptr.vmem [resolvable:$true] %s111_s0 }
  0xc2   :  { %p10408_p2 = scmp.ne.s32.totalorder %s13883_s5, %s10407_s21  ;;  %p10411_p3 = scmp.lt.u32.totalorder %s10407_s21, %s13883_s5 }
  0xc4   :  { %p10413_p4 = pnand %p10411_p3, %p10408_p2 }
  0xc6   :  { %10416 = shalt.err (!%p10413_p4)
}
  0xc7   :  { %s10417_s13 = scalar_lea.vmem %s91_s24, 16  ;;  %s10421_s12 = scalar_lea.vmem %s91_s24, 32 }
  0xc8   :  { %p10418_p5 = scmp.ne.s32.totalorder %s91_s24, %s10417_s13  ;;  %p10422_p6 = scmp.lt.s32.totalorder %s91_s24, %s91_s24 }
  0xc9   :  { %p10423_p7 = scmp.lt.s32.totalorder %s10421_s12, %s10417_s13 }
  0xcb   :  { %p10424_p8 = por %p10423_p7, %p10422_p6 }
  0xcd   :  { %p10425_p9 = pnand %p10424_p8, %p10418_p5 }
  0xcf   :  { %10428 = shalt.err (!%p10425_p9)
}
  0xd0   :  { %93 = dma.hbm_to_vmem [thread:$0]  %s13883_s5, 16, %s91_s24, [#allocation11]  }
  0xd1   :  { %s10429_s2 = scalar_lea.hbm %s13886_s8, 18432 }
  0xd2   :  { %p10430_p10 = scmp.ne.s32.totalorder %s13886_s8, %s10429_s2  ;;  %p10433_p11 = scmp.lt.u32.totalorder %s10429_s2, %s13886_s8 }
  0xd4   :  { %p10435_p12 = pnand %p10433_p11, %p10430_p10 }
  0xd6   :  { %10438 = shalt.err (!%p10435_p12)
}
  0xd7   :  { %s10439_s29 = scalar_lea.vmem %s10851_s0, 18432  ;;  %p10444_p0 = scmp.lt.s32.totalorder %s10851_s0, %s10851_s0 }
  0xd8   :  { %p10440_p13 = scmp.ne.s32.totalorder %s10851_s0, %s10439_s29  ;;  %p10445_p1 = scmp.lt.s32.totalorder %s10439_s29, %s10439_s29 }
  0xda   :  { %p10446_p2 = por %p10445_p1, %p10444_p0 }
  0xdc   :  { %p10447_p3 = pnand %p10446_p2, %p10440_p13 }
  0xde   :  { %10450 = shalt.err (!%p10447_p3)
}
  0xdf   :  { %117 = dma.hbm_to_vmem [thread:$0]  %s13886_s8, 18432, %s10851_s0, [#allocation14], %s10585_s22, %s10585_s22, %s10586_s3  }
  0xe0   :  { %s10599_s30 = smov [#allocation18]   ;;  %s10600_s12 = smov [#allocation21]  }
  0xe1   :  { %s136_s13 = sshll.u32 %s10599_s30, 4  ;;  %s158_s20 = sshll.u32 %s10600_s12, 4  ;;  %s137_s13 = int_to_ptr.vmem [resolvable:$true] %s136_s13  ;;  %s159_s20 = int_to_ptr.vmem [resolvable:$true] %s158_s20 }
  0xe2   :  { %s10451_s1 = scalar_lea.hbm %s13889_s11, 16 }
  0xe3   :  { %p10452_p4 = scmp.ne.s32.totalorder %s13889_s11, %s10451_s1  ;;  %p10455_p5 = scmp.lt.u32.totalorder %s10451_s1, %s13889_s11 }
  0xe5   :  { %p10457_p6 = pnand %p10455_p5, %p10452_p4 }
  0xe7   :  { %10460 = shalt.err (!%p10457_p6)
}
  0xe8   :  { %s10461_s8 = scalar_lea.vmem %s137_s13, 16  ;;  %s10465_s0 = scalar_lea.vmem %s137_s13, 32 }
  0xe9   :  { %p10462_p7 = scmp.ne.s32.totalorder %s137_s13, %s10461_s8  ;;  %p10466_p8 = scmp.lt.s32.totalorder %s137_s13, %s137_s13 }
  0xea   :  { %p10467_p9 = scmp.lt.s32.totalorder %s10465_s0, %s10461_s8 }
  0xec   :  { %p10468_p10 = por %p10467_p9, %p10466_p8 }
  0xee   :  { %p10469_p11 = pnand %p10468_p10, %p10462_p7 }
  0xf0   :  { %10472 = shalt.err (!%p10469_p11)
}
  0xf1   :  { %139 = dma.hbm_to_vmem [thread:$0]  %s13889_s11, 16, %s137_s13, [#allocation17]  }
  0xf2   :  { %s10473_s30 = scalar_lea.hbm %s13893_s15, 128 }
  0xf3   :  { %p10474_p12 = scmp.ne.s32.totalorder %s13893_s15, %s10473_s30  ;;  %p10477_p13 = scmp.lt.u32.totalorder %s10473_s30, %s13893_s15 }
  0xf5   :  { %p10479_p0 = pnand %p10477_p13, %p10474_p12 }
  0xf7   :  { %10482 = shalt.err (!%p10479_p0)
}
  0xf8   :  { %s10483_s2 = scalar_lea.vmem %s159_s20, 128  ;;  %p10488_p2 = scmp.lt.s32.totalorder %s159_s20, %s159_s20 }
  0xf9   :  { %p10484_p1 = scmp.ne.s32.totalorder %s159_s20, %s10483_s2  ;;  %p10489_p3 = scmp.lt.s32.totalorder %s10483_s2, %s10483_s2 }
  0xfb   :  { %p10490_p4 = por %p10489_p3, %p10488_p2 }
  0xfd   :  { %p10491_p5 = pnand %p10490_p4, %p10484_p1 }
  0xff   :  { %10494 = shalt.err (!%p10491_p5)
}
 0x100   :  { %161 = dma.hbm_to_vmem [thread:$0]  %s13893_s15, 128, %s159_s20, [#allocation20]  }
 0x101   :  { %s10601_s26 = smov [#allocation24]   ;;  %s10602_s9 = smov [#allocation27]  }
 0x102   :  { %s180_s21 = sshll.u32 %s10601_s26, 4  ;;  %s202_s8 = sshll.u32 %s10602_s9, 4  ;;  %s181_s21 = int_to_ptr.vmem [resolvable:$true] %s180_s21  ;;  %s203_s8 = int_to_ptr.vmem [resolvable:$true] %s202_s8 }
 0x103   :  { %s10495_s29 = scalar_lea.hbm %s13895_s17, 16 }
 0x104   :  { %p10496_p6 = scmp.ne.s32.totalorder %s13895_s17, %s10495_s29  ;;  %p10499_p7 = scmp.lt.u32.totalorder %s10495_s29, %s13895_s17 }
 0x106   :  { %p10501_p8 = pnand %p10499_p7, %p10496_p6 }
 0x108   :  { %10504 = shalt.err (!%p10501_p8)
}
 0x109   :  { %s10505_s15 = scalar_lea.vmem %s181_s21, 16  ;;  %s10509_s20 = scalar_lea.vmem %s181_s21, 32 }
 0x10a   :  { %p10506_p9 = scmp.ne.s32.totalorder %s181_s21, %s10505_s15  ;;  %p10510_p10 = scmp.lt.s32.totalorder %s181_s21, %s181_s21 }
 0x10b   :  { %p10511_p11 = scmp.lt.s32.totalorder %s10509_s20, %s10505_s15 }
 0x10d   :  { %p10512_p12 = por %p10511_p11, %p10510_p10 }
 0x10f   :  { %p10513_p13 = pnand %p10512_p12, %p10506_p9 }
 0x111   :  { %10516 = shalt.err (!%p10513_p13)
}
 0x112   :  { %183 = dma.hbm_to_vmem [thread:$0]  %s13895_s17, 16, %s181_s21, [#allocation23]  }
 0x113   :  { %s10517_s11 = scalar_lea.hbm %s13897_s19, 32 }
 0x114   :  { %p10518_p0 = scmp.ne.s32.totalorder %s13897_s19, %s10517_s11  ;;  %p10521_p1 = scmp.lt.u32.totalorder %s10517_s11, %s13897_s19 }
 0x116   :  { %p10523_p2 = pnand %p10521_p1, %p10518_p0 }
 0x118   :  { %10526 = shalt.err (!%p10523_p2)
}
 0x119   :  { %s10527_s28 = scalar_lea.vmem %s203_s8, 32  ;;  %p10532_p4 = scmp.lt.s32.totalorder %s203_s8, %s203_s8 }
 0x11a   :  { %p10528_p3 = scmp.ne.s32.totalorder %s203_s8, %s10527_s28  ;;  %p10533_p5 = scmp.lt.s32.totalorder %s10527_s28, %s10527_s28 }
 0x11c   :  { %p10534_p6 = por %p10533_p5, %p10532_p4 }
 0x11e   :  { %p10535_p7 = pnand %p10534_p6, %p10528_p3 }
 0x120   :  { %10538 = shalt.err (!%p10535_p7)
}
 0x121   :  { %205 = dma.hbm_to_vmem [thread:$0]  %s13897_s19, 32, %s203_s8, [#allocation26]  }
 0x122   :  { %10561 = dma.done.wait [#allocation5], 2048  }
 0x123   :  { %10562 = vsyncadd [#allocation5], 4294965248 }
 0x124   :  { %10563 = dma.done.wait [#allocation8], 6144  }
 0x125   :  { %10564 = vsyncadd [#allocation8], 4294961152 }
 0x126   :  { %10565 = dma.done.wait [#allocation11], 2064  }
 0x127   :  { %10566 = vsyncadd [#allocation11], 4294965232 }
 0x128   :  { %10567 = dma.done.wait [#allocation14], 18448  }
 0x129   :  { %10568 = vsyncadd [#allocation14], 4294948848 }
 0x12a   :  { %10569 = dma.done.wait [#allocation17], 32  }
 0x12b   :  { %10570 = vsyncadd [#allocation17], 4294967264 }
 0x12c   :  { %10571 = dma.done.wait [#allocation20], 144  }
 0x12d   :  { %10572 = vsyncadd [#allocation20], 4294967152 }
 0x12e   :  { %10573 = dma.done.wait [#allocation23], 272  }
 0x12f   :  { %10574 = vsyncadd [#allocation23], 4294967024 }
 0x130   :  { %10575 = dma.done.wait [#allocation26], 2080  }
 0x131   :  { %10576 = vsyncadd [#allocation26], 4294965216  ;;  %s256_s29 = sld [smem:[#allocation0]]   ;;  %268 = sst [smem:[#allocation30]] %s10596_s27  ;;  %vm13945_vm8 = vcmask 1040384  }
 0x132   :  { %270 = sst [smem:[#allocation30 + $0x1]] %s10596_s27  ;;  %s10603_s19 = smov [#allocation2]  }
 0x133   :  { %272 = sst [smem:[#allocation30 + $0x2]] %s10593_s23  ;;  %s264_s8 = sshll.u32 %s10603_s19, 4  ;;  %s265_s8 = int_to_ptr.vmem [resolvable:$true] %s264_s8 }
 0x134   :  { %274 = sst [smem:[#allocation30 + $0x3]] %s10585_s22  ;;  %s10604_s5 = smov 2  }
 0x135   :  { %276 = sst [smem:[#allocation30 + $0x4]] %s10592_s16  ;;  %s10605_s30 = smov 512  }
 0x136   :  { %278 = sst [smem:[#allocation30 + $0x5]] %s10604_s5  ;;  %s10606_s27 = smov [#allocation3]  }
 0x137   :  { %s7908_s24 = sshll.u32 %s256_s29, 26  ;;  %280 = sst [smem:[#allocation30 + $0x6]] %s10605_s30 }
 0x138   :  { %s7909_s12 = sadd.s32 134217728, %s7908_s24  ;;  %282 = sst [smem:[#allocation30 + $0x7]] %s10585_s22 }
 0x139   :  { %284 = sst [smem:[#allocation30 + $0x8]] %s10586_s3  ;;  %s10607_s15 = smov [#allocation29]  }
 0x13a   :  { %286 = dma.general %s13892_s14, 65536, %s265_s8, %s10606_s27, %s10607_s15, [#allocation30], %s7909_s12, 0  }
 0x13b   :  { %v9891_v0 = vld [vmem:[#allocation10 + $0x40] sm:$0xff]   ;;  %v9893_v2 = vld [vmem:[#allocation10 + $0x48] sm:$0xff]   ;;  %v9895_v4 = vld [vmem:[#allocation10 + $0x50] sm:$0xff]   ;;  %s14325_s20 = sld [smem:[#allocation101_spill]] }
 0x13c   :  { %v9892_v1 = vld [vmem:[#allocation10] sm:$0xff]   ;;  %8471 = vmatprep.subr.bf16.mxu0 %v9891_v0  ;;  %v9894_v3 = vld [vmem:[#allocation10 + $0x8] sm:$0xff]   ;;  %v9896_v5 = vld [vmem:[#allocation10 + $0x10] sm:$0xff]  }
 0x13d   :  { %8472 = vmatpush3.bf16.msra.mxu0 %v9892_v1  ;;  %v9897_v6 = vld [vmem:[#allocation10 + $0x58] sm:$0xff]   ;;  %v9899_v8 = vld [vmem:[#allocation10 + $0x60] sm:$0xff]   ;;  %v9901_v10 = vld [vmem:[#allocation10 + $0x68] sm:$0xff]  }
 0x13e   :  { %8473 = vmatprep.subr.bf16.mxu0 %v9893_v2  ;;  %v9898_v7 = vld [vmem:[#allocation10 + $0x18] sm:$0xff]   ;;  %v9900_v9 = vld [vmem:[#allocation10 + $0x20] sm:$0xff]   ;;  %v10943_v11 = vld [vmem:[#allocation4 + $0x8] sm:$0xff] }
 0x13f   :  { %v10945_v12 = vld [vmem:[#allocation4 + $0x18] sm:$0xff]  ;;  %v10947_v13 = vld [vmem:[#allocation4 + $0x28] sm:$0xff]  ;;  %v10953_v16 = vld [vmem:[#allocation4] sm:$0xff] }
 0x140   :  { %v316_v14 = vadd.f32 %v10945_v12, %v10943_v11  ;;  %v10951_v15 = vld [vmem:[#allocation4 + $0x38] sm:$0xff]  ;;  %v9902_v17 = vld [vmem:[#allocation10 + $0x28] sm:$0xff]   ;;  %v10956_v19 = vld [vmem:[#allocation4 + $0x10] sm:$0xff] }
 0x141   :  { %8474 = vmatpush3.bf16.msra.mxu0 %v9894_v3  ;;  %v10958_v20 = vld [vmem:[#allocation4 + $0x20] sm:$0xff]  ;;  %v9903_v21 = vld [vmem:[#allocation10 + $0x70] sm:$0xff]   ;;  %v296_v22 = vld [vmem:[#allocation4 + $0x48] sm:$0xff]  ;;  %v303_v24 = vadd.f32 %v10956_v19, %v10953_v16 }
 0x142   :  { %8475 = vmatprep.subr.bf16.mxu0 %v9895_v4  ;;  %v317_v18 = vadd.f32 %v316_v14, %v10947_v13  ;;  %v10960_v23 = vld [vmem:[#allocation4 + $0x58] sm:$0xff]  ;;  %v9904_v25 = vld [vmem:[#allocation10 + $0x30] sm:$0xff]   ;;  %v300_v29 = vld [vmem:[#allocation4 + $0x68] sm:$0xff] }
 0x143   :  { %v10965_v27 = vld [vmem:[#allocation4 + $0x30] sm:$0xff]  ;;  %v9905_v28 = vld [vmem:[#allocation10 + $0x78] sm:$0xff]   ;;  %v304_v30 = vadd.f32 %v303_v24, %v10958_v20  ;;  %v9907_v31 = vld [vmem:[%s13884_s6] sm:$0xff]  }
 0x144   :  { %v318_v26 = vadd.f32 %v317_v18, %v10951_v15  ;;  %v10971_v33 = vld [vmem:[#allocation4 + $0x40] sm:$0xff]  ;;  %v302_v34 = vld [vmem:[#allocation4 + $0x78] sm:$0xff]  ;;  %v10973_v35 = vld [vmem:[#allocation4 + $0x50] sm:$0xff]  ;;  %9369 = vmatprep.subr.bf16.mxu1 %v9907_v31 }
 0x145   :  { %8476 = vmatpush3.bf16.msra.mxu0 %v9896_v5  ;;  %v305_v36 = vadd.f32 %v304_v30, %v10965_v27  ;;  %v9906_v37 = vld [vmem:[#allocation10 + $0x38] sm:$0xff]   ;;  %9370 = vmatpush3.bf16.msra.mxu1 %v9907_v31  ;;  %v9910_v39 = vld [vmem:[%s13884_s6 + $0x8] sm:$0xff]   ;;  %v10980_v40 = vld [vmem:[#allocation4 + $0x60] sm:$0xff] }
 0x146   :  { %8477 = vmatprep.subr.bf16.mxu0 %v9897_v6  ;;  %v319_v32 = vadd.f32 %v318_v26, %v296_v22  ;;  %v9908_v43 = vld [vmem:[#allocation15 + $0x40] sm:$0xff]   ;;  %9371 = vmatprep.subr.bf16.mxu1 %v9910_v39  ;;  %v9913_v45 = vld [vmem:[%s13884_s6 + $0x10] sm:$0xff]   ;;  %v9916_v50 = vld [vmem:[%s13884_s6 + $0x18] sm:$0xff]  }
 0x147   :  { %v306_v41 = vadd.f32 %v305_v36, %v10971_v33  ;;  %v301_v47 = vld [vmem:[#allocation4 + $0x70] sm:$0xff] }
 0x148   :  { %v320_v38 = vadd.f32 %v319_v32, %v10960_v23 }
 0x149   :  { %8478 = vmatpush3.bf16.msra.mxu0 %v9898_v7  ;;  %v307_v44 = vadd.f32 %v306_v41, %v10973_v35  ;;  %9372 = vmatpush3.bf16.msra.mxu1 %v9910_v39 }
 0x14a   :  { %8479 = vmatprep.subr.bf16.mxu0 %v9899_v8  ;;  %v321_v42 = vadd.f32 %v320_v38, %v300_v29  ;;  %9373 = vmatprep.subr.bf16.mxu1 %v9913_v45 }
 0x14b   :  { %v308_v48 = vadd.f32 %v307_v44, %v10980_v40 }
 0x14c   :  { %v322_v46 = vadd.f32 %v321_v42, %v302_v34 }
 0x14d   :  { %8480 = vmatpush3.bf16.msra.mxu0 %v9900_v9  ;;  %v309_v51 = vadd.f32 %v308_v48, %v301_v47  ;;  %9374 = vmatpush3.bf16.msra.mxu1 %v9913_v45 }
 0x14e   :  { %8481 = vmatprep.subr.bf16.mxu0 %v9901_v10  ;;  %v323_v49 = vrot.slane %v322_v46, 4  ;;  %9375 = vmatprep.subr.bf16.mxu1 %v9916_v50 }
 0x14f   :  { %v310_v53 = vrot.slane %v309_v51, 4 }
 0x150   :  { %v324_v52 = vadd.f32 %v323_v49, %v322_v46 }
 0x151   :  { %8482 = vmatpush3.bf16.msra.mxu0 %v9902_v17  ;;  %v311_v55 = vadd.f32 %v310_v53, %v309_v51  ;;  %9376 = vmatpush3.bf16.msra.mxu1 %v9916_v50 }
 0x152   :  { %8483 = vmatprep.subr.bf16.mxu0 %v9903_v21  ;;  %v325_v54 = vrot.slane %v324_v52, 2 }
 0x153   :  { %v312_v57 = vrot.slane %v311_v55, 2 }
 0x154   :  { %v326_v56 = vadd.f32 %v325_v54, %v324_v52 }
 0x155   :  { %8484 = vmatpush3.bf16.msra.mxu0 %v9904_v25  ;;  %v313_v59 = vadd.f32 %v312_v57, %v311_v55 }
 0x156   :  { %8485 = vmatprep.subr.bf16.mxu0 %v9905_v28  ;;  %v327_v58 = vrot.slane %v326_v56, 1 }
 0x157   :  { %v314_v61 = vrot.slane %v313_v59, 1 }
 0x158   :  { %v328_v60 = vadd.f32 %v327_v58, %v326_v56 }
 0x159   :  { %8486 = vmatpush3.bf16.msra.mxu0 %v9906_v37  ;;  %v315_v63 = vadd.f32 %v314_v61, %v313_v59 }
 0x15a   :  { %8523 = vmatprep.subr.bf16.mxu0 %v9908_v43  ;;  %v331_v62 = vmul.f32 0.015625, %v328_v60 }
 0x15c   :  { %v10992_v0 = vsub.f32 %v10943_v11, %v331_v62  ;;  %v10995_v1 = vsub.f32 %v10945_v12, %v331_v62  ;;  %v10998_v2 = vsub.f32 %v10947_v13, %v331_v62  ;;  %v11001_v3 = vsub.f32 %v10951_v15, %v331_v62 }
 0x15d   :  { %v11003_v4 = vsub.f32 %v296_v22, %v331_v62  ;;  %v11012_v8 = vsub.f32 %v10960_v23, %v331_v62  ;;  %v330_v11 = vmul.f32 0.015625, %v315_v63  ;;  %v11016_v12 = vsub.f32 %v300_v29, %v331_v62 }
 0x15e   :  { %v349_v5 = vmul.f32 %v10992_v0, %v10992_v0  ;;  %v351_v6 = vmul.f32 %v10995_v1, %v10995_v1  ;;  %v353_v7 = vmul.f32 %v10998_v2, %v10998_v2  ;;  %v355_v9 = vmul.f32 %v11001_v3, %v11001_v3 }
 0x15f   :  { %v357_v13 = vmul.f32 %v11003_v4, %v11003_v4  ;;  %v11021_v15 = vsub.f32 %v10953_v16, %v330_v11  ;;  %v11024_v17 = vsub.f32 %v10956_v19, %v330_v11  ;;  %v11027_v18 = vsub.f32 %v10958_v20, %v330_v11 }
 0x160   :  { %v377_v10 = vadd.f32 %v351_v6, %v349_v5  ;;  %v11029_v21 = vsub.f32 %v302_v34, %v331_v62  ;;  %v359_v22 = vmul.f32 %v11012_v8, %v11012_v8  ;;  %v11034_v23 = vsub.f32 %v10965_v27, %v330_v11 }
 0x161   :  { %v11037_v25 = vsub.f32 %v10971_v33, %v330_v11  ;;  %v348_v16 = vmul.f32 %v11021_v15, %v11021_v15  ;;  %v350_v19 = vmul.f32 %v11024_v17, %v11024_v17  ;;  %v361_v20 = vmul.f32 %v11016_v12, %v11016_v12 }
 0x162   :  { %v378_v14 = vadd.f32 %v377_v10, %v353_v7  ;;  %v352_v26 = vmul.f32 %v11027_v18, %v11027_v18  ;;  %v11048_v27 = vsub.f32 %v10973_v35, %v330_v11  ;;  %v354_v29 = vmul.f32 %v11034_v23, %v11034_v23 }
 0x163   :  { %v364_v30 = vadd.f32 %v350_v19, %v348_v16  ;;  %v363_v31 = vmul.f32 %v11029_v21, %v11029_v21  ;;  %v11055_v33 = vsub.f32 %v10980_v40, %v330_v11  ;;  %v356_v34 = vmul.f32 %v11037_v25, %v11037_v25 }
 0x164   :  { %v379_v24 = vadd.f32 %v378_v14, %v355_v9  ;;  %v11059_v38 = vsub.f32 %v301_v47, %v330_v11  ;;  %v358_v35 = vmul.f32 %v11048_v27, %v11048_v27 }
 0x165   :  { %v365_v36 = vadd.f32 %v364_v30, %v352_v26  ;;  %v360_v42 = vmul.f32 %v11055_v33, %v11055_v33 }
 0x166   :  { %v380_v28 = vadd.f32 %v379_v24, %v357_v13  ;;  %v362_v40 = vmul.f32 %v11059_v38, %v11059_v38 }
 0x167   :  { %v366_v39 = vadd.f32 %v365_v36, %v354_v29 }
 0x168   :  { %v381_v32 = vadd.f32 %v380_v28, %v359_v22 }
 0x169   :  { %v367_v43 = vadd.f32 %v366_v39, %v356_v34 }
 0x16a   :  { %v382_v37 = vadd.f32 %v381_v32, %v361_v20 }
 0x16b   :  { %v368_v45 = vadd.f32 %v367_v43, %v358_v35  ;;  %v9912_v43 = vld [vmem:[#allocation15 + $0x8] sm:$0xff]  }
 0x16c   :  { %v383_v41 = vadd.f32 %v382_v37, %v363_v31  ;;  %v9911_v37 = vld [vmem:[#allocation15 + $0x48] sm:$0xff]  }
 0x16d   :  { %v369_v48 = vadd.f32 %v368_v45, %v360_v42  ;;  %v785_v45 = vld [vmem:[#allocation7 + $0x8] sm:$0xff] }
 0x16e   :  { %v384_v44 = vrot.slane %v383_v41, 4 }
 0x16f   :  { %v370_v50 = vadd.f32 %v369_v48, %v362_v40 }
 0x170   :  { %v385_v46 = vadd.f32 %v384_v44, %v383_v41 }
 0x171   :  { %v371_v51 = vrot.slane %v370_v50, 4 }
 0x172   :  { %v386_v49 = vrot.slane %v385_v46, 2 }
 0x173   :  { %v372_v53 = vadd.f32 %v371_v51, %v370_v50 }
 0x174   :  { %v387_v47 = vadd.f32 %v386_v49, %v385_v46  ;;  %v786_v46 = vld [vmem:[#allocation7 + $0x10] sm:$0xff]  ;;  %v789_v49 = vld [vmem:[#allocation7 + $0x28] sm:$0xff] }
 0x175   :  { %v373_v55 = vrot.slane %v372_v53, 2 }
 0x176   :  { %v388_v52 = vrot.slane %v387_v47, 1 }
 0x177   :  { %v374_v57 = vadd.f32 %v373_v55, %v372_v53 }
 0x178   :  { %v389_v54 = vadd.f32 %v388_v52, %v387_v47  ;;  %v788_v47 = vld [vmem:[#allocation7 + $0x20] sm:$0xff]  ;;  %v790_v52 = vld [vmem:[#allocation7 + $0x30] sm:$0xff] }
 0x179   :  { %v375_v59 = vrot.slane %v374_v57, 1 }
 0x17a   :  { %v391_v56 = vmul.f32 0.015873017, %v389_v54  ;;  %v793_v54 = vld [vmem:[#allocation7 + $0x48] sm:$0xff] }
 0x17b   :  { %v376_v60 = vadd.f32 %v375_v59, %v374_v57 }
 0x17c   :  { %v393_v58 = vadd.f32 1e-05, %v391_v56  ;;  %v792_v56 = vld [vmem:[#allocation7 + $0x40] sm:$0xff] }
 0x17d   :  { %v390_v61 = vmul.f32 0.015873017, %v376_v60  ;;  %v794_v60 = vld [vmem:[#allocation7 + $0x50] sm:$0xff] }
 0x17e   :  { %10167 = vrsqrt.f32 %v393_v58  ;;  %vm403_vm0 = vcmp.eq.f32.partialorder %v393_v58, inf  ;;  %vm405_vm1 = vcmp.eq.f32.partialorder %v393_v58, 0.0  ;;  %v406_v63 = vand.u32 2147483648, %v393_v58 }
 0x17f   :  { %v392_v62 = vadd.f32 1e-05, %v390_v61 }
 0x181   :  { %10169 = vrsqrt.f32 %v392_v62  ;;  %v399_v5 = vand.u32 2147483648, %v392_v62  ;;  %vm396_vm2 = vcmp.eq.f32.partialorder %v392_v62, inf  ;;  %vm398_vm3 = vcmp.eq.f32.partialorder %v392_v62, 0.0 }
 0x188   :  { %v10168_v6 = vpop.eup %10167 }
 0x189   :  { %v402_v7 = vmul.f32 %v10168_v6, %v393_v58 }
 0x18b   :  { %v404_v9 = vsel %vm403_vm0, %v393_v58, %v402_v7  ;;  %v10170_v11 = vpop.eup %10169  ;;  %v795_v58 = vld [vmem:[#allocation7 + $0x58] sm:$0xff] }
 0x18c   :  { %v407_v10 = vsel %vm405_vm1, %v406_v63, %v404_v9  ;;  %v395_v13 = vmul.f32 %v10170_v11, %v392_v62  ;;  %v799_v7 = vld [vmem:[#allocation7 + $0x78] sm:$0xff] }
 0x18d   :  { %10171 = vrcp.f32 %v407_v10  ;;  %v798_v10 = vld [vmem:[#allocation7 + $0x70] sm:$0xff] }
 0x18e   :  { %v397_v14 = vsel %vm396_vm2, %v392_v62, %v395_v13  ;;  %v797_v62 = vld [vmem:[#allocation7 + $0x68] sm:$0xff] }
 0x18f   :  { %v400_v22 = vsel %vm398_vm3, %v399_v5, %v397_v14  ;;  %v796_v5 = vld [vmem:[#allocation7 + $0x60] sm:$0xff] }
 0x190   :  { %10173 = vrcp.f32 %v400_v22 }
 0x197   :  { %v10172_v24 = vpop.eup %10171 }
 0x198   :  { %v413_v16 = vmul.f32 %v10172_v24, %v10992_v0  ;;  %v415_v19 = vmul.f32 %v10172_v24, %v10995_v1  ;;  %v421_v20 = vmul.f32 %v10172_v24, %v11003_v4  ;;  %v423_v26 = vmul.f32 %v10172_v24, %v11012_v8  ;;  %v9909_v4 = vld [vmem:[#allocation15] sm:$0xff]  }
 0x199   :  { %v11072_v28 = vmul.f32 %v10172_v24, %v11016_v12  ;;  %v11075_v29 = vmul.f32 %v10172_v24, %v11029_v21  ;;  %v417_v31 = vmul.f32 %v10172_v24, %v10998_v2  ;;  %v419_v32 = vmul.f32 %v10172_v24, %v11001_v3 }
 0x19a   :  { %v429_v30 = vpack.c.bf16 %v415_v19, %v413_v16  ;;  %v433_v34 = vpack.c.bf16 %v423_v26, %v421_v20  ;;  %v10174_v1 = vpop.eup %10173 }
 0x19b   :  { %v435_v0 = vpack.c.bf16 %v11075_v29, %v11072_v28  ;;  %v412_v8 = vmul.f32 %v10174_v1, %v11021_v15  ;;  %v414_v12 = vmul.f32 %v10174_v1, %v11024_v17  ;;  %v431_v36 = vpack.c.bf16 %v419_v32, %v417_v31  ;;  %v9914_v17 = vld [vmem:[#allocation15 + $0x50] sm:$0xff]  }
 0x19c   :  { %603 = vmatprep.mubr.bf16.mxu0 %v429_v30  ;;  %v420_v21 = vmul.f32 %v10174_v1, %v11037_v25  ;;  %v422_v35 = vmul.f32 %v10174_v1, %v11048_v27  ;;  %v424_v2 = vmul.f32 %v10174_v1, %v11055_v33  ;;  %v426_v3 = vmul.f32 %v10174_v1, %v11059_v38  ;;  %v9915_v25 = vld [vmem:[#allocation15 + $0x10] sm:$0xff]   ;;  %v9917_v27 = vld [vmem:[#allocation15 + $0x58] sm:$0xff]  }
 0x19d   :  { %v428_v39 = vpack.c.bf16 %v414_v12, %v412_v8  ;;  %v416_v44 = vmul.f32 %v10174_v1, %v11027_v18  ;;  %v418_v15 = vmul.f32 %v10174_v1, %v11034_v23  ;;  %v787_v33 = vld [vmem:[#allocation7 + $0x18] sm:$0xff]  ;;  %v784_v38 = vld [vmem:[#allocation7] sm:$0xff] }
 0x19e   :  { %v432_v41 = vpack.c.bf16 %v422_v35, %v420_v21  ;;  %v434_v42 = vpack.c.bf16 %v426_v3, %v424_v2  ;;  %v813_v48 = vadd.f32 %v787_v33, %v785_v45  ;;  %v800_v50 = vadd.f32 %v786_v46, %v784_v38  ;;  %v791_v23 = vld [vmem:[#allocation7 + $0x38] sm:$0xff] }
 0x19f   :  { %604 = vmatmul.mubr.bf16.vlgmr.msra.gmra.mrb[0].mxu0 %v428_v39  ;;  %v430_v40 = vpack.c.bf16 %v418_v15, %v416_v44 }
 0x1a0   :  { %611 = vmatprep.mubr.bf16.mxu0 %v431_v36  ;;  %8524 = vmatpush3.bf16.msra.mxu0 %v9909_v4  ;;  %v814_v18 = vadd.f32 %v813_v48, %v789_v49  ;;  %v801_v51 = vadd.f32 %v800_v50, %v788_v47 }
 0x1a1   :  { %8525 = vmatprep.subr.bf16.mxu0 %v9911_v37 }
 0x1a2   :  { %v815_v53 = vadd.f32 %v814_v18, %v791_v23  ;;  %v802_v55 = vadd.f32 %v801_v51, %v790_v52 }
 0x1a4   :  { %8526 = vmatpush3.bf16.msra.mxu0 %v9912_v43  ;;  %v816_v57 = vadd.f32 %v815_v53, %v793_v54  ;;  %v803_v59 = vadd.f32 %v802_v55, %v792_v56 }
 0x1a5   :  { %8527 = vmatprep.subr.bf16.mxu0 %v9914_v17 }
 0x1a6   :  { %v817_v61 = vadd.f32 %v816_v57, %v795_v58  ;;  %v804_v63 = vadd.f32 %v803_v59, %v794_v60 }
 0x1a7   :  { %612 = vmatmul.mubr.bf16.gmra.mrb[4].mxu0 %v430_v40 }
 0x1a8   :  { %619 = vmatprep.mubr.bf16.mxu0 %v433_v34  ;;  %8528 = vmatpush3.bf16.msra.mxu0 %v9915_v25  ;;  %v818_v6 = vadd.f32 %v817_v61, %v797_v62  ;;  %v805_v9 = vadd.f32 %v804_v63, %v796_v5 }
 0x1a9   :  { %8529 = vmatprep.subr.bf16.mxu0 %v9917_v27 }
 0x1aa   :  { %v819_v11 = vadd.f32 %v818_v6, %v799_v7  ;;  %v806_v13 = vadd.f32 %v805_v9, %v798_v10 }
 0x1ac   :  { %v820_v14 = vrot.slane %v819_v11, 4  ;;  %v807_v22 = vrot.slane %v806_v13, 4 }
 0x1ae   :  { %v821_v24 = vadd.f32 %v820_v14, %v819_v11  ;;  %v808_v16 = vadd.f32 %v807_v22, %v806_v13 }
 0x1af   :  { %620 = vmatmul.mubr.bf16.gmra.mrb[8].mxu0 %v432_v41 }
 0x1b0   :  { %627 = vmatprep.mubr.bf16.mxu0 %v435_v0  ;;  %v822_v19 = vrot.slane %v821_v24, 2  ;;  %v809_v20 = vrot.slane %v808_v16, 2 }
 0x1b2   :  { %v823_v26 = vadd.f32 %v822_v19, %v821_v24  ;;  %v810_v28 = vadd.f32 %v809_v20, %v808_v16 }
 0x1b4   :  { %v824_v29 = vrot.slane %v823_v26, 1  ;;  %v811_v30 = vrot.slane %v810_v28, 1 }
 0x1b6   :  { %v825_v31 = vadd.f32 %v824_v29, %v823_v26  ;;  %v812_v32 = vadd.f32 %v811_v30, %v810_v28 }
 0x1b7   :  { %628 = vmatmul.mubr.bf16.gmra.mrb[12].mxu0 %v434_v42 }
 0x1b8   :  { %v11089_v34 = vmul.f32 0.015625, %v825_v31  ;;  %v11091_v1 = vmul.f32 0.015625, %v812_v32 }
 0x1ba   :  { %14071 = vst [vmem:[#allocation41_spill] sm:$0xff] %v11089_v34  ;;  %14072 = vst [vmem:[#allocation42_spill] sm:$0xff] %v11091_v1  ;;  %v11094_v0 = vsub.f32 %v785_v45, %v11089_v34  ;;  %v11097_v4 = vsub.f32 %v787_v33, %v11089_v34  ;;  %v11100_v8 = vsub.f32 %v784_v38, %v11091_v1 }
 0x1bb   :  { %v11103_v12 = vsub.f32 %v786_v46, %v11091_v1  ;;  %v11106_v36 = vsub.f32 %v789_v49, %v11089_v34  ;;  %v11113_v35 = vsub.f32 %v788_v47, %v11091_v1  ;;  %v11120_v39 = vsub.f32 %v791_v23, %v11089_v34 }
 0x1bc   :  { %v845_v37 = vmul.f32 %v11094_v0, %v11094_v0  ;;  %v847_v21 = vmul.f32 %v11097_v4, %v11097_v4  ;;  %v844_v2 = vmul.f32 %v11100_v8, %v11100_v8  ;;  %v11125_v43 = vsub.f32 %v790_v52, %v11091_v1 }
 0x1bd   :  { %v846_v3 = vmul.f32 %v11103_v12, %v11103_v12  ;;  %v849_v41 = vmul.f32 %v11106_v36, %v11106_v36  ;;  %v848_v44 = vmul.f32 %v11113_v35, %v11113_v35  ;;  %v11130_v17 = vsub.f32 %v793_v54, %v11089_v34 }
 0x1be   :  { %v873_v42 = vadd.f32 %v847_v21, %v845_v37  ;;  %v851_v25 = vmul.f32 %v11120_v39, %v11120_v39  ;;  %v11135_v27 = vsub.f32 %v792_v56, %v11091_v1  ;;  %v850_v45 = vmul.f32 %v11125_v43, %v11125_v43 }
 0x1bf   :  { %v860_v15 = vadd.f32 %v846_v3, %v844_v2  ;;  %v11140_v38 = vsub.f32 %v795_v58, %v11089_v34  ;;  %v853_v46 = vmul.f32 %v11130_v17, %v11130_v17  ;;  %v11145_v49 = vsub.f32 %v794_v60, %v11091_v1 }
 0x1c0   :  { %v874_v40 = vadd.f32 %v873_v42, %v849_v41  ;;  %v852_v50 = vmul.f32 %v11135_v27, %v11135_v27  ;;  %v11150_v18 = vsub.f32 %v797_v62, %v11089_v34  ;;  %v11155_v52 = vsub.f32 %v796_v5, %v11091_v1  ;;  %v9918_v42 = vld [vmem:[#allocation15 + $0x18] sm:$0xff]  }
 0x1c1   :  { %v861_v33 = vadd.f32 %v860_v15, %v848_v44  ;;  %v855_v23 = vmul.f32 %v11140_v38, %v11140_v38  ;;  %v854_v53 = vmul.f32 %v11145_v49, %v11145_v49  ;;  %v11160_v55 = vsub.f32 %v799_v7, %v11089_v34  ;;  %8530 = vmatpush3.bf16.msra.mxu0 %v9918_v42 }
 0x1c2   :  { %v875_v48 = vadd.f32 %v874_v40, %v851_v25  ;;  %v857_v56 = vmul.f32 %v11150_v18, %v11150_v18  ;;  %v11165_v58 = vsub.f32 %v798_v10, %v11091_v1  ;;  %v856_v59 = vmul.f32 %v11155_v52, %v11155_v52 }
 0x1c3   :  { %v862_v47 = vadd.f32 %v861_v33, %v850_v45  ;;  %v859_v61 = vmul.f32 %v11160_v55, %v11160_v55  ;;  %v9920_v33 = vld [vmem:[#allocation15 + $0x60] sm:$0xff]  }
 0x1c4   :  { %v876_v51 = vadd.f32 %v875_v48, %v853_v46  ;;  %v858_v63 = vmul.f32 %v11165_v58, %v11165_v58  ;;  %v9919_v46 = vld [vmem:[%s13884_s6 + $0x20] sm:$0xff]   ;;  %8531 = vmatprep.subr.bf16.mxu0 %v9920_v33 }
 0x1c5   :  { %v863_v54 = vadd.f32 %v862_v47, %v852_v50  ;;  %v9921_v48 = vld [vmem:[#allocation15 + $0x20] sm:$0xff]   ;;  %9377 = vmatprep.subr.bf16.mxu1 %v9919_v46  ;;  %v9923_v47 = vld [vmem:[#allocation15 + $0x68] sm:$0xff]  }
 0x1c6   :  { %v877_v57 = vadd.f32 %v876_v51, %v855_v23  ;;  %8532 = vmatpush3.bf16.msra.mxu0 %v9921_v48  ;;  %9378 = vmatpush3.bf16.msra.mxu1 %v9919_v46  ;;  %v9922_v50 = vld [vmem:[%s13884_s6 + $0x28] sm:$0xff]   ;;  %v924_v51 = vlaneseq  ;;  %v14087_v48 = vmov 0 }
 0x1c7   :  { %v864_v60 = vadd.f32 %v863_v54, %v854_v53  ;;  %v9924_v23 = vld [vmem:[#allocation15 + $0x28] sm:$0xff]   ;;  %9379 = vmatprep.subr.bf16.mxu1 %v9922_v50  ;;  %8533 = vmatprep.subr.bf16.mxu0 %v9923_v47  ;;  %v9926_v53 = vld [vmem:[#allocation15 + $0x70] sm:$0xff]  }
 0x1c8   :  { %v878_v62 = vadd.f32 %v877_v57, %v857_v56  ;;  %v9925_v56 = vld [vmem:[%s13884_s6 + $0x30] sm:$0xff]  }
 0x1c9   :  { %v865_v5 = vadd.f32 %v864_v60, %v856_v59  ;;  %v9927_v57 = vld [vmem:[#allocation15 + $0x30] sm:$0xff]   ;;  %v11190_v59 = vshrl.u32 %v924_v51, 7  ;;  %v14094_v51 = vmov 0 }
 0x1ca   :  { %v879_v6 = vadd.f32 %v878_v62, %v859_v61  ;;  %8534 = vmatpush3.bf16.msra.mxu0 %v9924_v23  ;;  %9380 = vmatpush3.bf16.msra.mxu1 %v9922_v50  ;;  %v14090_v50 = vmov 0 }
 0x1cb   :  { %v866_v7 = vadd.f32 %v865_v5, %v858_v63  ;;  %14075 = vst [vmem:[#allocation45_spill] sm:$0xff] %v11190_v59  ;;  %8535 = vmatprep.subr.bf16.mxu0 %v9926_v53  ;;  %9381 = vmatprep.subr.bf16.mxu1 %v9925_v56  ;;  %v11203_v63 = vadd.s32 8, %v11190_v59  ;;  %v9929_v5 = vld [vmem:[#allocation15 + $0x78] sm:$0xff]  }
 0x1cc   :  { %v880_v9 = vrot.slane %v879_v6, 4 }
 0x1cd   :  { %v867_v11 = vrot.slane %v866_v7, 4 }
 0x1ce   :  { %v881_v13 = vadd.f32 %v880_v9, %v879_v6  ;;  %8536 = vmatpush3.bf16.msra.mxu0 %v9927_v57  ;;  %9382 = vmatpush3.bf16.msra.mxu1 %v9925_v56  ;;  %v13916_v6 = vmov 0.0   ;;  %v9940_v56 = vld [vmem:[#allocation15 + $0x150] sm:$0xff]  }
 0x1cf   :  { %v868_v14 = vadd.f32 %v867_v11, %v866_v7  ;;  %v11206_v7 = vrot.slane %v13916_v6, 7  ;;  %v9930_v11 = vld [vmem:[#allocation15 + $0x38] sm:$0xff]   ;;  %8537 = vmatprep.subr.bf16.mxu0 %v9929_v5  ;;  %v9942_v5 = vld [vmem:[#allocation15 + $0x110] sm:$0xff]   ;;  %v9954_v6 = vld [vmem:[#allocation15 + $0x128] sm:$0xff]  }
 0x1d0   :  { %v882_v10 = vrot.slane %v881_v13, 2 }
 0x1d1   :  { %v869_v22 = vrot.slane %v868_v14, 2 }
 0x1d2   :  { %v883_v24 = vadd.f32 %v882_v10, %v881_v13  ;;  %v13915_v13 = vand.u32 7, %v11190_v59  ;;  %8538 = vmatpush3.bf16.msra.mxu0 %v9930_v11  ;;  %v11338_v11 = vadd.s32 32, %v11190_v59 }
 0x1d3   :  { %v870_v16 = vadd.f32 %v869_v22, %v868_v14  ;;  %v11221_v22 = vsel %vm13945_vm8, 0.0, %v11206_v7 }
 0x1d4   :  { %v884_v19 = vrot.slane %v883_v24, 1  ;;  %14076 = vst [vmem:[#allocation46_spill] sm:$0xff] %v11221_v22  ;;  %vm11225_vm9 = vcmp.ge.s32.totalorder %v13915_v13, 1 }
 0x1d5   :  { %v871_v20 = vrot.slane %v870_v16, 1 }
 0x1d6   :  { %v885_v26 = vadd.f32 %v884_v19, %v883_v24  ;;  %v14077_v24 = vmov 0 }
 0x1d7   :  { %v872_v28 = vadd.f32 %v871_v20, %v870_v16  ;;  %v14078_v24 = vsel %vm11225_vm9, 4294967295, %v14077_v24  ;;  %v14080_v16 = vmov 0 }
 0x1d8   :  { %v887_v29 = vmul.f32 0.015873017, %v885_v26  ;;  %14079 = vst [vmem:[#allocation47_spill] sm:$0xff] %v14078_v24  ;;  %v14084_v26 = vmov 0  ;;  %v14113_v24 = vmov 0 }
 0x1d9   :  { %v886_v30 = vmul.f32 0.015873017, %v872_v28 }
 0x1da   :  { %v889_v31 = vadd.f32 1e-05, %v887_v29  ;;  %v9931_v29 = vld [vmem:[#allocation15 + $0xc0] sm:$0xff]  }
 0x1db   :  { %v888_v32 = vadd.f32 1e-05, %v886_v30  ;;  %v9932_v30 = vld [vmem:[#allocation15 + $0x140] sm:$0xff]  }
 0x1dc   :  { %10175 = vrsqrt.f32 %v889_v31  ;;  %vm899_vm4 = vcmp.eq.f32.partialorder %v889_v31, inf  ;;  %v902_v41 = vand.u32 2147483648, %v889_v31  ;;  %vm901_vm6 = vcmp.eq.f32.partialorder %v889_v31, 0.0  ;;  %8603 = vmatprep.subr.bf16.mxu0 %v9932_v30 }
 0x1dd   :  { %10177 = vrsqrt.f32 %v888_v32  ;;  %vm892_vm5 = vcmp.eq.f32.partialorder %v888_v32, inf  ;;  %v895_v44 = vand.u32 2147483648, %v888_v32  ;;  %vm894_vm7 = vcmp.eq.f32.partialorder %v888_v32, 0.0 }
 0x1e6   :  { %v10176_v37 = vpop.eup %10175 }
 0x1e7   :  { %v10178_v21 = vpop.eup %10177  ;;  %v898_v2 = vmul.f32 %v10176_v37, %v889_v31 }
 0x1e8   :  { %v891_v3 = vmul.f32 %v10178_v21, %v888_v32  ;;  %v11264_v21 = vadd.s32 16, %v11190_v59 }
 0x1e9   :  { %v900_v15 = vsel %vm899_vm4, %v889_v31, %v898_v2  ;;  %v9934_v31 = vld [vmem:[#allocation15 + $0x100] sm:$0xff]   ;;  %v11267_v2 = vadd.s32 24, %v11190_v59 }
 0x1ea   :  { %v893_v25 = vsel %vm892_vm5, %v888_v32, %v891_v3  ;;  %v11173_v40 = vsel %vm901_vm6, %v902_v41, %v900_v15  ;;  %v13913_v15 = vand.u32 7, %v11264_v21  ;;  %vm13991_vm5 = vcmask 1046528  }
 0x1eb   :  { %14073 = vst [vmem:[#allocation43_spill] sm:$0xff] %v11173_v40  ;;  %v11175_v45 = vsel %vm894_vm7, %v895_v44, %v893_v25  ;;  %10179 = vrcp.f32 %v11173_v40  ;;  %v9938_v44 = vld [vmem:[#allocation15 + $0x108] sm:$0xff]   ;;  %v13912_v25 = vand.u32 7, %v11267_v2 }
 0x1ec   :  { %14074 = vst [vmem:[#allocation44_spill] sm:$0xff] %v11175_v45  ;;  %10181 = vrcp.f32 %v11175_v45  ;;  %vm11291_vm12 = vcmp.ge.s32.totalorder %v13913_v15, 1  ;;  %v11417_v15 = vadd.s32 56, %v11190_v59 }
 0x1ed   :  { %v14088_v48 = vsel %vm11291_vm12, 4294967295, %v14087_v48  ;;  %vm11297_vm13 = vcmp.ge.s32.totalorder %v13912_v25, 1 }
 0x1ee   :  { %14089 = vst [vmem:[#allocation51_spill] sm:$0xff] %v14088_v48  ;;  %v14091_v50 = vsel %vm11297_vm13, 4294967295, %v14090_v50  ;;  %vm11312_vm14 = vmpackc.low %vm11297_vm13, %vm11291_vm12  ;;  %v13928_v1 = vand.u32 7, %v11417_v15 }
 0x1ef   :  { %14092 = vst [vmem:[#allocation52_spill] sm:$0xff] %v14091_v50  ;;  %v14095_v51 = vsel %vm11312_vm14, 4294967295, %v14094_v51 }
 0x1f0   :  { %14096 = vst [vmem:[#allocation54_spill] sm:$0xff] %v14095_v51  ;;  %vm11449_vm3 = vcmp.ge.s32.totalorder %v13928_v1, 1  ;;  %v9956_v1 = vld [vmem:[#allocation15 + $0x170] sm:$0xff]  }
 0x1f1   :  { %v14114_v24 = vsel %vm11449_vm3, 4294967295, %v14113_v24 }
 0x1f2   :  { %14115 = vst [vmem:[#allocation63_spill] sm:$0xff] %v14114_v24  ;;  %v9962_v24 = vld [vmem:[#allocation15 + $0x138] sm:$0xff]  }
 0x1f5   :  { %v11185_v54 = vpop.eup %10179 }
 0x1f6   :  { %v11192_v60 = vpop.eup %10181  ;;  %v11196_v61 = vmul.f32 %v11185_v54, %v11094_v0  ;;  %v9928_v0 = vld [vmem:[%s13884_s6 + $0x38] sm:$0xff]   ;;  %v11257_v32 = vmul.f32 %v11185_v54, %v11097_v4  ;;  %v11261_v37 = vmul.f32 %v11185_v54, %v11106_v36  ;;  %v9936_v4 = vld [vmem:[#allocation15 + $0x148] sm:$0xff]   ;;  %v11408_v25 = vmul.f32 %v11185_v54, %v11150_v18  ;;  %s10610_s6 = smov 96  }
 0x1f7   :  { %v11200_v62 = vmul.f32 %v11192_v60, %v11100_v8  ;;  %v13914_v8 = vand.u32 7, %v11203_v63  ;;  %9383 = vmatprep.subr.bf16.mxu1 %v9928_v0  ;;  %v11271_v3 = vmul.f32 %v11192_v60, %v11103_v12  ;;  %v11275_v41 = vmul.f32 %v11192_v60, %v11113_v35  ;;  %v9952_v18 = vld [vmem:[#allocation15 + $0x168] sm:$0xff]  }
 0x1f8   :  { %v1096_v9 = vrot.slane %v11196_v61, 7  ;;  %9384 = vmatpush3.bf16.msra.mxu1 %v9928_v0  ;;  %v1100_v42 = vrot.slane %v11257_v32, 7  ;;  %v1104_v36 = vrot.slane %v11261_v37, 7  ;;  %v11332_v0 = vmul.f32 %v11185_v54, %v11130_v17  ;;  %v9944_v17 = vld [vmem:[#allocation15 + $0x158] sm:$0xff]  }
 0x1f9   :  { %v1094_v14 = vrot.slane %v11200_v62, 7  ;;  %vm11231_vm10 = vcmp.ge.s32.totalorder %v13914_v8, 1  ;;  %8563 = vmatprep.subr.bf16.mxu1 %v9931_v29  ;;  %v1098_v33 = vrot.slane %v11271_v3, 7  ;;  %v1102_v46 = vrot.slane %v11275_v41, 7 }
 0x1fa   :  { %v11217_v10 = vsel %vm13945_vm8, %v11206_v7, %v1096_v9  ;;  %v14081_v16 = vsel %vm11231_vm10, 4294967295, %v14080_v16  ;;  %vm11245_vm11 = vmpackc.low %vm11231_vm10, %vm11225_vm9  ;;  %v11284_v12 = vsel %vm13945_vm8, %v1096_v9, %v1100_v42  ;;  %v11287_v35 = vsel %vm13945_vm8, %v1100_v42, %v1104_v36 }
 0x1fb   :  { %14082 = vst [vmem:[#allocation48_spill] sm:$0xff] %v14081_v16  ;;  %v11237_v19 = vsel %vm13945_vm8, %v11206_v7, %v1094_v14  ;;  %v8082_v20 = vpack.c.bf16 %v11217_v10, %v11221_v22  ;;  %v14085_v26 = vsel %vm11245_vm11, 4294967295, %v14084_v26  ;;  %v11303_v47 = vpack.c.bf16 %v11287_v35, %v11284_v12 }
 0x1fc   :  { %14083 = vst [vmem:[#allocation49_spill] sm:$0xff] %v11237_v19  ;;  %14086 = vst [vmem:[#allocation50_spill] sm:$0xff] %v14085_v26  ;;  %v8085_v28 = vpack.c.bf16 %v11237_v19, %v11221_v22  ;;  %v11306_v23 = vsel %vm13945_vm8, %v1094_v14, %v1098_v33  ;;  %v11317_v53 = vsel %vm13945_vm8, %v1098_v33, %v1102_v46  ;;  %v11341_v14 = vadd.s32 40, %v11190_v59 }
 0x1fd   :  { %8083 = vmatprep.mubr.msk.bf16.mxu0 %vm11245_vm11, %v8082_v20  ;;  %14093 = vst [vmem:[#allocation53_spill] sm:$0xff] %v11306_v23  ;;  %v11324_v57 = vpack.c.bf16 %v11317_v53, %v11306_v23  ;;  %v11328_v9 = vmul.f32 %v11185_v54, %v11120_v39  ;;  %v11345_v20 = vmul.f32 %v11192_v60, %v11125_v43  ;;  %v1112_v29 = vrot.slane %v11332_v0, 7 }
 0x1fe   :  { %8086 = vmatmul.mubr.msk.bf16.vlgmr.msra.gmra.mrb[16].mxu0 %vm11245_vm11, %v8085_v28  ;;  %v11349_v39 = vmul.f32 %v11192_v60, %v11135_v27  ;;  %v13910_v42 = vand.u32 7, %v11341_v14  ;;  %v13927_v13 = vrot.slane %v11408_v25, 7  ;;  %v14119_v26 = vmov 0.0  }
 0x1ff   :  { %8604 = vmatpush3.bf16.msra.mxu0 %v9934_v31  ;;  %8089 = vmatprep.mubr.msk.bf16.mxu0 %vm11312_vm14, %v11303_v47  ;;  %v1108_v28 = vrot.slane %v11328_v9, 7  ;;  %v9946_v31 = vld [vmem:[#allocation15 + $0x118] sm:$0xff]   ;;  %v1106_v43 = vrot.slane %v11345_v20, 7  ;;  %v1195_v22 = vrot.slane %v11257_v32, 1  ;;  %v14126_v19 = vmov 0 }
 0x200   :  { %8605 = vmatprep.subr.bf16.mxu0 %v9936_v4  ;;  %v13911_v4 = vand.u32 7, %v11338_v11  ;;  %v1110_v33 = vrot.slane %v11349_v39, 7  ;;  %vm11373_vm0 = vcmp.ge.s32.totalorder %v13910_v42, 1  ;;  %v9948_v42 = vld [vmem:[#allocation15 + $0x160] sm:$0xff]  }
 0x201   :  { %v11359_v27 = vsel %vm13945_vm8, %v1104_v36, %v1108_v28 }
 0x202   :  { %14097 = vst [vmem:[#allocation55_spill] sm:$0xff] %v11359_v27  ;;  %vm11367_vm15 = vcmp.ge.s32.totalorder %v13911_v4, 1  ;;  %v11393_v30 = vsel %vm13945_vm8, %v1106_v43, %v1110_v33  ;;  %v11404_v4 = vmul.f32 %v11185_v54, %v11140_v38  ;;  %v11425_v38 = vmul.f32 %v11192_v60, %v11155_v52 }
 0x203   :  { %8606 = vmatpush3.bf16.msra.mxu0 %v9938_v44  ;;  %v11362_v44 = vsel %vm13945_vm8, %v1108_v28, %v1112_v29  ;;  %vm11388_vm1 = vmpackc.low %vm11373_vm0, %vm11367_vm15  ;;  %v14105_v28 = vmov 0 }
 0x204   :  { %8607 = vmatprep.subr.bf16.mxu0 %v9940_v56  ;;  %14098 = vst [vmem:[#allocation56_spill] sm:$0xff] %v11362_v44  ;;  %v14099_v56 = vmov 0  ;;  %v11379_v36 = vpack.c.bf16 %v11362_v44, %v11359_v27  ;;  %v14106_v28 = vsel %vm11388_vm1, 4294967295, %v14105_v28  ;;  %v1116_v8 = vrot.slane %v11404_v4, 7 }
 0x205   :  { %v14100_v56 = vsel %vm11367_vm15, 4294967295, %v14099_v56  ;;  %14107 = vst [vmem:[#allocation59_spill] sm:$0xff] %v14106_v28  ;;  %v14125_v44 = vand.u32 7, %v11203_v63  ;;  %v14169_v27 = vmov 0 }
 0x206   :  { %8092 = vmatmul.mubr.msk.bf16.gmra.mrb[20].mxu0 %vm11312_vm14, %v11324_v57  ;;  %14101 = vst [vmem:[#allocation57_spill] sm:$0xff] %v14100_v56  ;;  %v11434_v45 = vsel %vm13945_vm8, %v1112_v29, %v1116_v8  ;;  %v11439_v52 = vsel %vm13945_vm8, %v1116_v8, %v13927_v13  ;;  %v14116_v8 = vmov 0  ;;  %v1201_v56 = vrot.slane %v11345_v20, 1 }
 0x207   :  { %8608 = vmatpush3.bf16.msra.mxu0 %v9942_v5  ;;  %v14102_v5 = vmov 0  ;;  %8095 = vmatprep.mubr.msk.bf16.mxu0 %vm11388_vm1, %v11379_v36  ;;  %14108 = vst [vmem:[#allocation60_spill] sm:$0xff] %v11434_v45  ;;  %14109 = vst [vmem:[#allocation61_spill] sm:$0xff] %v11439_v52  ;;  %v11455_v29 = vpack.c.bf16 %v11439_v52, %v11434_v45  ;;  %v1189_v52 = vrot.slane %v11200_v62, 1  ;;  %v14122_v45 = vmov 0 }
 0x208   :  { %8609 = vmatprep.subr.bf16.mxu0 %v9944_v17  ;;  %v14103_v5 = vsel %vm11373_vm0, 4294967295, %v14102_v5  ;;  %v11382_v17 = vsel %vm13945_vm8, %v1102_v46, %v1106_v43  ;;  %v11414_v43 = vadd.s32 48, %v11190_v59  ;;  %vm11503_vm7 = vcmp.le.s32.totalorder %v14125_v44, 6  ;;  %v9964_v44 = vld [vmem:[#allocation15 + $0x240] sm:$0xff]  }
 0x209   :  { %14104 = vst [vmem:[#allocation58_spill] sm:$0xff] %v14103_v5  ;;  %v11400_v46 = vpack.c.bf16 %v11393_v30, %v11382_v17  ;;  %v14121_v5 = vand.u32 7, %v11190_v59  ;;  %v14127_v19 = vsel %vm11503_vm7, 4294967295, %v14126_v19 }
 0x20a   :  { %v13929_v34 = vand.u32 7, %v11414_v43  ;;  %14128 = vst [vmem:[#allocation67_spill] sm:$0xff] %v14127_v19  ;;  %v1203_v19 = vrot.slane %v11328_v9, 1 }
 0x20b   :  { %8610 = vmatpush3.bf16.msra.mxu0 %v9946_v31  ;;  %v9950_v31 = vld [vmem:[#allocation15 + $0x120] sm:$0xff]   ;;  %vm11497_vm6 = vcmp.le.s32.totalorder %v14121_v5, 6  ;;  %v14129_v5 = vmov 0 }
 0x20c   :  { %8611 = vmatprep.subr.bf16.mxu0 %v9948_v42  ;;  %v11421_v42 = vmul.f32 %v11192_v60, %v11145_v49  ;;  %v13931_v49 = vrot.slane %v11425_v38, 7  ;;  %vm11443_vm2 = vcmp.ge.s32.totalorder %v13929_v34, 1  ;;  %v9960_v34 = vld [vmem:[#allocation15 + $0x178] sm:$0xff]   ;;  %v14123_v45 = vsel %vm11497_vm6, 4294967295, %v14122_v45 }
 0x20d   :  { %vm11464_vm4 = vmpackc.low %vm11449_vm3, %vm11443_vm2  ;;  %14124 = vst [vmem:[#allocation66_spill] sm:$0xff] %v14123_v45  ;;  %v1199_v45 = vrot.slane %v11261_v37, 1 }
 0x20e   :  { %8098 = vmatmul.mubr.msk.bf16.gmra.mrb[24].mxu0 %vm11388_vm1, %v11400_v46  ;;  %v1114_v40 = vrot.slane %v11421_v42, 7  ;;  %v14117_v8 = vsel %vm11464_vm4, 4294967295, %v14116_v8 }
 0x20f   :  { %8612 = vmatpush3.bf16.msra.mxu0 %v9950_v31  ;;  %v14110_v31 = vmov 0  ;;  %14118 = vst [vmem:[#allocation64_spill] sm:$0xff] %v14117_v8  ;;  %8101 = vmatprep.mubr.msk.bf16.mxu0 %vm11464_vm4, %v11455_v29 }
 0x210   :  { %8613 = vmatprep.subr.bf16.mxu0 %v9952_v18  ;;  %v14111_v31 = vsel %vm11443_vm2, 4294967295, %v14110_v31  ;;  %v11458_v18 = vsel %vm13945_vm8, %v1110_v33, %v1114_v40  ;;  %v11471_v13 = vsel %vm13945_vm8, %v1114_v40, %v13931_v49  ;;  %v9958_v33 = vld [vmem:[#allocation15 + $0x130] sm:$0xff]   ;;  %v11484_v40 = vrot.slane %v14119_v26, 1  ;;  %vm11514_vm8 = vmpackc.low %vm11503_vm7, %vm11497_vm6 }
 0x211   :  { %14112 = vst [vmem:[#allocation62_spill] sm:$0xff] %v14111_v31  ;;  %v1191_v49 = vrot.slane %v11196_v61, 1  ;;  %v1193_v31 = vrot.slane %v11271_v3, 1  ;;  %v14130_v5 = vsel %vm11514_vm8, 4294967295, %v14129_v5 }
 0x212   :  { %v1190_v23 = vsel %vm13991_vm5, %v11484_v40, %v1189_v52  ;;  %14131 = vst [vmem:[#allocation68_spill] sm:$0xff] %v14130_v5  ;;  %v14140_v5 = vmov 0 }
 0x213   :  { %8614 = vmatpush3.bf16.msra.mxu0 %v9954_v6  ;;  %v11478_v6 = vpack.c.bf16 %v11471_v13, %v11458_v18  ;;  %v11519_v63 = vsel %vm13991_vm5, %v1189_v52, %v1193_v31  ;;  %v1197_v52 = vrot.slane %v11275_v41, 1 }
 0x214   :  { %8615 = vmatprep.subr.bf16.mxu0 %v9956_v1  ;;  %v1192_v1 = vsel %vm13991_vm5, %v11484_v40, %v1191_v49  ;;  %14132 = vst [vmem:[#allocation69_spill] sm:$0xff] %v11519_v63 }
 0x216   :  { %8104 = vmatmul.mubr.msk.bf16.gmra.mrb[28].mxu0 %vm11464_vm4, %v11478_v6 }
 0x217   :  { %8616 = vmatpush3.bf16.msra.mxu0 %v9958_v33  ;;  %v11493_v33 = vsel %vm13991_vm5, %v1191_v49, %v1195_v22  ;;  %v8109_v49 = vpack.c.bf16 %v11519_v63, %v1190_v23  ;;  %v11534_v23 = vsel %vm13991_vm5, %v1199_v45, %v1203_v19  ;;  %v14153_v63 = vand.u32 7, %v11341_v14 }
 0x218   :  { %8617 = vmatprep.subr.bf16.mxu0 %v9960_v34  ;;  %14120 = vst [vmem:[#allocation65_spill] sm:$0xff] %v11493_v33  ;;  %v8106_v34 = vpack.c.bf16 %v11493_v33, %v1192_v1  ;;  %v9966_v1 = vld [vmem:[#allocation15 + $0x200] sm:$0xff]   ;;  %v9970_v33 = vld [vmem:[#allocation15 + $0x208] sm:$0xff]   ;;  %14134 = vst [vmem:[#allocation71_spill] sm:$0xff] %v11534_v23 }
 0x21a   :  { %8107 = vmatprep.mubr.msk.bf16.mxu0 %vm11514_vm8, %v8106_v34  ;;  %v11531_v34 = vsel %vm13991_vm5, %v1195_v22, %v1199_v45  ;;  %v11553_v22 = vsel %vm13991_vm5, %v1193_v31, %v1197_v52  ;;  %v10131_v45 = vld [vmem:[%s14325_s20 + $0x20] sm:$0xff]  }
 0x21b   :  { %8618 = vmatpush3.bf16.msra.mxu0 %v9962_v24  ;;  %v9968_v24 = vld [vmem:[#allocation15 + $0x248] sm:$0xff]   ;;  %14133 = vst [vmem:[#allocation70_spill] sm:$0xff] %v11531_v34  ;;  %14143 = vst [vmem:[#allocation74_spill] sm:$0xff] %v11553_v22 }
 0x21c   :  { %8683 = vmatprep.subr.bf16.mxu0 %v9964_v44  ;;  %v14135_v44 = vand.u32 7, %v11264_v21  ;;  %v11564_v21 = vsel %vm13991_vm5, %v1197_v52, %v1201_v56  ;;  %v9976_v52 = vld [vmem:[#allocation15 + $0x258] sm:$0xff]  }
 0x21d   :  { %14146 = vst [vmem:[#allocation75_spill] sm:$0xff] %v11564_v21  ;;  %v11571_v31 = vpack.c.bf16 %v11564_v21, %v11553_v22  ;;  %v14154_v22 = vmov 0  ;;  %v10054_v21 = vld [vmem:[#allocation15 + $0x430] sm:$0xff]  }
 0x21e   :  { %8110 = vmatmul.mubr.msk.bf16.vlgmr.msra.gmra.mrb[32].mxu0 %vm11514_vm8, %v8109_v49  ;;  %vm11538_vm6 = vcmp.le.s32.totalorder %v14135_v44, 6  ;;  %v14136_v49 = vmov 0  ;;  %v14149_v44 = vand.u32 7, %v11338_v11  ;;  %v14158_v11 = vmov 0 }
 0x21f   :  { %8684 = vmatpush3.bf16.msra.mxu0 %v9966_v1  ;;  %v14137_v49 = vsel %vm11538_vm6, 4294967295, %v14136_v49  ;;  %v14139_v1 = vand.u32 7, %v11267_v2  ;;  %v9972_v2 = vld [vmem:[#allocation15 + $0x250] sm:$0xff]  }
 0x220   :  { %8685 = vmatprep.subr.bf16.mxu0 %v9968_v24  ;;  %14138 = vst [vmem:[#allocation72_spill] sm:$0xff] %v14137_v49  ;;  %v11550_v24 = vpack.c.bf16 %v11534_v23, %v11531_v34  ;;  %v9978_v23 = vld [vmem:[#allocation15 + $0x218] sm:$0xff]   ;;  %v1205_v49 = vrot.slane %v11349_v39, 1  ;;  %v1209_v34 = vrot.slane %v11421_v42, 1  ;;  %vm11590_vm11 = vcmp.le.s32.totalorder %v14149_v44, 6 }
 0x221   :  { %vm11544_vm9 = vcmp.le.s32.totalorder %v14139_v1, 6  ;;  %v1207_v1 = vrot.slane %v11332_v0, 1  ;;  %v11627_v44 = vmul.f32 %v11185_v54, %v11160_v55 }
 0x222   :  { %v14141_v5 = vsel %vm11544_vm9, 4294967295, %v14140_v5  ;;  %vm11559_vm8 = vmpackc.low %vm11544_vm9, %vm11538_vm6  ;;  %vm11596_vm9 = vcmp.le.s32.totalorder %v14153_v63, 6  ;;  %v11616_v14 = vsel %vm13991_vm5, %v1205_v49, %v1209_v34  ;;  %v9980_v63 = vld [vmem:[#allocation15 + $0x260] sm:$0xff]  }
 0x223   :  { %14142 = vst [vmem:[#allocation73_spill] sm:$0xff] %v14141_v5  ;;  %8686 = vmatpush3.bf16.msra.mxu0 %v9970_v33  ;;  %8113 = vmatprep.mubr.msk.bf16.mxu0 %vm11559_vm8, %v11550_v24  ;;  %v9974_v33 = vld [vmem:[#allocation15 + $0x210] sm:$0xff]   ;;  %v1211_v5 = vrot.slane %v11404_v4, 1  ;;  %v14155_v22 = vsel %vm11596_vm9, 4294967295, %v14154_v22  ;;  %vm11611_vm6 = vmpackc.low %vm11596_vm9, %vm11590_vm11 }
 0x224   :  { %8687 = vmatprep.subr.bf16.mxu0 %v9972_v2  ;;  %v11583_v2 = vsel %vm13991_vm5, %v1203_v19, %v1207_v1  ;;  %14156 = vst [vmem:[#allocation79_spill] sm:$0xff] %v14155_v22  ;;  %v11605_v19 = vsel %vm13991_vm5, %v1201_v56, %v1205_v49  ;;  %v14159_v11 = vsel %vm11611_vm6, 4294967295, %v14158_v11  ;;  %14161 = vst [vmem:[#allocation82_spill] sm:$0xff] %v11616_v14  ;;  %v1215_v22 = vrot.slane %v11408_v25, 1 }
 0x225   :  { %14147 = vst [vmem:[#allocation76_spill] sm:$0xff] %v11583_v2  ;;  %v11586_v50 = vsel %vm13991_vm5, %v1207_v1, %v1211_v5  ;;  %14157 = vst [vmem:[#allocation80_spill] sm:$0xff] %v11605_v19  ;;  %v11623_v56 = vpack.c.bf16 %v11616_v14, %v11605_v19  ;;  %v11634_v49 = vmul.f32 %v11192_v60, %v11165_v58  ;;  %v9984_v1 = vld [vmem:[#allocation15 + $0x268] sm:$0xff]   ;;  %v14164_v60 = vand.u32 7, %v11414_v43 }
 0x226   :  { %8116 = vmatmul.mubr.msk.bf16.gmra.mrb[36].mxu0 %vm11559_vm8, %v11571_v31  ;;  %14148 = vst [vmem:[#allocation77_spill] sm:$0xff] %v11586_v50  ;;  %14160 = vst [vmem:[#allocation81_spill] sm:$0xff] %v14159_v11  ;;  %v11641_v54 = vsel %vm13991_vm5, %v1211_v5, %v1215_v22  ;;  %v14173_v43 = vmov 0 }
 0x227   :  { %8688 = vmatpush3.bf16.msra.mxu0 %v9974_v33  ;;  %v14150_v33 = vmov 0  ;;  %14162 = vst [vmem:[#allocation83_spill] sm:$0xff] %v11634_v49  ;;  %v13985_v55 = vrot.slane %v11634_v49, 1  ;;  %vm11650_vm9 = vcmp.le.s32.totalorder %v14164_v60, 6  ;;  %v9994_v60 = vld [vmem:[#allocation15 + $0x238] sm:$0xff]  }
 0x228   :  { %8689 = vmatprep.subr.bf16.mxu0 %v9976_v52  ;;  %v14151_v33 = vsel %vm11590_vm11, 4294967295, %v14150_v33  ;;  %v11602_v52 = vpack.c.bf16 %v11586_v50, %v11583_v2  ;;  %v13984_v50 = vrot.slane %v11627_v44, 1  ;;  %v14168_v2 = vand.u32 7, %v11417_v15 }
 0x229   :  { %14152 = vst [vmem:[#allocation78_spill] sm:$0xff] %v14151_v33  ;;  %v9986_v33 = vld [vmem:[#allocation15 + $0x228] sm:$0xff]  }
 0x22a   :  { %8119 = vmatprep.mubr.msk.bf16.mxu0 %vm11611_vm6, %v11602_v52  ;;  %v11646_v58 = vsel %vm13991_vm5, %v1215_v22, %v13984_v50  ;;  %vm11656_vm11 = vcmp.le.s32.totalorder %v14168_v2, 6  ;;  %v9988_v22 = vld [vmem:[#allocation15 + $0x270] sm:$0xff]   ;;  %v1314_v50 = vpack.c.bf16 %v11271_v3, %v11200_v62 }
 0x22b   :  { %8690 = vmatpush3.bf16.msra.mxu0 %v9978_v23  ;;  %v9982_v23 = vld [vmem:[#allocation15 + $0x220] sm:$0xff]   ;;  %14163 = vst [vmem:[#allocation84_spill] sm:$0xff] %v11646_v58  ;;  %v14170_v27 = vsel %vm11656_vm11, 4294967295, %v14169_v27  ;;  %v11662_v5 = vpack.c.bf16 %v11646_v58, %v11641_v54  ;;  %vm11671_vm7 = vmpackc.low %vm11656_vm11, %vm11650_vm9  ;;  %v9990_v2 = vld [vmem:[#allocation15 + $0x230] sm:$0xff]   ;;  %vm14194_vm11 = vcmask 1040384  }
 0x22c   :  { %8691 = vmatprep.subr.bf16.mxu0 %v9980_v63  ;;  %v1213_v63 = vrot.slane %v11425_v38, 1  ;;  %14171 = vst [vmem:[#allocation86_spill] sm:$0xff] %v14170_v27  ;;  %v14174_v43 = vsel %vm11671_vm7, 4294967295, %v14173_v43  ;;  %v9998_v27 = vld [vmem:[#allocation15 + $0x300] sm:$0xff]   ;;  %v10002_v58 = vld [vmem:[#allocation15 + $0x308] sm:$0xff]  }
 0x22d   :  { %14175 = vst [vmem:[#allocation88_spill] sm:$0xff] %v14174_v43 }
 0x22e   :  { %8122 = vmatmul.mubr.msk.bf16.gmra.mrb[40].mxu0 %vm11611_vm6, %v11623_v56  ;;  %v11678_v15 = vsel %vm13991_vm5, %v1213_v63, %v13985_v55  ;;  %v9996_v55 = vld [vmem:[#allocation15 + $0x340] sm:$0xff]  }
 0x22f   :  { %8692 = vmatpush3.bf16.msra.mxu0 %v9982_v23  ;;  %v14165_v23 = vmov 0  ;;  %8125 = vmatprep.mubr.msk.bf16.mxu0 %vm11671_vm7, %v11662_v5 }
 0x230   :  { %8693 = vmatprep.subr.bf16.mxu0 %v9984_v1  ;;  %v14166_v23 = vsel %vm11650_vm9, 4294967295, %v14165_v23  ;;  %v11665_v1 = vsel %vm13991_vm5, %v1209_v34, %v1213_v63  ;;  %v1315_v63 = vpack.c.bf16 %v11257_v32, %v11196_v61  ;;  %vm14177_vm5 = vcmask 1040384  }
 0x231   :  { %14167 = vst [vmem:[#allocation85_spill] sm:$0xff] %v14166_v23  ;;  %14172 = vst [vmem:[#allocation87_spill] sm:$0xff] %v11665_v1  ;;  %v11685_v34 = vpack.c.bf16 %v11678_v15, %v11665_v1  ;;  %v10004_v23 = vld [vmem:[#allocation15 + $0x350] sm:$0xff]  }
 0x233   :  { %8694 = vmatpush3.bf16.msra.mxu0 %v9986_v33  ;;  %v9992_v33 = vld [vmem:[#allocation15 + $0x278] sm:$0xff]  }
 0x234   :  { %8695 = vmatprep.subr.bf16.mxu0 %v9988_v22  ;;  %v10000_v22 = vld [vmem:[#allocation15 + $0x348] sm:$0xff]  }
 0x236   :  { %8128 = vmatmul.mubr.msk.bf16.gmra.mrb[44].mxu0 %vm11671_vm7, %v11685_v34 }
 0x237   :  { %8696 = vmatpush3.bf16.msra.mxu0 %v9990_v2  ;;  %2787 = vmatprep.mubr.bf16.mxu0 %v1315_v63  ;;  %v1317_v2 = vpack.c.bf16 %v11328_v9, %v11261_v37  ;;  %v10006_v63 = vld [vmem:[#allocation15 + $0x310] sm:$0xff]  }
 0x238   :  { %8697 = vmatprep.subr.bf16.mxu0 %v9992_v33  ;;  %v10012_v33 = vld [vmem:[#allocation15 + $0x360] sm:$0xff]  }
 0x23b   :  { %8698 = vmatpush3.bf16.msra.mxu0 %v9994_v60  ;;  %v1316_v60 = vpack.c.bf16 %v11345_v20, %v11275_v41 }
 0x23c   :  { %8763 = vmatprep.subr.bf16.mxu0 %v9996_v55  ;;  %v1319_v55 = vpack.c.bf16 %v11404_v4, %v11332_v0 }
 0x23e   :  { %2788 = vmatmul.mubr.bf16.vlgmr.msra.gmra.mrb[48].mxu0 %v1314_v50  ;;  %v10008_v50 = vld [vmem:[#allocation15 + $0x358] sm:$0xff]  }
 0x23f   :  { %8764 = vmatpush3.bf16.msra.mxu0 %v9998_v27  ;;  %2795 = vmatprep.mubr.bf16.mxu0 %v1317_v2  ;;  %v10010_v27 = vld [vmem:[#allocation15 + $0x318] sm:$0xff]   ;;  %v10014_v2 = vld [vmem:[#allocation15 + $0x320] sm:$0xff]  }
 0x240   :  { %8765 = vmatprep.subr.bf16.mxu0 %v10000_v22  ;;  %v1318_v22 = vpack.c.bf16 %v11421_v42, %v11349_v39 }
 0x243   :  { %8766 = vmatpush3.bf16.msra.mxu0 %v10002_v58 }
 0x244   :  { %8767 = vmatprep.subr.bf16.mxu0 %v10004_v23  ;;  %v10016_v23 = vld [vmem:[#allocation15 + $0x368] sm:$0xff]  }
 0x246   :  { %2796 = vmatmul.mubr.bf16.gmra.mrb[52].mxu0 %v1316_v60  ;;  %v10018_v60 = vld [vmem:[#allocation15 + $0x328] sm:$0xff]  }
 0x247   :  { %8768 = vmatpush3.bf16.msra.mxu0 %v10006_v63  ;;  %2803 = vmatprep.mubr.bf16.mxu0 %v1319_v55  ;;  %v13992_v63 = vrot.slane %v11634_v49, 7  ;;  %v10020_v55 = vld [vmem:[#allocation15 + $0x370] sm:$0xff]  }
 0x248   :  { %8769 = vmatprep.subr.bf16.mxu0 %v10008_v50  ;;  %v1321_v50 = vpack.c.bf16 %v11627_v44, %v11408_v25 }
 0x24b   :  { %8770 = vmatpush3.bf16.msra.mxu0 %v10010_v27  ;;  %v14176_v27 = vrot.slane %v11425_v38, 7 }
 0x24c   :  { %8771 = vmatprep.subr.bf16.mxu0 %v10012_v33  ;;  %v1320_v33 = vpack.c.bf16 %v11634_v49, %v11425_v38 }
 0x24d   :  { %v11714_v58 = vsel %vm14177_vm5, %v14176_v27, %v13992_v63  ;;  %v10028_v27 = vld [vmem:[#allocation15 + $0x440] sm:$0xff]  }
 0x24e   :  { %2804 = vmatmul.mubr.bf16.gmra.mrb[56].mxu0 %v1318_v22  ;;  %v10030_v63 = vld [vmem:[#allocation15 + $0x400] sm:$0xff]   ;;  %v1124_v22 = vrot.slane %v11627_v44, 7 }
 0x24f   :  { %8772 = vmatpush3.bf16.msra.mxu0 %v10014_v2  ;;  %2811 = vmatprep.mubr.bf16.mxu0 %v1321_v50  ;;  %v10022_v2 = vld [vmem:[#allocation15 + $0x330] sm:$0xff]   ;;  %v10032_v50 = vld [vmem:[#allocation15 + $0x448] sm:$0xff]  }
 0x250   :  { %8773 = vmatprep.subr.bf16.mxu0 %v10016_v23  ;;  %v10024_v23 = vld [vmem:[#allocation15 + $0x378] sm:$0xff]  }
 0x253   :  { %8774 = vmatpush3.bf16.msra.mxu0 %v10018_v60  ;;  %v10026_v60 = vld [vmem:[#allocation15 + $0x338] sm:$0xff]  }
 0x254   :  { %8775 = vmatprep.subr.bf16.mxu0 %v10020_v55  ;;  %v10036_v55 = vld [vmem:[#allocation15 + $0x450] sm:$0xff]  }
 0x256   :  { %2812 = vmatmul.mubr.bf16.gmra.mrb[60].mxu0 %v1320_v33  ;;  %v10034_v33 = vld [vmem:[#allocation15 + $0x408] sm:$0xff]  }
 0x257   :  { %8776 = vmatpush3.bf16.msra.mxu0 %v10022_v2  ;;  %8179 = vmatprep.mubr.msk.bf16.mxu0 %vm11312_vm14, %v11303_v47  ;;  %v10038_v2 = vld [vmem:[#allocation15 + $0x410] sm:$0xff]  }
 0x258   :  { %8777 = vmatprep.subr.bf16.mxu0 %v10024_v23 }
 0x25b   :  { %8778 = vmatpush3.bf16.msra.mxu0 %v10026_v60 }
 0x25c   :  { %8843 = vmatprep.subr.bf16.mxu0 %v10028_v27  ;;  %v11740_v27 = vld [vmem:[#allocation12] ss:$0 sm:$0xff] }
 0x25e   :  { %8182 = vmatmul.mubr.msk.bf16.vlgmr.msra.gmra.mrb[64].mxu0 %vm11312_vm14, %v11324_v57  ;;  %v10040_v57 = vld [vmem:[#allocation15 + $0x458] sm:$0xff]  }
 0x25f   :  { %8844 = vmatpush3.bf16.msra.mxu0 %v10030_v63  ;;  %8185 = vmatprep.mubr.msk.bf16.mxu0 %vm11388_vm1, %v11379_v36  ;;  %v10042_v36 = vld [vmem:[#allocation15 + $0x418] sm:$0xff]   ;;  %v11738_v63 = vadd.s32 64, %v11190_v59 }
 0x260   :  { %8845 = vmatprep.subr.bf16.mxu0 %v10032_v50  ;;  %v10050_v50 = vld [vmem:[#allocation15 + $0x428] sm:$0xff]  }
 0x261   :  { %v14178_v51 = vand.u32 7, %v11738_v63 }
 0x263   :  { %8846 = vmatpush3.bf16.msra.mxu0 %v10034_v33  ;;  %vm11757_vm5 = vcmp.ge.s32.totalorder %v14178_v51, 1 }
 0x264   :  { %8847 = vmatprep.subr.bf16.mxu0 %v10036_v55 }
 0x266   :  { %8188 = vmatmul.mubr.msk.bf16.gmra.mrb[68].mxu0 %vm11388_vm1, %v11400_v46  ;;  %v10044_v46 = vld [vmem:[#allocation15 + $0x460] sm:$0xff]   ;;  %vm14183_vm1 = vcmask 1040384  }
 0x267   :  { %8848 = vmatpush3.bf16.msra.mxu0 %v10038_v2  ;;  %8191 = vmatprep.mubr.msk.bf16.mxu0 %vm11464_vm4, %v11455_v29  ;;  %v10046_v2 = vld [vmem:[#allocation15 + $0x420] sm:$0xff]  }
 0x268   :  { %8849 = vmatprep.subr.bf16.mxu0 %v10040_v57 }
 0x26b   :  { %8850 = vmatpush3.bf16.msra.mxu0 %v10042_v36  ;;  %v11751_v36 = vadd.s32 72, %v11190_v59  ;;  %v14185_v59 = vmov 0 }
 0x26c   :  { %8851 = vmatprep.subr.bf16.mxu0 %v10044_v46  ;;  %v14182_v46 = vrot.slane %v11408_v25, 7 }
 0x26d   :  { %v14009_v29 = vand.u32 7, %v11751_v36 }
 0x26e   :  { %8194 = vmatmul.mubr.msk.bf16.gmra.mrb[72].mxu0 %vm11464_vm4, %v11478_v6  ;;  %v11764_v6 = vsel %vm14183_vm1, %v14182_v46, %v1124_v22  ;;  %vm14184_vm4 = vmmov %vm14183_vm1 }
 0x26f   :  { %8852 = vmatpush3.bf16.msra.mxu0 %v10046_v2  ;;  %vm11770_vm14 = vcmp.ge.s32.totalorder %v14009_v29, 1 }
 0x270   :  { %v14186_v59 = vsel %vm11770_vm14, 4294967295, %v14185_v59  ;;  %vm11779_vm1 = vmpackc.low %vm11770_vm14, %vm11757_vm5 }
 0x271   :  { %14187 = vst [vmem:[#allocation90_spill] sm:$0xff] %v14186_v59 }
 0x272   :  { %v8487_v23 = vpop.f32.mrb[0].mxu0 }
 0x273   :  { %v8488_v60 = vpop.f32.mrb[1].mxu0 }
 0x274   :  { %v8489_v33 = vadd.f32 %v8488_v60, %v8487_v23  ;;  %v8490_v55 = vpop.f32.mrb[2].mxu0  ;;  %v10048_v23 = vld [vmem:[#allocation15 + $0x468] sm:$0xff]  }
 0x275   :  { %v8491_v47 = vpop.f32.mrb[3].mxu0  ;;  %8853 = vmatprep.subr.bf16.mxu0 %v10048_v23  ;;  %v14188_v23 = vmov 0 }
 0x276   :  { %v8492_v28 = vadd.f32 %v8491_v47, %v8490_v55  ;;  %v606_v57 = vadd.f32 %v8489_v33, %v11740_v27  ;;  %v14179_v47 = vmov 0  ;;  %v1127_v33 = vsel %vm14184_vm4, %v1124_v22, %v11206_v7  ;;  %8854 = vmatpush3.bf16.msra.mxu0 %v10050_v50  ;;  %v10052_v50 = vld [vmem:[#allocation15 + $0x470] sm:$0xff]  }
 0x277   :  { %v14180_v47 = vsel %vm11757_vm5, 4294967295, %v14179_v47  ;;  %v8196_v51 = vpack.c.bf16 %v1127_v33, %v11764_v6  ;;  %v14189_v23 = vsel %vm11779_vm1, 4294967295, %v14188_v23  ;;  %v14191_v22 = vrot.slane %v11634_v49, 1  ;;  %8855 = vmatprep.subr.bf16.mxu0 %v10052_v50 }
 0x278   :  { %v609_v60 = vadd.f32 %v8492_v28, %v11740_v27  ;;  %14181 = vst [vmem:[#allocation89_spill] sm:$0xff] %v14180_v47  ;;  %v636_v28 = vmax.f32 %v606_v57, 0.0  ;;  %14190 = vst [vmem:[#allocation91_spill] sm:$0xff] %v14189_v23  ;;  %vm14192_vm4 = vcmask 1046528  }
 0x279   :  { %v11787_v57 = vsel %vm14192_vm4, %v14191_v22, %v11484_v40  ;;  %8197 = vmatprep.mubr.msk.bf16.mxu0 %vm11779_vm1, %v8196_v51 }
 0x27a   :  { %v8493_v55 = vpop.f32.mrb[4].mxu0  ;;  %v637_v2 = vmax.f32 %v609_v60, 0.0  ;;  %v14193_v60 = vrot.slane %v11634_v49, 7  ;;  %8856 = vmatpush3.bf16.msra.mxu0 %v10054_v21 }
 0x27b   :  { %v8494_v8 = vpop.f32.mrb[5].mxu0 }
 0x27c   :  { %v1126_v46 = vsel %vm14194_vm11, %v14193_v60, %v11206_v7  ;;  %v8495_v33 = vadd.f32 %v8494_v8, %v8493_v55  ;;  %v8496_v29 = vpop.f32.mrb[6].mxu0  ;;  %v644_v14 = vpack.c.bf16 %v637_v2, %v636_v28  ;;  %v10056_v8 = vld [vmem:[#allocation15 + $0x478] sm:$0xff]  }
 0x27d   :  { %v8199_v1 = vpack.c.bf16 %v1126_v46, %v11714_v58  ;;  %v8497_v22 = vpop.f32.mrb[7].mxu0  ;;  %v10058_v28 = vld [vmem:[#allocation15 + $0x438] sm:$0xff]   ;;  %8857 = vmatprep.subr.bf16.mxu0 %v10056_v8  ;;  %v9933_v46 = vld [vmem:[#allocation15 + $0x80] sm:$0xff]   ;;  %v9939_v8 = vld [vmem:[#allocation15 + $0xd0] sm:$0xff]  }
 0x27e   :  { %v614_v19 = vadd.f32 %v8495_v33, %v11740_v27  ;;  %v8498_v49 = vadd.f32 %v8497_v22, %v8496_v29  ;;  %9385 = vmatprep.mubr.bf16.mxu1 %v644_v14  ;;  %8858 = vmatpush3.bf16.msra.mxu0 %v10058_v28 }
 0x27f   :  { %8200 = vmatmul.mubr.msk.bf16.gmra.mrb[76].mxu0 %vm11779_vm1, %v8199_v1  ;;  %v9935_v1 = vld [vmem:[#allocation15 + $0xc8] sm:$0xff]   ;;  %vm14204_vm1 = vmmov %vm14192_vm4 }
 0x280   :  { %8203 = vmatprep.mubr.msk.bf16.mxu0 %vm11559_vm8, %v11550_v24  ;;  %v617_v55 = vadd.f32 %v8498_v49, %v11740_v27  ;;  %v638_v2 = vmax.f32 %v614_v19, 0.0  ;;  %v9937_v24 = vld [vmem:[#allocation15 + $0x88] sm:$0xff]  }
 0x282   :  { %v639_v51 = vmax.f32 %v617_v55, 0.0  ;;  %v8499_v60 = vpop.f32.mrb[8].mxu0 }
 0x283   :  { %v8500_v50 = vpop.f32.mrb[9].mxu0 }
 0x284   :  { %v645_v14 = vpack.c.bf16 %v639_v51, %v638_v2  ;;  %v8501_v29 = vadd.f32 %v8500_v50, %v8499_v60  ;;  %v8502_v33 = vpop.f32.mrb[10].mxu0  ;;  %v9941_v51 = vld [vmem:[#allocation15 + $0x90] sm:$0xff]  }
 0x285   :  { %v8503_v21 = vpop.f32.mrb[11].mxu0 }
 0x286   :  { %9386 = vmatmul.mubr.bf16.vlgmr.msra.gmra.mrb[0].mxu1 %v645_v14  ;;  %v622_v22 = vadd.f32 %v8501_v29, %v11740_v27  ;;  %v8504_v59 = vadd.f32 %v8503_v21, %v8502_v33  ;;  %v9947_v21 = vld [vmem:[#allocation15 + $0xe0] sm:$0xff]  }
 0x287   :  { %8206 = vmatmul.mubr.msk.bf16.vlgmr.msra.gmra.mrb[80].mxu0 %vm11559_vm8, %v11571_v31  ;;  %8564 = vmatpush3.bf16.msra.mxu1 %v9933_v46  ;;  %v9943_v31 = vld [vmem:[#allocation15 + $0xd8] sm:$0xff]  }
 0x288   :  { %8209 = vmatprep.mubr.msk.bf16.mxu0 %vm11611_vm6, %v11602_v52  ;;  %v640_v19 = vmax.f32 %v622_v22, 0.0  ;;  %8565 = vmatprep.subr.bf16.mxu1 %v9935_v1  ;;  %v625_v49 = vadd.f32 %v8504_v59, %v11740_v27  ;;  %v9945_v59 = vld [vmem:[#allocation15 + $0x98] sm:$0xff]  }
 0x28a   :  { %v641_v55 = vmax.f32 %v625_v49, 0.0  ;;  %v8505_v28 = vpop.f32.mrb[12].mxu0 }
 0x28b   :  { %8566 = vmatpush3.bf16.msra.mxu1 %v9937_v24  ;;  %v8506_v2 = vpop.f32.mrb[13].mxu0  ;;  %v9949_v24 = vld [vmem:[#allocation15 + $0xa0] sm:$0xff]  }
 0x28c   :  { %v8507_v60 = vadd.f32 %v8506_v2, %v8505_v28  ;;  %8567 = vmatprep.subr.bf16.mxu1 %v9939_v8  ;;  %v8508_v50 = vpop.f32.mrb[14].mxu0  ;;  %v646_v46 = vpack.c.bf16 %v641_v55, %v640_v19  ;;  %v1291_v19 = vpack.c.bf16 %v11196_v61, %v14119_v26  ;;  %v14196_v8 = vmov 0 }
 0x28d   :  { %v8509_v14 = vpop.f32.mrb[15].mxu0  ;;  %v14199_v61 = vrot.slane %v11627_v44, 1  ;;  %v14200_v28 = vand.u32 7, %v11751_v36  ;;  %v14201_v2 = vmov 0 }
 0x28e   :  { %v630_v29 = vadd.f32 %v8507_v60, %v11740_v27  ;;  %v8510_v33 = vadd.f32 %v8509_v14, %v8508_v50  ;;  %9389 = vmatprep.mubr.bf16.mxu1 %v646_v46  ;;  %v9957_v60 = vld [vmem:[#allocation15 + $0xb0] sm:$0xff]   ;;  %v9961_v46 = vld [vmem:[#allocation15 + $0xb8] sm:$0xff]   ;;  %v9963_v14 = vld [vmem:[#allocation15 + $0x1c0] sm:$0xff]  }
 0x28f   :  { %8212 = vmatmul.mubr.msk.bf16.gmra.mrb[84].mxu0 %vm11611_vm6, %v11623_v56  ;;  %8568 = vmatpush3.bf16.msra.mxu1 %v9941_v51  ;;  %v9951_v56 = vld [vmem:[#allocation15 + $0xe8] sm:$0xff]   ;;  %v11836_v55 = vsel %vm14192_vm4, %v14199_v61, %v11484_v40  ;;  %vm11840_vm14 = vcmp.le.s32.totalorder %v14200_v28, 6  ;;  %v14206_v51 = vmov 0  ;;  %vm11914_vm4 = vmpackc.low %vm11367_vm15, %vm11297_vm13 }
 0x290   :  { %8215 = vmatprep.mubr.msk.bf16.mxu0 %vm11671_vm7, %v11662_v5  ;;  %v642_v52 = vmax.f32 %v630_v29, 0.0  ;;  %v633_v1 = vadd.f32 %v8510_v33, %v11740_v27  ;;  %8569 = vmatprep.subr.bf16.mxu1 %v9943_v31  ;;  %v9953_v5 = vld [vmem:[#allocation15 + $0xa8] sm:$0xff]   ;;  %v14195_v27 = vand.u32 7, %v11738_v63  ;;  %v14202_v2 = vsel %vm11840_vm14, 4294967295, %v14201_v2  ;;  %v9955_v63 = vld [vmem:[#allocation15 + $0xf0] sm:$0xff]   ;;  %v9959_v31 = vld [vmem:[#allocation15 + $0xf8] sm:$0xff]  }
 0x291   :  { %14203 = vst [vmem:[#allocation93_spill] sm:$0xff] %v14202_v2  ;;  %v1290_v29 = vpack.c.bf16 %v11200_v62, %v14119_v26  ;;  %v9965_v33 = vld [vmem:[#allocation15 + $0x180] sm:$0xff]   ;;  %v9973_v62 = vld [vmem:[#allocation15 + $0x190] sm:$0xff]   ;;  %v9999_v61 = vld [vmem:[#allocation15 + $0x2c8] sm:$0xff]  }
 0x292   :  { %v643_v22 = vmax.f32 %v633_v1, 0.0  ;;  %vm11828_vm11 = vcmp.le.s32.totalorder %v14195_v27, 6  ;;  %v9969_v1 = vld [vmem:[#allocation15 + $0x188] sm:$0xff]   ;;  %vm11931_vm15 = vmpackc.low %vm11443_vm2, %vm11373_vm0  ;;  %v10091_v2 = vld [vmem:[%s13888_s10 + $0x140] sm:$0xff]  }
 0x293   :  { %8570 = vmatpush3.bf16.msra.mxu1 %v9945_v59  ;;  %v14197_v8 = vsel %vm11828_vm11, 4294967295, %v14196_v8  ;;  %v11868_v59 = vpack.c.bf16 %v11261_v37, %v11257_v32  ;;  %v9975_v32 = vld [vmem:[#allocation15 + $0x1d8] sm:$0xff]   ;;  %vm11948_vm2 = vmpackc.low %vm11757_vm5, %vm11449_vm3 }
 0x294   :  { %8571 = vmatprep.subr.bf16.mxu1 %v9947_v21  ;;  %v647_v49 = vpack.c.bf16 %v643_v22, %v642_v52  ;;  %14198 = vst [vmem:[#allocation92_spill] sm:$0xff] %v14197_v8  ;;  %v9967_v52 = vld [vmem:[#allocation15 + $0x1c8] sm:$0xff]   ;;  %v9971_v21 = vld [vmem:[#allocation15 + $0x1d0] sm:$0xff]   ;;  %v11873_v22 = vpack.c.bf16 %v11275_v41, %v11271_v3  ;;  %v9977_v37 = vld [vmem:[#allocation15 + $0x198] sm:$0xff]   ;;  %v11883_v3 = vpack.c.bf16 %v11349_v39, %v11345_v20 }
 0x295   :  { %v9981_v41 = vld [vmem:[#allocation15 + $0x1a0] sm:$0xff]   ;;  %v11893_v20 = vpack.c.bf16 %v11425_v38, %v11421_v42  ;;  %v9989_v39 = vld [vmem:[#allocation15 + $0x1b0] sm:$0xff]   ;;  %v9993_v42 = vld [vmem:[#allocation15 + $0x1b8] sm:$0xff]  }
 0x296   :  { %9390 = vmatmul.mubr.bf16.gmra.mrb[4].mxu1 %v647_v49  ;;  %v9985_v49 = vld [vmem:[#allocation15 + $0x1a8] sm:$0xff]   ;;  %v9995_v38 = vld [vmem:[#allocation15 + $0x2c0] sm:$0xff]  }
 0x297   :  { %8218 = vmatmul.mubr.msk.bf16.gmra.mrb[88].mxu0 %vm11671_vm7, %v11685_v34  ;;  %8572 = vmatpush3.bf16.msra.mxu1 %v9949_v24  ;;  %v11846_v34 = vsel %vm14204_vm1, %v11484_v40, 0.0  ;;  %vm11852_vm7 = vmpackc.low %vm11840_vm14, %vm11828_vm11  ;;  %v11877_v24 = vpack.c.bf16 %v11332_v0, %v11328_v9  ;;  %v11887_v9 = vpack.c.bf16 %v11408_v25, %v11404_v4  ;;  %v9983_v0 = vld [vmem:[#allocation15 + $0x1e8] sm:$0xff]   ;;  %v8130_v25 = vpack.c.bf16 %v11284_v12, %v11217_v10  ;;  %v9991_v4 = vld [vmem:[#allocation15 + $0x1f8] sm:$0xff]  }
 0x298   :  { %2592 = vmatprep.mubr.bf16.mxu1 %v1291_v19  ;;  %14205 = vst [vmem:[#allocation94_spill] sm:$0xff] %v11846_v34  ;;  %8573 = vmatprep.subr.bf16.mxu1 %v9951_v56  ;;  %v14207_v51 = vsel %vm11852_vm7, 4294967295, %v14206_v51  ;;  %v8220_v36 = vpack.c.bf16 %v11846_v34, %v11836_v55  ;;  %v8223_v50 = vpack.c.bf16 %v11846_v34, %v11787_v57  ;;  %v9979_v19 = vld [vmem:[#allocation15 + $0x1e0] sm:$0xff]   ;;  %v9987_v56 = vld [vmem:[#allocation15 + $0x1f0] sm:$0xff]   ;;  %vm11901_vm1 = vmpackc.low %vm11291_vm12, %vm11231_vm10 }
 0x299   :  { %14208 = vst [vmem:[#allocation95_spill] sm:$0xff] %v14207_v51  ;;  %v9997_v10 = vld [vmem:[#allocation15 + $0x280] sm:$0xff]   ;;  %v14211_v12 = vld [vmem:[#allocation55_spill] sm:$0xff] }
 0x29a   :  { %8221 = vmatprep.mubr.msk.bf16.mxu0 %vm11852_vm7, %v8220_v36  ;;  %v8136_v27 = vpack.c.bf16 %v14211_v12, %v11287_v35  ;;  %v10003_v35 = vld [vmem:[#allocation15 + $0x2d0] sm:$0xff]  }
 0x29b   :  { %8574 = vmatpush3.bf16.msra.mxu1 %v9953_v5 }
 0x29c   :  { %8575 = vmatprep.subr.bf16.mxu1 %v9955_v63  ;;  %v10073_v63 = vld [vmem:[%s13888_s10 + $0xd8] sm:$0xff]  }
 0x29f   :  { %8224 = vmatmul.mubr.msk.bf16.gmra.mrb[92].mxu0 %vm11852_vm7, %v8223_v50  ;;  %8576 = vmatpush3.bf16.msra.mxu1 %v9957_v60  ;;  %v14216_v60 = vld [vmem:[#allocation53_spill] sm:$0xff] }
 0x2a0   :  { %8577 = vmatprep.subr.bf16.mxu1 %v9959_v31  ;;  %v14217_v50 = vld [vmem:[#allocation49_spill] sm:$0xff] }
 0x2a1   :  { %v14218_v31 = vpack.c.bf16 %v14216_v60, %v14217_v50  ;;  %v14234_v60 = vld [vmem:[#allocation70_spill] sm:$0xff]  ;;  %v10023_v50 = vld [vmem:[#allocation15 + $0x2f8] sm:$0xff]  }
 0x2a3   :  { %8578 = vmatpush3.bf16.msra.mxu1 %v9961_v46  ;;  %v10001_v46 = vld [vmem:[#allocation15 + $0x288] sm:$0xff]  }
 0x2a4   :  { %8643 = vmatprep.subr.bf16.mxu1 %v9963_v14  ;;  %v10005_v14 = vld [vmem:[#allocation15 + $0x290] sm:$0xff]  }
 0x2a6   :  { %2593 = vmatmul.mubr.bf16.vlgmr.msra.gmra.mrb[8].mxu1 %v1290_v29  ;;  %v14219_v29 = vld [vmem:[#allocation56_spill] sm:$0xff] }
 0x2a7   :  { %8644 = vmatpush3.bf16.msra.mxu1 %v9965_v33  ;;  %2600 = vmatprep.mubr.bf16.mxu1 %v11868_v59  ;;  %v14220_v33 = vld [vmem:[#allocation60_spill] sm:$0xff] }
 0x2a8   :  { %8645 = vmatprep.subr.bf16.mxu1 %v9967_v52  ;;  %v8142_v52 = vpack.c.bf16 %v14220_v33, %v14219_v29  ;;  %v14242_v29 = vpack.c.bf16 %v11714_v58, %v11471_v13  ;;  %v10025_v33 = vld [vmem:[#allocation15 + $0x2b8] sm:$0xff]   ;;  %v10031_v58 = vld [vmem:[#allocation15 + $0x3c8] sm:$0xff]  }
 0x2ab   :  { %8646 = vmatpush3.bf16.msra.mxu1 %v9969_v1  ;;  %v10007_v1 = vld [vmem:[#allocation15 + $0x2d8] sm:$0xff]  }
 0x2ac   :  { %8647 = vmatprep.subr.bf16.mxu1 %v9971_v21 }
 0x2ae   :  { %2601 = vmatmul.mubr.bf16.gmra.mrb[12].mxu1 %v11873_v22 }
 0x2af   :  { %8648 = vmatpush3.bf16.msra.mxu1 %v9973_v62  ;;  %2608 = vmatprep.mubr.bf16.mxu1 %v11877_v24 }
 0x2b0   :  { %8649 = vmatprep.subr.bf16.mxu1 %v9975_v32  ;;  %v14223_v32 = vmov 0 }
 0x2b1   :  { %v14224_v32 = vsel %vm11931_vm15, 4294967295, %v14223_v32 }
 0x2b2   :  { %14225 = vst [vmem:[#allocation55_spill] sm:$0xff] %v14224_v32 }
 0x2b3   :  { %8650 = vmatpush3.bf16.msra.mxu1 %v9977_v37  ;;  %v14226_v37 = vpack.c.bf16 %v11382_v17, %v11317_v53  ;;  %v14229_v53 = vmov 0  ;;  %v14232_v17 = vpack.c.bf16 %v11458_v18, %v11393_v30 }
 0x2b4   :  { %8651 = vmatprep.subr.bf16.mxu1 %v9979_v19  ;;  %v10009_v19 = vld [vmem:[#allocation15 + $0x298] sm:$0xff]   ;;  %v14230_v53 = vsel %vm11948_vm2, 4294967295, %v14229_v53 }
 0x2b5   :  { %14231 = vst [vmem:[#allocation53_spill] sm:$0xff] %v14230_v53 }
 0x2b6   :  { %2609 = vmatmul.mubr.bf16.gmra.mrb[16].mxu1 %v11883_v3 }
 0x2b7   :  { %8652 = vmatpush3.bf16.msra.mxu1 %v9981_v41  ;;  %2616 = vmatprep.mubr.bf16.mxu1 %v11887_v9  ;;  %v10011_v41 = vld [vmem:[#allocation15 + $0x2e0] sm:$0xff]  }
 0x2b8   :  { %8653 = vmatprep.subr.bf16.mxu1 %v9983_v0  ;;  %v10013_v0 = vld [vmem:[#allocation15 + $0x2a0] sm:$0xff]  }
 0x2bb   :  { %8654 = vmatpush3.bf16.msra.mxu1 %v9985_v49  ;;  %v14227_v49 = vld [vmem:[#allocation61_spill] sm:$0xff] }
 0x2bc   :  { %8655 = vmatprep.subr.bf16.mxu1 %v9987_v56  ;;  %v8148_v56 = vpack.c.bf16 %v11764_v6, %v14227_v49 }
 0x2be   :  { %2617 = vmatmul.mubr.bf16.gmra.mrb[20].mxu1 %v11893_v20 }
 0x2bf   :  { %8656 = vmatpush3.bf16.msra.mxu1 %v9989_v39  ;;  %8131 = vmatprep.mubr.msk.bf16.mxu1 %vm11901_vm1, %v8130_v25  ;;  %v10015_v39 = vld [vmem:[#allocation15 + $0x2e8] sm:$0xff]  }
 0x2c0   :  { %8657 = vmatprep.subr.bf16.mxu1 %v9991_v4  ;;  %v10017_v4 = vld [vmem:[#allocation15 + $0x2a8] sm:$0xff]  }
 0x2c3   :  { %8658 = vmatpush3.bf16.msra.mxu1 %v9993_v42  ;;  %v10019_v42 = vld [vmem:[#allocation15 + $0x2f0] sm:$0xff]  }
 0x2c4   :  { %8723 = vmatprep.subr.bf16.mxu1 %v9995_v38 }
 0x2c6   :  { %8134 = vmatmul.mubr.msk.bf16.vlgmr.msra.gmra.mrb[24].mxu1 %vm11901_vm1, %v14218_v31  ;;  %v14235_v31 = vld [vmem:[#allocation67_spill] sm:$0xff] }
 0x2c7   :  { %8724 = vmatpush3.bf16.msra.mxu1 %v9997_v10  ;;  %8137 = vmatprep.mubr.msk.bf16.mxu1 %vm11914_vm4, %v8136_v27  ;;  %v10021_v27 = vld [vmem:[#allocation15 + $0x2b0] sm:$0xff]   ;;  %vm14236_vm5 = vnez %v14235_v31 }
 0x2c8   :  { %8725 = vmatprep.subr.bf16.mxu1 %v9999_v61  ;;  %v14233_v61 = vld [vmem:[#allocation65_spill] sm:$0xff] }
 0x2c9   :  { %v8154_v30 = vpack.c.bf16 %v14234_v60, %v14233_v61  ;;  %v10033_v61 = vld [vmem:[#allocation15 + $0x388] sm:$0xff]   ;;  %v10035_v60 = vld [vmem:[#allocation15 + $0x3d0] sm:$0xff]  }
 0x2cb   :  { %8726 = vmatpush3.bf16.msra.mxu1 %v10001_v46  ;;  %v14237_v46 = vld [vmem:[#allocation72_spill] sm:$0xff] }
 0x2cc   :  { %8727 = vmatprep.subr.bf16.mxu1 %v10003_v35  ;;  %vm14238_vm3 = vnez %v14237_v46  ;;  %v14239_v35 = vmov 0  ;;  %v10075_v46 = vld [vmem:[%s13888_s10 + $0x98] sm:$0xff]  }
 0x2cd   :  { %vm11967_vm0 = vmpackc.low %vm14238_vm3, %vm14236_vm5 }
 0x2ce   :  { %8140 = vmatmul.mubr.msk.bf16.gmra.mrb[28].mxu1 %vm11914_vm4, %v14226_v37  ;;  %v14240_v35 = vsel %vm11967_vm0, 4294967295, %v14239_v35 }
 0x2cf   :  { %8728 = vmatpush3.bf16.msra.mxu1 %v10005_v14  ;;  %8143 = vmatprep.mubr.msk.bf16.mxu1 %vm11931_vm15, %v8142_v52  ;;  %14241 = vst [vmem:[#allocation49_spill] sm:$0xff] %v14240_v35  ;;  %v10027_v52 = vld [vmem:[#allocation15 + $0x3c0] sm:$0xff]  }
 0x2d0   :  { %8729 = vmatprep.subr.bf16.mxu1 %v10007_v1 }
 0x2d1   :  { %v8539_v6 = vpop.f32.mrb[16].mxu0 }
 0x2d2   :  { %v8540_v38 = vpop.f32.mrb[17].mxu0 }
 0x2d3   :  { %8730 = vmatpush3.bf16.msra.mxu1 %v10009_v19  ;;  %v11959_v10 = vadd.f32 %v8540_v38, %v8539_v6  ;;  %v8542_v12 = vpop.f32.mrb[18].mxu0  ;;  %v10029_v19 = vld [vmem:[#allocation15 + $0x380] sm:$0xff]   ;;  %v14252_v38 = vld [vmem:[#allocation74_spill] sm:$0xff] }
 0x2d4   :  { %8731 = vmatprep.subr.bf16.mxu1 %v10011_v41  ;;  %v8543_v18 = vpop.f32.mrb[19].mxu0  ;;  %v14243_v41 = vld [vmem:[#allocation71_spill] sm:$0xff] }
 0x2d5   :  { %v11971_v14 = vadd.f32 %v8543_v18, %v8542_v12  ;;  %v14253_v12 = vld [vmem:[#allocation69_spill] sm:$0xff] }
 0x2d6   :  { %8146 = vmatmul.mubr.msk.bf16.gmra.mrb[32].mxu1 %vm11931_vm15, %v14232_v17  ;;  %v14247_v17 = vld [vmem:[#allocation78_spill] sm:$0xff] }
 0x2d7   :  { %8732 = vmatpush3.bf16.msra.mxu1 %v10013_v0  ;;  %8149 = vmatprep.mubr.msk.bf16.mxu1 %vm11948_vm2, %v8148_v56  ;;  %v14244_v0 = vld [vmem:[#allocation76_spill] sm:$0xff]  ;;  %vm14248_vm3 = vnez %v14247_v17 }
 0x2d8   :  { %8733 = vmatprep.subr.bf16.mxu1 %v10015_v39  ;;  %v8160_v49 = vpack.c.bf16 %v14244_v0, %v14243_v41  ;;  %v14245_v39 = vld [vmem:[#allocation73_spill] sm:$0xff]  ;;  %v14256_v41 = vld [vmem:[#allocation79_spill] sm:$0xff]  ;;  %v14259_v0 = vmov 0 }
 0x2d9   :  { %v8545_v1 = vpop.f32.mrb[20].mxu0  ;;  %vm14246_vm5 = vnez %v14245_v39 }
 0x2da   :  { %v8546_v37 = vpop.f32.mrb[21].mxu0  ;;  %vm11988_vm13 = vmpackc.low %vm14248_vm3, %vm14246_vm5  ;;  %vm14257_vm3 = vnez %v14256_v41  ;;  %vm14289_vm5 = vcmask 1040384  }
 0x2db   :  { %8734 = vmatpush3.bf16.msra.mxu1 %v10017_v4  ;;  %v11982_v56 = vadd.f32 %v8546_v37, %v8545_v1  ;;  %v8548_v13 = vpop.f32.mrb[22].mxu0  ;;  %v14249_v4 = vmov 0  ;;  %v10039_v37 = vld [vmem:[#allocation15 + $0x3d8] sm:$0xff]   ;;  %vm12009_vm12 = vmpackc.low %vm11650_vm9, %vm14257_vm3 }
 0x2dc   :  { %8735 = vmatprep.subr.bf16.mxu1 %v10019_v42  ;;  %v14250_v4 = vsel %vm11988_vm13, 4294967295, %v14249_v4  ;;  %v8549_v6 = vpop.f32.mrb[23].mxu0  ;;  %v14260_v0 = vsel %vm12009_vm12, 4294967295, %v14259_v0 }
 0x2dd   :  { %14251 = vst [vmem:[#allocation56_spill] sm:$0xff] %v14250_v4  ;;  %v11992_v42 = vadd.f32 %v8549_v6, %v8548_v13  ;;  %14261 = vst [vmem:[#allocation60_spill] sm:$0xff] %v14260_v0  ;;  %v14263_v6 = vld [vmem:[#allocation75_spill] sm:$0xff] }
 0x2de   :  { %8152 = vmatmul.mubr.msk.bf16.gmra.mrb[36].mxu1 %vm11948_vm2, %v14242_v29  ;;  %v14255_v29 = vld [vmem:[#allocation77_spill] sm:$0xff] }
 0x2df   :  { %8736 = vmatpush3.bf16.msra.mxu1 %v10021_v27  ;;  %8155 = vmatprep.mubr.msk.bf16.mxu1 %vm11967_vm0, %v8154_v30  ;;  %v14254_v27 = vpack.c.bf16 %v14252_v38, %v14253_v12  ;;  %v10043_v12 = vld [vmem:[#allocation15 + $0x3e0] sm:$0xff]  }
 0x2e0   :  { %8737 = vmatprep.subr.bf16.mxu1 %v10023_v50  ;;  %v10037_v50 = vld [vmem:[#allocation15 + $0x390] sm:$0xff]  }
 0x2e1   :  { %v8551_v30 = vpop.f32.mrb[24].mxu0 }
 0x2e2   :  { %v8552_v18 = vpop.f32.mrb[25].mxu0 }
 0x2e3   :  { %8738 = vmatpush3.bf16.msra.mxu1 %v10025_v33  ;;  %v8166_v33 = vpack.c.bf16 %v11641_v54, %v14255_v29  ;;  %v8554_v1 = vpop.f32.mrb[26].mxu0  ;;  %v10041_v54 = vld [vmem:[#allocation15 + $0x398] sm:$0xff]  }
 0x2e4   :  { %8803 = vmatprep.subr.bf16.mxu1 %v10027_v52  ;;  %v12003_v52 = vadd.f32 %v8552_v18, %v8551_v30  ;;  %v14265_v30 = vld [vmem:[#allocation84_spill] sm:$0xff] }
 0x2e5   :  { %v8172_v18 = vpack.c.bf16 %v11836_v55, %v14265_v30  ;;  %v10049_v55 = vld [vmem:[#allocation15 + $0x3a8] sm:$0xff]   ;;  %v10053_v30 = vld [vmem:[#allocation15 + $0x3b0] sm:$0xff]  }
 0x2e6   :  { %8158 = vmatmul.mubr.msk.bf16.vlgmr.msra.gmra.mrb[40].mxu1 %vm11967_vm0, %v14254_v27 }
 0x2e7   :  { %8804 = vmatpush3.bf16.msra.mxu1 %v10029_v19  ;;  %8161 = vmatprep.mubr.msk.bf16.mxu1 %vm11988_vm13, %v8160_v49  ;;  %v8555_v49 = vpop.f32.mrb[27].mxu0 }
 0x2e8   :  { %8805 = vmatprep.subr.bf16.mxu1 %v10031_v58  ;;  %v12013_v13 = vadd.f32 %v8555_v49, %v8554_v1  ;;  %v14262_v58 = vld [vmem:[#allocation80_spill] sm:$0xff]  ;;  %v10047_v49 = vld [vmem:[#allocation15 + $0x3e8] sm:$0xff]  }
 0x2e9   :  { %v14264_v38 = vpack.c.bf16 %v14262_v58, %v14263_v6  ;;  %v8557_v27 = vpop.f32.mrb[28].mxu0  ;;  %v14266_v58 = vld [vmem:[#allocation86_spill] sm:$0xff]  ;;  %v14271_v6 = vld [vmem:[#allocation87_spill] sm:$0xff] }
 0x2ea   :  { %vm14267_vm9 = vnez %v14266_v58 }
 0x2eb   :  { %8806 = vmatpush3.bf16.msra.mxu1 %v10033_v61  ;;  %v8558_v61 = vpop.f32.mrb[29].mxu0  ;;  %vm12030_vm3 = vmpackc.low %vm11828_vm11, %vm14267_vm9  ;;  %vm14285_vm11 = vcmask 1040384  }
 0x2ec   :  { %8807 = vmatprep.subr.bf16.mxu1 %v10035_v60  ;;  %v10045_v60 = vld [vmem:[#allocation15 + $0x3a0] sm:$0xff]   ;;  %v12024_v29 = vadd.f32 %v8558_v61, %v8557_v27  ;;  %v8560_v1 = vpop.f32.mrb[30].mxu0 }
 0x2ee   :  { %8164 = vmatmul.mubr.msk.bf16.gmra.mrb[44].mxu1 %vm11988_vm13, %v14264_v38  ;;  %v14272_v38 = vld [vmem:[#allocation82_spill] sm:$0xff] }
 0x2ef   :  { %8808 = vmatpush3.bf16.msra.mxu1 %v10037_v50  ;;  %8167 = vmatprep.mubr.msk.bf16.mxu1 %vm12009_vm12, %v8166_v33  ;;  %v14268_v50 = vmov 0  ;;  %v8561_v33 = vpop.f32.mrb[31].mxu0 }
 0x2f0   :  { %8809 = vmatprep.subr.bf16.mxu1 %v10039_v37  ;;  %v14269_v50 = vsel %vm12030_vm3, 4294967295, %v14268_v50  ;;  %v12034_v37 = vadd.f32 %v8561_v33, %v8560_v1  ;;  %v10055_v1 = vld [vmem:[#allocation15 + $0x3f8] sm:$0xff]  }
 0x2f1   :  { %14270 = vst [vmem:[#allocation61_spill] sm:$0xff] %v14269_v50  ;;  %v8619_v27 = vpop.f32.mrb[32].mxu0 }
 0x2f2   :  { %v8620_v61 = vpop.f32.mrb[33].mxu0 }
 0x2f3   :  { %8810 = vmatpush3.bf16.msra.mxu1 %v10041_v54  ;;  %v14273_v54 = vpack.c.bf16 %v14271_v6, %v14272_v38  ;;  %v8622_v8 = vpop.f32.mrb[34].mxu0  ;;  %v12043_v33 = vadd.f32 %v8620_v61, %v8619_v27 }
 0x2f4   :  { %8811 = vmatprep.subr.bf16.mxu1 %v10043_v12  ;;  %v10051_v12 = vld [vmem:[#allocation15 + $0x3f0] sm:$0xff]   ;;  %v8623_v6 = vpop.f32.mrb[35].mxu0 }
 0x2f5   :  { %v12045_v38 = vadd.f32 %v8623_v6, %v8622_v8 }
 0x2f6   :  { %8170 = vmatmul.mubr.msk.bf16.gmra.mrb[48].mxu1 %vm12009_vm12, %v14273_v54 }
 0x2f7   :  { %8812 = vmatpush3.bf16.msra.mxu1 %v10045_v60  ;;  %8173 = vmatprep.mubr.msk.bf16.mxu1 %vm12030_vm3, %v8172_v18  ;;  %v14274_v60 = vpack.c.bf16 %v11787_v57, %v11678_v15  ;;  %v10057_v18 = vld [vmem:[#allocation15 + $0x3b8] sm:$0xff]  }
 0x2f8   :  { %8813 = vmatprep.subr.bf16.mxu1 %v10047_v49 }
 0x2f9   :  { %v8625_v49 = vpop.f32.mrb[36].mxu0 }
 0x2fa   :  { %v8626_v54 = vpop.f32.mrb[37].mxu0 }
 0x2fb   :  { %8814 = vmatpush3.bf16.msra.mxu1 %v10049_v55  ;;  %v8628_v55 = vpop.f32.mrb[38].mxu0 }
 0x2fc   :  { %8815 = vmatprep.subr.bf16.mxu1 %v10051_v12  ;;  %v12053_v12 = vadd.f32 %v8626_v54, %v8625_v49  ;;  %v8629_v27 = vpop.f32.mrb[39].mxu0 }
 0x2fd   :  { %v12055_v8 = vadd.f32 %v8629_v27, %v8628_v55  ;;  %v14275_v27 = vld [vmem:[#allocation83_spill] sm:$0xff] }
 0x2fe   :  { %8176 = vmatmul.mubr.msk.bf16.gmra.mrb[52].mxu1 %vm12030_vm3, %v14274_v60 }
 0x2ff   :  { %8816 = vmatpush3.bf16.msra.mxu1 %v10053_v30  ;;  %2982 = vmatprep.mubr.bf16.mxu1 %v11868_v59 }
 0x300   :  { %8817 = vmatprep.subr.bf16.mxu1 %v10055_v1 }
 0x301   :  { %v8631_v15 = vpop.f32.mrb[40].mxu0 }
 0x302   :  { %v8632_v57 = vpop.f32.mrb[41].mxu0 }
 0x303   :  { %8818 = vmatpush3.bf16.msra.mxu1 %v10057_v18  ;;  %v8634_v61 = vpop.f32.mrb[42].mxu0  ;;  %v12059_v30 = vadd.f32 %v8632_v57, %v8631_v15  ;;  %v1333_v18 = vpack.c.bf16 %v14119_v26, %v11627_v44 }
 0x304   :  { %v8635_v59 = vpop.f32.mrb[43].mxu0 }
 0x305   :  { %v12061_v1 = vadd.f32 %v8635_v59, %v8634_v61 }
 0x306   :  { %2983 = vmatmul.mubr.bf16.vlgmr.msra.gmra.mrb[56].mxu1 %v11873_v22 }
 0x307   :  { %2990 = vmatprep.mubr.bf16.mxu1 %v11877_v24 }
 0x309   :  { %v8637_v6 = vpop.f32.mrb[44].mxu0 }
 0x30a   :  { %v8638_v60 = vpop.f32.mrb[45].mxu0 }
 0x30b   :  { %v8640_v22 = vpop.f32.mrb[46].mxu0  ;;  %v12067_v49 = vadd.f32 %v8638_v60, %v8637_v6 }
 0x30c   :  { %v8641_v24 = vpop.f32.mrb[47].mxu0 }
 0x30d   :  { %v12069_v54 = vadd.f32 %v8641_v24, %v8640_v22 }
 0x30e   :  { %2991 = vmatmul.mubr.bf16.gmra.mrb[60].mxu1 %v11883_v3  ;;  %v1332_v3 = vpack.c.bf16 %v14119_v26, %v14275_v27 }
 0x30f   :  { %2998 = vmatprep.mubr.bf16.mxu1 %v11887_v9 }
 0x311   :  { %v8699_v55 = vpop.f32.mrb[48].mxu0 }
 0x312   :  { %v8700_v15 = vpop.f32.mrb[49].mxu0 }
 0x313   :  { %v8702_v9 = vpop.f32.mrb[50].mxu0  ;;  %v12074_v57 = vadd.f32 %v8700_v15, %v8699_v55 }
 0x314   :  { %v8703_v61 = vpop.f32.mrb[51].mxu0 }
 0x315   :  { %v12076_v59 = vadd.f32 %v8703_v61, %v8702_v9 }
 0x316   :  { %2999 = vmatmul.mubr.bf16.gmra.mrb[64].mxu1 %v11893_v20 }
 0x317   :  { %3006 = vmatprep.mubr.bf16.mxu1 %v1333_v18 }
 0x319   :  { %v8705_v44 = vpop.f32.mrb[52].mxu0 }
 0x31a   :  { %v8706_v6 = vpop.f32.mrb[53].mxu0 }
 0x31b   :  { %v8708_v60 = vpop.f32.mrb[54].mxu0  ;;  %v12078_v22 = vadd.f32 %v8706_v6, %v8705_v44 }
 0x31c   :  { %v8709_v24 = vpop.f32.mrb[55].mxu0 }
 0x31d   :  { %v12080_v20 = vadd.f32 %v8709_v24, %v8708_v60 }
 0x31e   :  { %3007 = vmatmul.mubr.bf16.gmra.mrb[68].mxu1 %v1332_v3 }
 0x321   :  { %v8711_v18 = vpop.f32.mrb[56].mxu0 }
 0x322   :  { %v8712_v47 = vpop.f32.mrb[57].mxu0 }
 0x323   :  { %v8714_v58 = vpop.f32.mrb[58].mxu0  ;;  %v12082_v27 = vadd.f32 %v8712_v47, %v8711_v18 }
 0x324   :  { %v8715_v19 = vpop.f32.mrb[59].mxu0 }
 0x325   :  { %v12084_v55 = vadd.f32 %v8715_v19, %v8714_v58 }
 0x329   :  { %v8717_v15 = vpop.f32.mrb[60].mxu0 }
 0x32a   :  { %v8718_v9 = vpop.f32.mrb[61].mxu0 }
 0x32b   :  { %v8720_v61 = vpop.f32.mrb[62].mxu0  ;;  %v12086_v3 = vadd.f32 %v8718_v9, %v8717_v15  ;;  %v10060_v15 = vld [vmem:[%s13888_s10] sm:$0xff]  }
 0x32c   :  { %v8721_v41 = vpop.f32.mrb[63].mxu0 }
 0x32d   :  { %v12088_v17 = vadd.f32 %v8721_v41, %v8720_v61  ;;  %v10059_v41 = vld [vmem:[%s13888_s10 + $0x40] sm:$0xff]  }
 0x32e   :  { %8883 = vmatprep.subr.bf16.mxu1 %v10059_v41  ;;  %v10065_v41 = vld [vmem:[%s13888_s10 + $0xc8] sm:$0xff]  }
 0x32f   :  { %8884 = vmatpush3.bf16.msra.mxu1 %v10060_v15  ;;  %v10066_v15 = vld [vmem:[%s13888_s10 + $0x50] sm:$0xff]  }
 0x331   :  { %v8779_v44 = vpop.f32.mrb[64].mxu0 }
 0x332   :  { %v8780_v6 = vpop.f32.mrb[65].mxu0 }
 0x333   :  { %v8782_v60 = vpop.f32.mrb[66].mxu0  ;;  %v12090_v24 = vadd.f32 %v8780_v6, %v8779_v44  ;;  %v10063_v44 = vld [vmem:[%s13888_s10 + $0x80] sm:$0xff]  }
 0x334   :  { %v8783_v25 = vpop.f32.mrb[67].mxu0 }
 0x335   :  { %v12092_v62 = vadd.f32 %v8783_v25, %v8782_v60  ;;  %v10061_v25 = vld [vmem:[%s13888_s10 + $0xc0] sm:$0xff]   ;;  %v10064_v60 = vld [vmem:[%s13888_s10 + $0x8] sm:$0xff]  }
 0x336   :  { %8923 = vmatprep.subr.bf16.mxu0 %v10061_v25  ;;  %v10067_v25 = vld [vmem:[%s13888_s10 + $0x88] sm:$0xff]  }
 0x337   :  { %8924 = vmatpush3.bf16.msra.mxu0 %v10063_v44 }
 0x338   :  { %8925 = vmatprep.subr.bf16.mxu0 %v10065_v41  ;;  %v10072_v41 = vld [vmem:[%s13888_s10 + $0x18] sm:$0xff]  }
 0x339   :  { %v8785_v47 = vpop.f32.mrb[68].mxu0 }
 0x33a   :  { %v8786_v18 = vpop.f32.mrb[69].mxu0 }
 0x33b   :  { %v8788_v19 = vpop.f32.mrb[70].mxu0  ;;  %v12094_v58 = vadd.f32 %v8786_v18, %v8785_v47  ;;  %8926 = vmatpush3.bf16.msra.mxu0 %v10067_v25 }
 0x33c   :  { %v8789_v21 = vpop.f32.mrb[71].mxu0 }
 0x33d   :  { %v12096_v31 = vadd.f32 %v8789_v21, %v8788_v19  ;;  %v10062_v21 = vld [vmem:[%s13888_s10 + $0x48] sm:$0xff]  }
 0x33e   :  { %8885 = vmatprep.subr.bf16.mxu1 %v10062_v21  ;;  %v10069_v21 = vld [vmem:[%s13888_s10 + $0xd0] sm:$0xff]  }
 0x33f   :  { %8886 = vmatpush3.bf16.msra.mxu1 %v10064_v60  ;;  %v10071_v60 = vld [vmem:[%s13888_s10 + $0x90] sm:$0xff]   ;;  %8927 = vmatprep.subr.bf16.mxu0 %v10069_v21  ;;  %v10074_v21 = vld [vmem:[%s13888_s10 + $0x60] sm:$0xff]  }
 0x340   :  { %8887 = vmatprep.subr.bf16.mxu1 %v10066_v15  ;;  %8928 = vmatpush3.bf16.msra.mxu0 %v10071_v60 }
 0x341   :  { %v8791_v9 = vpop.f32.mrb[72].mxu0  ;;  %8929 = vmatprep.subr.bf16.mxu0 %v10073_v63 }
 0x342   :  { %v8792_v61 = vpop.f32.mrb[73].mxu0 }
 0x343   :  { %v8794_v6 = vpop.f32.mrb[74].mxu0  ;;  %v12116_v47 = vadd.f32 %v8792_v61, %v8791_v9  ;;  %v10068_v9 = vld [vmem:[%s13888_s10 + $0x10] sm:$0xff]  }
 0x344   :  { %v8795_v18 = vpop.f32.mrb[75].mxu0  ;;  %8888 = vmatpush3.bf16.msra.mxu1 %v10068_v9  ;;  %8930 = vmatpush3.bf16.msra.mxu0 %v10075_v46  ;;  %v10078_v46 = vld [vmem:[%s13888_s10 + $0x68] sm:$0xff]  }
 0x345   :  { %v12118_v19 = vadd.f32 %v8795_v18, %v8794_v6  ;;  %v10070_v6 = vld [vmem:[%s13888_s10 + $0x58] sm:$0xff]  }
 0x346   :  { %8889 = vmatprep.subr.bf16.mxu1 %v10070_v6 }
 0x348   :  { %8890 = vmatpush3.bf16.msra.mxu1 %v10072_v41 }
 0x349   :  { %8891 = vmatprep.subr.bf16.mxu1 %v10074_v21  ;;  %v10079_v21 = vld [vmem:[%s13888_s10 + $0xa0] sm:$0xff]  }
 0x352   :  { %v8797_v61 = vpop.f32.mrb[76].mxu0 }
 0x353   :  { %v8798_v44 = vpop.f32.mrb[77].mxu0 }
 0x354   :  { %v8800_v18 = vpop.f32.mrb[78].mxu0  ;;  %v12144_v15 = vadd.f32 %v8798_v44, %v8797_v61  ;;  %v12157_v61 = vld [vmem:[#allocation13] ss:$0 sm:$0xff] }
 0x355   :  { %v8801_v25 = vpop.f32.mrb[79].mxu0  ;;  %v10076_v44 = vld [vmem:[%s13888_s10 + $0x20] sm:$0xff]  }
 0x356   :  { %v12146_v9 = vadd.f32 %v8801_v25, %v8800_v18  ;;  %8892 = vmatpush3.bf16.msra.mxu1 %v10076_v44  ;;  %v10077_v18 = vld [vmem:[%s13888_s10 + $0xe0] sm:$0xff]  }
 0x357   :  { %8931 = vmatprep.subr.bf16.mxu0 %v10077_v18  ;;  %8893 = vmatprep.subr.bf16.mxu1 %v10078_v46 }
 0x358   :  { %8932 = vmatpush3.bf16.msra.mxu0 %v10079_v21  ;;  %v10085_v21 = vld [vmem:[%s13888_s10 + $0xf0] sm:$0xff]  }
 0x359   :  { %v9387_v6 = vpop.f32.mrb[0].mxu1 }
 0x35a   :  { %v8859_v60 = vpop.f32.mrb[80].mxu0  ;;  %v12166_v41 = vadd.f32 %v9387_v6, %v12157_v61  ;;  %v753_v25 = vpop.f32.mrb[1].mxu1 }
 0x35b   :  { %v8860_v28 = vpop.f32.mrb[81].mxu0  ;;  %v12169_v63 = vadd.f32 %v12157_v61, %v753_v25  ;;  %v9388_v48 = vpop.f32.mrb[2].mxu1  ;;  %v10080_v25 = vld [vmem:[%s13888_s10 + $0x28] sm:$0xff]  }
 0x35c   :  { %14276 = vst [vmem:[#allocation65_spill] sm:$0xff] %v12166_v41  ;;  %v8862_v39 = vpop.f32.mrb[82].mxu0  ;;  %v12178_v44 = vadd.f32 %v9388_v48, %v12157_v61  ;;  %v756_v6 = vpop.f32.mrb[3].mxu1  ;;  %v12180_v41 = vadd.f32 %v8860_v28, %v8859_v60  ;;  %8894 = vmatpush3.bf16.msra.mxu1 %v10080_v25  ;;  %v10081_v48 = vld [vmem:[%s13888_s10 + $0xe8] sm:$0xff]   ;;  %v10082_v28 = vld [vmem:[%s13888_s10 + $0x70] sm:$0xff]   ;;  %v10086_v25 = vld [vmem:[%s13888_s10 + $0x78] sm:$0xff]  }
 0x35d   :  { %14277 = vst [vmem:[#allocation70_spill] sm:$0xff] %v12169_v63  ;;  %v8863_v16 = vpop.f32.mrb[83].mxu0  ;;  %v12186_v18 = vadd.f32 %v12157_v61, %v756_v6  ;;  %v10083_v60 = vld [vmem:[%s13888_s10 + $0xa8] sm:$0xff]   ;;  %8933 = vmatprep.subr.bf16.mxu0 %v10081_v48  ;;  %8895 = vmatprep.subr.bf16.mxu1 %v10082_v28  ;;  %v10087_v48 = vld [vmem:[%s13888_s10 + $0xb0] sm:$0xff]   ;;  %v10088_v28 = vld [vmem:[%s13888_s10 + $0x38] sm:$0xff]  }
 0x35e   :  { %14278 = vst [vmem:[#allocation71_spill] sm:$0xff] %v12178_v44  ;;  %v12188_v63 = vadd.f32 %v8863_v16, %v8862_v39  ;;  %v10084_v16 = vld [vmem:[%s13888_s10 + $0x30] sm:$0xff]   ;;  %8934 = vmatpush3.bf16.msra.mxu0 %v10083_v60 }
 0x35f   :  { %14279 = vst [vmem:[#allocation76_spill] sm:$0xff] %v12186_v18  ;;  %8935 = vmatprep.subr.bf16.mxu0 %v10085_v21  ;;  %v10089_v18 = vld [vmem:[%s13888_s10 + $0xf8] sm:$0xff]  }
 0x360   :  { %8896 = vmatpush3.bf16.msra.mxu1 %v10084_v16  ;;  %v10090_v21 = vld [vmem:[%s13888_s10 + $0xb8] sm:$0xff]  }
 0x361   :  { %8897 = vmatprep.subr.bf16.mxu1 %v10086_v25 }
 0x362   :  { %v8865_v39 = vpop.f32.mrb[84].mxu0  ;;  %8936 = vmatpush3.bf16.msra.mxu0 %v10087_v48  ;;  %v10093_v48 = vld [vmem:[%s13888_s10 + $0x1c0] sm:$0xff]  }
 0x363   :  { %v8866_v46 = vpop.f32.mrb[85].mxu0  ;;  %8937 = vmatprep.subr.bf16.mxu0 %v10089_v18 }
 0x364   :  { %v8868_v6 = vpop.f32.mrb[86].mxu0  ;;  %v12214_v60 = vadd.f32 %v8866_v46, %v8865_v39  ;;  %8898 = vmatpush3.bf16.msra.mxu1 %v10088_v28 }
 0x365   :  { %v8869_v44 = vpop.f32.mrb[87].mxu0  ;;  %8963 = vmatprep.subr.bf16.mxu1 %v10091_v2 }
 0x366   :  { %v12216_v16 = vadd.f32 %v8869_v44, %v8868_v6  ;;  %8938 = vmatpush3.bf16.msra.mxu0 %v10090_v21 }
 0x367   :  { %9003 = vmatprep.subr.bf16.mxu0 %v10093_v48 }
 0x369   :  { %v9391_v39 = vpop.f32.mrb[4].mxu1 }
 0x36a   :  { %v8871_v44 = vpop.f32.mrb[88].mxu0  ;;  %v12228_v46 = vadd.f32 %v9391_v39, %v12157_v61  ;;  %v769_v6 = vpop.f32.mrb[5].mxu1 }
 0x36b   :  { %v8872_v25 = vpop.f32.mrb[89].mxu0  ;;  %v12234_v28 = vadd.f32 %v12157_v61, %v769_v6  ;;  %v9392_v51 = vpop.f32.mrb[6].mxu1 }
 0x36c   :  { %14280 = vst [vmem:[#allocation74_spill] sm:$0xff] %v12228_v46  ;;  %v8874_v34 = vpop.f32.mrb[90].mxu0  ;;  %v12237_v18 = vadd.f32 %v9392_v51, %v12157_v61  ;;  %v772_v21 = vpop.f32.mrb[7].mxu1  ;;  %v12242_v46 = vadd.f32 %v8872_v25, %v8871_v44  ;;  %v7936_v51 = vld [vmem:[#allocation16] ss:$0 sm:$0xff] }
 0x36d   :  { %14281 = vst [vmem:[#allocation69_spill] sm:$0xff] %v12234_v28  ;;  %v8875_v2 = vpop.f32.mrb[91].mxu0  ;;  %v12240_v39 = vadd.f32 %v12157_v61, %v772_v21  ;;  %v2530_v48 = vadd.f32 %v11959_v10, %v7936_v51  ;;  %v2533_v44 = vadd.f32 %v11971_v14, %v7936_v51 }
 0x36e   :  { %14282 = vst [vmem:[#allocation77_spill] sm:$0xff] %v12237_v18  ;;  %v12244_v23 = vadd.f32 %v8875_v2, %v8874_v34 }
 0x36f   :  { %14283 = vst [vmem:[#allocation80_spill] sm:$0xff] %v12240_v39 }
 0x372   :  { %v8877_v50 = vpop.f32.mrb[92].mxu0 }
 0x373   :  { %v8878_v0 = vpop.f32.mrb[93].mxu0 }
 0x374   :  { %v8880_v4 = vpop.f32.mrb[94].mxu0  ;;  %v12246_v28 = vadd.f32 %v8878_v0, %v8877_v50 }
 0x375   :  { %v8881_v6 = vpop.f32.mrb[95].mxu0 }
 0x376   :  { %v12248_v43 = vadd.f32 %v8881_v6, %v8880_v4  ;;  %v2538_v6 = vadd.f32 %v11982_v56, %v7936_v51  ;;  %v2549_v56 = vadd.f32 %v12013_v13, %v7936_v51 }
 0x378   :  { %14284 = vst [vmem:[#allocation75_spill] sm:$0xff] %v12248_v43 }
 0x379   :  { %v8579_v18 = vpop.f32.mrb[8].mxu1 }
 0x37a   :  { %v8580_v53 = vpop.f32.mrb[9].mxu1 }
 0x37b   :  { %v8581_v35 = vadd.f32 %v8580_v53, %v8579_v18  ;;  %v8582_v61 = vpop.f32.mrb[10].mxu1  ;;  %v2541_v53 = vadd.f32 %v11992_v42, %v7936_v51 }
 0x37c   :  { %v8583_v21 = vpop.f32.mrb[11].mxu1 }
 0x37d   :  { %v2595_v34 = vadd.f32 %v8581_v35, %v2530_v48  ;;  %v8584_v25 = vadd.f32 %v8583_v21, %v8582_v61 }
 0x37f   :  { %v2660_v2 = vadd.f32 %v12043_v33, %v2595_v34  ;;  %v2598_v39 = vadd.f32 %v8584_v25, %v2533_v44 }
 0x381   :  { %v2663_v0 = vadd.f32 %v12045_v38, %v2598_v39  ;;  %v8585_v50 = vpop.f32.mrb[12].mxu1  ;;  %v2546_v38 = vadd.f32 %v12003_v52, %v7936_v51  ;;  %v2557_v52 = vadd.f32 %v12034_v37, %v7936_v51 }
 0x382   :  { %v8586_v4 = vpop.f32.mrb[13].mxu1 }
 0x383   :  { %v8587_v11 = vadd.f32 %v8586_v4, %v8585_v50  ;;  %v8588_v32 = vpop.f32.mrb[14].mxu1 }
 0x384   :  { %v8589_v43 = vpop.f32.mrb[15].mxu1 }
 0x385   :  { %v2603_v10 = vadd.f32 %v8587_v11, %v2538_v6  ;;  %v8590_v18 = vadd.f32 %v8589_v43, %v8588_v32 }
 0x387   :  { %v2668_v14 = vadd.f32 %v12053_v12, %v2603_v10  ;;  %v2606_v35 = vadd.f32 %v8590_v18, %v2541_v53 }
 0x389   :  { %v2671_v48 = vadd.f32 %v12055_v8, %v2606_v35  ;;  %v8591_v33 = vpop.f32.mrb[16].mxu1  ;;  %v2554_v8 = vadd.f32 %v12024_v29, %v7936_v51 }
 0x38a   :  { %v8592_v61 = vpop.f32.mrb[17].mxu1 }
 0x38b   :  { %v8593_v39 = vadd.f32 %v8592_v61, %v8591_v33  ;;  %v8594_v21 = vpop.f32.mrb[18].mxu1 }
 0x38c   :  { %v8595_v44 = vpop.f32.mrb[19].mxu1 }
 0x38d   :  { %v2611_v34 = vadd.f32 %v8593_v39, %v2546_v38  ;;  %v8596_v25 = vadd.f32 %v8595_v44, %v8594_v21 }
 0x38f   :  { %v2676_v42 = vadd.f32 %v12059_v30, %v2611_v34  ;;  %v2614_v11 = vadd.f32 %v8596_v25, %v2549_v56 }
 0x391   :  { %v2679_v43 = vadd.f32 %v12061_v1, %v2614_v11  ;;  %v8597_v32 = vpop.f32.mrb[20].mxu1 }
 0x392   :  { %v8598_v12 = vpop.f32.mrb[21].mxu1 }
 0x393   :  { %v8599_v50 = vadd.f32 %v8598_v12, %v8597_v32  ;;  %v8600_v4 = vpop.f32.mrb[22].mxu1 }
 0x394   :  { %v8601_v6 = vpop.f32.mrb[23].mxu1 }
 0x395   :  { %v2619_v53 = vadd.f32 %v8599_v50, %v2554_v8  ;;  %v8602_v10 = vadd.f32 %v8601_v6, %v8600_v4 }
 0x397   :  { %v2684_v13 = vadd.f32 %v12067_v49, %v2619_v53  ;;  %v2622_v18 = vadd.f32 %v8602_v10, %v2557_v52 }
 0x399   :  { %v2687_v35 = vadd.f32 %v12069_v54, %v2622_v18  ;;  %v8659_v30 = vpop.f32.mrb[24].mxu1 }
 0x39a   :  { %v8660_v33 = vpop.f32.mrb[25].mxu1 }
 0x39b   :  { %v8661_v61 = vadd.f32 %v8660_v33, %v8659_v30  ;;  %v8662_v1 = vpop.f32.mrb[26].mxu1 }
 0x39c   :  { %v8663_v38 = vpop.f32.mrb[27].mxu1 }
 0x39d   :  { %v2725_v39 = vadd.f32 %v8661_v61, %v2660_v2  ;;  %v8664_v21 = vadd.f32 %v8663_v38, %v8662_v1 }
 0x39f   :  { %v2790_v29 = vadd.f32 %v12074_v57, %v2725_v39  ;;  %v2728_v44 = vadd.f32 %v8664_v21, %v2663_v0 }
 0x3a1   :  { %v2793_v56 = vadd.f32 %v12076_v59, %v2728_v44  ;;  %v8665_v37 = vpop.f32.mrb[28].mxu1 }
 0x3a2   :  { %v8666_v51 = vpop.f32.mrb[29].mxu1 }
 0x3a3   :  { %v8667_v34 = vadd.f32 %v8666_v51, %v8665_v37  ;;  %v8668_v25 = vpop.f32.mrb[30].mxu1 }
 0x3a4   :  { %v8669_v49 = vpop.f32.mrb[31].mxu1 }
 0x3a5   :  { %v2733_v11 = vadd.f32 %v8667_v34, %v2668_v14  ;;  %v8670_v32 = vadd.f32 %v8669_v49, %v8668_v25 }
 0x3a7   :  { %v2798_v54 = vadd.f32 %v12078_v22, %v2733_v11  ;;  %v2736_v12 = vadd.f32 %v8670_v32, %v2671_v48 }
 0x3a9   :  { %v2801_v8 = vadd.f32 %v12080_v20, %v2736_v12  ;;  %v8671_v50 = vpop.f32.mrb[32].mxu1 }
 0x3aa   :  { %v8672_v2 = vpop.f32.mrb[33].mxu1 }
 0x3ab   :  { %v8673_v4 = vadd.f32 %v8672_v2, %v8671_v50  ;;  %v8674_v6 = vpop.f32.mrb[34].mxu1 }
 0x3ac   :  { %v8675_v57 = vpop.f32.mrb[35].mxu1 }
 0x3ad   :  { %v2741_v0 = vadd.f32 %v8673_v4, %v2676_v42  ;;  %v8676_v52 = vadd.f32 %v8675_v57, %v8674_v6 }
 0x3af   :  { %v2806_v59 = vadd.f32 %v12082_v27, %v2741_v0  ;;  %v2744_v53 = vadd.f32 %v8676_v52, %v2679_v43 }
 0x3b1   :  { %v2809_v10 = vadd.f32 %v12084_v55, %v2744_v53  ;;  %v8677_v18 = vpop.f32.mrb[36].mxu1 }
 0x3b2   :  { %v8678_v14 = vpop.f32.mrb[37].mxu1 }
 0x3b3   :  { %v8679_v30 = vadd.f32 %v8678_v14, %v8677_v18  ;;  %v8680_v33 = vpop.f32.mrb[38].mxu1 }
 0x3b4   :  { %v8681_v22 = vpop.f32.mrb[39].mxu1 }
 0x3b5   :  { %v2749_v48 = vadd.f32 %v8679_v30, %v2684_v13  ;;  %v8682_v61 = vadd.f32 %v8681_v22, %v8680_v33 }
 0x3b7   :  { %v2814_v20 = vadd.f32 %v12086_v3, %v2749_v48  ;;  %v2752_v1 = vadd.f32 %v8682_v61, %v2687_v35 }
 0x3b9   :  { %v2817_v38 = vadd.f32 %v12088_v17, %v2752_v1  ;;  %v8739_v39 = vpop.f32.mrb[40].mxu1 }
 0x3ba   :  { %v8740_v42 = vpop.f32.mrb[41].mxu1 }
 0x3bb   :  { %v8741_v21 = vadd.f32 %v8740_v42, %v8739_v39  ;;  %v8742_v44 = vpop.f32.mrb[42].mxu1 }
 0x3bc   :  { %v8743_v27 = vpop.f32.mrb[43].mxu1 }
 0x3bd   :  { %v2855_v43 = vadd.f32 %v8741_v21, %v2790_v29  ;;  %v8744_v37 = vadd.f32 %v8743_v27, %v8742_v44 }
 0x3bf   :  { %v2920_v55 = vadd.f32 %v12090_v24, %v2855_v43  ;;  %v2858_v51 = vadd.f32 %v8744_v37, %v2793_v56 }
 0x3c1   :  { %v2923_v34 = vadd.f32 %v12092_v62, %v2858_v51  ;;  %v8745_v25 = vpop.f32.mrb[44].mxu1 }
 0x3c2   :  { %v8746_v13 = vpop.f32.mrb[45].mxu1 }
 0x3c3   :  { %v8747_v49 = vadd.f32 %v8746_v13, %v8745_v25  ;;  %v8748_v11 = vpop.f32.mrb[46].mxu1  ;;  %v10092_v25 = vld [vmem:[%s13888_s10 + $0x100] sm:$0xff]   ;;  %v14286_v13 = vld [vmem:[#allocation46_spill] sm:$0xff] }
 0x3c4   :  { %v8749_v3 = vpop.f32.mrb[47].mxu1 }
 0x3c5   :  { %v2863_v35 = vadd.f32 %v8747_v49, %v2798_v54  ;;  %v8750_v32 = vadd.f32 %v8749_v3, %v8748_v11 }
 0x3c7   :  { %v2928_v17 = vadd.f32 %v12094_v58, %v2863_v35  ;;  %v2866_v12 = vadd.f32 %v8750_v32, %v2801_v8  ;;  %v10094_v32 = vld [vmem:[%s13888_s10 + $0x148] sm:$0xff]  }
 0x3c9   :  { %v2931_v50 = vadd.f32 %v12096_v31, %v2866_v12  ;;  %v8751_v2 = vpop.f32.mrb[48].mxu1 }
 0x3ca   :  { %v8752_v29 = vpop.f32.mrb[49].mxu1 }
 0x3cb   :  { %v8753_v4 = vadd.f32 %v8752_v29, %v8751_v2  ;;  %v8754_v6 = vpop.f32.mrb[50].mxu1 }
 0x3cc   :  { %v8755_v24 = vpop.f32.mrb[51].mxu1 }
 0x3cd   :  { %v2871_v56 = vadd.f32 %v8753_v4, %v2806_v59  ;;  %v8756_v57 = vadd.f32 %v8755_v24, %v8754_v6 }
 0x3cf   :  { %v12279_v62 = vadd.f32 %v12116_v47, %v2871_v56  ;;  %v2874_v0 = vadd.f32 %v8756_v57, %v2809_v10  ;;  %v10095_v57 = vld [vmem:[%s13888_s10 + $0x180] sm:$0xff]  }
 0x3d1   :  { %v12282_v52 = vadd.f32 %v12118_v19, %v2874_v0  ;;  %v8757_v54 = vpop.f32.mrb[52].mxu1 }
 0x3d2   :  { %v8758_v53 = vpop.f32.mrb[53].mxu1 }
 0x3d3   :  { %v8759_v58 = vadd.f32 %v8758_v53, %v8757_v54  ;;  %v8760_v8 = vpop.f32.mrb[54].mxu1  ;;  %v10096_v54 = vld [vmem:[%s13888_s10 + $0x108] sm:$0xff]  }
 0x3d4   :  { %v8761_v18 = vpop.f32.mrb[55].mxu1  ;;  %v10097_v53 = vld [vmem:[%s13888_s10 + $0x1c8] sm:$0xff]  }
 0x3d5   :  { %v2879_v31 = vadd.f32 %v8759_v58, %v2814_v20  ;;  %v8762_v14 = vadd.f32 %v8761_v18, %v8760_v8  ;;  %v10098_v8 = vld [vmem:[%s13888_s10 + $0x150] sm:$0xff]  }
 0x3d7   :  { %v12285_v30 = vadd.f32 %v12144_v15, %v2879_v31  ;;  %v2882_v33 = vadd.f32 %v8762_v14, %v2817_v38  ;;  %v14292_v14 = vld [vmem:[#allocation68_spill] sm:$0xff] }
 0x3d9   :  { %v12288_v59 = vadd.f32 %v12146_v9, %v2882_v33  ;;  %v8819_v47 = vpop.f32.mrb[56].mxu1 }
 0x3da   :  { %v8820_v22 = vpop.f32.mrb[57].mxu1 }
 0x3db   :  { %v8821_v10 = vadd.f32 %v8820_v22, %v8819_v47  ;;  %v8822_v48 = vpop.f32.mrb[58].mxu1 }
 0x3dc   :  { %v8823_v19 = vpop.f32.mrb[59].mxu1 }
 0x3dd   :  { %v2985_v61 = vadd.f32 %v8821_v10, %v2920_v55  ;;  %v8824_v1 = vadd.f32 %v8823_v19, %v8822_v48  ;;  %v10099_v10 = vld [vmem:[%s13888_s10 + $0x188] sm:$0xff]  }
 0x3df   :  { %v3050_v39 = vadd.f32 %v12180_v41, %v2985_v61  ;;  %v2988_v42 = vadd.f32 %v8824_v1, %v2923_v34  ;;  %v10101_v61 = vld [vmem:[%s13888_s10 + $0x1d0] sm:$0xff]  }
 0x3e1   :  { %v12291_v21 = vmax.f32 %v3050_v39, 0.0  ;;  %v3053_v20 = vadd.f32 %v12188_v63, %v2988_v42  ;;  %v8825_v15 = vpop.f32.mrb[60].mxu1 }
 0x3e2   :  { %v8826_v44 = vpop.f32.mrb[61].mxu1 }
 0x3e3   :  { %v3096_v38 = vrot.slane %v12291_v21, 7  ;;  %v3131_v9 = vrot.slane %v12291_v21, 1  ;;  %v12296_v27 = vmax.f32 %v3053_v20, 0.0  ;;  %v8827_v43 = vadd.f32 %v8826_v44, %v8825_v15  ;;  %v8828_v37 = vpop.f32.mrb[62].mxu1 }
 0x3e4   :  { %v8829_v51 = vpop.f32.mrb[63].mxu1  ;;  %v3170_v55 = vpack.c.bf16 %v12291_v21, %v14119_v26 }
 0x3e5   :  { %v3097_v41 = vsel %vm14285_vm11, %v11206_v7, %v3096_v38  ;;  %v3098_v34 = vrot.slane %v12296_v27, 7  ;;  %v3133_v63 = vrot.slane %v12296_v27, 1  ;;  %v3182_v11 = vpack.c.bf16 %v12296_v27, %v12291_v21  ;;  %v10125_v21 = vld [vmem:[%s13888_s10 + $0x210] sm:$0xff]  }
 0x3e6   :  { %v8299_v49 = vpack.c.bf16 %v3097_v41, %v14286_v13  ;;  %v2993_v3 = vadd.f32 %v8827_v43, %v2928_v17  ;;  %v8830_v35 = vadd.f32 %v8829_v51, %v8828_v37  ;;  %3808 = vmatprep.mubr.bf16.mxu1 %v3170_v55  ;;  %vm14287_vm11 = vcmask 1046528   ;;  %v14290_v17 = vld [vmem:[#allocation50_spill] sm:$0xff] }
 0x3e7   :  { %v3132_v12 = vsel %vm14287_vm11, %v11484_v40, %v3131_v9  ;;  %vm14288_vm9 = vmmov %vm14287_vm11  ;;  %v3099_v29 = vsel %vm14289_vm5, %v3096_v38, %v3098_v34  ;;  %vm14291_vm10 = vnez %v14290_v17 }
 0x3e8   :  { %v12316_v2 = vsel %vm14288_vm9, %v3131_v9, %v3133_v63  ;;  %v3058_v6 = vadd.f32 %v12214_v60, %v2993_v3  ;;  %v2996_v24 = vadd.f32 %v8830_v35, %v2931_v50  ;;  %8300 = vmatmul.mubr.msk.bf16.vlgmr.msra.gmra.mrb[72].mxu1 %vm14291_vm10, %v8299_v49  ;;  %v8311_v56 = vpack.c.bf16 %v3099_v29, %v3097_v41  ;;  %vm14294_vm10 = vmmov %vm14289_vm5  ;;  %v10102_v9 = vld [vmem:[%s13888_s10 + $0x158] sm:$0xff]   ;;  %v14298_v41 = vld [vmem:[#allocation54_spill] sm:$0xff] }
 0x3e9   :  { %v8314_v4 = vpack.c.bf16 %v12316_v2, %v3132_v12  ;;  %v8831_v0 = vpop.f32.mrb[64].mxu1  ;;  %8964 = vmatpush3.bf16.msra.mxu1 %v10092_v25  ;;  %vm14293_vm9 = vnez %v14292_v14  ;;  %vm14295_vm5 = vmmov %vm14287_vm11  ;;  %v10103_v49 = vld [vmem:[%s13888_s10 + $0x190] sm:$0xff]  }
 0x3ea   :  { %v12332_v60 = vmax.f32 %v3058_v6, 0.0  ;;  %v3061_v50 = vadd.f32 %v12216_v16, %v2996_v24  ;;  %v8832_v58 = vpop.f32.mrb[65].mxu1  ;;  %8312 = vmatprep.mubr.msk.bf16.mxu0 %vm11901_vm1, %v8311_v56  ;;  %8965 = vmatprep.subr.bf16.mxu1 %v10094_v32  ;;  %vm14296_vm1 = vmmov %vm14294_vm10  ;;  %v10105_v6 = vld [vmem:[%s13888_s10 + $0x1d8] sm:$0xff]   ;;  %v10106_v24 = vld [vmem:[%s13888_s10 + $0x160] sm:$0xff]  }
 0x3eb   :  { %v8833_v18 = vadd.f32 %v8832_v58, %v8831_v0  ;;  %v8834_v31 = vpop.f32.mrb[66].mxu1  ;;  %8315 = vmatmul.mubr.msk.bf16.vlgmr.msra.gmra.mrb[96].mxu0 %vm14293_vm9, %v8314_v4  ;;  %vm14297_vm11 = vmmov %vm14295_vm5  ;;  %vm14299_vm9 = vnez %v14298_v41  ;;  %v10108_v58 = vld [vmem:[%s13888_s10 + $0x120] sm:$0xff]   ;;  %v14321_v41 = vld [vmem:[#allocation91_spill] sm:$0xff] }
 0x3ec   :  { %v3100_v33 = vrot.slane %v12332_v60, 7  ;;  %v3135_v47 = vrot.slane %v12332_v60, 1  ;;  %v12344_v22 = vmax.f32 %v3061_v50, 0.0  ;;  %v8835_v16 = vpop.f32.mrb[67].mxu1  ;;  %9004 = vmatpush3.bf16.msra.mxu0 %v10095_v57  ;;  %v12348_v5 = vpack.c.bf16 %v12332_v60, %v12296_v27 }
 0x3ed   :  { %v3001_v48 = vadd.f32 %v8833_v18, %v12279_v62  ;;  %v8836_v19 = vadd.f32 %v8835_v16, %v8834_v31  ;;  %8966 = vmatpush3.bf16.msra.mxu1 %v10096_v54  ;;  %9005 = vmatprep.subr.bf16.mxu0 %v10097_v53  ;;  %v10100_v62 = vld [vmem:[%s13888_s10 + $0x110] sm:$0xff]   ;;  %v10107_v53 = vld [vmem:[%s13888_s10 + $0x198] sm:$0xff]  }
 0x3ee   :  { %v3102_v1 = vrot.slane %v12344_v22, 7  ;;  %v3137_v39 = vrot.slane %v12344_v22, 1  ;;  %3816 = vmatprep.mubr.bf16.mxu1 %v12348_v5  ;;  %v3101_v42 = vsel %vm14294_vm10, %v3098_v34, %v3100_v33  ;;  %8967 = vmatprep.subr.bf16.mxu1 %v10098_v8  ;;  %v12365_v20 = vsel %vm14295_vm5, %v3133_v63, %v3135_v47  ;;  %vm14301_vm10 = vmmov %vm14295_vm5 }
 0x3ef   :  { %v3066_v15 = vadd.f32 %v12242_v46, %v3001_v48  ;;  %v3004_v44 = vadd.f32 %v8836_v19, %v12282_v52  ;;  %v12369_v38 = vpack.c.bf16 %v3101_v42, %v3099_v29  ;;  %v8335_v43 = vpack.c.bf16 %v12365_v20, %v12316_v2  ;;  %vm14302_vm5 = vmmov %vm14296_vm1  ;;  %v10122_v2 = vld [vmem:[%s13888_s10 + $0x1b8] sm:$0xff]  }
 0x3f0   :  { %9006 = vmatpush3.bf16.msra.mxu0 %v10099_v10  ;;  %v3103_v37 = vsel %vm14296_vm1, %v3100_v33, %v3102_v1  ;;  %v12378_v51 = vsel %vm14297_vm11, %v3135_v47, %v3137_v39  ;;  %v3183_v46 = vpack.c.bf16 %v12344_v22, %v12332_v60  ;;  %v10110_v47 = vld [vmem:[%s13888_s10 + $0x168] sm:$0xff]   ;;  %v10127_v60 = vld [vmem:[%s13888_s10 + $0x220] sm:$0xff]  }
 0x3f1   :  { %v12382_v55 = vmax.f32 %v3066_v15, 0.0  ;;  %v3069_v52 = vadd.f32 %v12244_v23, %v3004_v44  ;;  %8303 = vmatmul.mubr.msk.bf16.gmra.mrb[76].mxu1 %vm14299_vm9, %v12369_v38  ;;  %v8837_v34 = vpop.f32.mrb[68].mxu1  ;;  %v8317_v63 = vpack.c.bf16 %v3103_v37, %v3101_v42  ;;  %v12390_v25 = vpack.c.bf16 %v12378_v51, %v12365_v20  ;;  %9007 = vmatprep.subr.bf16.mxu0 %v10101_v61  ;;  %v10104_v23 = vld [vmem:[%s13888_s10 + $0x118] sm:$0xff]   ;;  %v10111_v42 = vld [vmem:[%s13888_s10 + $0x1a0] sm:$0xff]   ;;  %v10113_v15 = vld [vmem:[%s13888_s10 + $0x1e8] sm:$0xff]  }
 0x3f2   :  { %8968 = vmatpush3.bf16.msra.mxu1 %v10100_v62  ;;  %v8838_v3 = vpop.f32.mrb[69].mxu1  ;;  %v14305_v61 = vld [vmem:[#allocation59_spill] sm:$0xff]  ;;  %v10112_v62 = vld [vmem:[%s13888_s10 + $0x128] sm:$0xff]   ;;  %v10123_v20 = vld [vmem:[%s13888_s10 + $0x200] sm:$0xff]  }
 0x3f3   :  { %v3104_v35 = vrot.slane %v12382_v55, 7  ;;  %v3139_v32 = vrot.slane %v12382_v55, 1  ;;  %v12400_v12 = vmax.f32 %v3069_v52, 0.0  ;;  %v8839_v29 = vadd.f32 %v8838_v3, %v8837_v34  ;;  %8318 = vmatprep.mubr.msk.bf16.mxu0 %vm11914_vm4, %v8317_v63  ;;  %v8840_v4 = vpop.f32.mrb[70].mxu1  ;;  %8969 = vmatprep.subr.bf16.mxu1 %v10102_v9  ;;  %vm14300_vm4 = vmmov %vm14296_vm1  ;;  %v10114_v63 = vld [vmem:[%s13888_s10 + $0x170] sm:$0xff]  }
 0x3f4   :  { %8321 = vmatmul.mubr.msk.bf16.gmra.mrb[100].mxu0 %vm11559_vm8, %v12390_v25  ;;  %v8841_v17 = vpop.f32.mrb[71].mxu1  ;;  %v12415_v56 = vpack.c.bf16 %v12382_v55, %v12344_v22  ;;  %vm14303_vm1 = vmmov %vm14301_vm10  ;;  %vm14306_vm11 = vnez %v14305_v61 }
 0x3f5   :  { %v3106_v36 = vrot.slane %v12400_v12, 7  ;;  %v3141_v57 = vrot.slane %v12400_v12, 1  ;;  %v3009_v0 = vadd.f32 %v8839_v29, %v12285_v30  ;;  %v8842_v54 = vadd.f32 %v8841_v17, %v8840_v4  ;;  %9008 = vmatpush3.bf16.msra.mxu0 %v10103_v49  ;;  %v10109_v30 = vld [vmem:[%s13888_s10 + $0x1e0] sm:$0xff]  }
 0x3f6   :  { %3824 = vmatprep.mubr.bf16.mxu1 %v12415_v56  ;;  %8970 = vmatpush3.bf16.msra.mxu1 %v10104_v23  ;;  %v3105_v50 = vsel %vm14300_vm4, %v3102_v1, %v3104_v35  ;;  %v12429_v8 = vsel %vm14301_vm10, %v3137_v39, %v3139_v32  ;;  %v3184_v18 = vpack.c.bf16 %v12400_v12, %v12382_v55  ;;  %vm14310_vm10 = vmmov %vm14300_vm4  ;;  %v10130_v55 = vld [vmem:[%s13888_s10 + $0x238] sm:$0xff]  }
 0x3f7   :  { %v3074_v31 = vadd.f32 %v12246_v28, %v3009_v0  ;;  %v3012_v14 = vadd.f32 %v8842_v54, %v12288_v59  ;;  %9009 = vmatprep.subr.bf16.mxu0 %v10105_v6  ;;  %v12438_v33 = vpack.c.bf16 %v3105_v50, %v3103_v37  ;;  %8971 = vmatprep.subr.bf16.mxu1 %v10106_v24  ;;  %v14304_v28 = vld [vmem:[#allocation75_spill] sm:$0xff] }
 0x3f8   :  { %v3107_v16 = vsel %vm14302_vm5, %v3104_v35, %v3106_v36  ;;  %v12445_v10 = vsel %vm14303_vm1, %v3139_v32, %v3141_v57  ;;  %v8338_v48 = vpack.c.bf16 %v12429_v8, %v12378_v51  ;;  %v10115_v32 = vld [vmem:[%s13888_s10 + $0x1a8] sm:$0xff]   ;;  %v10116_v6 = vld [vmem:[%s13888_s10 + $0x130] sm:$0xff]   ;;  %vm14311_vm5 = vmmov %vm14303_vm1 }
 0x3f9   :  { %v12449_v19 = vmax.f32 %v3074_v31, 0.0  ;;  %v3077_v59 = vadd.f32 %v14304_v28, %v3012_v14  ;;  %8306 = vmatmul.mubr.msk.bf16.gmra.mrb[80].mxu1 %vm14306_vm11, %v12438_v33  ;;  %9010 = vmatpush3.bf16.msra.mxu0 %v10107_v53  ;;  %v8323_v1 = vpack.c.bf16 %v3107_v16, %v3105_v50  ;;  %v12457_v39 = vpack.c.bf16 %v12445_v10, %v12429_v8  ;;  %v10117_v0 = vld [vmem:[%s13888_s10 + $0x1f0] sm:$0xff]   ;;  %v14312_v14 = vld [vmem:[#allocation64_spill] sm:$0xff] }
 0x3fa   :  { %8972 = vmatpush3.bf16.msra.mxu1 %v10108_v58  ;;  %9011 = vmatprep.subr.bf16.mxu0 %v10109_v30  ;;  %v10118_v58 = vld [vmem:[%s13888_s10 + $0x178] sm:$0xff]  }
 0x3fb   :  { %v3108_v44 = vrot.slane %v12449_v19, 7  ;;  %v3143_v9 = vrot.slane %v12449_v19, 1  ;;  %v12470_v37 = vmax.f32 %v3077_v59, 0.0  ;;  %8324 = vmatprep.mubr.msk.bf16.mxu0 %vm11931_vm15, %v8323_v1  ;;  %8973 = vmatprep.subr.bf16.mxu1 %v10110_v47  ;;  %v3173_v34 = vpack.c.bf16 %v12449_v19, %v12400_v12  ;;  %vm14309_vm15 = vmmov %vm14303_vm1  ;;  %v10119_v47 = vld [vmem:[%s13888_s10 + $0x1b0] sm:$0xff]   ;;  %v10121_v28 = vld [vmem:[%s13888_s10 + $0x1f8] sm:$0xff]  }
 0x3fc   :  { %8327 = vmatmul.mubr.msk.bf16.gmra.mrb[104].mxu0 %vm11611_vm6, %v12457_v39  ;;  %v14316_v1 = vld [vmem:[#allocation88_spill] sm:$0xff]  ;;  %v14323_v12 = vld [vmem:[#allocation94_spill] sm:$0xff] }
 0x3fd   :  { %v3110_v3 = vrot.slane %v12470_v37, 7  ;;  %v3145_v23 = vrot.slane %v12470_v37, 1  ;;  %9012 = vmatpush3.bf16.msra.mxu0 %v10111_v42  ;;  %3832 = vmatprep.mubr.bf16.mxu1 %v3173_v34  ;;  %v3109_v35 = vsel %vm14300_vm4, %v3106_v36, %v3108_v44  ;;  %v3144_v29 = vsel %vm14309_vm15, %v3141_v57, %v3143_v9 }
 0x3fe   :  { %8974 = vmatpush3.bf16.msra.mxu1 %v10112_v62  ;;  %9013 = vmatprep.subr.bf16.mxu0 %v10113_v15  ;;  %v8308_v4 = vpack.c.bf16 %v3109_v35, %v3107_v16  ;;  %v8341_v24 = vpack.c.bf16 %v3144_v29, %v12445_v10  ;;  %v3185_v54 = vpack.c.bf16 %v12470_v37, %v12449_v19  ;;  %v10120_v19 = vld [vmem:[%s13888_s10 + $0x138] sm:$0xff]  }
 0x3ff   :  { %8975 = vmatprep.subr.bf16.mxu1 %v10114_v63  ;;  %v12494_v17 = vsel %vm14310_vm10, %v3108_v44, %v3110_v3  ;;  %v3146_v36 = vsel %vm14311_vm5, %v3143_v9, %v3145_v23  ;;  %v12502_v57 = vsel %vm14303_vm1, %v3145_v23, %v11484_v40  ;;  %v3112_v31 = vsel %vm14300_vm4, %v3110_v3, %v11206_v7  ;;  %vm14338_vm5 = vmmov %vm14303_vm1 }
 0x400   :  { %v8329_v53 = vpack.c.bf16 %v12494_v17, %v3109_v35  ;;  %v12507_v50 = vpack.c.bf16 %v3146_v36, %v3144_v29  ;;  %v8344_v30 = vpack.c.bf16 %v12502_v57, %v3146_v36  ;;  %vm14313_vm15 = vnez %v14312_v14 }
 0x401   :  { %8309 = vmatmul.mubr.msk.bf16.gmra.mrb[84].mxu1 %vm14313_vm15, %v8308_v4  ;;  %9014 = vmatpush3.bf16.msra.mxu0 %v10115_v32  ;;  %v8356_v16 = vpack.c.bf16 %v3112_v31, %v12494_v17  ;;  %vm14317_vm10 = vnez %v14316_v1  ;;  %v3191_v51 = vpack.c.bf16 %v14119_v26, %v12470_v37 }
 0x402   :  { %8976 = vmatpush3.bf16.msra.mxu1 %v10116_v6  ;;  %8336 = vmatprep.mubr.msk.bf16.mxu1 %vm11967_vm0, %v8335_v43  ;;  %vm14329_vm0 = vmmov %vm14300_vm4 }
 0x403   :  { %8330 = vmatprep.mubr.msk.bf16.mxu0 %vm11948_vm2, %v8329_v53  ;;  %9015 = vmatprep.subr.bf16.mxu0 %v10117_v0  ;;  %vm14330_vm2 = vmmov %vm14303_vm1 }
 0x404   :  { %8333 = vmatmul.mubr.msk.bf16.gmra.mrb[108].mxu0 %vm14317_vm10, %v12507_v50  ;;  %8977 = vmatprep.subr.bf16.mxu1 %v10118_v58 }
 0x405   :  { %9016 = vmatpush3.bf16.msra.mxu0 %v10119_v47  ;;  %4003 = vmatprep.mubr.bf16.mxu0 %v12348_v5  ;;  %v10124_v5 = vld [vmem:[%s13888_s10 + $0x208] sm:$0xff]  }
 0x406   :  { %8978 = vmatpush3.bf16.msra.mxu1 %v10120_v19  ;;  %9017 = vmatprep.subr.bf16.mxu0 %v10121_v28 }
 0x407   :  { %9417 = vmatprep.subr.bf16.mxu1 %v10131_v45 }
 0x409   :  { %3939 = vmatmul.mubr.bf16.vlgmr.msra.gmra.mrb[88].mxu1 %v3182_v11  ;;  %9018 = vmatpush3.bf16.msra.mxu0 %v10122_v2  ;;  %v10126_v11 = vld [vmem:[%s13888_s10 + $0x218] sm:$0xff]  }
 0x40a   :  { %8339 = vmatprep.mubr.msk.bf16.mxu1 %vm11988_vm13, %v8338_v48  ;;  %9393 = vmatprep.subr.bf16.mxu0 %v10123_v20  ;;  %v12624_v48 = vld [vmem:[%s14325_s20] sm:$0xff]   ;;  %vm4235_vm13 = vcmask 523264  }
 0x40b   :  { %9418 = vmatpush3.bf16.msra.mxu1 %v10131_v45 }
 0x40c   :  { %8348 = vmatmul.mubr.msk.bf16.vlgmr.msra.gmra.mrb[112].mxu0 %vm14299_vm9, %v12369_v38  ;;  %v10128_v38 = vld [vmem:[%s13888_s10 + $0x228] sm:$0xff]   ;;  %vm14336_vm9 = vmmov %vm14329_vm0 }
 0x40d   :  { %4011 = vmatprep.mubr.bf16.mxu0 %v12415_v56  ;;  %9394 = vmatpush3.bf16.msra.mxu0 %v10123_v20  ;;  %v8368_v56 = vpack.c.bf16 %v14323_v12, %v12502_v57 }
 0x40e   :  { %9395 = vmatprep.subr.bf16.mxu0 %v10124_v5 }
 0x411   :  { %3947 = vmatmul.mubr.bf16.gmra.mrb[92].mxu1 %v3183_v46  ;;  %9396 = vmatpush3.bf16.msra.mxu0 %v10124_v5  ;;  %v10129_v46 = vld [vmem:[%s13888_s10 + $0x230] sm:$0xff]  }
 0x412   :  { %8342 = vmatprep.mubr.msk.bf16.mxu1 %vm12009_vm12, %v8341_v24  ;;  %9397 = vmatprep.subr.bf16.mxu0 %v10125_v21  ;;  %vm14322_vm12 = vnez %v14321_v41 }
 0x414   :  { %8351 = vmatmul.mubr.msk.bf16.gmra.mrb[116].mxu0 %vm14306_vm11, %v12438_v33  ;;  %v10134_v33 = vld [vmem:[%s14325_s20 + $0x38] sm:$0xff]   ;;  %vm14337_vm11 = vmmov %vm14329_vm0 }
 0x415   :  { %4019 = vmatprep.mubr.bf16.mxu0 %v3173_v34  ;;  %9398 = vmatpush3.bf16.msra.mxu0 %v10125_v21 }
 0x416   :  { %9399 = vmatprep.subr.bf16.mxu0 %v10126_v11 }
 0x419   :  { %3955 = vmatmul.mubr.bf16.gmra.mrb[96].mxu1 %v3184_v18  ;;  %9400 = vmatpush3.bf16.msra.mxu0 %v10126_v11  ;;  %v10133_v18 = vld [vmem:[%s14325_s20 + $0x30] sm:$0xff]  }
 0x41a   :  { %8345 = vmatprep.mubr.msk.bf16.mxu1 %vm12030_vm3, %v8344_v30  ;;  %9401 = vmatprep.subr.bf16.mxu0 %v10127_v60 }
 0x41c   :  { %8354 = vmatmul.mubr.msk.bf16.gmra.mrb[120].mxu0 %vm14313_vm15, %v8308_v4 }
 0x41d   :  { %4027 = vmatprep.mubr.bf16.mxu0 %v3191_v51  ;;  %9402 = vmatpush3.bf16.msra.mxu0 %v10127_v60 }
 0x41e   :  { %9403 = vmatprep.subr.bf16.mxu0 %v10128_v38 }
 0x421   :  { %3963 = vmatmul.mubr.bf16.gmra.mrb[100].mxu1 %v3185_v54  ;;  %9404 = vmatpush3.bf16.msra.mxu0 %v10128_v38 }
 0x422   :  { %9405 = vmatprep.subr.bf16.mxu0 %v10129_v46 }
 0x424   :  { %8357 = vmatmul.mubr.msk.bf16.gmra.mrb[124].mxu0 %vm14322_vm12, %v8356_v16  ;;  %vm14347_vm12 = vmmov %vm14330_vm2 }
 0x425   :  { %9406 = vmatpush3.bf16.msra.mxu0 %v10129_v46  ;;  %9409 = vmatprep.mubr.msk.bf16.mxu0 %vm11559_vm8, %v12390_v25  ;;  %v10132_v25 = vld [vmem:[%s14325_s20 + $0x28] sm:$0xff]  }
 0x426   :  { %9407 = vmatprep.subr.bf16.mxu0 %v10130_v55  ;;  %9419 = vmatprep.subr.bf16.mxu1 %v10132_v25 }
 0x427   :  { %9420 = vmatpush3.bf16.msra.mxu1 %v10132_v25 }
 0x428   :  { %9421 = vmatprep.subr.bf16.mxu1 %v10133_v18 }
 0x429   :  { %9408 = vmatpush3.bf16.msra.mxu0 %v10130_v55 }
 0x42b   :  { %9422 = vmatpush3.bf16.msra.mxu1 %v10133_v18 }
 0x42c   :  { %9410 = vmatmul.mubr.msk.bf16.vlgmr.msra.gmra.mrb[128].mxu0 %vm11611_vm6, %v12457_v39  ;;  %9423 = vmatprep.subr.bf16.mxu1 %v10134_v33  ;;  %v8225_v39 = vld [vmem:[#allocation18] ss:$0 sm:$0xff]  ;;  %vm14333_vm6 = vmmov %vm14329_vm0 }
 0x42d   :  { %9413 = vmatprep.mubr.msk.bf16.mxu0 %vm14317_vm10, %v12507_v50 }
 0x42f   :  { %9424 = vmatpush3.bf16.msra.mxu1 %v10134_v33 }
 0x430   :  { %9433 = vmatprep.subr.bf16.mxu1 %v12624_v48 }
 0x434   :  { %9414 = vmatmul.mubr.msk.bf16.gmra.mrb[132].mxu0 %vm11852_vm7, %v8368_v56 }
 0x4bb   :  { %v8899_v61 = vpop.f32.mrb[72].mxu1 }
 0x4bc   :  { %v8900_v42 = vpop.f32.mrb[73].mxu1 }
 0x4bd   :  { %v8901_v62 = vadd.f32 %v8900_v42, %v8899_v61  ;;  %v8902_v15 = vpop.f32.mrb[74].mxu1 }
 0x4be   :  { %v8903_v44 = vpop.f32.mrb[75].mxu1  ;;  %v8939_v9 = vpop.f32.mrb[96].mxu0 }
 0x4bf   :  { %v3811_v37 = vadd.f32 %v8901_v62, %v8225_v39  ;;  %v8904_v52 = vadd.f32 %v8903_v44, %v8902_v15  ;;  %v8940_v34 = vpop.f32.mrb[97].mxu0 }
 0x4c0   :  { %v8941_v63 = vadd.f32 %v8940_v34, %v8939_v9  ;;  %v8942_v49 = vpop.f32.mrb[98].mxu0 }
 0x4c1   :  { %v3814_v3 = vadd.f32 %v8904_v52, %v8225_v39  ;;  %v8943_v23 = vpop.f32.mrb[99].mxu0 }
 0x4c2   :  { %v3876_v35 = vadd.f32 %v8941_v63, %v3811_v37  ;;  %v8944_v32 = vadd.f32 %v8943_v23, %v8942_v49 }
 0x4c4   :  { %v3879_v29 = vadd.f32 %v8944_v32, %v3814_v3  ;;  %v8905_v4 = vpop.f32.mrb[76].mxu1 }
 0x4c5   :  { %v8906_v6 = vpop.f32.mrb[77].mxu1 }
 0x4c6   :  { %v8907_v24 = vadd.f32 %v8906_v6, %v8905_v4  ;;  %v8908_v17 = vpop.f32.mrb[78].mxu1 }
 0x4c7   :  { %v8909_v36 = vpop.f32.mrb[79].mxu1  ;;  %v8945_v0 = vpop.f32.mrb[100].mxu0 }
 0x4c8   :  { %v3819_v57 = vadd.f32 %v8907_v24, %v8225_v39  ;;  %v8910_v54 = vadd.f32 %v8909_v36, %v8908_v17  ;;  %v8946_v53 = vpop.f32.mrb[101].mxu0 }
 0x4c9   :  { %v8947_v50 = vadd.f32 %v8946_v53, %v8945_v0  ;;  %v8948_v58 = vpop.f32.mrb[102].mxu0 }
 0x4ca   :  { %v3822_v30 = vadd.f32 %v8910_v54, %v8225_v39  ;;  %v8949_v31 = vpop.f32.mrb[103].mxu0 }
 0x4cb   :  { %v3884_v14 = vadd.f32 %v8947_v50, %v3819_v57  ;;  %v8950_v47 = vadd.f32 %v8949_v31, %v8948_v58 }
 0x4cc   :  { %v8911_v16 = vpop.f32.mrb[80].mxu1 }
 0x4cd   :  { %v3887_v10 = vadd.f32 %v8950_v47, %v3822_v30  ;;  %v8912_v19 = vpop.f32.mrb[81].mxu1 }
 0x4ce   :  { %v8913_v28 = vadd.f32 %v8912_v19, %v8911_v16  ;;  %v8914_v59 = vpop.f32.mrb[82].mxu1 }
 0x4cf   :  { %v8915_v1 = vpop.f32.mrb[83].mxu1  ;;  %v8951_v2 = vpop.f32.mrb[104].mxu0 }
 0x4d0   :  { %v3827_v20 = vadd.f32 %v8913_v28, %v8225_v39  ;;  %v8916_v43 = vadd.f32 %v8915_v1, %v8914_v59  ;;  %v8952_v5 = vpop.f32.mrb[105].mxu0 }
 0x4d1   :  { %v8953_v21 = vadd.f32 %v8952_v5, %v8951_v2  ;;  %v8954_v27 = vpop.f32.mrb[106].mxu0 }
 0x4d2   :  { %v3830_v11 = vadd.f32 %v8916_v43, %v8225_v39  ;;  %v8955_v60 = vpop.f32.mrb[107].mxu0 }
 0x4d3   :  { %v3892_v22 = vadd.f32 %v8953_v21, %v3827_v20  ;;  %v8956_v38 = vadd.f32 %v8955_v60, %v8954_v27 }
 0x4d4   :  { %v8917_v51 = vpop.f32.mrb[84].mxu1 }
 0x4d5   :  { %v3895_v46 = vadd.f32 %v8956_v38, %v3830_v11  ;;  %v8918_v55 = vpop.f32.mrb[85].mxu1 }
 0x4d6   :  { %v8919_v41 = vadd.f32 %v8918_v55, %v8917_v51  ;;  %v8920_v56 = vpop.f32.mrb[86].mxu1 }
 0x4d7   :  { %v8921_v8 = vpop.f32.mrb[87].mxu1  ;;  %v8957_v45 = vpop.f32.mrb[108].mxu0 }
 0x4d8   :  { %v3835_v25 = vadd.f32 %v8919_v41, %v8225_v39  ;;  %v8922_v18 = vadd.f32 %v8921_v8, %v8920_v56  ;;  %v8958_v33 = vpop.f32.mrb[109].mxu0 }
 0x4d9   :  { %v8959_v61 = vadd.f32 %v8958_v33, %v8957_v45  ;;  %v8960_v42 = vpop.f32.mrb[110].mxu0 }
 0x4da   :  { %v3838_v62 = vadd.f32 %v8922_v18, %v8225_v39  ;;  %v8961_v15 = vpop.f32.mrb[111].mxu0 }
 0x4db   :  { %v3900_v44 = vadd.f32 %v8959_v61, %v3835_v25  ;;  %v8962_v9 = vadd.f32 %v8961_v15, %v8960_v42 }
 0x4dc   :  { %v8979_v37 = vpop.f32.mrb[88].mxu1 }
 0x4dd   :  { %v3903_v52 = vadd.f32 %v8962_v9, %v3838_v62  ;;  %v8980_v34 = vpop.f32.mrb[89].mxu1 }
 0x4de   :  { %v8981_v63 = vadd.f32 %v8980_v34, %v8979_v37  ;;  %v8982_v49 = vpop.f32.mrb[90].mxu1 }
 0x4df   :  { %v8983_v3 = vpop.f32.mrb[91].mxu1  ;;  %v9019_v23 = vpop.f32.mrb[112].mxu0 }
 0x4e0   :  { %v3941_v32 = vadd.f32 %v8981_v63, %v3876_v35  ;;  %v8984_v4 = vadd.f32 %v8983_v3, %v8982_v49  ;;  %v9020_v6 = vpop.f32.mrb[113].mxu0 }
 0x4e1   :  { %v9021_v24 = vadd.f32 %v9020_v6, %v9019_v23  ;;  %v9022_v17 = vpop.f32.mrb[114].mxu0 }
 0x4e2   :  { %v3944_v36 = vadd.f32 %v8984_v4, %v3879_v29  ;;  %v9023_v0 = vpop.f32.mrb[115].mxu0 }
 0x4e3   :  { %v9024_v57 = vadd.f32 %v9023_v0, %v9022_v17  ;;  %v4006_v54 = vadd.f32 %v9021_v24, %v3941_v32 }
 0x4e4   :  { %v8985_v39 = vpop.f32.mrb[92].mxu1 }
 0x4e5   :  { %v8986_v53 = vpop.f32.mrb[93].mxu1  ;;  %v4009_v50 = vadd.f32 %v9024_v57, %v3944_v36 }
 0x4e6   :  { %v8987_v58 = vadd.f32 %v8986_v53, %v8985_v39  ;;  %v8988_v30 = vpop.f32.mrb[94].mxu1 }
 0x4e7   :  { %v8989_v31 = vpop.f32.mrb[95].mxu1  ;;  %v9025_v47 = vpop.f32.mrb[116].mxu0 }
 0x4e8   :  { %v3949_v16 = vadd.f32 %v8987_v58, %v3884_v14  ;;  %v8990_v19 = vadd.f32 %v8989_v31, %v8988_v30  ;;  %v9026_v28 = vpop.f32.mrb[117].mxu0  ;;  %v10143_v31 = vld [vmem:[%s14325_s20 + $0x60] sm:$0xff]  }
 0x4e9   :  { %v9027_v59 = vadd.f32 %v9026_v28, %v9025_v47  ;;  %v9028_v35 = vpop.f32.mrb[118].mxu0  ;;  %v1281_v47 = vsel %vm11840_vm14, %v14323_v12, 0.0  ;;  %v10142_v12 = vld [vmem:[%s14325_s20 + $0x58] sm:$0xff]   ;;  %vm5445_vm14 = vcmask 261120  }
 0x4ea   :  { %v3952_v1 = vadd.f32 %v8990_v19, %v3887_v10  ;;  %v9029_v2 = vpop.f32.mrb[119].mxu0 }
 0x4eb   :  { %v9030_v20 = vadd.f32 %v9029_v2, %v9028_v35  ;;  %v4014_v43 = vadd.f32 %v9027_v59, %v3949_v16 }
 0x4ec   :  { %v8991_v29 = vpop.f32.mrb[96].mxu1 }
 0x4ed   :  { %v8992_v5 = vpop.f32.mrb[97].mxu1  ;;  %v4017_v21 = vadd.f32 %v9030_v20, %v3952_v1 }
 0x4ee   :  { %v8993_v27 = vadd.f32 %v8992_v5, %v8991_v29  ;;  %v8994_v11 = vpop.f32.mrb[98].mxu1 }
 0x4ef   :  { %v8995_v60 = vpop.f32.mrb[99].mxu1  ;;  %v9031_v38 = vpop.f32.mrb[120].mxu0 }
 0x4f0   :  { %v3957_v51 = vadd.f32 %v8993_v27, %v3892_v22  ;;  %v8996_v55 = vadd.f32 %v8995_v60, %v8994_v11  ;;  %v9032_v41 = vpop.f32.mrb[121].mxu0 }
 0x4f1   :  { %v9033_v56 = vadd.f32 %v9032_v41, %v9031_v38  ;;  %v9034_v14 = vpop.f32.mrb[122].mxu0 }
 0x4f2   :  { %v3960_v8 = vadd.f32 %v8996_v55, %v3895_v46  ;;  %v9035_v45 = vpop.f32.mrb[123].mxu0 }
 0x4f3   :  { %v9036_v25 = vadd.f32 %v9035_v45, %v9034_v14  ;;  %v12627_v18 = vadd.f32 %v9033_v56, %v3957_v51  ;;  %v14331_v51 = vld [vmem:[#allocation48_spill] sm:$0xff]  ;;  %v14334_v56 = vld [vmem:[#allocation73_spill] sm:$0xff] }
 0x4f4   :  { %v8997_v10 = vpop.f32.mrb[100].mxu1  ;;  %vm14332_vm3 = vnez %v14331_v51  ;;  %vm14335_vm7 = vnez %v14334_v56  ;;  %v14356_v51 = vld [vmem:[#allocation58_spill] sm:$0xff] }
 0x4f5   :  { %v8998_v33 = vpop.f32.mrb[101].mxu1  ;;  %v12629_v61 = vadd.f32 %v9036_v25, %v3960_v8 }
 0x4f6   :  { %v8999_v42 = vadd.f32 %v8998_v33, %v8997_v10  ;;  %v9000_v62 = vpop.f32.mrb[102].mxu1  ;;  %v14339_v33 = vld [vmem:[#allocation51_spill] sm:$0xff] }
 0x4f7   :  { %v9001_v15 = vpop.f32.mrb[103].mxu1  ;;  %v9037_v9 = vpop.f32.mrb[124].mxu0  ;;  %vm14340_vm1 = vnez %v14339_v33  ;;  %v14362_v33 = vld [vmem:[#allocation63_spill] sm:$0xff] }
 0x4f8   :  { %v3965_v37 = vadd.f32 %v8999_v42, %v3900_v44  ;;  %v9002_v34 = vadd.f32 %v9001_v15, %v9000_v62  ;;  %v9038_v22 = vpop.f32.mrb[125].mxu0  ;;  %v14326_v44 = vld [vmem:[#allocation47_spill] sm:$0xff]  ;;  %v14341_v62 = vld [vmem:[#allocation52_spill] sm:$0xff] }
 0x4f9   :  { %v9039_v63 = vadd.f32 %v9038_v22, %v9037_v9  ;;  %v9040_v49 = vpop.f32.mrb[126].mxu0  ;;  %vm14327_vm8 = vnez %v14326_v44  ;;  %vm14342_vm4 = vnez %v14341_v62  ;;  %v14343_v9 = vld [vmem:[#allocation72_spill] sm:$0xff]  ;;  %v14349_v44 = vld [vmem:[#allocation66_spill] sm:$0xff] }
 0x4fa   :  { %v3968_v3 = vadd.f32 %v9002_v34, %v3903_v52  ;;  %v9041_v23 = vpop.f32.mrb[127].mxu0  ;;  %v1168_v58 = vsel %vm14327_vm8, %v14286_v13, 0.0  ;;  %vm14344_vm15 = vnez %v14343_v9  ;;  %vm14348_vm8 = vmmov %vm14330_vm2 }
 0x4fb   :  { %v9042_v46 = vadd.f32 %v9041_v23, %v9040_v49  ;;  %v4030_v32 = vadd.f32 %v9039_v63, %v3965_v37 }
 0x4fd   :  { %v4033_v4 = vadd.f32 %v9042_v46, %v3968_v3  ;;  %v10137_v46 = vld [vmem:[%s14325_s20 + $0x10] sm:$0xff]  }
 0x4ff   :  { %v9411_v6 = vpop.f32.mrb[128].mxu0 }
 0x500   :  { %v4079_v24 = vadd.f32 %v9411_v6, %v4014_v43  ;;  %v4070_v17 = vpop.f32.mrb[129].mxu0 }
 0x501   :  { %v4071_v36 = vadd.f32 %v4070_v17, %v4006_v54  ;;  %v9412_v0 = vpop.f32.mrb[130].mxu0 }
 0x502   :  { %v12631_v57 = vmax.f32 %v4079_v24, 0.0  ;;  %v4082_v39 = vadd.f32 %v9412_v0, %v4017_v21  ;;  %v4073_v53 = vpop.f32.mrb[131].mxu0  ;;  %v10136_v21 = vld [vmem:[%s14325_s20 + $0x8] sm:$0xff]  }
 0x503   :  { %v12636_v30 = vmax.f32 %v4071_v36, 0.0  ;;  %v4074_v52 = vadd.f32 %v4073_v53, %v4009_v50  ;;  %v14345_v0 = vld [vmem:[#allocation57_spill] sm:$0xff] }
 0x504   :  { %v4121_v16 = vrot.slane %v12631_v57, 7  ;;  %v12642_v19 = vmax.f32 %v4082_v39, 0.0  ;;  %v4156_v54 = vrot.slane %v12631_v57, 1  ;;  %vm14346_vm10 = vnez %v14345_v0 }
 0x505   :  { %v4117_v28 = vrot.slane %v12636_v30, 7  ;;  %v12646_v59 = vmax.f32 %v4074_v52, 0.0  ;;  %v4199_v13 = vpack.c.bf16 %v12636_v30, %v14119_v26  ;;  %v4152_v50 = vrot.slane %v12636_v30, 1 }
 0x506   :  { %v4123_v35 = vrot.slane %v12642_v19, 7  ;;  %v4158_v1 = vrot.slane %v12642_v19, 1  ;;  %v4657_v2 = vpack.c.bf16 %v12642_v19, %v12631_v57 }
 0x507   :  { %v4119_v20 = vrot.slane %v12646_v59, 7  ;;  %v4154_v43 = vrot.slane %v12646_v59, 1  ;;  %v12659_v29 = vpack.c.bf16 %v12631_v57, %v12646_v59  ;;  %v9415_v5 = vpop.f32.mrb[132].mxu0  ;;  %9425 = vmatprep.mubr.msk.bf16.mxu1 %vm4235_vm13, %v4199_v13  ;;  %v4118_v27 = vsel %vm14329_vm0, %v11206_v7, %v4117_v28  ;;  %v10138_v13 = vld [vmem:[%s14325_s20 + $0x18] sm:$0xff]   ;;  %v10155_v57 = vld [vmem:[%s14325_s20 + $0xc0] sm:$0xff]  }
 0x508   :  { %v4159_v11 = vsel %vm14330_vm2, %v4156_v54, %v4158_v1  ;;  %v4095_v60 = vadd.f32 %v9415_v5, %v4030_v32  ;;  %v4086_v38 = vpop.f32.mrb[133].mxu0  ;;  %v12670_v55 = vsel %vm14332_vm3, %v4118_v27, 0.0  ;;  %v4124_v41 = vsel %vm14333_vm6, %v4121_v16, %v4123_v35  ;;  %vm14351_vm2 = vmmov %vm14333_vm6  ;;  %v14352_v27 = vld [vmem:[#allocation67_spill] sm:$0xff] }
 0x509   :  { %v12675_v14 = vsel %vm14335_vm7, %v4159_v11, 0.0  ;;  %v4120_v8 = vsel %vm14336_vm9, %v4117_v28, %v4119_v20  ;;  %v4122_v45 = vsel %vm14337_vm11, %v4119_v20, %v4121_v16  ;;  %v4157_v25 = vsel %vm14338_vm5, %v4154_v43, %v4156_v54  ;;  %v9416_v10 = vpop.f32.mrb[134].mxu0  ;;  %9426 = vmatmul.mubr.msk.bf16.vlgmr.msra.gmra.mrb[104].mxu1 %vm4235_vm13, %v12659_v29  ;;  %vm14354_vm6 = vmmov %vm14338_vm5 }
 0x50a   :  { %v12684_v42 = vsel %vm14340_vm1, %v4120_v8, 0.0  ;;  %v12688_v15 = vsel %vm14342_vm4, %v4122_v45, 0.0  ;;  %v12692_v37 = vsel %vm14344_vm15, %v4157_v25, 0.0  ;;  %v12694_v34 = vmax.f32 %v4095_v60, 0.0  ;;  %v4089_v22 = vpop.f32.mrb[135].mxu0  ;;  %9434 = vmatpush3.bf16.msra.mxu1 %v12624_v48  ;;  %vm14355_vm7 = vmmov %vm14338_vm5  ;;  %v14360_v25 = vld [vmem:[#allocation62_spill] sm:$0xff] }
 0x50b   :  { %v12699_v63 = vpack.c.bf16 %v12688_v15, %v12684_v42  ;;  %v12703_v49 = vpack.c.bf16 %v12675_v14, %v12692_v37  ;;  %v4087_v3 = vadd.f32 %v4086_v38, %v12627_v18  ;;  %v4098_v23 = vadd.f32 %v9416_v10, %v4033_v4  ;;  %9435 = vmatprep.subr.bf16.mxu1 %v10136_v21  ;;  %vm14358_vm11 = vmmov %vm14351_vm2 }
 0x50c   :  { %v4129_v32 = vrot.slane %v12694_v34, 7  ;;  %v4164_v48 = vrot.slane %v12694_v34, 1  ;;  %v4090_v6 = vadd.f32 %v4089_v22, %v12629_v61  ;;  %v4187_v24 = vpack.c.bf16 %v12670_v55, %v1168_v58  ;;  %vm14359_vm5 = vmmov %vm14351_vm2 }
 0x50d   :  { %v12713_v17 = vmax.f32 %v4087_v3, 0.0  ;;  %v12715_v36 = vmax.f32 %v4098_v23, 0.0  ;;  %v12719_v18 = vsel %vm14346_vm10, %v4124_v41, 0.0  ;;  %v4153_v4 = vsel %vm14347_vm12, %v11484_v40, %v4152_v50  ;;  %vm14364_vm15 = vmmov %vm14354_vm6  ;;  %v14365_v3 = vld [vmem:[#allocation78_spill] sm:$0xff] }
 0x50e   :  { %v12723_v39 = vmax.f32 %v4090_v6, 0.0  ;;  %9436 = vmatpush3.bf16.msra.mxu1 %v10136_v21  ;;  %v4536_v53 = vpack.c.bf16 %v12719_v18, %v12688_v15  ;;  %v4155_v61 = vsel %vm14348_vm8, %v4152_v50, %v4154_v43  ;;  %vm14350_vm0 = vnez %v14349_v44  ;;  %vm14369_vm8 = vmmov %vm14354_vm6  ;;  %v10151_v15 = vld [vmem:[%s14325_s20 + $0xa0] sm:$0xff]  }
 0x50f   :  { %v4178_v58 = vsel %vm14350_vm0, %v4153_v4, 0.0  ;;  %v4125_v52 = vrot.slane %v12713_v17, 7  ;;  %v4160_v16 = vrot.slane %v12713_v17, 1  ;;  %v4131_v54 = vrot.slane %v12715_v36, 7  ;;  %9437 = vmatprep.subr.bf16.mxu1 %v10137_v46 }
 0x510   :  { %v4166_v28 = vrot.slane %v12715_v36, 1  ;;  %v4127_v20 = vrot.slane %v12723_v39, 7  ;;  %v4162_v50 = vrot.slane %v12723_v39, 1  ;;  %v12741_v43 = vpack.c.bf16 %v12713_v17, %v12642_v19  ;;  %v10156_v19 = vld [vmem:[%s14325_s20 + $0xc8] sm:$0xff]  }
 0x511   :  { %v12745_v5 = vpack.c.bf16 %v12694_v34, %v12723_v39  ;;  %v4126_v21 = vsel %vm14351_vm2, %v4123_v35, %v4125_v52  ;;  %vm14353_vm3 = vnez %v14352_v27  ;;  %v4161_v60 = vsel %vm14354_vm6, %v4158_v1, %v4160_v16  ;;  %v10139_v1 = vld [vmem:[%s14325_s20 + $0x40] sm:$0xff]  }
 0x512   :  { %v12750_v11 = vsel %vm14353_vm3, %v4155_v61, 0.0  ;;  %v4167_v38 = vsel %vm14355_vm7, %v4164_v48, %v4166_v28  ;;  %9429 = vmatprep.mubr.msk.bf16.mxu1 %vm4235_vm13, %v12741_v43  ;;  %9438 = vmatpush3.bf16.msra.mxu1 %v10137_v46  ;;  %vm14357_vm9 = vnez %v14356_v51  ;;  %v4128_v56 = vsel %vm14358_vm11, %v4125_v52, %v4127_v20  ;;  %v14367_v46 = vld [vmem:[#allocation79_spill] sm:$0xff]  ;;  %v14370_v61 = vld [vmem:[#allocation85_spill] sm:$0xff]  ;;  %vm14374_vm3 = vmmov %vm14359_vm5 }
 0x513   :  { %v12758_v41 = vsel %vm14357_vm9, %v4126_v21, 0.0  ;;  %v4130_v35 = vsel %vm14359_vm5, %v4127_v20, %v4129_v32  ;;  %v4414_v8 = vpack.c.bf16 %v12750_v11, %v4178_v58  ;;  %9430 = vmatmul.mubr.msk.bf16.gmra.mrb[108].mxu1 %vm4235_vm13, %v12745_v5  ;;  %9439 = vmatprep.subr.bf16.mxu1 %v10138_v13  ;;  %vm14361_vm1 = vnez %v14360_v25  ;;  %v14372_v58 = vld [vmem:[#allocation86_spill] sm:$0xff]  ;;  %v14375_v21 = vld [vmem:[#allocation89_spill] sm:$0xff]  ;;  %vm14379_vm11 = vmmov %vm14374_vm3 }
 0x514   :  { %v12770_v45 = vpack.c.bf16 %v12758_v41, %v12719_v18  ;;  %v12774_v10 = vsel %vm14361_vm1, %v4128_v56, 0.0  ;;  %vm14363_vm4 = vnez %v14362_v33  ;;  %v4163_v9 = vsel %vm14364_vm15, %v4160_v16, %v4162_v50  ;;  %9441 = vmatprep.mubr.msk.bf16.mxu1 %vm4235_vm13, %v4187_v24  ;;  %v14380_v56 = vld [vmem:[#allocation90_spill] sm:$0xff]  ;;  %v10150_v33 = vld [vmem:[%s14325_s20 + $0x98] sm:$0xff]  }
 0x515   :  { %v12778_v62 = vsel %vm14363_vm4, %v4130_v35, 0.0  ;;  %vm14366_vm10 = vnez %v14365_v3  ;;  %vm14368_vm12 = vnez %v14367_v46  ;;  %v4165_v0 = vsel %vm14369_vm8, %v4162_v50, %v4164_v48  ;;  %v10148_v25 = vld [vmem:[%s14325_s20 + $0x88] sm:$0xff]   ;;  %v10166_v3 = vld [vmem:[%s14325_s20 + $0x118] sm:$0xff]  }
 0x516   :  { %v12784_v22 = vpack.c.bf16 %v12778_v62, %v12774_v10  ;;  %v12788_v23 = vsel %vm14366_vm10, %v4161_v60, 0.0  ;;  %v12792_v6 = vsel %vm14368_vm12, %v4163_v9, 0.0  ;;  %vm14371_vm0 = vnez %v14370_v61  ;;  %9440 = vmatpush3.bf16.msra.mxu1 %v10138_v13  ;;  %v10152_v18 = vld [vmem:[%s14325_s20 + $0xa8] sm:$0xff]  }
 0x517   :  { %v12797_v4 = vpack.c.bf16 %v12792_v6, %v12788_v23  ;;  %v4778_v24 = vpack.c.bf16 %v12788_v23, %v12675_v14  ;;  %v12803_v44 = vsel %vm14371_vm0, %v4165_v0, 0.0  ;;  %vm14373_vm2 = vnez %v14372_v58  ;;  %9449 = vmatprep.subr.bf16.mxu1 %v10139_v1  ;;  %v10159_v14 = vld [vmem:[%s14325_s20 + $0xe0] sm:$0xff]   ;;  %v10164_v9 = vld [vmem:[%s14325_s20 + $0x108] sm:$0xff]  }
 0x518   :  { %v12807_v52 = vsel %vm14373_vm2, %v4167_v38, 0.0  ;;  %v4535_v48 = vpack.c.bf16 %v12684_v42, %v12670_v55  ;;  %v4537_v20 = vpack.c.bf16 %v12774_v10, %v12758_v41  ;;  %v4132_v50 = vsel %vm14374_vm3, %v4129_v32, %v4131_v54  ;;  %v10149_v10 = vld [vmem:[%s14325_s20 + $0x90] sm:$0xff]  }
 0x519   :  { %v12811_v16 = vpack.c.bf16 %v12807_v52, %v12803_v44  ;;  %vm14376_vm6 = vnez %v14375_v21  ;;  %v4656_v60 = vpack.c.bf16 %v12646_v59, %v12636_v30  ;;  %v4658_v13 = vpack.c.bf16 %v12723_v39, %v12713_v17  ;;  %v10140_v30 = vld [vmem:[%s14325_s20 + $0x48] sm:$0xff]   ;;  %v14377_v59 = vld [vmem:[#allocation92_spill] sm:$0xff] }
 0x51a   :  { %v4150_v27 = vsel %vm14376_vm6, %v4132_v50, 0.0  ;;  %v4659_v38 = vpack.c.bf16 %v12715_v36, %v12694_v34  ;;  %v4777_v42 = vpack.c.bf16 %v12692_v37, %v12750_v11  ;;  %v4779_v32 = vpack.c.bf16 %v12803_v44, %v12792_v6  ;;  %v10158_v37 = vld [vmem:[%s14325_s20 + $0xd8] sm:$0xff]   ;;  %v10160_v34 = vld [vmem:[%s14325_s20 + $0xe8] sm:$0xff]  }
 0x51b   :  { %v4538_v55 = vpack.c.bf16 %v4150_v27, %v12778_v62  ;;  %v4168_v51 = vsel %vm14355_vm7, %v4166_v28, %v11484_v40  ;;  %vm14378_vm9 = vnez %v14377_v59  ;;  %v4133_v39 = vsel %vm14379_vm11, %v4131_v54, %v11206_v7  ;;  %9442 = vmatmul.mubr.msk.bf16.vlgmr.msra.gmra.mrb[104].mxu1 %vm4235_vm13, %v12699_v63  ;;  %v10141_v7 = vld [vmem:[%s14325_s20 + $0x50] sm:$0xff]   ;;  %v10154_v62 = vld [vmem:[%s14325_s20 + $0xb8] sm:$0xff]  }
 0x51c   :  { %v12838_v17 = vsel %vm14378_vm9, %v4168_v51, 0.0  ;;  %vm14381_vm5 = vnez %v14380_v56  ;;  %9445 = vmatprep.mubr.msk.bf16.mxu1 %vm4235_vm13, %v12770_v45  ;;  %9450 = vmatpush3.bf16.msra.mxu1 %v10139_v1  ;;  %v10145_v54 = vld [vmem:[%s14325_s20 + $0x70] sm:$0xff]   ;;  %v10147_v1 = vld [vmem:[%s14325_s20 + $0x80] sm:$0xff]   ;;  %v10162_v11 = vld [vmem:[%s14325_s20 + $0xf8] sm:$0xff]   ;;  %vm5454_vm1 = vcmask 785408  }
 0x51d   :  { %v4780_v41 = vpack.c.bf16 %v12838_v17, %v12807_v52  ;;  %v4151_v35 = vsel %vm14381_vm5, %v4133_v39, 0.0  ;;  %v12851_v40 = vpack.c.bf16 %v1281_v47, %v12838_v17  ;;  %9451 = vmatprep.subr.bf16.mxu1 %v10140_v30  ;;  %v10144_v47 = vld [vmem:[%s14325_s20 + $0x68] sm:$0xff]  }
 0x51e   :  { %v12855_v28 = vpack.c.bf16 %v4151_v35, %v4150_v27 }
 0x520   :  { %9452 = vmatpush3.bf16.msra.mxu1 %v10140_v30 }
 0x521   :  { %9453 = vmatprep.subr.bf16.mxu1 %v10141_v7 }
 0x523   :  { %9446 = vmatmul.mubr.msk.bf16.gmra.mrb[108].mxu1 %vm4235_vm13, %v12784_v22 }
 0x524   :  { %9454 = vmatpush3.bf16.msra.mxu1 %v10141_v7  ;;  %9457 = vmatprep.mubr.msk.bf16.mxu1 %vm4235_vm13, %v4414_v8  ;;  %v10146_v8 = vld [vmem:[%s14325_s20 + $0x78] sm:$0xff]  }
 0x525   :  { %9455 = vmatprep.subr.bf16.mxu1 %v10142_v12 }
 0x528   :  { %9456 = vmatpush3.bf16.msra.mxu1 %v10142_v12 }
 0x529   :  { %9465 = vmatprep.subr.bf16.mxu1 %v10143_v31 }
 0x52b   :  { %9458 = vmatmul.mubr.msk.bf16.vlgmr.msra.gmra.mrb[104].mxu1 %vm4235_vm13, %v12703_v49 }
 0x52c   :  { %9461 = vmatprep.mubr.msk.bf16.mxu1 %vm4235_vm13, %v12797_v4  ;;  %9466 = vmatpush3.bf16.msra.mxu1 %v10143_v31 }
 0x52d   :  { %9467 = vmatprep.subr.bf16.mxu1 %v10144_v47 }
 0x530   :  { %9468 = vmatpush3.bf16.msra.mxu1 %v10144_v47 }
 0x531   :  { %9469 = vmatprep.subr.bf16.mxu1 %v10145_v54 }
 0x533   :  { %9462 = vmatmul.mubr.msk.bf16.gmra.mrb[108].mxu1 %vm4235_vm13, %v12811_v16 }
 0x534   :  { %9470 = vmatpush3.bf16.msra.mxu1 %v10145_v54  ;;  %9473 = vmatprep.mubr.msk.bf16.mxu1 %vm4235_vm13, %v4535_v48 }
 0x535   :  { %9471 = vmatprep.subr.bf16.mxu1 %v10146_v8 }
 0x538   :  { %9472 = vmatpush3.bf16.msra.mxu1 %v10146_v8 }
 0x539   :  { %9481 = vmatprep.subr.bf16.mxu1 %v10147_v1 }
 0x53b   :  { %9474 = vmatmul.mubr.msk.bf16.vlgmr.msra.gmra.mrb[104].mxu1 %vm4235_vm13, %v4536_v53  ;;  %v10153_v53 = vld [vmem:[%s14325_s20 + $0xb0] sm:$0xff]  }
 0x53c   :  { %9477 = vmatprep.mubr.msk.bf16.mxu1 %vm4235_vm13, %v4537_v20  ;;  %9482 = vmatpush3.bf16.msra.mxu1 %v10147_v1  ;;  %v5381_v1 = vld [vmem:[#allocation9 + $0x40] sm:$0xff] }
 0x53d   :  { %9483 = vmatprep.subr.bf16.mxu1 %v10148_v25 }
 0x540   :  { %9484 = vmatpush3.bf16.msra.mxu1 %v10148_v25  ;;  %v5382_v25 = vld [vmem:[#allocation9 + $0x48] sm:$0xff] }
 0x541   :  { %9485 = vmatprep.subr.bf16.mxu1 %v10149_v10 }
 0x543   :  { %9478 = vmatmul.mubr.msk.bf16.gmra.mrb[108].mxu1 %vm4235_vm13, %v4538_v55 }
 0x544   :  { %9486 = vmatpush3.bf16.msra.mxu1 %v10149_v10  ;;  %9489 = vmatprep.mubr.msk.bf16.mxu1 %vm4235_vm13, %v4656_v60  ;;  %v5383_v10 = vld [vmem:[#allocation9 + $0x50] sm:$0xff] }
 0x545   :  { %9487 = vmatprep.subr.bf16.mxu1 %v10150_v33 }
 0x548   :  { %9488 = vmatpush3.bf16.msra.mxu1 %v10150_v33 }
 0x549   :  { %9497 = vmatprep.subr.bf16.mxu1 %v10151_v15 }
 0x54b   :  { %9490 = vmatmul.mubr.msk.bf16.vlgmr.msra.gmra.mrb[104].mxu1 %vm4235_vm13, %v4657_v2  ;;  %v10157_v2 = vld [vmem:[%s14325_s20 + $0xd0] sm:$0xff]  }
 0x54c   :  { %9493 = vmatprep.mubr.msk.bf16.mxu1 %vm4235_vm13, %v4658_v13  ;;  %9498 = vmatpush3.bf16.msra.mxu1 %v10151_v15 }
 0x54d   :  { %9499 = vmatprep.subr.bf16.mxu1 %v10152_v18 }
 0x550   :  { %9500 = vmatpush3.bf16.msra.mxu1 %v10152_v18 }
 0x551   :  { %9501 = vmatprep.subr.bf16.mxu1 %v10153_v53 }
 0x553   :  { %9494 = vmatmul.mubr.msk.bf16.gmra.mrb[108].mxu1 %vm4235_vm13, %v4659_v38 }
 0x554   :  { %9502 = vmatpush3.bf16.msra.mxu1 %v10153_v53  ;;  %9505 = vmatprep.mubr.msk.bf16.mxu1 %vm4235_vm13, %v4777_v42 }
 0x555   :  { %9503 = vmatprep.subr.bf16.mxu1 %v10154_v62 }
 0x558   :  { %9504 = vmatpush3.bf16.msra.mxu1 %v10154_v62  ;;  %v5384_v62 = vld [vmem:[#allocation9 + $0x58] sm:$0xff] }
 0x559   :  { %9513 = vmatprep.subr.bf16.mxu1 %v10155_v57 }
 0x55b   :  { %9506 = vmatmul.mubr.msk.bf16.vlgmr.msra.gmra.mrb[104].mxu1 %vm4235_vm13, %v4778_v24 }
 0x55c   :  { %9509 = vmatprep.mubr.msk.bf16.mxu1 %vm4235_vm13, %v4779_v32  ;;  %9514 = vmatpush3.bf16.msra.mxu1 %v10155_v57  ;;  %v5373_v57 = vld [vmem:[#allocation9] sm:$0xff] }
 0x55d   :  { %9515 = vmatprep.subr.bf16.mxu1 %v10156_v19 }
 0x560   :  { %9516 = vmatpush3.bf16.msra.mxu1 %v10156_v19  ;;  %v5374_v19 = vld [vmem:[#allocation9 + $0x8] sm:$0xff] }
 0x561   :  { %9517 = vmatprep.subr.bf16.mxu1 %v10157_v2 }
 0x563   :  { %9510 = vmatmul.mubr.msk.bf16.gmra.mrb[108].mxu1 %vm4235_vm13, %v4780_v41 }
 0x564   :  { %9518 = vmatpush3.bf16.msra.mxu1 %v10157_v2  ;;  %9521 = vmatprep.mubr.msk.bf16.mxu1 %vm4235_vm13, %v12699_v63  ;;  %v10161_v63 = vld [vmem:[%s14325_s20 + $0xf0] sm:$0xff]  }
 0x565   :  { %9519 = vmatprep.subr.bf16.mxu1 %v10158_v37  ;;  %v5375_v2 = vld [vmem:[#allocation9 + $0x10] sm:$0xff] }
 0x568   :  { %9520 = vmatpush3.bf16.msra.mxu1 %v10158_v37 }
 0x569   :  { %9529 = vmatprep.subr.bf16.mxu1 %v10159_v14 }
 0x56b   :  { %9522 = vmatmul.mubr.msk.bf16.vlgmr.msra.gmra.mrb[104].mxu1 %vm4235_vm13, %v12770_v45  ;;  %v10163_v45 = vld [vmem:[%s14325_s20 + $0x100] sm:$0xff]  }
 0x56c   :  { %9525 = vmatprep.mubr.msk.bf16.mxu1 %vm4235_vm13, %v12784_v22  ;;  %9530 = vmatpush3.bf16.msra.mxu1 %v10159_v14  ;;  %v5007_v22 = vpack.c.bf16 %v14119_v26, %v12715_v36  ;;  %v8442_v26 = vld [vmem:[#allocation19] ss:$0 sm:$0xff]  ;;  %v5376_v14 = vld [vmem:[#allocation9 + $0x18] sm:$0xff] }
 0x56d   :  { %9531 = vmatprep.subr.bf16.mxu1 %v10160_v34 }
 0x570   :  { %9532 = vmatpush3.bf16.msra.mxu1 %v10160_v34  ;;  %v5377_v34 = vld [vmem:[#allocation9 + $0x20] sm:$0xff] }
 0x571   :  { %9533 = vmatprep.subr.bf16.mxu1 %v10161_v63 }
 0x573   :  { %9526 = vmatmul.mubr.msk.bf16.gmra.mrb[108].mxu1 %vm4235_vm13, %v12855_v28 }
 0x574   :  { %9534 = vmatpush3.bf16.msra.mxu1 %v10161_v63  ;;  %9537 = vmatprep.mubr.msk.bf16.mxu1 %vm4235_vm13, %v12659_v29  ;;  %v10165_v29 = vld [vmem:[%s14325_s20 + $0x110] sm:$0xff]   ;;  %s10609_s20 = smov 32   ;;  %v5378_v63 = vld [vmem:[#allocation9 + $0x28] sm:$0xff] }
 0x575   :  { %9535 = vmatprep.subr.bf16.mxu1 %v10162_v11 }
 0x578   :  { %9536 = vmatpush3.bf16.msra.mxu1 %v10162_v11  ;;  %v5385_v11 = vld [vmem:[#allocation9 + $0x60] sm:$0xff] }
 0x579   :  { %9545 = vmatprep.subr.bf16.mxu1 %v10163_v45 }
 0x57b   :  { %9538 = vmatmul.mubr.msk.bf16.vlgmr.msra.gmra.mrb[104].mxu1 %vm4235_vm13, %v12741_v43 }
 0x57c   :  { %9541 = vmatprep.mubr.msk.bf16.mxu1 %vm4235_vm13, %v12745_v5  ;;  %9546 = vmatpush3.bf16.msra.mxu1 %v10163_v45  ;;  %v5386_v45 = vld [vmem:[#allocation9 + $0x68] sm:$0xff] }
 0x57d   :  { %9547 = vmatprep.subr.bf16.mxu1 %v10164_v9 }
 0x580   :  { %9548 = vmatpush3.bf16.msra.mxu1 %v10164_v9  ;;  %v5387_v9 = vld [vmem:[#allocation9 + $0x70] sm:$0xff] }
 0x581   :  { %9549 = vmatprep.subr.bf16.mxu1 %v10165_v29 }
 0x583   :  { %9542 = vmatmul.mubr.msk.bf16.gmra.mrb[108].mxu1 %vm4235_vm13, %v5007_v22 }
 0x584   :  { %9550 = vmatpush3.bf16.msra.mxu1 %v10165_v29  ;;  %9553 = vmatprep.mubr.msk.bf16.mxu1 %vm4235_vm13, %v12703_v49 }
 0x585   :  { %9551 = vmatprep.subr.bf16.mxu1 %v10166_v3 }
 0x588   :  { %9552 = vmatpush3.bf16.msra.mxu1 %v10166_v3  ;;  %v5388_v3 = vld [vmem:[#allocation9 + $0x78] sm:$0xff] }
 0x58b   :  { %9554 = vmatmul.mubr.msk.bf16.vlgmr.msra.gmra.mrb[104].mxu1 %vm4235_vm13, %v12797_v4 }
 0x58c   :  { %9557 = vmatprep.mubr.msk.bf16.mxu1 %vm4235_vm13, %v12811_v16 }
 0x593   :  { %9558 = vmatmul.mubr.msk.bf16.gmra.mrb[108].mxu1 %vm4235_vm13, %v12851_v40 }
 0x65e   :  { %v9555_v36 = vpop.f32.mrb[104].mxu1 }
 0x65f   :  { %v5186_v43 = vpop.f32.mrb[105].mxu1  ;;  %v5234_v46 = vadd.f32 %v9555_v36, %v8442_v26  ;;  %v5379_v36 = vld [vmem:[#allocation9 + $0x30] sm:$0xff] }
 0x660   :  { %v5232_v5 = vadd.f32 %v8442_v26, %v5186_v43  ;;  %v9556_v23 = vpop.f32.mrb[106].mxu1  ;;  %v5380_v43 = vld [vmem:[#allocation9 + $0x38] sm:$0xff] }
 0x661   :  { %v5235_v6 = vadd.f32 %v9556_v23, %v8442_v26  ;;  %v5189_v0 = vpop.f32.mrb[107].mxu1 }
 0x662   :  { %v5233_v49 = vadd.f32 %v8442_v26, %v5189_v0  ;;  %5240 = vxpose.xlu0.b32.start [1/8] (short) (narrow) %v5232_v5, 32 }
 0x663   :  { %v9599_v24 = vpack.c.bf16 %v5235_v6, %v5234_v46 }
 0x664   :  { %v9595_v61 = vpack.c.bf16 %v5233_v49, %v5232_v5 }
 0x666   :  { %5241 = vxpose.xlu0.b32.cont [2/8] (short) (narrow) %v5233_v49, 32  ;;  %v9559_v4 = vpop.f32.mrb[108].mxu1  ;;  %9596 = vmatprep.subr.bf16.mxu0 %v9595_v61 }
 0x667   :  { %v5202_v44 = vpop.f32.mrb[109].mxu1  ;;  %9598 = vmatpush3.bf16.msra.mxu0 %v9595_v61  ;;  %v5238_v52 = vadd.f32 %v9559_v4, %v8442_v26 }
 0x668   :  { %v9560_v58 = vpop.f32.mrb[110].mxu1  ;;  %9600 = vmatprep.subr.bf16.mxu0 %v9599_v24  ;;  %v5236_v20 = vadd.f32 %v8442_v26, %v5202_v44 }
 0x669   :  { %v5239_v16 = vadd.f32 %v9560_v58, %v8442_v26  ;;  %v5205_v48 = vpop.f32.mrb[111].mxu1 }
 0x66a   :  { %v5237_v50 = vadd.f32 %v8442_v26, %v5205_v48  ;;  %5242 = vxpose.xlu0.b32.cont [3/8] (short) (narrow) %v5234_v46, 32  ;;  %v5390_v48 = vld [vmem:[#allocation9 + $0x88] sm:$0xff] }
 0x66b   :  { %v9607_v21 = vpack.c.bf16 %v5239_v16, %v5238_v52  ;;  %9602 = vmatpush3.bf16.msra.mxu0 %v9599_v24 }
 0x66c   :  { %v9603_v27 = vpack.c.bf16 %v5237_v50, %v5236_v20 }
 0x66e   :  { %5243 = vxpose.xlu0.b32.cont [4/8] (short) (narrow) %v5235_v6, 32  ;;  %9604 = vmatprep.subr.bf16.mxu0 %v9603_v27 }
 0x66f   :  { %9606 = vmatpush3.bf16.msra.mxu0 %v9603_v27 }
 0x670   :  { %9608 = vmatprep.subr.bf16.mxu0 %v9607_v21 }
 0x672   :  { %5244 = vxpose.xlu0.b32.cont [5/8] (short) (narrow) %v5236_v20, 32 }
 0x673   :  { %9610 = vmatpush3.bf16.msra.mxu0 %v9607_v21 }
 0x676   :  { %5245 = vxpose.xlu0.b32.cont [6/8] (short) (narrow) %v5237_v50, 32 }
 0x67a   :  { %5246 = vxpose.xlu0.b32.cont [7/8] (short) (narrow) %v5238_v52, 32 }
 0x67e   :  { %5247 = vxpose.xlu0.b32.end [8/8] (short) (narrow) %v5239_v16, 32  ;;  %v5389_v16 = vld [vmem:[#allocation9 + $0x80] sm:$0xff] }
 0x6e2   :  { %v5256_v60 = vpop.trf.xlu0 }
 0x6e3   :  { %9577 = vmatprep.mubr.msk.f32.mxu0 %vm4235_vm13, %v5256_v60  ;;  %v5391_v60 = vld [vmem:[#allocation9 + $0x90] sm:$0xff] }
 0x6e6   :  { %v5257_v13 = vpop.trf.xlu0 }
 0x6e7   :  { %9578 = vmatmul.mubr.msk.f32.vlgmr.msra.gmra.mrb[136].mxu0 %vm4235_vm13, %v5257_v13  ;;  %v5392_v13 = vld [vmem:[#allocation9 + $0x98] sm:$0xff] }
 0x6ea   :  { %v5258_v38 = vpop.trf.xlu0 }
 0x6eb   :  { %9580 = vmatprep.mubr.msk.f32.mxu0 %vm4235_vm13, %v5258_v38  ;;  %v5393_v38 = vld [vmem:[#allocation9 + $0xa0] sm:$0xff] }
 0x6ee   :  { %v5259_v55 = vpop.trf.xlu0 }
 0x6ef   :  { %9581 = vmatmul.mubr.msk.f32.gmra.mrb[138].mxu0 %vm4235_vm13, %v5259_v55 }
 0x7ba   :  { %v9579_v42 = vpop.f32.mrb[136].mxu0 }
 0x7bb   :  { %v5370_v32 = vmul.f32 0.015625, %v9579_v42  ;;  %v5350_v51 = vpop.f32.mrb[137].mxu0 }
 0x7bc   :  { %v5369_v39 = vmul.f32 0.015625, %v5350_v51 }
 0x7bd   :  { %5411 = vrot.lane.b32.xlu1 %v5370_v32, %s10609_s20 }
 0x7c1   :  { %5423 = vrot.lane.b32.xlu1 %v5370_v32, %s10585_s22 }
 0x7c2   :  { %v9582_v30 = vpop.f32.mrb[138].mxu0 }
 0x7c3   :  { %v5372_v59 = vmul.f32 0.015625, %v9582_v30  ;;  %v5360_v17 = vpop.f32.mrb[139].mxu0  ;;  %v5394_v30 = vld [vmem:[#allocation9 + $0xa8] sm:$0xff] }
 0x7c4   :  { %v5371_v41 = vmul.f32 0.015625, %v5360_v17  ;;  %v5396_v17 = vld [vmem:[#allocation9 + $0xb8] sm:$0xff] }
 0x7c5   :  { %5435 = vrot.lane.b32.xlu1 %v5370_v32, %s10610_s6  ;;  %5415 = vrot.lane.b32.xlu0 %v5372_v59, %s10609_s20 }
 0x7c9   :  { %5409 = vrot.lane.b32.xlu1 %v5369_v39, %s10609_s20 }
 0x7cd   :  { %5421 = vrot.lane.b32.xlu1 %v5369_v39, %s10585_s22 }
 0x7d1   :  { %5433 = vrot.lane.b32.xlu1 %v5369_v39, %s10610_s6 }
 0x7d5   :  { %5427 = vrot.lane.b32.xlu1 %v5372_v59, %s10585_s22 }
 0x7d9   :  { %5413 = vrot.lane.b32.xlu1 %v5371_v41, %s10609_s20 }
 0x7dd   :  { %5425 = vrot.lane.b32.xlu1 %v5371_v41, %s10585_s22 }
 0x7e1   :  { %5437 = vrot.lane.b32.xlu1 %v5371_v41, %s10610_s6 }
 0x7e5   :  { %5439 = vrot.lane.b32.xlu1 %v5372_v59, %s10610_s6 }
 0x82f   :  { %v5412_v56 = vpop.permute.xlu1 %5411 }
 0x830   :  { %v5447_v47 = vsel %vm5445_vm14, %v5370_v32, %v5412_v56 }
 0x833   :  { %v5424_v35 = vpop.permute.xlu1 %5423 }
 0x834   :  { %v5451_v54 = vsel %vm4235_vm13, %v5447_v47, %v5424_v35 }
 0x837   :  { %v5436_v40 = vpop.permute.xlu1 %5435  ;;  %v5416_v15 = vpop.permute.xlu0 %5415 }
 0x838   :  { %v5456_v33 = vsel %vm5454_vm1, %v5451_v54, %v5436_v40  ;;  %v5449_v22 = vsel %vm5445_vm14, %v5372_v59, %v5416_v15  ;;  %v5395_v59 = vld [vmem:[#allocation9 + $0xb0] sm:$0xff] }
 0x839   :  { %v5467_v29 = vmul.f32 %v5456_v33, %v5381_v1  ;;  %v5468_v26 = vmul.f32 %v5456_v33, %v5382_v25  ;;  %v5469_v0 = vmul.f32 %v5456_v33, %v5383_v10  ;;  %v5470_v4 = vmul.f32 %v5456_v33, %v5384_v62  ;;  %v5397_v10 = vld [vmem:[#allocation9 + $0xc0] sm:$0xff] }
 0x83a   :  { %v5471_v44 = vmul.f32 %v5456_v33, %v5385_v11  ;;  %v5472_v58 = vmul.f32 %v5456_v33, %v5386_v45  ;;  %v5473_v52 = vmul.f32 %v5456_v33, %v5387_v9  ;;  %v5474_v20 = vmul.f32 %v5456_v33, %v5388_v3  ;;  %v5398_v33 = vld [vmem:[#allocation9 + $0xc8] sm:$0xff]  ;;  %v5403_v9 = vld [vmem:[#allocation9 + $0xf0] sm:$0xff] }
 0x83b   :  { %v5410_v28 = vpop.permute.xlu1 %5409  ;;  %v5402_v45 = vld [vmem:[#allocation9 + $0xe8] sm:$0xff] }
 0x83c   :  { %v5446_v8 = vsel %vm5445_vm14, %v5369_v39, %v5410_v28 }
 0x83f   :  { %v5422_v7 = vpop.permute.xlu1 %5421 }
 0x840   :  { %v5450_v18 = vsel %vm4235_vm13, %v5446_v8, %v5422_v7 }
 0x843   :  { %v5434_v12 = vpop.permute.xlu1 %5433 }
 0x844   :  { %v5455_v37 = vsel %vm5454_vm1, %v5450_v18, %v5434_v12 }
 0x845   :  { %v5459_v5 = vmul.f32 %v5455_v37, %v5373_v57  ;;  %v5460_v23 = vmul.f32 %v5455_v37, %v5374_v19  ;;  %v5461_v46 = vmul.f32 %v5455_v37, %v5375_v2  ;;  %v5462_v49 = vmul.f32 %v5455_v37, %v5376_v14  ;;  %v5399_v57 = vld [vmem:[#allocation9 + $0xd0] sm:$0xff]  ;;  %v5400_v19 = vld [vmem:[#allocation9 + $0xd8] sm:$0xff]  ;;  %v5401_v2 = vld [vmem:[#allocation9 + $0xe0] sm:$0xff] }
 0x846   :  { %v5463_v24 = vmul.f32 %v5455_v37, %v5377_v34  ;;  %v5464_v61 = vmul.f32 %v5455_v37, %v5378_v63  ;;  %v5465_v50 = vmul.f32 %v5455_v37, %v5379_v36  ;;  %v5466_v21 = vmul.f32 %v5455_v37, %v5380_v43 }
 0x847   :  { %v13020_v31 = vpop.permute.xlu1 %5427  ;;  %v5491_v55 = vadd.f32 %v5467_v29, %v5459_v5  ;;  %v5500_v42 = vadd.f32 %v5468_v26, %v5460_v23  ;;  %v5509_v32 = vadd.f32 %v5469_v0, %v5461_v46  ;;  %v5518_v56 = vadd.f32 %v5470_v4, %v5462_v49  ;;  %v5404_v29 = vld [vmem:[#allocation9 + $0xf8] sm:$0xff] }
 0x848   :  { %v5527_v35 = vadd.f32 %v5471_v44, %v5463_v24  ;;  %v5536_v40 = vadd.f32 %v5472_v58, %v5464_v61  ;;  %v5545_v15 = vadd.f32 %v5473_v52, %v5465_v50  ;;  %v5554_v18 = vadd.f32 %v5474_v20, %v5466_v21 }
 0x84b   :  { %v5414_v53 = vpop.permute.xlu1 %5413 }
 0x84c   :  { %v5448_v27 = vsel %vm5445_vm14, %v5371_v41, %v5414_v53  ;;  %v5453_v53 = vsel %vm4235_vm13, %v5449_v22, %v13020_v31 }
 0x84f   :  { %v5426_v6 = vpop.permute.xlu1 %5425 }
 0x850   :  { %v5452_v51 = vsel %vm4235_vm13, %v5448_v27, %v5426_v6 }
 0x853   :  { %v5438_v39 = vpop.permute.xlu1 %5437 }
 0x854   :  { %v5457_v28 = vsel %vm5454_vm1, %v5452_v51, %v5438_v39 }
 0x855   :  { %v5475_v7 = vmul.f32 %v5457_v28, %v5389_v16  ;;  %v5476_v12 = vmul.f32 %v5457_v28, %v5390_v48  ;;  %v5477_v41 = vmul.f32 %v5457_v28, %v5391_v60  ;;  %v5478_v47 = vmul.f32 %v5457_v28, %v5392_v13 }
 0x856   :  { %v5479_v54 = vmul.f32 %v5457_v28, %v5393_v38  ;;  %v5480_v8 = vmul.f32 %v5457_v28, %v5394_v30  ;;  %v5481_v1 = vmul.f32 %v5457_v28, %v5395_v59  ;;  %v5482_v25 = vmul.f32 %v5457_v28, %v5396_v17 }
 0x857   :  { %v5492_v62 = vadd.f32 %v5491_v55, %v5475_v7  ;;  %v5440_v37 = vpop.permute.xlu1 %5439  ;;  %v5501_v14 = vadd.f32 %v5500_v42, %v5476_v12  ;;  %v5510_v34 = vadd.f32 %v5509_v32, %v5477_v41  ;;  %v5519_v63 = vadd.f32 %v5518_v56, %v5478_v47 }
 0x858   :  { %v5528_v11 = vadd.f32 %v5527_v35, %v5479_v54  ;;  %v5537_v3 = vadd.f32 %v5536_v40, %v5480_v8  ;;  %v5546_v26 = vadd.f32 %v5545_v15, %v5481_v1  ;;  %v5555_v36 = vadd.f32 %v5554_v18, %v5482_v25 }
 0x859   :  { %v5458_v43 = vsel %vm5454_vm1, %v5453_v53, %v5440_v37 }
 0x85a   :  { %v5483_v5 = vmul.f32 %v5458_v43, %v5397_v10  ;;  %v5484_v23 = vmul.f32 %v5458_v43, %v5398_v33  ;;  %v5485_v31 = vmul.f32 %v5458_v43, %v5399_v57  ;;  %v5486_v22 = vmul.f32 %v5458_v43, %v5400_v19 }
 0x85b   :  { %v5487_v46 = vmul.f32 %v5458_v43, %v5401_v2  ;;  %v5488_v6 = vmul.f32 %v5458_v43, %v5402_v45  ;;  %v5489_v0 = vmul.f32 %v5458_v43, %v5403_v9  ;;  %v5490_v49 = vmul.f32 %v5458_v43, %v5404_v29 }
 0x85c   :  { %v5493_v24 = vadd.f32 %v5492_v62, %v5483_v5  ;;  %v5502_v61 = vadd.f32 %v5501_v14, %v5484_v23  ;;  %v5511_v4 = vadd.f32 %v5510_v34, %v5485_v31  ;;  %v5520_v44 = vadd.f32 %v5519_v63, %v5486_v22 }
 0x85d   :  { %v5529_v58 = vadd.f32 %v5528_v11, %v5487_v46  ;;  %v5538_v52 = vadd.f32 %v5537_v3, %v5488_v6  ;;  %v5547_v16 = vadd.f32 %v5546_v26, %v5489_v0  ;;  %v5556_v48 = vadd.f32 %v5555_v36, %v5490_v49 }
 0x85e   :  { %v5494_v20 = vrot.slane %v5493_v24, 4  ;;  %v5503_v50 = vrot.slane %v5502_v61, 4  ;;  %v5512_v21 = vrot.slane %v5511_v4, 4  ;;  %v5521_v27 = vrot.slane %v5520_v44, 4 }
 0x85f   :  { %v5530_v60 = vrot.slane %v5529_v58, 4  ;;  %v5539_v13 = vrot.slane %v5538_v52, 4  ;;  %v5548_v38 = vrot.slane %v5547_v16, 4  ;;  %v5557_v55 = vrot.slane %v5556_v48, 4 }
 0x860   :  { %v5495_v42 = vadd.f32 %v5494_v20, %v5493_v24  ;;  %v5504_v32 = vadd.f32 %v5503_v50, %v5502_v61  ;;  %v5513_v51 = vadd.f32 %v5512_v21, %v5511_v4  ;;  %v5522_v30 = vadd.f32 %v5521_v27, %v5520_v44 }
 0x861   :  { %v5531_v59 = vadd.f32 %v5530_v60, %v5529_v58  ;;  %v5540_v17 = vadd.f32 %v5539_v13, %v5538_v52  ;;  %v5549_v39 = vadd.f32 %v5548_v38, %v5547_v16  ;;  %v5558_v56 = vadd.f32 %v5557_v55, %v5556_v48 }
 0x862   :  { %v5496_v35 = vrot.slane %v5495_v42, 2  ;;  %v5505_v40 = vrot.slane %v5504_v32, 2  ;;  %v5514_v28 = vrot.slane %v5513_v51, 2  ;;  %v5523_v7 = vrot.slane %v5522_v30, 2 }
 0x863   :  { %v5532_v12 = vrot.slane %v5531_v59, 2  ;;  %v5541_v41 = vrot.slane %v5540_v17, 2  ;;  %v5550_v47 = vrot.slane %v5549_v39, 2  ;;  %v5559_v54 = vrot.slane %v5558_v56, 2 }
 0x864   :  { %v5497_v8 = vadd.f32 %v5496_v35, %v5495_v42  ;;  %v5506_v1 = vadd.f32 %v5505_v40, %v5504_v32  ;;  %v5515_v25 = vadd.f32 %v5514_v28, %v5513_v51  ;;  %v5524_v10 = vadd.f32 %v5523_v7, %v5522_v30 }
 0x865   :  { %v5533_v33 = vadd.f32 %v5532_v12, %v5531_v59  ;;  %v5542_v15 = vadd.f32 %v5541_v41, %v5540_v17  ;;  %v5551_v18 = vadd.f32 %v5550_v47, %v5549_v39  ;;  %v5560_v53 = vadd.f32 %v5559_v54, %v5558_v56 }
 0x866   :  { %v5498_v62 = vrot.slane %v5497_v8, 1  ;;  %v5507_v57 = vrot.slane %v5506_v1, 1  ;;  %v5516_v19 = vrot.slane %v5515_v25, 1  ;;  %v5525_v2 = vrot.slane %v5524_v10, 1 }
 0x867   :  { %v5534_v37 = vrot.slane %v5533_v33, 1  ;;  %v5543_v14 = vrot.slane %v5542_v15, 1  ;;  %v5552_v34 = vrot.slane %v5551_v18, 1  ;;  %v5561_v63 = vrot.slane %v5560_v53, 1 }
 0x868   :  { %v13035_v11 = vadd.f32 %v5498_v62, %v5497_v8  ;;  %v5508_v45 = vadd.f32 %v5507_v57, %v5506_v1  ;;  %v13037_v9 = vadd.f32 %v5516_v19, %v5515_v25  ;;  %v13039_v29 = vadd.f32 %v5525_v2, %v5524_v10 }
 0x869   :  { %v13041_v3 = vadd.f32 %v5534_v37, %v5533_v33  ;;  %v13043_v26 = vadd.f32 %v5543_v14, %v5542_v15  ;;  %v13045_v36 = vadd.f32 %v5552_v34, %v5551_v18  ;;  %v13047_v43 = vadd.f32 %v5561_v63, %v5560_v53 }
 0x86a   :  { %10577 = dma.done.wait [#allocation3], 65536 }
 0x86b   :  { %10578 = vsyncadd [#allocation3], 4294901760  ;;  %v13049_v5 = vpack.c.bf16 %v5508_v45, %v5508_v45  ;;  %v14382_v23 = vld [vmem:[#allocation70_spill] sm:$0xff]  ;;  %v14383_v31 = vld [vmem:[#allocation76_spill] sm:$0xff]  ;;  %s14391_s8 = sld [smem:[#allocation99_spill]] }
 0x86c   :  { %6793 = vrot.lane.b32.xlu0 %v14382_v23, %s10609_s20  ;;  %6841 = vrot.lane.b32.xlu1 %v14382_v23, %s10610_s6  ;;  %v5576_v22 = vld [vmem:[#allocation2 + $0x8] sm:$0xff]  ;;  %v5578_v46 = vld [vmem:[#allocation2 + $0x18] sm:$0xff]  ;;  %v5575_v6 = vld [vmem:[#allocation2] sm:$0xff] }
 0x86d   :  { %6161 = vmatprep.mubr.bf16.mxu0 %v13049_v5  ;;  %6325 = vmatprep.mubr.bf16.mxu1 %v13049_v5  ;;  %v5577_v0 = vld [vmem:[#allocation2 + $0x10] sm:$0xff]  ;;  %v5584_v49 = vld [vmem:[#allocation2 + $0x48] sm:$0xff]  ;;  %v5586_v24 = vld [vmem:[#allocation2 + $0x58] sm:$0xff] }
 0x86e   :  { %6129 = vmatprep.subr.bf16.mxu0 %v5576_v22  ;;  %6293 = vmatprep.subr.bf16.mxu1 %v5578_v46  ;;  %v5583_v61 = vld [vmem:[#allocation2 + $0x40] sm:$0xff]  ;;  %v5585_v4 = vld [vmem:[#allocation2 + $0x50] sm:$0xff]  ;;  %v5592_v44 = vld [vmem:[#allocation2 + $0x88] sm:$0xff] }
 0x86f   :  { %6130 = vmatpush1.bf16.msra.mxu0 %v5575_v6  ;;  %6294 = vmatpush1.bf16.msra.mxu1 %v5577_v0  ;;  %v5594_v58 = vld [vmem:[#allocation2 + $0x98] sm:$0xff]  ;;  %v5591_v52 = vld [vmem:[#allocation2 + $0x80] sm:$0xff]  ;;  %v5593_v16 = vld [vmem:[#allocation2 + $0x90] sm:$0xff] }
 0x870   :  { %6817 = vrot.lane.b32.xlu0 %v14382_v23, %s10585_s22  ;;  %6795 = vrot.lane.b32.xlu1 %v14383_v31, %s10609_s20  ;;  %v5600_v48 = vld [vmem:[#allocation2 + $0xc8] sm:$0xff]  ;;  %v5602_v20 = vld [vmem:[#allocation2 + $0xd8] sm:$0xff]  ;;  %v5599_v21 = vld [vmem:[#allocation2 + $0xc0] sm:$0xff] }
 0x871   :  { %6131 = vmatprep.subr.bf16.mxu0 %v5584_v49  ;;  %6295 = vmatprep.subr.bf16.mxu1 %v5586_v24  ;;  %v14384_v50 = vld [vmem:[#allocation65_spill] sm:$0xff]  ;;  %v5601_v27 = vld [vmem:[#allocation2 + $0xd0] sm:$0xff]  ;;  %v5610_v13 = vld [vmem:[#allocation2 + $0x118] sm:$0xff] }
 0x872   :  { %v5608_v60 = vld [vmem:[#allocation2 + $0x108] sm:$0xff]  ;;  %v14385_v38 = vld [vmem:[#allocation71_spill] sm:$0xff]  ;;  %v5607_v55 = vld [vmem:[#allocation2 + $0x100] sm:$0xff] }
 0x873   :  { %6132 = vmatpush1.bf16.msra.mxu0 %v5583_v61  ;;  %6296 = vmatpush1.bf16.msra.mxu1 %v5585_v4  ;;  %v5609_v42 = vld [vmem:[#allocation2 + $0x110] sm:$0xff]  ;;  %v5616_v32 = vld [vmem:[#allocation2 + $0x148] sm:$0xff]  ;;  %v5618_v51 = vld [vmem:[#allocation2 + $0x158] sm:$0xff] }
 0x874   :  { %6819 = vrot.lane.b32.xlu0 %v14383_v31, %s10585_s22  ;;  %6843 = vrot.lane.b32.xlu1 %v14383_v31, %s10610_s6  ;;  %v5615_v30 = vld [vmem:[#allocation2 + $0x140] sm:$0xff]  ;;  %v5617_v59 = vld [vmem:[#allocation2 + $0x150] sm:$0xff]  ;;  %v5624_v17 = vld [vmem:[#allocation2 + $0x188] sm:$0xff] }
 0x875   :  { %6133 = vmatprep.subr.bf16.mxu0 %v5592_v44  ;;  %6297 = vmatprep.subr.bf16.mxu1 %v5594_v58  ;;  %v5626_v39 = vld [vmem:[#allocation2 + $0x198] sm:$0xff]  ;;  %v14386_v56 = vld [vmem:[#allocation69_spill] sm:$0xff]  ;;  %v5625_v40 = vld [vmem:[#allocation2 + $0x190] sm:$0xff] }
 0x876   :  { %v5623_v35 = vld [vmem:[#allocation2 + $0x180] sm:$0xff]  ;;  %v5632_v28 = vld [vmem:[#allocation2 + $0x1c8] sm:$0xff]  ;;  %v5634_v7 = vld [vmem:[#allocation2 + $0x1d8] sm:$0xff] }
 0x877   :  { %6134 = vmatpush1.bf16.msra.mxu0 %v5591_v52  ;;  %6298 = vmatpush1.bf16.msra.mxu1 %v5593_v16  ;;  %v14387_v12 = vld [vmem:[#allocation80_spill] sm:$0xff]  ;;  %v5633_v47 = vld [vmem:[#allocation2 + $0x1d0] sm:$0xff]  ;;  %v5640_v54 = vld [vmem:[#allocation2 + $0x208] sm:$0xff] }
 0x878   :  { %6797 = vrot.lane.b32.xlu0 %v14384_v50, %s10609_s20  ;;  %6821 = vrot.lane.b32.xlu1 %v14384_v50, %s10585_s22  ;;  %v5631_v41 = vld [vmem:[#allocation2 + $0x1c0] sm:$0xff]  ;;  %v5642_v8 = vld [vmem:[#allocation2 + $0x218] sm:$0xff]  ;;  %v5641_v25 = vld [vmem:[#allocation2 + $0x210] sm:$0xff] }
 0x879   :  { %6135 = vmatprep.subr.bf16.mxu0 %v5600_v48  ;;  %6299 = vmatprep.subr.bf16.mxu1 %v5602_v20  ;;  %v5639_v1 = vld [vmem:[#allocation2 + $0x200] sm:$0xff]  ;;  %v5648_v10 = vld [vmem:[#allocation2 + $0x248] sm:$0xff]  ;;  %v5650_v33 = vld [vmem:[#allocation2 + $0x258] sm:$0xff] }
 0x87a   :  { %v14388_v15 = vld [vmem:[#allocation74_spill] sm:$0xff]  ;;  %v5647_v18 = vld [vmem:[#allocation2 + $0x240] sm:$0xff]  ;;  %v5658_v57 = vld [vmem:[#allocation2 + $0x298] sm:$0xff] }
 0x87b   :  { %6136 = vmatpush1.bf16.msra.mxu0 %v5599_v21  ;;  %6300 = vmatpush1.bf16.msra.mxu1 %v5601_v27  ;;  %v5649_v53 = vld [vmem:[#allocation2 + $0x250] sm:$0xff]  ;;  %v5656_v62 = vld [vmem:[#allocation2 + $0x288] sm:$0xff]  ;;  %v5655_v2 = vld [vmem:[#allocation2 + $0x280] sm:$0xff] }
 0x87c   :  { %6845 = vrot.lane.b32.xlu0 %v14384_v50, %s10610_s6  ;;  %6799 = vrot.lane.b32.xlu1 %v14385_v38, %s10609_s20  ;;  %v14389_v19 = vld [vmem:[#allocation77_spill] sm:$0xff]  ;;  %v5657_v37 = vld [vmem:[#allocation2 + $0x290] sm:$0xff]  ;;  %v5666_v34 = vld [vmem:[#allocation2 + $0x2d8] sm:$0xff] }
 0x87d   :  { %6137 = vmatprep.subr.bf16.mxu0 %v5608_v60  ;;  %6301 = vmatprep.subr.bf16.mxu1 %v5610_v13  ;;  %v5664_v14 = vld [vmem:[#allocation2 + $0x2c8] sm:$0xff]  ;;  %v5663_v63 = vld [vmem:[#allocation2 + $0x2c0] sm:$0xff]  ;;  %v5665_v45 = vld [vmem:[#allocation2 + $0x2d0] sm:$0xff] }
 0x87e   :  { %v5672_v22 = vld [vmem:[#allocation2 + $0x308] sm:$0xff]  ;;  %v5674_v46 = vld [vmem:[#allocation2 + $0x318] sm:$0xff]  ;;  %v5671_v6 = vld [vmem:[#allocation2 + $0x300] sm:$0xff] }
 0x87f   :  { %6138 = vmatpush1.bf16.msra.mxu0 %v5607_v55  ;;  %6302 = vmatpush1.bf16.msra.mxu1 %v5609_v42  ;;  %v5673_v0 = vld [vmem:[#allocation2 + $0x310] sm:$0xff]  ;;  %v5680_v49 = vld [vmem:[#allocation2 + $0x348] sm:$0xff]  ;;  %v5682_v24 = vld [vmem:[#allocation2 + $0x358] sm:$0xff]  ;;  %v13103_v55 = vpack.c.bf16 %v13035_v11, %v13035_v11 }
 0x880   :  { %6823 = vrot.lane.b32.xlu0 %v14385_v38, %s10585_s22  ;;  %6847 = vrot.lane.b32.xlu1 %v14385_v38, %s10610_s6  ;;  %v5679_v61 = vld [vmem:[#allocation2 + $0x340] sm:$0xff]  ;;  %v5681_v4 = vld [vmem:[#allocation2 + $0x350] sm:$0xff]  ;;  %v5688_v44 = vld [vmem:[#allocation2 + $0x388] sm:$0xff] }
 0x881   :  { %6139 = vmatprep.subr.bf16.mxu0 %v5616_v32  ;;  %6303 = vmatprep.subr.bf16.mxu1 %v5618_v51  ;;  %v5690_v58 = vld [vmem:[#allocation2 + $0x398] sm:$0xff]  ;;  %v5687_v52 = vld [vmem:[#allocation2 + $0x380] sm:$0xff]  ;;  %v5689_v16 = vld [vmem:[#allocation2 + $0x390] sm:$0xff] }
 0x882   :  { %v5696_v48 = vld [vmem:[#allocation2 + $0x3c8] sm:$0xff]  ;;  %v5698_v20 = vld [vmem:[#allocation2 + $0x3d8] sm:$0xff]  ;;  %v5695_v21 = vld [vmem:[#allocation2 + $0x3c0] sm:$0xff] }
 0x883   :  { %6140 = vmatpush1.bf16.msra.mxu0 %v5615_v30  ;;  %6304 = vmatpush1.bf16.msra.mxu1 %v5617_v59  ;;  %v5697_v27 = vld [vmem:[#allocation2 + $0x3d0] sm:$0xff]  ;;  %v5704_v60 = vld [vmem:[#allocation2 + $0x408] sm:$0xff]  ;;  %v5706_v13 = vld [vmem:[#allocation2 + $0x418] sm:$0xff]  ;;  %v13107_v59 = vpack.c.bf16 %v13039_v29, %v13039_v29 }
 0x884   :  { %6801 = vrot.lane.b32.xlu0 %v14386_v56, %s10609_s20  ;;  %6825 = vrot.lane.b32.xlu1 %v14386_v56, %s10585_s22  ;;  %v5703_v42 = vld [vmem:[#allocation2 + $0x400] sm:$0xff]  ;;  %v5705_v32 = vld [vmem:[#allocation2 + $0x410] sm:$0xff]  ;;  %v5712_v51 = vld [vmem:[#allocation2 + $0x448] sm:$0xff] }
 0x885   :  { %6141 = vmatprep.subr.bf16.mxu0 %v5624_v17  ;;  %6305 = vmatprep.subr.bf16.mxu1 %v5626_v39  ;;  %v5714_v30 = vld [vmem:[#allocation2 + $0x458] sm:$0xff]  ;;  %v5711_v17 = vld [vmem:[#allocation2 + $0x440] sm:$0xff]  ;;  %v5713_v11 = vld [vmem:[#allocation2 + $0x450] sm:$0xff] }
 0x886   :  { %v5720_v39 = vld [vmem:[#allocation2 + $0x488] sm:$0xff]  ;;  %v5721_v29 = vld [vmem:[#allocation2 + $0x490] sm:$0xff] }
 0x887   :  { %6142 = vmatpush1.bf16.msra.mxu0 %v5623_v35  ;;  %6306 = vmatpush1.bf16.msra.mxu1 %v5625_v40  ;;  %v5722_v35 = vld [vmem:[#allocation2 + $0x498] sm:$0xff]  ;;  %v5719_v40 = vld [vmem:[#allocation2 + $0x480] sm:$0xff] }
 0x888   :  { %6849 = vrot.lane.b32.xlu0 %v14386_v56, %s10610_s6  ;;  %6803 = vrot.lane.b32.xlu1 %v14387_v12, %s10609_s20 }
 0x889   :  { %6143 = vmatprep.subr.bf16.mxu0 %v5632_v28  ;;  %6307 = vmatprep.subr.bf16.mxu1 %v5634_v7  ;;  %v5728_v28 = vld [vmem:[#allocation2 + $0x4c8] sm:$0xff]  ;;  %v5730_v7 = vld [vmem:[#allocation2 + $0x4d8] sm:$0xff] }
 0x88b   :  { %6144 = vmatpush1.bf16.msra.mxu0 %v5631_v41  ;;  %6308 = vmatpush1.bf16.msra.mxu1 %v5633_v47  ;;  %v5727_v41 = vld [vmem:[#allocation2 + $0x4c0] sm:$0xff]  ;;  %v5729_v47 = vld [vmem:[#allocation2 + $0x4d0] sm:$0xff] }
 0x88c   :  { %6827 = vrot.lane.b32.xlu0 %v14387_v12, %s10585_s22  ;;  %6851 = vrot.lane.b32.xlu1 %v14387_v12, %s10610_s6 }
 0x88d   :  { %6145 = vmatprep.subr.bf16.mxu0 %v5640_v54  ;;  %6309 = vmatprep.subr.bf16.mxu1 %v5642_v8  ;;  %v5736_v54 = vld [vmem:[#allocation2 + $0x508] sm:$0xff]  ;;  %v5738_v8 = vld [vmem:[#allocation2 + $0x518] sm:$0xff] }
 0x88f   :  { %6146 = vmatpush1.bf16.msra.mxu0 %v5639_v1  ;;  %6310 = vmatpush1.bf16.msra.mxu1 %v5641_v25  ;;  %v5735_v1 = vld [vmem:[#allocation2 + $0x500] sm:$0xff]  ;;  %v5737_v25 = vld [vmem:[#allocation2 + $0x510] sm:$0xff] }
 0x890   :  { %6805 = vrot.lane.b32.xlu0 %v14388_v15, %s10609_s20  ;;  %6829 = vrot.lane.b32.xlu1 %v14388_v15, %s10585_s22 }
 0x891   :  { %6147 = vmatprep.subr.bf16.mxu0 %v5648_v10  ;;  %6311 = vmatprep.subr.bf16.mxu1 %v5650_v33  ;;  %v5744_v10 = vld [vmem:[#allocation2 + $0x548] sm:$0xff]  ;;  %v5746_v33 = vld [vmem:[#allocation2 + $0x558] sm:$0xff] }
 0x893   :  { %6148 = vmatpush1.bf16.msra.mxu0 %v5647_v18  ;;  %6312 = vmatpush1.bf16.msra.mxu1 %v5649_v53  ;;  %v5743_v18 = vld [vmem:[#allocation2 + $0x540] sm:$0xff]  ;;  %v5745_v53 = vld [vmem:[#allocation2 + $0x550] sm:$0xff] }
 0x894   :  { %6853 = vrot.lane.b32.xlu0 %v14388_v15, %s10610_s6  ;;  %6807 = vrot.lane.b32.xlu1 %v14389_v19, %s10609_s20 }
 0x895   :  { %6149 = vmatprep.subr.bf16.mxu0 %v5656_v62  ;;  %6313 = vmatprep.subr.bf16.mxu1 %v5658_v57  ;;  %v5752_v62 = vld [vmem:[#allocation2 + $0x588] sm:$0xff]  ;;  %v5754_v57 = vld [vmem:[#allocation2 + $0x598] sm:$0xff] }
 0x897   :  { %6150 = vmatpush1.bf16.msra.mxu0 %v5655_v2  ;;  %6314 = vmatpush1.bf16.msra.mxu1 %v5657_v37  ;;  %v5751_v2 = vld [vmem:[#allocation2 + $0x580] sm:$0xff]  ;;  %v5753_v37 = vld [vmem:[#allocation2 + $0x590] sm:$0xff] }
 0x898   :  { %6831 = vrot.lane.b32.xlu0 %v14389_v19, %s10585_s22  ;;  %6855 = vrot.lane.b32.xlu1 %v14389_v19, %s10610_s6 }
 0x899   :  { %6151 = vmatprep.subr.bf16.mxu0 %v5664_v14  ;;  %6315 = vmatprep.subr.bf16.mxu1 %v5666_v34  ;;  %v5760_v14 = vld [vmem:[#allocation2 + $0x5c8] sm:$0xff]  ;;  %v5762_v34 = vld [vmem:[#allocation2 + $0x5d8] sm:$0xff] }
 0x89b   :  { %6152 = vmatpush1.bf16.msra.mxu0 %v5663_v63  ;;  %6316 = vmatpush1.bf16.msra.mxu1 %v5665_v45  ;;  %v5759_v63 = vld [vmem:[#allocation2 + $0x5c0] sm:$0xff]  ;;  %v5761_v45 = vld [vmem:[#allocation2 + $0x5d0] sm:$0xff] }
 0x89c   :  { %6153 = vmatprep.subr.bf16.mxu0 %v5672_v22  ;;  %6317 = vmatprep.subr.bf16.mxu1 %v5674_v46  ;;  %v5768_v22 = vld [vmem:[#allocation2 + $0x608] sm:$0xff]  ;;  %v5770_v46 = vld [vmem:[#allocation2 + $0x618] sm:$0xff] }
 0x89f   :  { %6154 = vmatpush1.bf16.msra.mxu0 %v5671_v6  ;;  %6318 = vmatpush1.bf16.msra.mxu1 %v5673_v0  ;;  %v5767_v6 = vld [vmem:[#allocation2 + $0x600] sm:$0xff]  ;;  %v5769_v0 = vld [vmem:[#allocation2 + $0x610] sm:$0xff] }
 0x8a0   :  { %6155 = vmatprep.subr.bf16.mxu0 %v5680_v49  ;;  %6319 = vmatprep.subr.bf16.mxu1 %v5682_v24  ;;  %v5776_v49 = vld [vmem:[#allocation2 + $0x648] sm:$0xff]  ;;  %v5778_v24 = vld [vmem:[#allocation2 + $0x658] sm:$0xff] }
 0x8a3   :  { %6156 = vmatpush1.bf16.msra.mxu0 %v5679_v61  ;;  %6320 = vmatpush1.bf16.msra.mxu1 %v5681_v4  ;;  %v5775_v61 = vld [vmem:[#allocation2 + $0x640] sm:$0xff]  ;;  %v5777_v4 = vld [vmem:[#allocation2 + $0x650] sm:$0xff] }
 0x8a4   :  { %6157 = vmatprep.subr.bf16.mxu0 %v5688_v44  ;;  %6321 = vmatprep.subr.bf16.mxu1 %v5690_v58  ;;  %v5784_v44 = vld [vmem:[#allocation2 + $0x688] sm:$0xff]  ;;  %v5786_v58 = vld [vmem:[#allocation2 + $0x698] sm:$0xff] }
 0x8a7   :  { %6158 = vmatpush1.bf16.msra.mxu0 %v5687_v52  ;;  %6322 = vmatpush1.bf16.msra.mxu1 %v5689_v16  ;;  %v5783_v52 = vld [vmem:[#allocation2 + $0x680] sm:$0xff]  ;;  %v5785_v16 = vld [vmem:[#allocation2 + $0x690] sm:$0xff] }
 0x8a8   :  { %6159 = vmatprep.subr.bf16.mxu0 %v5696_v48  ;;  %6323 = vmatprep.subr.bf16.mxu1 %v5698_v20  ;;  %v5792_v48 = vld [vmem:[#allocation2 + $0x6c8] sm:$0xff]  ;;  %v5794_v20 = vld [vmem:[#allocation2 + $0x6d8] sm:$0xff] }
 0x8ab   :  { %6160 = vmatpush1.bf16.msra.mxu0 %v5695_v21  ;;  %6324 = vmatpush1.bf16.msra.mxu1 %v5697_v27  ;;  %v5791_v21 = vld [vmem:[#allocation2 + $0x6c0] sm:$0xff]  ;;  %v5793_v27 = vld [vmem:[#allocation2 + $0x6d0] sm:$0xff] }
 0x8ac   :  { %6170 = vmatprep.subr.bf16.mxu0 %v5704_v60  ;;  %6334 = vmatprep.subr.bf16.mxu1 %v5706_v13  ;;  %v5800_v60 = vld [vmem:[#allocation2 + $0x708] sm:$0xff]  ;;  %v5802_v13 = vld [vmem:[#allocation2 + $0x718] sm:$0xff] }
 0x8ae   :  { %6162 = vmatmul.mubr.bf16.vlgmr.msra.gmra.mrb[140].mxu0 %v13103_v55  ;;  %6326 = vmatmul.mubr.bf16.vlgmr.msra.gmra.mrb[112].mxu1 %v13103_v55 }
 0x8af   :  { %6171 = vmatpush1.bf16.msra.mxu0 %v5703_v42  ;;  %6335 = vmatpush1.bf16.msra.mxu1 %v5705_v32  ;;  %v5799_v42 = vld [vmem:[#allocation2 + $0x700] sm:$0xff]  ;;  %v5801_v32 = vld [vmem:[#allocation2 + $0x710] sm:$0xff] }
 0x8b0   :  { %6172 = vmatprep.subr.bf16.mxu0 %v5712_v51  ;;  %6336 = vmatprep.subr.bf16.mxu1 %v5714_v30  ;;  %v5808_v51 = vld [vmem:[#allocation2 + $0x748] sm:$0xff]  ;;  %v5810_v30 = vld [vmem:[#allocation2 + $0x758] sm:$0xff] }
 0x8b1   :  { %6202 = vmatprep.mubr.bf16.mxu0 %v13107_v59  ;;  %6366 = vmatprep.mubr.bf16.mxu1 %v13107_v59 }
 0x8b3   :  { %6173 = vmatpush1.bf16.msra.mxu0 %v5711_v17  ;;  %6337 = vmatpush1.bf16.msra.mxu1 %v5713_v11  ;;  %v5807_v17 = vld [vmem:[#allocation2 + $0x740] sm:$0xff]  ;;  %v5809_v11 = vld [vmem:[#allocation2 + $0x750] sm:$0xff] }
 0x8b4   :  { %6174 = vmatprep.subr.bf16.mxu0 %v5720_v39  ;;  %6338 = vmatprep.subr.bf16.mxu1 %v5722_v35  ;;  %v5816_v39 = vld [vmem:[#allocation2 + $0x788] sm:$0xff]  ;;  %v5818_v35 = vld [vmem:[#allocation2 + $0x798] sm:$0xff] }
 0x8b7   :  { %6175 = vmatpush1.bf16.msra.mxu0 %v5719_v40  ;;  %6339 = vmatpush1.bf16.msra.mxu1 %v5721_v29  ;;  %v5815_v40 = vld [vmem:[#allocation2 + $0x780] sm:$0xff]  ;;  %v5817_v29 = vld [vmem:[#allocation2 + $0x790] sm:$0xff] }
 0x8b8   :  { %6176 = vmatprep.subr.bf16.mxu0 %v5728_v28  ;;  %6340 = vmatprep.subr.bf16.mxu1 %v5730_v7  ;;  %v5824_v28 = vld [vmem:[#allocation2 + $0x7c8] sm:$0xff]  ;;  %v5826_v7 = vld [vmem:[#allocation2 + $0x7d8] sm:$0xff] }
 0x8bb   :  { %6177 = vmatpush1.bf16.msra.mxu0 %v5727_v41  ;;  %6341 = vmatpush1.bf16.msra.mxu1 %v5729_v47  ;;  %v5823_v41 = vld [vmem:[#allocation2 + $0x7c0] sm:$0xff]  ;;  %v5825_v47 = vld [vmem:[#allocation2 + $0x7d0] sm:$0xff] }
 0x8bc   :  { %6178 = vmatprep.subr.bf16.mxu0 %v5736_v54  ;;  %6342 = vmatprep.subr.bf16.mxu1 %v5738_v8  ;;  %v5832_v54 = vld [vmem:[#allocation2 + $0x808] sm:$0xff]  ;;  %v5834_v8 = vld [vmem:[#allocation2 + $0x818] sm:$0xff] }
 0x8bf   :  { %6179 = vmatpush1.bf16.msra.mxu0 %v5735_v1  ;;  %6343 = vmatpush1.bf16.msra.mxu1 %v5737_v25  ;;  %v13115_v1 = vpack.c.bf16 %v13037_v9, %v13037_v9  ;;  %v5831_v25 = vld [vmem:[#allocation2 + $0x800] sm:$0xff] }
 0x8c0   :  { %6180 = vmatprep.subr.bf16.mxu0 %v5744_v10  ;;  %6344 = vmatprep.subr.bf16.mxu1 %v5746_v33  ;;  %v5833_v10 = vld [vmem:[#allocation2 + $0x810] sm:$0xff]  ;;  %v5840_v33 = vld [vmem:[#allocation2 + $0x848] sm:$0xff]  ;;  %v5839_v9 = vld [vmem:[#allocation2 + $0x840] sm:$0xff] }
 0x8c3   :  { %6181 = vmatpush1.bf16.msra.mxu0 %v5743_v18  ;;  %6345 = vmatpush1.bf16.msra.mxu1 %v5745_v53  ;;  %v5842_v18 = vld [vmem:[#allocation2 + $0x858] sm:$0xff]  ;;  %v13119_v53 = vpack.c.bf16 %v13043_v26, %v13043_v26  ;;  %v5847_v26 = vld [vmem:[#allocation2 + $0x880] sm:$0xff] }
 0x8c4   :  { %6182 = vmatprep.subr.bf16.mxu0 %v5752_v62  ;;  %6346 = vmatprep.subr.bf16.mxu1 %v5754_v57  ;;  %v5841_v62 = vld [vmem:[#allocation2 + $0x850] sm:$0xff]  ;;  %v5848_v57 = vld [vmem:[#allocation2 + $0x888] sm:$0xff] }
 0x8c7   :  { %6183 = vmatpush1.bf16.msra.mxu0 %v5751_v2  ;;  %6347 = vmatpush1.bf16.msra.mxu1 %v5753_v37  ;;  %v5850_v2 = vld [vmem:[#allocation2 + $0x898] sm:$0xff]  ;;  %v5849_v37 = vld [vmem:[#allocation2 + $0x890] sm:$0xff] }
 0x8c8   :  { %6184 = vmatprep.subr.bf16.mxu0 %v5760_v14  ;;  %6348 = vmatprep.subr.bf16.mxu1 %v5762_v34  ;;  %v5856_v14 = vld [vmem:[#allocation2 + $0x8c8] sm:$0xff]  ;;  %v5858_v34 = vld [vmem:[#allocation2 + $0x8d8] sm:$0xff] }
 0x8cb   :  { %6185 = vmatpush1.bf16.msra.mxu0 %v5759_v63  ;;  %6349 = vmatpush1.bf16.msra.mxu1 %v5761_v45  ;;  %v5855_v63 = vld [vmem:[#allocation2 + $0x8c0] sm:$0xff]  ;;  %v5857_v45 = vld [vmem:[#allocation2 + $0x8d0] sm:$0xff] }
 0x8cc   :  { %6186 = vmatprep.subr.bf16.mxu0 %v5768_v22  ;;  %6350 = vmatprep.subr.bf16.mxu1 %v5770_v46  ;;  %v5864_v22 = vld [vmem:[#allocation2 + $0x908] sm:$0xff]  ;;  %v5866_v46 = vld [vmem:[#allocation2 + $0x918] sm:$0xff] }
 0x8cf   :  { %6187 = vmatpush1.bf16.msra.mxu0 %v5767_v6  ;;  %6351 = vmatpush1.bf16.msra.mxu1 %v5769_v0  ;;  %v5863_v6 = vld [vmem:[#allocation2 + $0x900] sm:$0xff]  ;;  %v5865_v0 = vld [vmem:[#allocation2 + $0x910] sm:$0xff] }
 0x8d0   :  { %6188 = vmatprep.subr.bf16.mxu0 %v5776_v49  ;;  %6352 = vmatprep.subr.bf16.mxu1 %v5778_v24  ;;  %v5872_v49 = vld [vmem:[#allocation2 + $0x948] sm:$0xff]  ;;  %v5874_v24 = vld [vmem:[#allocation2 + $0x958] sm:$0xff] }
 0x8d3   :  { %6189 = vmatpush1.bf16.msra.mxu0 %v5775_v61  ;;  %6353 = vmatpush1.bf16.msra.mxu1 %v5777_v4  ;;  %v5871_v61 = vld [vmem:[#allocation2 + $0x940] sm:$0xff]  ;;  %v5873_v4 = vld [vmem:[#allocation2 + $0x950] sm:$0xff] }
 0x8d4   :  { %6190 = vmatprep.subr.bf16.mxu0 %v5784_v44  ;;  %6354 = vmatprep.subr.bf16.mxu1 %v5786_v58  ;;  %v5880_v44 = vld [vmem:[#allocation2 + $0x988] sm:$0xff]  ;;  %v5882_v58 = vld [vmem:[#allocation2 + $0x998] sm:$0xff] }
 0x8d7   :  { %6191 = vmatpush1.bf16.msra.mxu0 %v5783_v52  ;;  %6355 = vmatpush1.bf16.msra.mxu1 %v5785_v16  ;;  %v5879_v52 = vld [vmem:[#allocation2 + $0x980] sm:$0xff]  ;;  %v5881_v16 = vld [vmem:[#allocation2 + $0x990] sm:$0xff] }
 0x8d8   :  { %6192 = vmatprep.subr.bf16.mxu0 %v5792_v48  ;;  %6356 = vmatprep.subr.bf16.mxu1 %v5794_v20  ;;  %v5888_v48 = vld [vmem:[#allocation2 + $0x9c8] sm:$0xff]  ;;  %v5890_v20 = vld [vmem:[#allocation2 + $0x9d8] sm:$0xff] }
 0x8db   :  { %6193 = vmatpush1.bf16.msra.mxu0 %v5791_v21  ;;  %6357 = vmatpush1.bf16.msra.mxu1 %v5793_v27  ;;  %v5887_v21 = vld [vmem:[#allocation2 + $0x9c0] sm:$0xff]  ;;  %v5889_v27 = vld [vmem:[#allocation2 + $0x9d0] sm:$0xff] }
 0x8dc   :  { %6194 = vmatprep.subr.bf16.mxu0 %v5800_v60  ;;  %6358 = vmatprep.subr.bf16.mxu1 %v5802_v13  ;;  %v5896_v60 = vld [vmem:[#allocation2 + $0xa08] sm:$0xff]  ;;  %v5898_v13 = vld [vmem:[#allocation2 + $0xa18] sm:$0xff] }
 0x8df   :  { %6195 = vmatpush1.bf16.msra.mxu0 %v5799_v42  ;;  %6359 = vmatpush1.bf16.msra.mxu1 %v5801_v32  ;;  %v5895_v42 = vld [vmem:[#allocation2 + $0xa00] sm:$0xff]  ;;  %v5897_v32 = vld [vmem:[#allocation2 + $0xa10] sm:$0xff] }
 0x8e0   :  { %6196 = vmatprep.subr.bf16.mxu0 %v5808_v51  ;;  %6360 = vmatprep.subr.bf16.mxu1 %v5810_v30  ;;  %v5904_v51 = vld [vmem:[#allocation2 + $0xa48] sm:$0xff]  ;;  %v5906_v30 = vld [vmem:[#allocation2 + $0xa58] sm:$0xff] }
 0x8e3   :  { %6197 = vmatpush1.bf16.msra.mxu0 %v5807_v17  ;;  %6361 = vmatpush1.bf16.msra.mxu1 %v5809_v11  ;;  %v5903_v17 = vld [vmem:[#allocation2 + $0xa40] sm:$0xff]  ;;  %v5905_v11 = vld [vmem:[#allocation2 + $0xa50] sm:$0xff] }
 0x8e4   :  { %6198 = vmatprep.subr.bf16.mxu0 %v5816_v39  ;;  %6362 = vmatprep.subr.bf16.mxu1 %v5818_v35  ;;  %v5912_v39 = vld [vmem:[#allocation2 + $0xa88] sm:$0xff]  ;;  %v5914_v35 = vld [vmem:[#allocation2 + $0xa98] sm:$0xff] }
 0x8e7   :  { %6199 = vmatpush1.bf16.msra.mxu0 %v5815_v40  ;;  %6363 = vmatpush1.bf16.msra.mxu1 %v5817_v29  ;;  %v5911_v40 = vld [vmem:[#allocation2 + $0xa80] sm:$0xff]  ;;  %v5913_v29 = vld [vmem:[#allocation2 + $0xa90] sm:$0xff] }
 0x8e8   :  { %6200 = vmatprep.subr.bf16.mxu0 %v5824_v28  ;;  %6364 = vmatprep.subr.bf16.mxu1 %v5826_v7  ;;  %v5920_v28 = vld [vmem:[#allocation2 + $0xac8] sm:$0xff]  ;;  %v5922_v7 = vld [vmem:[#allocation2 + $0xad8] sm:$0xff] }
 0x8eb   :  { %6201 = vmatpush1.bf16.msra.mxu0 %v5823_v41  ;;  %6365 = vmatpush1.bf16.msra.mxu1 %v5825_v47  ;;  %v5919_v41 = vld [vmem:[#allocation2 + $0xac0] sm:$0xff]  ;;  %v5921_v47 = vld [vmem:[#allocation2 + $0xad0] sm:$0xff] }
 0x8ec   :  { %6211 = vmatprep.subr.bf16.mxu0 %v5832_v54  ;;  %6375 = vmatprep.subr.bf16.mxu1 %v5834_v8  ;;  %v5928_v54 = vld [vmem:[#allocation2 + $0xb08] sm:$0xff]  ;;  %v5930_v8 = vld [vmem:[#allocation2 + $0xb18] sm:$0xff] }
 0x8ee   :  { %6203 = vmatmul.mubr.bf16.vlgmr.msra.gmra.mrb[140].mxu0 %v13115_v1  ;;  %6367 = vmatmul.mubr.bf16.vlgmr.msra.gmra.mrb[112].mxu1 %v13115_v1 }
 0x8ef   :  { %6212 = vmatpush1.bf16.msra.mxu0 %v5831_v25  ;;  %6376 = vmatpush1.bf16.msra.mxu1 %v5833_v10  ;;  %v5927_v25 = vld [vmem:[#allocation2 + $0xb00] sm:$0xff]  ;;  %v5929_v10 = vld [vmem:[#allocation2 + $0xb10] sm:$0xff] }
 0x8f0   :  { %6213 = vmatprep.subr.bf16.mxu0 %v5840_v33  ;;  %6377 = vmatprep.subr.bf16.mxu1 %v5842_v18  ;;  %v5936_v33 = vld [vmem:[#allocation2 + $0xb48] sm:$0xff]  ;;  %v5938_v18 = vld [vmem:[#allocation2 + $0xb58] sm:$0xff] }
 0x8f1   :  { %6243 = vmatprep.mubr.bf16.mxu0 %v13119_v53  ;;  %6407 = vmatprep.mubr.bf16.mxu1 %v13119_v53 }
 0x8f3   :  { %6214 = vmatpush1.bf16.msra.mxu0 %v5839_v9  ;;  %6378 = vmatpush1.bf16.msra.mxu1 %v5841_v62  ;;  %v5935_v9 = vld [vmem:[#allocation2 + $0xb40] sm:$0xff]  ;;  %v5937_v62 = vld [vmem:[#allocation2 + $0xb50] sm:$0xff] }
 0x8f4   :  { %6215 = vmatprep.subr.bf16.mxu0 %v5848_v57  ;;  %6379 = vmatprep.subr.bf16.mxu1 %v5850_v2  ;;  %v5944_v57 = vld [vmem:[#allocation2 + $0xb88] sm:$0xff]  ;;  %v5946_v2 = vld [vmem:[#allocation2 + $0xb98] sm:$0xff] }
 0x8f7   :  { %6216 = vmatpush1.bf16.msra.mxu0 %v5847_v26  ;;  %6380 = vmatpush1.bf16.msra.mxu1 %v5849_v37  ;;  %v5943_v26 = vld [vmem:[#allocation2 + $0xb80] sm:$0xff]  ;;  %v5945_v37 = vld [vmem:[#allocation2 + $0xb90] sm:$0xff] }
 0x8f8   :  { %6217 = vmatprep.subr.bf16.mxu0 %v5856_v14  ;;  %6381 = vmatprep.subr.bf16.mxu1 %v5858_v34  ;;  %v5952_v14 = vld [vmem:[#allocation2 + $0xbc8] sm:$0xff]  ;;  %v5954_v34 = vld [vmem:[#allocation2 + $0xbd8] sm:$0xff] }
 0x8fb   :  { %6218 = vmatpush1.bf16.msra.mxu0 %v5855_v63  ;;  %6382 = vmatpush1.bf16.msra.mxu1 %v5857_v45  ;;  %v5951_v63 = vld [vmem:[#allocation2 + $0xbc0] sm:$0xff]  ;;  %v5953_v45 = vld [vmem:[#allocation2 + $0xbd0] sm:$0xff] }
 0x8fc   :  { %6219 = vmatprep.subr.bf16.mxu0 %v5864_v22  ;;  %6383 = vmatprep.subr.bf16.mxu1 %v5866_v46  ;;  %v5960_v22 = vld [vmem:[#allocation2 + $0xc08] sm:$0xff]  ;;  %v5962_v46 = vld [vmem:[#allocation2 + $0xc18] sm:$0xff] }
 0x8ff   :  { %6220 = vmatpush1.bf16.msra.mxu0 %v5863_v6  ;;  %6384 = vmatpush1.bf16.msra.mxu1 %v5865_v0  ;;  %v13127_v6 = vpack.c.bf16 %v13041_v3, %v13041_v3  ;;  %v5959_v0 = vld [vmem:[#allocation2 + $0xc00] sm:$0xff] }
 0x900   :  { %6221 = vmatprep.subr.bf16.mxu0 %v5872_v49  ;;  %6385 = vmatprep.subr.bf16.mxu1 %v5874_v24  ;;  %v5961_v49 = vld [vmem:[#allocation2 + $0xc10] sm:$0xff]  ;;  %v5968_v24 = vld [vmem:[#allocation2 + $0xc48] sm:$0xff]  ;;  %v5967_v3 = vld [vmem:[#allocation2 + $0xc40] sm:$0xff] }
 0x903   :  { %6222 = vmatpush1.bf16.msra.mxu0 %v5871_v61  ;;  %6386 = vmatpush1.bf16.msra.mxu1 %v5873_v4  ;;  %v5970_v61 = vld [vmem:[#allocation2 + $0xc58] sm:$0xff]  ;;  %v13131_v4 = vpack.c.bf16 %v13047_v43, %v13047_v43  ;;  %v5975_v43 = vld [vmem:[#allocation2 + $0xc80] sm:$0xff] }
 0x904   :  { %6223 = vmatprep.subr.bf16.mxu0 %v5880_v44  ;;  %6387 = vmatprep.subr.bf16.mxu1 %v5882_v58  ;;  %v5969_v44 = vld [vmem:[#allocation2 + $0xc50] sm:$0xff]  ;;  %v5976_v58 = vld [vmem:[#allocation2 + $0xc88] sm:$0xff] }
 0x907   :  { %6224 = vmatpush1.bf16.msra.mxu0 %v5879_v52  ;;  %6388 = vmatpush1.bf16.msra.mxu1 %v5881_v16  ;;  %v5978_v52 = vld [vmem:[#allocation2 + $0xc98] sm:$0xff]  ;;  %v5977_v16 = vld [vmem:[#allocation2 + $0xc90] sm:$0xff] }
 0x908   :  { %6225 = vmatprep.subr.bf16.mxu0 %v5888_v48  ;;  %6389 = vmatprep.subr.bf16.mxu1 %v5890_v20  ;;  %v5984_v48 = vld [vmem:[#allocation2 + $0xcc8] sm:$0xff]  ;;  %v5986_v20 = vld [vmem:[#allocation2 + $0xcd8] sm:$0xff] }
 0x90b   :  { %6226 = vmatpush1.bf16.msra.mxu0 %v5887_v21  ;;  %6390 = vmatpush1.bf16.msra.mxu1 %v5889_v27  ;;  %v5983_v21 = vld [vmem:[#allocation2 + $0xcc0] sm:$0xff]  ;;  %v5985_v27 = vld [vmem:[#allocation2 + $0xcd0] sm:$0xff] }
 0x90c   :  { %6227 = vmatprep.subr.bf16.mxu0 %v5896_v60  ;;  %6391 = vmatprep.subr.bf16.mxu1 %v5898_v13  ;;  %v5992_v60 = vld [vmem:[#allocation2 + $0xd08] sm:$0xff]  ;;  %v5994_v13 = vld [vmem:[#allocation2 + $0xd18] sm:$0xff] }
 0x90f   :  { %6228 = vmatpush1.bf16.msra.mxu0 %v5895_v42  ;;  %6392 = vmatpush1.bf16.msra.mxu1 %v5897_v32  ;;  %v5991_v42 = vld [vmem:[#allocation2 + $0xd00] sm:$0xff]  ;;  %v5993_v32 = vld [vmem:[#allocation2 + $0xd10] sm:$0xff] }
 0x910   :  { %6229 = vmatprep.subr.bf16.mxu0 %v5904_v51  ;;  %6393 = vmatprep.subr.bf16.mxu1 %v5906_v30  ;;  %v6000_v51 = vld [vmem:[#allocation2 + $0xd48] sm:$0xff]  ;;  %v6002_v30 = vld [vmem:[#allocation2 + $0xd58] sm:$0xff] }
 0x913   :  { %6230 = vmatpush1.bf16.msra.mxu0 %v5903_v17  ;;  %6394 = vmatpush1.bf16.msra.mxu1 %v5905_v11  ;;  %v5999_v17 = vld [vmem:[#allocation2 + $0xd40] sm:$0xff]  ;;  %v6001_v11 = vld [vmem:[#allocation2 + $0xd50] sm:$0xff] }
 0x914   :  { %6231 = vmatprep.subr.bf16.mxu0 %v5912_v39  ;;  %6395 = vmatprep.subr.bf16.mxu1 %v5914_v35  ;;  %v6008_v39 = vld [vmem:[#allocation2 + $0xd88] sm:$0xff]  ;;  %v6010_v35 = vld [vmem:[#allocation2 + $0xd98] sm:$0xff] }
 0x917   :  { %6232 = vmatpush1.bf16.msra.mxu0 %v5911_v40  ;;  %6396 = vmatpush1.bf16.msra.mxu1 %v5913_v29  ;;  %v6007_v40 = vld [vmem:[#allocation2 + $0xd80] sm:$0xff]  ;;  %v6009_v29 = vld [vmem:[#allocation2 + $0xd90] sm:$0xff] }
 0x918   :  { %6233 = vmatprep.subr.bf16.mxu0 %v5920_v28  ;;  %6397 = vmatprep.subr.bf16.mxu1 %v5922_v7  ;;  %v6016_v28 = vld [vmem:[#allocation2 + $0xdc8] sm:$0xff]  ;;  %v6018_v7 = vld [vmem:[#allocation2 + $0xdd8] sm:$0xff] }
 0x91b   :  { %6234 = vmatpush1.bf16.msra.mxu0 %v5919_v41  ;;  %6398 = vmatpush1.bf16.msra.mxu1 %v5921_v47  ;;  %v6015_v41 = vld [vmem:[#allocation2 + $0xdc0] sm:$0xff]  ;;  %v6017_v47 = vld [vmem:[#allocation2 + $0xdd0] sm:$0xff] }
 0x91c   :  { %6235 = vmatprep.subr.bf16.mxu0 %v5928_v54  ;;  %6399 = vmatprep.subr.bf16.mxu1 %v5930_v8  ;;  %v6024_v54 = vld [vmem:[#allocation2 + $0xe08] sm:$0xff]  ;;  %v6026_v8 = vld [vmem:[#allocation2 + $0xe18] sm:$0xff] }
 0x91f   :  { %6236 = vmatpush1.bf16.msra.mxu0 %v5927_v25  ;;  %6400 = vmatpush1.bf16.msra.mxu1 %v5929_v10  ;;  %v6023_v25 = vld [vmem:[#allocation2 + $0xe00] sm:$0xff]  ;;  %v6025_v10 = vld [vmem:[#allocation2 + $0xe10] sm:$0xff] }
 0x920   :  { %6237 = vmatprep.subr.bf16.mxu0 %v5936_v33  ;;  %6401 = vmatprep.subr.bf16.mxu1 %v5938_v18  ;;  %v6032_v33 = vld [vmem:[#allocation2 + $0xe48] sm:$0xff]  ;;  %v6034_v18 = vld [vmem:[#allocation2 + $0xe58] sm:$0xff] }
 0x923   :  { %6238 = vmatpush1.bf16.msra.mxu0 %v5935_v9  ;;  %6402 = vmatpush1.bf16.msra.mxu1 %v5937_v62  ;;  %v6031_v9 = vld [vmem:[#allocation2 + $0xe40] sm:$0xff]  ;;  %v6033_v62 = vld [vmem:[#allocation2 + $0xe50] sm:$0xff] }
 0x924   :  { %6239 = vmatprep.subr.bf16.mxu0 %v5944_v57  ;;  %6403 = vmatprep.subr.bf16.mxu1 %v5946_v2  ;;  %v6040_v57 = vld [vmem:[#allocation2 + $0xe88] sm:$0xff]  ;;  %v6042_v2 = vld [vmem:[#allocation2 + $0xe98] sm:$0xff] }
 0x927   :  { %6240 = vmatpush1.bf16.msra.mxu0 %v5943_v26  ;;  %6404 = vmatpush1.bf16.msra.mxu1 %v5945_v37  ;;  %v6039_v26 = vld [vmem:[#allocation2 + $0xe80] sm:$0xff]  ;;  %v6041_v37 = vld [vmem:[#allocation2 + $0xe90] sm:$0xff] }
 0x928   :  { %6241 = vmatprep.subr.bf16.mxu0 %v5952_v14  ;;  %6405 = vmatprep.subr.bf16.mxu1 %v5954_v34  ;;  %v6048_v14 = vld [vmem:[#allocation2 + $0xec8] sm:$0xff]  ;;  %v6050_v34 = vld [vmem:[#allocation2 + $0xed8] sm:$0xff] }
 0x92b   :  { %6242 = vmatpush1.bf16.msra.mxu0 %v5951_v63  ;;  %6406 = vmatpush1.bf16.msra.mxu1 %v5953_v45  ;;  %v6047_v63 = vld [vmem:[#allocation2 + $0xec0] sm:$0xff]  ;;  %v6049_v45 = vld [vmem:[#allocation2 + $0xed0] sm:$0xff] }
 0x92c   :  { %6252 = vmatprep.subr.bf16.mxu0 %v5960_v22  ;;  %6416 = vmatprep.subr.bf16.mxu1 %v5962_v46  ;;  %v6056_v22 = vld [vmem:[#allocation2 + $0xf08] sm:$0xff]  ;;  %v6058_v46 = vld [vmem:[#allocation2 + $0xf18] sm:$0xff] }
 0x92e   :  { %6244 = vmatmul.mubr.bf16.vlgmr.msra.gmra.mrb[140].mxu0 %v13127_v6  ;;  %6408 = vmatmul.mubr.bf16.vlgmr.msra.gmra.mrb[112].mxu1 %v13127_v6 }
 0x92f   :  { %6253 = vmatpush1.bf16.msra.mxu0 %v5959_v0  ;;  %6417 = vmatpush1.bf16.msra.mxu1 %v5961_v49  ;;  %v6055_v0 = vld [vmem:[#allocation2 + $0xf00] sm:$0xff]  ;;  %v6057_v49 = vld [vmem:[#allocation2 + $0xf10] sm:$0xff] }
 0x930   :  { %6254 = vmatprep.subr.bf16.mxu0 %v5968_v24  ;;  %6418 = vmatprep.subr.bf16.mxu1 %v5970_v61  ;;  %v6064_v24 = vld [vmem:[#allocation2 + $0xf48] sm:$0xff]  ;;  %v6066_v61 = vld [vmem:[#allocation2 + $0xf58] sm:$0xff] }
 0x931   :  { %6284 = vmatprep.mubr.bf16.mxu0 %v13131_v4  ;;  %6448 = vmatprep.mubr.bf16.mxu1 %v13131_v4 }
 0x933   :  { %6255 = vmatpush1.bf16.msra.mxu0 %v5967_v3  ;;  %6419 = vmatpush1.bf16.msra.mxu1 %v5969_v44  ;;  %v6063_v3 = vld [vmem:[#allocation2 + $0xf40] sm:$0xff]  ;;  %v6065_v44 = vld [vmem:[#allocation2 + $0xf50] sm:$0xff] }
 0x934   :  { %6256 = vmatprep.subr.bf16.mxu0 %v5976_v58  ;;  %6420 = vmatprep.subr.bf16.mxu1 %v5978_v52  ;;  %v6072_v58 = vld [vmem:[#allocation2 + $0xf88] sm:$0xff]  ;;  %v6074_v52 = vld [vmem:[#allocation2 + $0xf98] sm:$0xff] }
 0x937   :  { %6257 = vmatpush1.bf16.msra.mxu0 %v5975_v43  ;;  %6421 = vmatpush1.bf16.msra.mxu1 %v5977_v16  ;;  %v6071_v43 = vld [vmem:[#allocation2 + $0xf80] sm:$0xff]  ;;  %v6073_v16 = vld [vmem:[#allocation2 + $0xf90] sm:$0xff] }
 0x938   :  { %6258 = vmatprep.subr.bf16.mxu0 %v5984_v48  ;;  %6422 = vmatprep.subr.bf16.mxu1 %v5986_v20  ;;  %v6080_v48 = vld [vmem:[#allocation2 + $0xfc8] sm:$0xff]  ;;  %v6082_v20 = vld [vmem:[#allocation2 + $0xfd8] sm:$0xff] }
 0x93b   :  { %6259 = vmatpush1.bf16.msra.mxu0 %v5983_v21  ;;  %6423 = vmatpush1.bf16.msra.mxu1 %v5985_v27  ;;  %v6079_v21 = vld [vmem:[#allocation2 + $0xfc0] sm:$0xff]  ;;  %v6081_v27 = vld [vmem:[#allocation2 + $0xfd0] sm:$0xff] }
 0x93c   :  { %6260 = vmatprep.subr.bf16.mxu0 %v5992_v60  ;;  %6424 = vmatprep.subr.bf16.mxu1 %v5994_v13  ;;  %v5580_v60 = vld [vmem:[#allocation2 + $0x28] sm:$0xff]  ;;  %v5582_v13 = vld [vmem:[#allocation2 + $0x38] sm:$0xff] }
 0x93f   :  { %6261 = vmatpush1.bf16.msra.mxu0 %v5991_v42  ;;  %6425 = vmatpush1.bf16.msra.mxu1 %v5993_v32  ;;  %v13139_v42 = vpack.c.bf16 %v13045_v36, %v13045_v36  ;;  %v5579_v32 = vld [vmem:[#allocation2 + $0x20] sm:$0xff]  ;;  %v5596_v36 = vld [vmem:[#allocation2 + $0xa8] sm:$0xff] }
 0x940   :  { %6262 = vmatprep.subr.bf16.mxu0 %v6000_v51  ;;  %6426 = vmatprep.subr.bf16.mxu1 %v6002_v30  ;;  %v5581_v51 = vld [vmem:[#allocation2 + $0x30] sm:$0xff]  ;;  %v5588_v30 = vld [vmem:[#allocation2 + $0x68] sm:$0xff] }
 0x943   :  { %6263 = vmatpush1.bf16.msra.mxu0 %v5999_v17  ;;  %6427 = vmatpush1.bf16.msra.mxu1 %v6001_v11  ;;  %v5590_v17 = vld [vmem:[#allocation2 + $0x78] sm:$0xff]  ;;  %v5587_v11 = vld [vmem:[#allocation2 + $0x60] sm:$0xff] }
 0x944   :  { %6264 = vmatprep.subr.bf16.mxu0 %v6008_v39  ;;  %6428 = vmatprep.subr.bf16.mxu1 %v6010_v35  ;;  %v5589_v39 = vld [vmem:[#allocation2 + $0x70] sm:$0xff]  ;;  %v5598_v35 = vld [vmem:[#allocation2 + $0xb8] sm:$0xff] }
 0x947   :  { %6265 = vmatpush1.bf16.msra.mxu0 %v6007_v40  ;;  %6429 = vmatpush1.bf16.msra.mxu1 %v6009_v29  ;;  %v5595_v40 = vld [vmem:[#allocation2 + $0xa0] sm:$0xff]  ;;  %v5597_v29 = vld [vmem:[#allocation2 + $0xb0] sm:$0xff] }
 0x948   :  { %6266 = vmatprep.subr.bf16.mxu0 %v6016_v28  ;;  %6430 = vmatprep.subr.bf16.mxu1 %v6018_v7  ;;  %v5604_v28 = vld [vmem:[#allocation2 + $0xe8] sm:$0xff]  ;;  %v5606_v7 = vld [vmem:[#allocation2 + $0xf8] sm:$0xff] }
 0x94b   :  { %6267 = vmatpush1.bf16.msra.mxu0 %v6015_v41  ;;  %6431 = vmatpush1.bf16.msra.mxu1 %v6017_v47  ;;  %v5603_v41 = vld [vmem:[#allocation2 + $0xe0] sm:$0xff]  ;;  %v5605_v47 = vld [vmem:[#allocation2 + $0xf0] sm:$0xff] }
 0x94c   :  { %6268 = vmatprep.subr.bf16.mxu0 %v6024_v54  ;;  %6432 = vmatprep.subr.bf16.mxu1 %v6026_v8  ;;  %v5612_v54 = vld [vmem:[#allocation2 + $0x128] sm:$0xff]  ;;  %v5614_v8 = vld [vmem:[#allocation2 + $0x138] sm:$0xff] }
 0x94f   :  { %6269 = vmatpush1.bf16.msra.mxu0 %v6023_v25  ;;  %6433 = vmatpush1.bf16.msra.mxu1 %v6025_v10  ;;  %v5613_v25 = vld [vmem:[#allocation2 + $0x130] sm:$0xff]  ;;  %v5620_v10 = vld [vmem:[#allocation2 + $0x168] sm:$0xff] }
 0x950   :  { %6270 = vmatprep.subr.bf16.mxu0 %v6032_v33  ;;  %6434 = vmatprep.subr.bf16.mxu1 %v6034_v18  ;;  %v5622_v33 = vld [vmem:[#allocation2 + $0x178] sm:$0xff]  ;;  %v5619_v18 = vld [vmem:[#allocation2 + $0x160] sm:$0xff] }
 0x953   :  { %6271 = vmatpush1.bf16.msra.mxu0 %v6031_v9  ;;  %6435 = vmatpush1.bf16.msra.mxu1 %v6033_v62  ;;  %v5621_v9 = vld [vmem:[#allocation2 + $0x170] sm:$0xff]  ;;  %v5628_v62 = vld [vmem:[#allocation2 + $0x1a8] sm:$0xff] }
 0x954   :  { %6272 = vmatprep.subr.bf16.mxu0 %v6040_v57  ;;  %6436 = vmatprep.subr.bf16.mxu1 %v6042_v2  ;;  %v5630_v57 = vld [vmem:[#allocation2 + $0x1b8] sm:$0xff]  ;;  %v5627_v2 = vld [vmem:[#allocation2 + $0x1a0] sm:$0xff] }
 0x957   :  { %6273 = vmatpush1.bf16.msra.mxu0 %v6039_v26  ;;  %6437 = vmatpush1.bf16.msra.mxu1 %v6041_v37  ;;  %v5629_v26 = vld [vmem:[#allocation2 + $0x1b0] sm:$0xff]  ;;  %v5636_v37 = vld [vmem:[#allocation2 + $0x1e8] sm:$0xff] }
 0x958   :  { %6274 = vmatprep.subr.bf16.mxu0 %v6048_v14  ;;  %6438 = vmatprep.subr.bf16.mxu1 %v6050_v34  ;;  %v5638_v14 = vld [vmem:[#allocation2 + $0x1f8] sm:$0xff]  ;;  %v5635_v34 = vld [vmem:[#allocation2 + $0x1e0] sm:$0xff] }
 0x95b   :  { %6275 = vmatpush1.bf16.msra.mxu0 %v6047_v63  ;;  %6439 = vmatpush1.bf16.msra.mxu1 %v6049_v45  ;;  %v5637_v63 = vld [vmem:[#allocation2 + $0x1f0] sm:$0xff]  ;;  %v5644_v45 = vld [vmem:[#allocation2 + $0x228] sm:$0xff] }
 0x95c   :  { %6276 = vmatprep.subr.bf16.mxu0 %v6056_v22  ;;  %6440 = vmatprep.subr.bf16.mxu1 %v6058_v46  ;;  %v5646_v22 = vld [vmem:[#allocation2 + $0x238] sm:$0xff]  ;;  %v5643_v46 = vld [vmem:[#allocation2 + $0x220] sm:$0xff] }
 0x95f   :  { %6277 = vmatpush1.bf16.msra.mxu0 %v6055_v0  ;;  %6441 = vmatpush1.bf16.msra.mxu1 %v6057_v49  ;;  %v5645_v0 = vld [vmem:[#allocation2 + $0x230] sm:$0xff]  ;;  %v5652_v49 = vld [vmem:[#allocation2 + $0x268] sm:$0xff] }
 0x960   :  { %6278 = vmatprep.subr.bf16.mxu0 %v6064_v24  ;;  %6442 = vmatprep.subr.bf16.mxu1 %v6066_v61  ;;  %v5654_v24 = vld [vmem:[#allocation2 + $0x278] sm:$0xff]  ;;  %v5651_v61 = vld [vmem:[#allocation2 + $0x260] sm:$0xff] }
 0x963   :  { %6279 = vmatpush1.bf16.msra.mxu0 %v6063_v3  ;;  %6443 = vmatpush1.bf16.msra.mxu1 %v6065_v44  ;;  %v5653_v3 = vld [vmem:[#allocation2 + $0x270] sm:$0xff]  ;;  %v5660_v44 = vld [vmem:[#allocation2 + $0x2a8] sm:$0xff] }
 0x964   :  { %6280 = vmatprep.subr.bf16.mxu0 %v6072_v58  ;;  %6444 = vmatprep.subr.bf16.mxu1 %v6074_v52  ;;  %v5662_v58 = vld [vmem:[#allocation2 + $0x2b8] sm:$0xff]  ;;  %v5659_v52 = vld [vmem:[#allocation2 + $0x2a0] sm:$0xff] }
 0x967   :  { %6281 = vmatpush1.bf16.msra.mxu0 %v6071_v43  ;;  %6445 = vmatpush1.bf16.msra.mxu1 %v6073_v16  ;;  %v5661_v43 = vld [vmem:[#allocation2 + $0x2b0] sm:$0xff]  ;;  %v5668_v16 = vld [vmem:[#allocation2 + $0x2e8] sm:$0xff] }
 0x968   :  { %6282 = vmatprep.subr.bf16.mxu0 %v6080_v48  ;;  %6446 = vmatprep.subr.bf16.mxu1 %v6082_v20  ;;  %v5670_v48 = vld [vmem:[#allocation2 + $0x2f8] sm:$0xff]  ;;  %v5667_v20 = vld [vmem:[#allocation2 + $0x2e0] sm:$0xff] }
 0x96b   :  { %6283 = vmatpush1.bf16.msra.mxu0 %v6079_v21  ;;  %6447 = vmatpush1.bf16.msra.mxu1 %v6081_v27  ;;  %v5669_v21 = vld [vmem:[#allocation2 + $0x2f0] sm:$0xff]  ;;  %v5676_v27 = vld [vmem:[#allocation2 + $0x328] sm:$0xff] }
 0x96c   :  { %6457 = vmatprep.subr.bf16.mxu0 %v5580_v60  ;;  %6621 = vmatprep.subr.bf16.mxu1 %v5582_v13  ;;  %v5678_v60 = vld [vmem:[#allocation2 + $0x338] sm:$0xff]  ;;  %v5675_v13 = vld [vmem:[#allocation2 + $0x320] sm:$0xff] }
 0x96e   :  { %6285 = vmatmul.mubr.bf16.vlgmr.msra.gmra.mrb[140].mxu0 %v13139_v42  ;;  %6449 = vmatmul.mubr.bf16.vlgmr.msra.gmra.mrb[112].mxu1 %v13139_v42 }
 0x96f   :  { %6458 = vmatpush1.bf16.msra.mxu0 %v5579_v32  ;;  %6622 = vmatpush1.bf16.msra.mxu1 %v5581_v51  ;;  %v5677_v32 = vld [vmem:[#allocation2 + $0x330] sm:$0xff]  ;;  %v5684_v51 = vld [vmem:[#allocation2 + $0x368] sm:$0xff] }
 0x970   :  { %6459 = vmatprep.subr.bf16.mxu0 %v5588_v30  ;;  %6623 = vmatprep.subr.bf16.mxu1 %v5590_v17  ;;  %v5686_v30 = vld [vmem:[#allocation2 + $0x378] sm:$0xff]  ;;  %v5683_v17 = vld [vmem:[#allocation2 + $0x360] sm:$0xff] }
 0x971   :  { %6489 = vmatprep.mubr.bf16.mxu0 %v13049_v5  ;;  %6653 = vmatprep.mubr.bf16.mxu1 %v13049_v5  ;;  %v5611_v5 = vld [vmem:[#allocation2 + $0x120] sm:$0xff] }
 0x973   :  { %6460 = vmatpush1.bf16.msra.mxu0 %v5587_v11  ;;  %6624 = vmatpush1.bf16.msra.mxu1 %v5589_v39  ;;  %v5685_v11 = vld [vmem:[#allocation2 + $0x370] sm:$0xff]  ;;  %v5692_v39 = vld [vmem:[#allocation2 + $0x3a8] sm:$0xff] }
 0x974   :  { %6461 = vmatprep.subr.bf16.mxu0 %v5596_v36  ;;  %6625 = vmatprep.subr.bf16.mxu1 %v5598_v35  ;;  %v5694_v36 = vld [vmem:[#allocation2 + $0x3b8] sm:$0xff]  ;;  %v5691_v35 = vld [vmem:[#allocation2 + $0x3a0] sm:$0xff] }
 0x977   :  { %6462 = vmatpush1.bf16.msra.mxu0 %v5595_v40  ;;  %6626 = vmatpush1.bf16.msra.mxu1 %v5597_v29  ;;  %v5693_v40 = vld [vmem:[#allocation2 + $0x3b0] sm:$0xff]  ;;  %v5700_v29 = vld [vmem:[#allocation2 + $0x3e8] sm:$0xff] }
 0x978   :  { %6463 = vmatprep.subr.bf16.mxu0 %v5604_v28  ;;  %6627 = vmatprep.subr.bf16.mxu1 %v5606_v7  ;;  %v5702_v28 = vld [vmem:[#allocation2 + $0x3f8] sm:$0xff]  ;;  %v5699_v7 = vld [vmem:[#allocation2 + $0x3e0] sm:$0xff] }
 0x97b   :  { %6464 = vmatpush1.bf16.msra.mxu0 %v5603_v41  ;;  %6628 = vmatpush1.bf16.msra.mxu1 %v5605_v47  ;;  %v5701_v41 = vld [vmem:[#allocation2 + $0x3f0] sm:$0xff]  ;;  %v5708_v47 = vld [vmem:[#allocation2 + $0x428] sm:$0xff] }
 0x97c   :  { %6465 = vmatprep.subr.bf16.mxu0 %v5612_v54  ;;  %6629 = vmatprep.subr.bf16.mxu1 %v5614_v8  ;;  %v5710_v54 = vld [vmem:[#allocation2 + $0x438] sm:$0xff]  ;;  %v5707_v8 = vld [vmem:[#allocation2 + $0x420] sm:$0xff] }
 0x97f   :  { %6466 = vmatpush1.bf16.msra.mxu0 %v5611_v5  ;;  %6630 = vmatpush1.bf16.msra.mxu1 %v5613_v25  ;;  %v5709_v5 = vld [vmem:[#allocation2 + $0x430] sm:$0xff]  ;;  %v5716_v25 = vld [vmem:[#allocation2 + $0x468] sm:$0xff] }
 0x980   :  { %6467 = vmatprep.subr.bf16.mxu0 %v5620_v10  ;;  %6631 = vmatprep.subr.bf16.mxu1 %v5622_v33  ;;  %v5718_v10 = vld [vmem:[#allocation2 + $0x478] sm:$0xff]  ;;  %v5715_v33 = vld [vmem:[#allocation2 + $0x460] sm:$0xff] }
 0x983   :  { %6468 = vmatpush1.bf16.msra.mxu0 %v5619_v18  ;;  %6632 = vmatpush1.bf16.msra.mxu1 %v5621_v9  ;;  %v5717_v18 = vld [vmem:[#allocation2 + $0x470] sm:$0xff]  ;;  %v5724_v9 = vld [vmem:[#allocation2 + $0x4a8] sm:$0xff] }
 0x984   :  { %6469 = vmatprep.subr.bf16.mxu0 %v5628_v62  ;;  %6633 = vmatprep.subr.bf16.mxu1 %v5630_v57  ;;  %v5726_v62 = vld [vmem:[#allocation2 + $0x4b8] sm:$0xff]  ;;  %v5723_v57 = vld [vmem:[#allocation2 + $0x4a0] sm:$0xff] }
 0x987   :  { %6470 = vmatpush1.bf16.msra.mxu0 %v5627_v2  ;;  %6634 = vmatpush1.bf16.msra.mxu1 %v5629_v26  ;;  %v5725_v2 = vld [vmem:[#allocation2 + $0x4b0] sm:$0xff]  ;;  %v5732_v26 = vld [vmem:[#allocation2 + $0x4e8] sm:$0xff] }
 0x988   :  { %6471 = vmatprep.subr.bf16.mxu0 %v5636_v37  ;;  %6635 = vmatprep.subr.bf16.mxu1 %v5638_v14  ;;  %v5731_v37 = vld [vmem:[#allocation2 + $0x4e0] sm:$0xff]  ;;  %v5733_v14 = vld [vmem:[#allocation2 + $0x4f0] sm:$0xff] }
 0x98b   :  { %6472 = vmatpush1.bf16.msra.mxu0 %v5635_v34  ;;  %6636 = vmatpush1.bf16.msra.mxu1 %v5637_v63  ;;  %v5740_v34 = vld [vmem:[#allocation2 + $0x528] sm:$0xff]  ;;  %v5742_v63 = vld [vmem:[#allocation2 + $0x538] sm:$0xff] }
 0x98c   :  { %6473 = vmatprep.subr.bf16.mxu0 %v5644_v45  ;;  %6637 = vmatprep.subr.bf16.mxu1 %v5646_v22  ;;  %v5741_v45 = vld [vmem:[#allocation2 + $0x530] sm:$0xff]  ;;  %v5748_v22 = vld [vmem:[#allocation2 + $0x568] sm:$0xff] }
 0x98f   :  { %6474 = vmatpush1.bf16.msra.mxu0 %v5643_v46  ;;  %6638 = vmatpush1.bf16.msra.mxu1 %v5645_v0  ;;  %v5750_v46 = vld [vmem:[#allocation2 + $0x578] sm:$0xff]  ;;  %v5747_v0 = vld [vmem:[#allocation2 + $0x560] sm:$0xff] }
 0x990   :  { %6475 = vmatprep.subr.bf16.mxu0 %v5652_v49  ;;  %6639 = vmatprep.subr.bf16.mxu1 %v5654_v24  ;;  %v5749_v49 = vld [vmem:[#allocation2 + $0x570] sm:$0xff]  ;;  %v5756_v24 = vld [vmem:[#allocation2 + $0x5a8] sm:$0xff] }
 0x993   :  { %6476 = vmatpush1.bf16.msra.mxu0 %v5651_v61  ;;  %6640 = vmatpush1.bf16.msra.mxu1 %v5653_v3  ;;  %v5758_v61 = vld [vmem:[#allocation2 + $0x5b8] sm:$0xff]  ;;  %v5755_v3 = vld [vmem:[#allocation2 + $0x5a0] sm:$0xff] }
 0x994   :  { %6477 = vmatprep.subr.bf16.mxu0 %v5660_v44  ;;  %6641 = vmatprep.subr.bf16.mxu1 %v5662_v58  ;;  %v5757_v44 = vld [vmem:[#allocation2 + $0x5b0] sm:$0xff]  ;;  %v5764_v58 = vld [vmem:[#allocation2 + $0x5e8] sm:$0xff] }
 0x997   :  { %6478 = vmatpush1.bf16.msra.mxu0 %v5659_v52  ;;  %6642 = vmatpush1.bf16.msra.mxu1 %v5661_v43  ;;  %v5766_v52 = vld [vmem:[#allocation2 + $0x5f8] sm:$0xff]  ;;  %v5763_v43 = vld [vmem:[#allocation2 + $0x5e0] sm:$0xff] }
 0x998   :  { %6479 = vmatprep.subr.bf16.mxu0 %v5668_v16  ;;  %6643 = vmatprep.subr.bf16.mxu1 %v5670_v48  ;;  %v5765_v16 = vld [vmem:[#allocation2 + $0x5f0] sm:$0xff]  ;;  %v5772_v48 = vld [vmem:[#allocation2 + $0x628] sm:$0xff] }
 0x99b   :  { %6480 = vmatpush1.bf16.msra.mxu0 %v5667_v20  ;;  %6644 = vmatpush1.bf16.msra.mxu1 %v5669_v21  ;;  %v5774_v20 = vld [vmem:[#allocation2 + $0x638] sm:$0xff]  ;;  %v5771_v21 = vld [vmem:[#allocation2 + $0x620] sm:$0xff] }
 0x99c   :  { %6481 = vmatprep.subr.bf16.mxu0 %v5676_v27  ;;  %6645 = vmatprep.subr.bf16.mxu1 %v5678_v60  ;;  %v5773_v27 = vld [vmem:[#allocation2 + $0x630] sm:$0xff]  ;;  %v5780_v60 = vld [vmem:[#allocation2 + $0x668] sm:$0xff] }
 0x99f   :  { %6482 = vmatpush1.bf16.msra.mxu0 %v5675_v13  ;;  %6646 = vmatpush1.bf16.msra.mxu1 %v5677_v32  ;;  %v5782_v13 = vld [vmem:[#allocation2 + $0x678] sm:$0xff]  ;;  %v5779_v32 = vld [vmem:[#allocation2 + $0x660] sm:$0xff] }
 0x9a0   :  { %6483 = vmatprep.subr.bf16.mxu0 %v5684_v51  ;;  %6647 = vmatprep.subr.bf16.mxu1 %v5686_v30  ;;  %v5781_v51 = vld [vmem:[#allocation2 + $0x670] sm:$0xff]  ;;  %v5788_v30 = vld [vmem:[#allocation2 + $0x6a8] sm:$0xff] }
 0x9a3   :  { %6484 = vmatpush1.bf16.msra.mxu0 %v5683_v17  ;;  %6648 = vmatpush1.bf16.msra.mxu1 %v5685_v11  ;;  %v5790_v17 = vld [vmem:[#allocation2 + $0x6b8] sm:$0xff]  ;;  %v5787_v11 = vld [vmem:[#allocation2 + $0x6a0] sm:$0xff] }
 0x9a4   :  { %6485 = vmatprep.subr.bf16.mxu0 %v5692_v39  ;;  %6649 = vmatprep.subr.bf16.mxu1 %v5694_v36  ;;  %v5789_v39 = vld [vmem:[#allocation2 + $0x6b0] sm:$0xff]  ;;  %v5796_v36 = vld [vmem:[#allocation2 + $0x6e8] sm:$0xff] }
 0x9a7   :  { %6486 = vmatpush1.bf16.msra.mxu0 %v5691_v35  ;;  %6650 = vmatpush1.bf16.msra.mxu1 %v5693_v40  ;;  %v5798_v35 = vld [vmem:[#allocation2 + $0x6f8] sm:$0xff]  ;;  %v5795_v40 = vld [vmem:[#allocation2 + $0x6e0] sm:$0xff] }
 0x9a8   :  { %6487 = vmatprep.subr.bf16.mxu0 %v5700_v29  ;;  %6651 = vmatprep.subr.bf16.mxu1 %v5702_v28  ;;  %v5797_v29 = vld [vmem:[#allocation2 + $0x6f0] sm:$0xff]  ;;  %v5804_v28 = vld [vmem:[#allocation2 + $0x728] sm:$0xff] }
 0x9ab   :  { %6488 = vmatpush1.bf16.msra.mxu0 %v5699_v7  ;;  %6652 = vmatpush1.bf16.msra.mxu1 %v5701_v41  ;;  %v5806_v7 = vld [vmem:[#allocation2 + $0x738] sm:$0xff]  ;;  %v5803_v41 = vld [vmem:[#allocation2 + $0x720] sm:$0xff] }
 0x9ac   :  { %6498 = vmatprep.subr.bf16.mxu0 %v5708_v47  ;;  %6662 = vmatprep.subr.bf16.mxu1 %v5710_v54  ;;  %v5805_v47 = vld [vmem:[#allocation2 + $0x730] sm:$0xff]  ;;  %v5812_v54 = vld [vmem:[#allocation2 + $0x768] sm:$0xff] }
 0x9ae   :  { %6490 = vmatmul.mubr.bf16.vlgmr.msra.gmra.mrb[144].mxu0 %v13103_v55  ;;  %6654 = vmatmul.mubr.bf16.vlgmr.msra.gmra.mrb[116].mxu1 %v13103_v55  ;;  %v5734_v55 = vld [vmem:[#allocation2 + $0x4f8] sm:$0xff] }
 0x9af   :  { %6499 = vmatpush1.bf16.msra.mxu0 %v5707_v8  ;;  %6663 = vmatpush1.bf16.msra.mxu1 %v5709_v5  ;;  %v5814_v8 = vld [vmem:[#allocation2 + $0x778] sm:$0xff]  ;;  %v5811_v5 = vld [vmem:[#allocation2 + $0x760] sm:$0xff] }
 0x9b0   :  { %6500 = vmatprep.subr.bf16.mxu0 %v5716_v25  ;;  %6664 = vmatprep.subr.bf16.mxu1 %v5718_v10  ;;  %v5813_v25 = vld [vmem:[#allocation2 + $0x770] sm:$0xff]  ;;  %v5820_v10 = vld [vmem:[#allocation2 + $0x7a8] sm:$0xff] }
 0x9b1   :  { %6530 = vmatprep.mubr.bf16.mxu0 %v13107_v59  ;;  %6694 = vmatprep.mubr.bf16.mxu1 %v13107_v59  ;;  %v5739_v59 = vld [vmem:[#allocation2 + $0x520] sm:$0xff] }
 0x9b3   :  { %6501 = vmatpush1.bf16.msra.mxu0 %v5715_v33  ;;  %6665 = vmatpush1.bf16.msra.mxu1 %v5717_v18  ;;  %v5822_v33 = vld [vmem:[#allocation2 + $0x7b8] sm:$0xff]  ;;  %v5819_v18 = vld [vmem:[#allocation2 + $0x7a0] sm:$0xff] }
 0x9b4   :  { %6502 = vmatprep.subr.bf16.mxu0 %v5724_v9  ;;  %6666 = vmatprep.subr.bf16.mxu1 %v5726_v62  ;;  %v5821_v9 = vld [vmem:[#allocation2 + $0x7b0] sm:$0xff]  ;;  %v5828_v62 = vld [vmem:[#allocation2 + $0x7e8] sm:$0xff] }
 0x9b7   :  { %6503 = vmatpush1.bf16.msra.mxu0 %v5723_v57  ;;  %6667 = vmatpush1.bf16.msra.mxu1 %v5725_v2  ;;  %v5830_v57 = vld [vmem:[#allocation2 + $0x7f8] sm:$0xff]  ;;  %v5827_v2 = vld [vmem:[#allocation2 + $0x7e0] sm:$0xff] }
 0x9b8   :  { %6504 = vmatprep.subr.bf16.mxu0 %v5732_v26  ;;  %6668 = vmatprep.subr.bf16.mxu1 %v5734_v55  ;;  %v5829_v26 = vld [vmem:[#allocation2 + $0x7f0] sm:$0xff]  ;;  %v5836_v55 = vld [vmem:[#allocation2 + $0x828] sm:$0xff] }
 0x9bb   :  { %6505 = vmatpush1.bf16.msra.mxu0 %v5731_v37  ;;  %6669 = vmatpush1.bf16.msra.mxu1 %v5733_v14  ;;  %v5838_v37 = vld [vmem:[#allocation2 + $0x838] sm:$0xff]  ;;  %v5835_v14 = vld [vmem:[#allocation2 + $0x820] sm:$0xff] }
 0x9bc   :  { %6506 = vmatprep.subr.bf16.mxu0 %v5740_v34  ;;  %6670 = vmatprep.subr.bf16.mxu1 %v5742_v63  ;;  %v5837_v34 = vld [vmem:[#allocation2 + $0x830] sm:$0xff]  ;;  %v5844_v63 = vld [vmem:[#allocation2 + $0x868] sm:$0xff] }
 0x9bf   :  { %6507 = vmatpush1.bf16.msra.mxu0 %v5739_v59  ;;  %6671 = vmatpush1.bf16.msra.mxu1 %v5741_v45  ;;  %v5846_v59 = vld [vmem:[#allocation2 + $0x878] sm:$0xff]  ;;  %v5843_v45 = vld [vmem:[#allocation2 + $0x860] sm:$0xff] }
 0x9c0   :  { %6508 = vmatprep.subr.bf16.mxu0 %v5748_v22  ;;  %6672 = vmatprep.subr.bf16.mxu1 %v5750_v46  ;;  %v5845_v22 = vld [vmem:[#allocation2 + $0x870] sm:$0xff]  ;;  %v5852_v46 = vld [vmem:[#allocation2 + $0x8a8] sm:$0xff] }
 0x9c3   :  { %6509 = vmatpush1.bf16.msra.mxu0 %v5747_v0  ;;  %6673 = vmatpush1.bf16.msra.mxu1 %v5749_v49  ;;  %v5854_v0 = vld [vmem:[#allocation2 + $0x8b8] sm:$0xff]  ;;  %v5851_v49 = vld [vmem:[#allocation2 + $0x8a0] sm:$0xff] }
 0x9c4   :  { %6510 = vmatprep.subr.bf16.mxu0 %v5756_v24  ;;  %6674 = vmatprep.subr.bf16.mxu1 %v5758_v61  ;;  %v5853_v24 = vld [vmem:[#allocation2 + $0x8b0] sm:$0xff]  ;;  %v5860_v61 = vld [vmem:[#allocation2 + $0x8e8] sm:$0xff] }
 0x9c7   :  { %6511 = vmatpush1.bf16.msra.mxu0 %v5755_v3  ;;  %6675 = vmatpush1.bf16.msra.mxu1 %v5757_v44  ;;  %v5859_v3 = vld [vmem:[#allocation2 + $0x8e0] sm:$0xff]  ;;  %v5861_v44 = vld [vmem:[#allocation2 + $0x8f0] sm:$0xff] }
 0x9c8   :  { %6512 = vmatprep.subr.bf16.mxu0 %v5764_v58  ;;  %6676 = vmatprep.subr.bf16.mxu1 %v5766_v52  ;;  %v5868_v58 = vld [vmem:[#allocation2 + $0x928] sm:$0xff]  ;;  %v5870_v52 = vld [vmem:[#allocation2 + $0x938] sm:$0xff] }
 0x9cb   :  { %6513 = vmatpush1.bf16.msra.mxu0 %v5763_v43  ;;  %6677 = vmatpush1.bf16.msra.mxu1 %v5765_v16  ;;  %v5869_v43 = vld [vmem:[#allocation2 + $0x930] sm:$0xff]  ;;  %v5876_v16 = vld [vmem:[#allocation2 + $0x968] sm:$0xff] }
 0x9cc   :  { %6514 = vmatprep.subr.bf16.mxu0 %v5772_v48  ;;  %6678 = vmatprep.subr.bf16.mxu1 %v5774_v20  ;;  %v5878_v48 = vld [vmem:[#allocation2 + $0x978] sm:$0xff]  ;;  %v5875_v20 = vld [vmem:[#allocation2 + $0x960] sm:$0xff] }
 0x9cf   :  { %6515 = vmatpush1.bf16.msra.mxu0 %v5771_v21  ;;  %6679 = vmatpush1.bf16.msra.mxu1 %v5773_v27  ;;  %v5877_v21 = vld [vmem:[#allocation2 + $0x970] sm:$0xff]  ;;  %v5884_v27 = vld [vmem:[#allocation2 + $0x9a8] sm:$0xff] }
 0x9d0   :  { %6516 = vmatprep.subr.bf16.mxu0 %v5780_v60  ;;  %6680 = vmatprep.subr.bf16.mxu1 %v5782_v13  ;;  %v5886_v60 = vld [vmem:[#allocation2 + $0x9b8] sm:$0xff]  ;;  %v5883_v13 = vld [vmem:[#allocation2 + $0x9a0] sm:$0xff] }
 0x9d3   :  { %6517 = vmatpush1.bf16.msra.mxu0 %v5779_v32  ;;  %6681 = vmatpush1.bf16.msra.mxu1 %v5781_v51  ;;  %v5885_v32 = vld [vmem:[#allocation2 + $0x9b0] sm:$0xff]  ;;  %v5892_v51 = vld [vmem:[#allocation2 + $0x9e8] sm:$0xff] }
 0x9d4   :  { %6518 = vmatprep.subr.bf16.mxu0 %v5788_v30  ;;  %6682 = vmatprep.subr.bf16.mxu1 %v5790_v17  ;;  %v5894_v30 = vld [vmem:[#allocation2 + $0x9f8] sm:$0xff]  ;;  %v5891_v17 = vld [vmem:[#allocation2 + $0x9e0] sm:$0xff] }
 0x9d7   :  { %6519 = vmatpush1.bf16.msra.mxu0 %v5787_v11  ;;  %6683 = vmatpush1.bf16.msra.mxu1 %v5789_v39  ;;  %v5893_v11 = vld [vmem:[#allocation2 + $0x9f0] sm:$0xff]  ;;  %v5900_v39 = vld [vmem:[#allocation2 + $0xa28] sm:$0xff] }
 0x9d8   :  { %6520 = vmatprep.subr.bf16.mxu0 %v5796_v36  ;;  %6684 = vmatprep.subr.bf16.mxu1 %v5798_v35  ;;  %v5902_v36 = vld [vmem:[#allocation2 + $0xa38] sm:$0xff]  ;;  %v5899_v35 = vld [vmem:[#allocation2 + $0xa20] sm:$0xff] }
 0x9db   :  { %6521 = vmatpush1.bf16.msra.mxu0 %v5795_v40  ;;  %6685 = vmatpush1.bf16.msra.mxu1 %v5797_v29  ;;  %v5901_v40 = vld [vmem:[#allocation2 + $0xa30] sm:$0xff]  ;;  %v5908_v29 = vld [vmem:[#allocation2 + $0xa68] sm:$0xff] }
 0x9dc   :  { %6522 = vmatprep.subr.bf16.mxu0 %v5804_v28  ;;  %6686 = vmatprep.subr.bf16.mxu1 %v5806_v7  ;;  %v5910_v28 = vld [vmem:[#allocation2 + $0xa78] sm:$0xff]  ;;  %v5907_v7 = vld [vmem:[#allocation2 + $0xa60] sm:$0xff] }
 0x9df   :  { %6523 = vmatpush1.bf16.msra.mxu0 %v5803_v41  ;;  %6687 = vmatpush1.bf16.msra.mxu1 %v5805_v47  ;;  %v5909_v41 = vld [vmem:[#allocation2 + $0xa70] sm:$0xff]  ;;  %v5916_v47 = vld [vmem:[#allocation2 + $0xaa8] sm:$0xff] }
 0x9e0   :  { %6524 = vmatprep.subr.bf16.mxu0 %v5812_v54  ;;  %6688 = vmatprep.subr.bf16.mxu1 %v5814_v8  ;;  %v5918_v54 = vld [vmem:[#allocation2 + $0xab8] sm:$0xff]  ;;  %v5915_v8 = vld [vmem:[#allocation2 + $0xaa0] sm:$0xff] }
 0x9e3   :  { %6525 = vmatpush1.bf16.msra.mxu0 %v5811_v5  ;;  %6689 = vmatpush1.bf16.msra.mxu1 %v5813_v25  ;;  %v5917_v5 = vld [vmem:[#allocation2 + $0xab0] sm:$0xff]  ;;  %v5924_v25 = vld [vmem:[#allocation2 + $0xae8] sm:$0xff] }
 0x9e4   :  { %6526 = vmatprep.subr.bf16.mxu0 %v5820_v10  ;;  %6690 = vmatprep.subr.bf16.mxu1 %v5822_v33  ;;  %v5926_v10 = vld [vmem:[#allocation2 + $0xaf8] sm:$0xff]  ;;  %v5923_v33 = vld [vmem:[#allocation2 + $0xae0] sm:$0xff] }
 0x9e7   :  { %6527 = vmatpush1.bf16.msra.mxu0 %v5819_v18  ;;  %6691 = vmatpush1.bf16.msra.mxu1 %v5821_v9  ;;  %v5925_v18 = vld [vmem:[#allocation2 + $0xaf0] sm:$0xff]  ;;  %v5932_v9 = vld [vmem:[#allocation2 + $0xb28] sm:$0xff] }
 0x9e8   :  { %6528 = vmatprep.subr.bf16.mxu0 %v5828_v62  ;;  %6692 = vmatprep.subr.bf16.mxu1 %v5830_v57  ;;  %v5934_v62 = vld [vmem:[#allocation2 + $0xb38] sm:$0xff]  ;;  %v5931_v57 = vld [vmem:[#allocation2 + $0xb20] sm:$0xff] }
 0x9eb   :  { %6529 = vmatpush1.bf16.msra.mxu0 %v5827_v2  ;;  %6693 = vmatpush1.bf16.msra.mxu1 %v5829_v26  ;;  %v5933_v2 = vld [vmem:[#allocation2 + $0xb30] sm:$0xff]  ;;  %v5940_v26 = vld [vmem:[#allocation2 + $0xb68] sm:$0xff] }
 0x9ec   :  { %6539 = vmatprep.subr.bf16.mxu0 %v5836_v55  ;;  %6703 = vmatprep.subr.bf16.mxu1 %v5838_v37  ;;  %v5942_v55 = vld [vmem:[#allocation2 + $0xb78] sm:$0xff]  ;;  %v5939_v37 = vld [vmem:[#allocation2 + $0xb60] sm:$0xff] }
 0x9ee   :  { %6531 = vmatmul.mubr.bf16.vlgmr.msra.gmra.mrb[144].mxu0 %v13115_v1  ;;  %6695 = vmatmul.mubr.bf16.vlgmr.msra.gmra.mrb[116].mxu1 %v13115_v1  ;;  %v5862_v1 = vld [vmem:[#allocation2 + $0x8f8] sm:$0xff] }
 0x9ef   :  { %6540 = vmatpush1.bf16.msra.mxu0 %v5835_v14  ;;  %6704 = vmatpush1.bf16.msra.mxu1 %v5837_v34  ;;  %v5941_v14 = vld [vmem:[#allocation2 + $0xb70] sm:$0xff]  ;;  %v5948_v34 = vld [vmem:[#allocation2 + $0xba8] sm:$0xff] }
 0x9f0   :  { %6541 = vmatprep.subr.bf16.mxu0 %v5844_v63  ;;  %6705 = vmatprep.subr.bf16.mxu1 %v5846_v59  ;;  %v5950_v63 = vld [vmem:[#allocation2 + $0xbb8] sm:$0xff]  ;;  %v5947_v59 = vld [vmem:[#allocation2 + $0xba0] sm:$0xff] }
 0x9f1   :  { %6571 = vmatprep.mubr.bf16.mxu0 %v13119_v53  ;;  %6735 = vmatprep.mubr.bf16.mxu1 %v13119_v53  ;;  %v5867_v53 = vld [vmem:[#allocation2 + $0x920] sm:$0xff] }
 0x9f3   :  { %6542 = vmatpush1.bf16.msra.mxu0 %v5843_v45  ;;  %6706 = vmatpush1.bf16.msra.mxu1 %v5845_v22  ;;  %v5949_v45 = vld [vmem:[#allocation2 + $0xbb0] sm:$0xff]  ;;  %v5956_v22 = vld [vmem:[#allocation2 + $0xbe8] sm:$0xff] }
 0x9f4   :  { %6543 = vmatprep.subr.bf16.mxu0 %v5852_v46  ;;  %6707 = vmatprep.subr.bf16.mxu1 %v5854_v0  ;;  %v5958_v46 = vld [vmem:[#allocation2 + $0xbf8] sm:$0xff]  ;;  %v5955_v0 = vld [vmem:[#allocation2 + $0xbe0] sm:$0xff] }
 0x9f7   :  { %6544 = vmatpush1.bf16.msra.mxu0 %v5851_v49  ;;  %6708 = vmatpush1.bf16.msra.mxu1 %v5853_v24  ;;  %v5957_v49 = vld [vmem:[#allocation2 + $0xbf0] sm:$0xff]  ;;  %v5964_v24 = vld [vmem:[#allocation2 + $0xc28] sm:$0xff] }
 0x9f8   :  { %6545 = vmatprep.subr.bf16.mxu0 %v5860_v61  ;;  %6709 = vmatprep.subr.bf16.mxu1 %v5862_v1  ;;  %v5966_v61 = vld [vmem:[#allocation2 + $0xc38] sm:$0xff]  ;;  %v5963_v1 = vld [vmem:[#allocation2 + $0xc20] sm:$0xff] }
 0x9fb   :  { %6546 = vmatpush1.bf16.msra.mxu0 %v5859_v3  ;;  %6710 = vmatpush1.bf16.msra.mxu1 %v5861_v44  ;;  %v5965_v3 = vld [vmem:[#allocation2 + $0xc30] sm:$0xff]  ;;  %v5972_v44 = vld [vmem:[#allocation2 + $0xc68] sm:$0xff] }
 0x9fc   :  { %6547 = vmatprep.subr.bf16.mxu0 %v5868_v58  ;;  %6711 = vmatprep.subr.bf16.mxu1 %v5870_v52  ;;  %v5974_v58 = vld [vmem:[#allocation2 + $0xc78] sm:$0xff]  ;;  %v5971_v52 = vld [vmem:[#allocation2 + $0xc60] sm:$0xff] }
 0x9ff   :  { %6548 = vmatpush1.bf16.msra.mxu0 %v5867_v53  ;;  %6712 = vmatpush1.bf16.msra.mxu1 %v5869_v43  ;;  %v5973_v53 = vld [vmem:[#allocation2 + $0xc70] sm:$0xff]  ;;  %v5980_v43 = vld [vmem:[#allocation2 + $0xca8] sm:$0xff] }
 0xa00   :  { %6549 = vmatprep.subr.bf16.mxu0 %v5876_v16  ;;  %6713 = vmatprep.subr.bf16.mxu1 %v5878_v48  ;;  %v5982_v16 = vld [vmem:[#allocation2 + $0xcb8] sm:$0xff]  ;;  %v5979_v48 = vld [vmem:[#allocation2 + $0xca0] sm:$0xff] }
 0xa03   :  { %6550 = vmatpush1.bf16.msra.mxu0 %v5875_v20  ;;  %6714 = vmatpush1.bf16.msra.mxu1 %v5877_v21  ;;  %v5981_v20 = vld [vmem:[#allocation2 + $0xcb0] sm:$0xff]  ;;  %v5988_v21 = vld [vmem:[#allocation2 + $0xce8] sm:$0xff] }
 0xa04   :  { %6551 = vmatprep.subr.bf16.mxu0 %v5884_v27  ;;  %6715 = vmatprep.subr.bf16.mxu1 %v5886_v60  ;;  %v5987_v27 = vld [vmem:[#allocation2 + $0xce0] sm:$0xff]  ;;  %v5989_v60 = vld [vmem:[#allocation2 + $0xcf0] sm:$0xff] }
 0xa07   :  { %6552 = vmatpush1.bf16.msra.mxu0 %v5883_v13  ;;  %6716 = vmatpush1.bf16.msra.mxu1 %v5885_v32  ;;  %v5996_v13 = vld [vmem:[#allocation2 + $0xd28] sm:$0xff]  ;;  %v5998_v32 = vld [vmem:[#allocation2 + $0xd38] sm:$0xff] }
 0xa08   :  { %6553 = vmatprep.subr.bf16.mxu0 %v5892_v51  ;;  %6717 = vmatprep.subr.bf16.mxu1 %v5894_v30  ;;  %v5997_v51 = vld [vmem:[#allocation2 + $0xd30] sm:$0xff]  ;;  %v6004_v30 = vld [vmem:[#allocation2 + $0xd68] sm:$0xff] }
 0xa0b   :  { %6554 = vmatpush1.bf16.msra.mxu0 %v5891_v17  ;;  %6718 = vmatpush1.bf16.msra.mxu1 %v5893_v11  ;;  %v6006_v17 = vld [vmem:[#allocation2 + $0xd78] sm:$0xff]  ;;  %v6003_v11 = vld [vmem:[#allocation2 + $0xd60] sm:$0xff] }
 0xa0c   :  { %6555 = vmatprep.subr.bf16.mxu0 %v5900_v39  ;;  %6719 = vmatprep.subr.bf16.mxu1 %v5902_v36  ;;  %v6005_v39 = vld [vmem:[#allocation2 + $0xd70] sm:$0xff] }
 0xa0f   :  { %6556 = vmatpush1.bf16.msra.mxu0 %v5899_v35  ;;  %6720 = vmatpush1.bf16.msra.mxu1 %v5901_v40  ;;  %v6012_v40 = vld [vmem:[#allocation2 + $0xda8] sm:$0xff] }
 0xa10   :  { %6557 = vmatprep.subr.bf16.mxu0 %v5908_v29  ;;  %6721 = vmatprep.subr.bf16.mxu1 %v5910_v28  ;;  %v6014_v29 = vld [vmem:[#allocation2 + $0xdb8] sm:$0xff] }
 0xa13   :  { %6558 = vmatpush1.bf16.msra.mxu0 %v5907_v7  ;;  %6722 = vmatpush1.bf16.msra.mxu1 %v5909_v41 }
 0xa14   :  { %6559 = vmatprep.subr.bf16.mxu0 %v5916_v47  ;;  %6723 = vmatprep.subr.bf16.mxu1 %v5918_v54 }
 0xa17   :  { %6560 = vmatpush1.bf16.msra.mxu0 %v5915_v8  ;;  %6724 = vmatpush1.bf16.msra.mxu1 %v5917_v5  ;;  %v6011_v5 = vld [vmem:[#allocation2 + $0xda0] sm:$0xff] }
 0xa18   :  { %6561 = vmatprep.subr.bf16.mxu0 %v5924_v25  ;;  %6725 = vmatprep.subr.bf16.mxu1 %v5926_v10  ;;  %v6013_v25 = vld [vmem:[#allocation2 + $0xdb0] sm:$0xff]  ;;  %v6020_v10 = vld [vmem:[#allocation2 + $0xde8] sm:$0xff] }
 0xa1b   :  { %6562 = vmatpush1.bf16.msra.mxu0 %v5923_v33  ;;  %6726 = vmatpush1.bf16.msra.mxu1 %v5925_v18  ;;  %v6022_v33 = vld [vmem:[#allocation2 + $0xdf8] sm:$0xff]  ;;  %v6019_v18 = vld [vmem:[#allocation2 + $0xde0] sm:$0xff] }
 0xa1c   :  { %6563 = vmatprep.subr.bf16.mxu0 %v5932_v9  ;;  %6727 = vmatprep.subr.bf16.mxu1 %v5934_v62  ;;  %v6021_v9 = vld [vmem:[#allocation2 + $0xdf0] sm:$0xff]  ;;  %v6028_v62 = vld [vmem:[#allocation2 + $0xe28] sm:$0xff] }
 0xa1f   :  { %6564 = vmatpush1.bf16.msra.mxu0 %v5931_v57  ;;  %6728 = vmatpush1.bf16.msra.mxu1 %v5933_v2  ;;  %v6030_v57 = vld [vmem:[#allocation2 + $0xe38] sm:$0xff]  ;;  %v6027_v2 = vld [vmem:[#allocation2 + $0xe20] sm:$0xff] }
 0xa20   :  { %6565 = vmatprep.subr.bf16.mxu0 %v5940_v26  ;;  %6729 = vmatprep.subr.bf16.mxu1 %v5942_v55  ;;  %v6029_v26 = vld [vmem:[#allocation2 + $0xe30] sm:$0xff]  ;;  %v6036_v55 = vld [vmem:[#allocation2 + $0xe68] sm:$0xff] }
 0xa23   :  { %6566 = vmatpush1.bf16.msra.mxu0 %v5939_v37  ;;  %6730 = vmatpush1.bf16.msra.mxu1 %v5941_v14  ;;  %v6038_v37 = vld [vmem:[#allocation2 + $0xe78] sm:$0xff]  ;;  %v6035_v14 = vld [vmem:[#allocation2 + $0xe60] sm:$0xff] }
 0xa24   :  { %6567 = vmatprep.subr.bf16.mxu0 %v5948_v34  ;;  %6731 = vmatprep.subr.bf16.mxu1 %v5950_v63  ;;  %v6037_v34 = vld [vmem:[#allocation2 + $0xe70] sm:$0xff]  ;;  %v6044_v63 = vld [vmem:[#allocation2 + $0xea8] sm:$0xff] }
 0xa27   :  { %6568 = vmatpush1.bf16.msra.mxu0 %v5947_v59  ;;  %6732 = vmatpush1.bf16.msra.mxu1 %v5949_v45  ;;  %v6046_v59 = vld [vmem:[#allocation2 + $0xeb8] sm:$0xff]  ;;  %v6043_v45 = vld [vmem:[#allocation2 + $0xea0] sm:$0xff] }
 0xa28   :  { %6569 = vmatprep.subr.bf16.mxu0 %v5956_v22  ;;  %6733 = vmatprep.subr.bf16.mxu1 %v5958_v46  ;;  %v6045_v22 = vld [vmem:[#allocation2 + $0xeb0] sm:$0xff]  ;;  %v6052_v46 = vld [vmem:[#allocation2 + $0xee8] sm:$0xff] }
 0xa2b   :  { %6570 = vmatpush1.bf16.msra.mxu0 %v5955_v0  ;;  %6734 = vmatpush1.bf16.msra.mxu1 %v5957_v49  ;;  %v6054_v0 = vld [vmem:[#allocation2 + $0xef8] sm:$0xff]  ;;  %v6051_v49 = vld [vmem:[#allocation2 + $0xee0] sm:$0xff] }
 0xa2c   :  { %6580 = vmatprep.subr.bf16.mxu0 %v5964_v24  ;;  %6744 = vmatprep.subr.bf16.mxu1 %v5966_v61  ;;  %v6053_v24 = vld [vmem:[#allocation2 + $0xef0] sm:$0xff]  ;;  %v6060_v61 = vld [vmem:[#allocation2 + $0xf28] sm:$0xff] }
 0xa2e   :  { %6572 = vmatmul.mubr.bf16.vlgmr.msra.gmra.mrb[144].mxu0 %v13127_v6  ;;  %6736 = vmatmul.mubr.bf16.vlgmr.msra.gmra.mrb[116].mxu1 %v13127_v6  ;;  %v5990_v6 = vld [vmem:[#allocation2 + $0xcf8] sm:$0xff] }
 0xa2f   :  { %6581 = vmatpush1.bf16.msra.mxu0 %v5963_v1  ;;  %6745 = vmatpush1.bf16.msra.mxu1 %v5965_v3  ;;  %v6062_v1 = vld [vmem:[#allocation2 + $0xf38] sm:$0xff]  ;;  %v6794_v3 = vpop.permute.xlu0 %6793 }
 0xa30   :  { %6582 = vmatprep.subr.bf16.mxu0 %v5972_v44  ;;  %6746 = vmatprep.subr.bf16.mxu1 %v5974_v58  ;;  %v6059_v44 = vld [vmem:[#allocation2 + $0xf20] sm:$0xff]  ;;  %v6061_v58 = vld [vmem:[#allocation2 + $0xf30] sm:$0xff] }
 0xa31   :  { %6612 = vmatprep.mubr.bf16.mxu0 %v13131_v4  ;;  %6776 = vmatprep.mubr.bf16.mxu1 %v13131_v4  ;;  %v5995_v4 = vld [vmem:[#allocation2 + $0xd20] sm:$0xff] }
 0xa33   :  { %6583 = vmatpush1.bf16.msra.mxu0 %v5971_v52  ;;  %6747 = vmatpush1.bf16.msra.mxu1 %v5973_v53  ;;  %v6842_v52 = vpop.permute.xlu1 %6841  ;;  %v14390_v53 = vld [vmem:[#allocation45_spill] sm:$0xff] }
 0xa34   :  { %6584 = vmatprep.subr.bf16.mxu0 %v5980_v43  ;;  %6748 = vmatprep.subr.bf16.mxu1 %v5982_v16  ;;  %v6095_v43 = vsub.s32 1, %v14390_v53  ;;  %v6068_v16 = vld [vmem:[#allocation2 + $0xf68] sm:$0xff] }
 0xa37   :  { %6585 = vmatpush1.bf16.msra.mxu0 %v5979_v48  ;;  %6749 = vmatpush1.bf16.msra.mxu1 %v5981_v20  ;;  %v6070_v48 = vld [vmem:[#allocation2 + $0xf78] sm:$0xff]  ;;  %v13166_v20 = vld [vmem:[#allocation21] sm:$0xff] }
 0xa38   :  { %6586 = vmatprep.subr.bf16.mxu0 %v5988_v21  ;;  %6750 = vmatprep.subr.bf16.mxu1 %v5990_v6  ;;  %v6818_v21 = vpop.permute.xlu0 %6817  ;;  %v6067_v6 = vld [vmem:[#allocation2 + $0xf60] sm:$0xff] }
 0xa3b   :  { %6587 = vmatpush1.bf16.msra.mxu0 %v5987_v27  ;;  %6751 = vmatpush1.bf16.msra.mxu1 %v5989_v60  ;;  %v6069_v27 = vld [vmem:[#allocation2 + $0xf70] sm:$0xff]  ;;  %v6096_v60 = vrot.slane %v13166_v20, %v6095_v43 }
 0xa3c   :  { %6588 = vmatprep.subr.bf16.mxu0 %v5996_v13  ;;  %6752 = vmatprep.subr.bf16.mxu1 %v5998_v32  ;;  %v6076_v13 = vld [vmem:[#allocation2 + $0xfa8] sm:$0xff]  ;;  %v6078_v32 = vld [vmem:[#allocation2 + $0xfb8] sm:$0xff] }
 0xa3f   :  { %6589 = vmatpush1.bf16.msra.mxu0 %v5995_v4  ;;  %6753 = vmatpush1.bf16.msra.mxu1 %v5997_v51  ;;  %v13171_v4 = vpop.permute.xlu1 %6795  ;;  %v6865_v51 = vsel %vm5445_vm14, %v14382_v23, %v6794_v3 }
 0xa40   :  { %6590 = vmatprep.subr.bf16.mxu0 %v6004_v30  ;;  %6754 = vmatprep.subr.bf16.mxu1 %v6006_v17  ;;  %v6075_v30 = vld [vmem:[#allocation2 + $0xfa0] sm:$0xff]  ;;  %v6077_v17 = vld [vmem:[#allocation2 + $0xfb0] sm:$0xff]  ;;  %v6873_v23 = vsel %vm4235_vm13, %v6865_v51, %v6818_v21  ;;  %v7012_v51 = vld [vmem:[%s14391_s8 + $0xd8] sm:$0xff] }
 0xa41   :  { %v13157_v36 = vpop.f32.mrb[140].mxu0  ;;  %v13159_v35 = vpop.f32.mrb[112].mxu1 }
 0xa42   :  { %v13161_v28 = vpop.f32.mrb[141].mxu0  ;;  %v13163_v7 = vpop.f32.mrb[113].mxu1 }
 0xa43   :  { %v6290_v41 = vpop.f32.mrb[142].mxu0  ;;  %v6454_v47 = vpop.f32.mrb[114].mxu1  ;;  %6591 = vmatpush1.bf16.msra.mxu0 %v6003_v11  ;;  %6755 = vmatpush1.bf16.msra.mxu1 %v6005_v39  ;;  %v6084_v11 = vld [vmem:[#allocation2 + $0xfe8] sm:$0xff]  ;;  %v9740_v39 = vadd.f32 %v13161_v28, %v6096_v60  ;;  %v6085_v28 = vld [vmem:[#allocation2 + $0xff0] sm:$0xff]  ;;  %v6993_v60 = vld [vmem:[%s14391_s8 + $0x40] sm:$0xff] }
 0xa44   :  { %v6291_v54 = vpop.f32.mrb[143].mxu0  ;;  %v6455_v8 = vpop.f32.mrb[115].mxu1  ;;  %6592 = vmatprep.subr.bf16.mxu0 %v6012_v40  ;;  %6756 = vmatprep.subr.bf16.mxu1 %v6014_v29  ;;  %v6086_v40 = vld [vmem:[#allocation2 + $0xff8] sm:$0xff]  ;;  %v7001_v29 = vld [vmem:[%s14391_s8 + $0x80] sm:$0xff]  ;;  %v7002_v41 = vld [vmem:[%s14391_s8 + $0x88] sm:$0xff] }
 0xa45   :  { %v13182_v47 = vpop.permute.xlu0 %6819  ;;  %v13186_v54 = vsub.s32 0, %v14390_v53  ;;  %v6083_v8 = vld [vmem:[#allocation2 + $0xfe0] sm:$0xff] }
 0xa47   :  { %6593 = vmatpush1.bf16.msra.mxu0 %v6011_v5  ;;  %6757 = vmatpush1.bf16.msra.mxu1 %v6013_v25  ;;  %v9611_v5 = vpack.c.bf16 %v7002_v41, %v7001_v29  ;;  %v6985_v25 = vld [vmem:[%s14391_s8] sm:$0xff]  ;;  %v7014_v41 = vld [vmem:[%s14391_s8 + $0xe8] sm:$0xff] }
 0xa48   :  { %6594 = vmatprep.subr.bf16.mxu0 %v6020_v10  ;;  %6758 = vmatprep.subr.bf16.mxu1 %v6022_v33  ;;  %v6986_v10 = vld [vmem:[%s14391_s8 + $0x8] sm:$0xff]  ;;  %v13194_v33 = vpop.permute.xlu1 %6843  ;;  %v7013_v29 = vld [vmem:[%s14391_s8 + $0xe0] sm:$0xff] }
 0xa4b   :  { %6595 = vmatpush1.bf16.msra.mxu0 %v6019_v18  ;;  %6759 = vmatpush1.bf16.msra.mxu1 %v6021_v9  ;;  %v13197_v18 = vrot.slane %v9740_v39, %v13186_v54  ;;  %v7003_v9 = vld [vmem:[%s14391_s8 + $0x90] sm:$0xff] }
 0xa4c   :  { %6596 = vmatprep.subr.bf16.mxu0 %v6028_v62  ;;  %6760 = vmatprep.subr.bf16.mxu1 %v6030_v57  ;;  %v7004_v62 = vld [vmem:[%s14391_s8 + $0x98] sm:$0xff]  ;;  %v13206_v57 = vsel %vm5454_vm1, %v6873_v23, %v6842_v52  ;;  %v6995_v39 = vld [vmem:[%s14391_s8 + $0x50] sm:$0xff] }
 0xa4f   :  { %6597 = vmatpush1.bf16.msra.mxu0 %v6027_v2  ;;  %6761 = vmatpush1.bf16.msra.mxu1 %v6029_v26  ;;  %v9613_v2 = vpack.c.bf16 %v6986_v10, %v6985_v25  ;;  %v13208_v26 = vpop.permute.xlu0 %6797  ;;  %v6997_v25 = vld [vmem:[%s14391_s8 + $0x60] sm:$0xff]  ;;  %v6998_v10 = vld [vmem:[%s14391_s8 + $0x68] sm:$0xff] }
 0xa50   :  { %6598 = vmatprep.subr.bf16.mxu0 %v6036_v55  ;;  %6762 = vmatprep.subr.bf16.mxu1 %v6038_v37  ;;  %v9615_v55 = vpack.c.bf16 %v7004_v62, %v7003_v9  ;;  %v6987_v37 = vld [vmem:[%s14391_s8 + $0x10] sm:$0xff] }
 0xa51   :  { %v7015_v62 = vld [vmem:[%s14391_s8 + $0xf0] sm:$0xff] }
 0xa53   :  { %6599 = vmatpush1.bf16.msra.mxu0 %v6035_v14  ;;  %6763 = vmatpush1.bf16.msra.mxu1 %v6037_v34  ;;  %v6988_v14 = vld [vmem:[%s14391_s8 + $0x18] sm:$0xff]  ;;  %v6922_v34 = vmul.f32 %v13197_v18, %v13206_v57 }
 0xa54   :  { %6600 = vmatprep.subr.bf16.mxu0 %v6044_v63  ;;  %6764 = vmatprep.subr.bf16.mxu1 %v6046_v59  ;;  %v7005_v63 = vld [vmem:[%s14391_s8 + $0xa0] sm:$0xff]  ;;  %v7006_v59 = vld [vmem:[%s14391_s8 + $0xa8] sm:$0xff] }
 0xa57   :  { %6601 = vmatpush1.bf16.msra.mxu0 %v6043_v45  ;;  %6765 = vmatpush1.bf16.msra.mxu1 %v6045_v22  ;;  %v13226_v45 = vpop.permute.xlu1 %6821  ;;  %v9617_v22 = vpack.c.bf16 %v6988_v14, %v6987_v37  ;;  %v6866_v37 = vsel %vm5445_vm14, %v14383_v31, %v13171_v4  ;;  %v7034_v31 = vld [vmem:[%s14391_s8 + $0x188] sm:$0xff] }
 0xa58   :  { %6602 = vmatprep.subr.bf16.mxu0 %v6052_v46  ;;  %6766 = vmatprep.subr.bf16.mxu1 %v6054_v0  ;;  %v9619_v46 = vpack.c.bf16 %v7006_v59, %v7005_v63  ;;  %v6989_v0 = vld [vmem:[%s14391_s8 + $0x20] sm:$0xff]  ;;  %v6999_v59 = vld [vmem:[%s14391_s8 + $0x70] sm:$0xff] }
 0xa5b   :  { %6603 = vmatpush1.bf16.msra.mxu0 %v6051_v49  ;;  %6767 = vmatpush1.bf16.msra.mxu1 %v6053_v24  ;;  %v6990_v49 = vld [vmem:[%s14391_s8 + $0x28] sm:$0xff]  ;;  %v7007_v24 = vld [vmem:[%s14391_s8 + $0xb0] sm:$0xff]  ;;  %v6800_v52 = vpop.permute.xlu1 %6799 }
 0xa5c   :  { %6604 = vmatprep.subr.bf16.mxu0 %v6060_v61  ;;  %6768 = vmatprep.subr.bf16.mxu1 %v6062_v1  ;;  %v13240_v61 = vpop.permute.xlu0 %6845  ;;  %v9621_v1 = vpack.c.bf16 %v6990_v49, %v6989_v0  ;;  %v6867_v49 = vsel %vm5445_vm14, %v14384_v50, %v13208_v26  ;;  %v7036_v50 = vld [vmem:[%s14391_s8 + $0x198] sm:$0xff] }
 0xa5f   :  { %6605 = vmatpush1.bf16.msra.mxu0 %v6059_v44  ;;  %6769 = vmatpush1.bf16.msra.mxu1 %v6061_v58  ;;  %v6991_v44 = vld [vmem:[%s14391_s8 + $0x30] sm:$0xff]  ;;  %v6992_v58 = vld [vmem:[%s14391_s8 + $0x38] sm:$0xff] }
 0xa60   :  { %6606 = vmatprep.subr.bf16.mxu0 %v6068_v16  ;;  %6770 = vmatprep.subr.bf16.mxu1 %v6070_v48  ;;  %v7009_v16 = vld [vmem:[%s14391_s8 + $0xc0] sm:$0xff]  ;;  %v7010_v48 = vld [vmem:[%s14391_s8 + $0xc8] sm:$0xff]  ;;  %v9625_v21 = vpack.c.bf16 %v6992_v58, %v6991_v44  ;;  %v6875_v58 = vsel %vm4235_vm13, %v6867_v49, %v13226_v45  ;;  %v6103_v49 = vsub.s32 3, %v14390_v53 }
 0xa63   :  { %6607 = vmatpush1.bf16.msra.mxu0 %v6067_v6  ;;  %6771 = vmatpush1.bf16.msra.mxu1 %v6069_v27  ;;  %v13254_v6 = vpop.permute.xlu0 %6823  ;;  %v9627_v27 = vpack.c.bf16 %v7010_v48, %v7009_v16  ;;  %v6868_v48 = vsel %vm5445_vm14, %v14385_v38, %v6800_v52  ;;  %v7037_v38 = vld [vmem:[%s14391_s8 + $0x1a0] sm:$0xff]  ;;  %v7038_v52 = vld [vmem:[%s14391_s8 + $0x1a8] sm:$0xff] }
 0xa64   :  { %6608 = vmatprep.subr.bf16.mxu0 %v6076_v13  ;;  %6772 = vmatprep.subr.bf16.mxu1 %v6078_v32  ;;  %v6994_v13 = vld [vmem:[%s14391_s8 + $0x48] sm:$0xff]  ;;  %v7011_v32 = vld [vmem:[%s14391_s8 + $0xd0] sm:$0xff] }
 0xa67   :  { %6609 = vmatpush1.bf16.msra.mxu0 %v6075_v30  ;;  %6773 = vmatpush1.bf16.msra.mxu1 %v6077_v17  ;;  %v13268_v30 = vpop.permute.xlu1 %6847  ;;  %v9629_v17 = vpack.c.bf16 %v6994_v13, %v6993_v60  ;;  %v6802_v23 = vpop.permute.xlu0 %6801  ;;  %v7019_v60 = vld [vmem:[%s14391_s8 + $0x110] sm:$0xff] }
 0xa68   :  { %6610 = vmatprep.subr.bf16.mxu0 %v6084_v11  ;;  %6774 = vmatprep.subr.bf16.mxu1 %v6086_v40  ;;  %v9631_v11 = vpack.c.bf16 %v7012_v51, %v7011_v32  ;;  %v6996_v40 = vld [vmem:[%s14391_s8 + $0x58] sm:$0xff]  ;;  %v13360_v32 = vsel %vm5454_vm1, %v6875_v58, %v13240_v61  ;;  %v6876_v51 = vsel %vm4235_vm13, %v6868_v48, %v13254_v6  ;;  %v7021_v61 = vld [vmem:[%s14391_s8 + $0x120] sm:$0xff]  ;;  %v7022_v6 = vld [vmem:[%s14391_s8 + $0x128] sm:$0xff]  ;;  %v6099_v58 = vsub.s32 2, %v14390_v53 }
 0xa6b   :  { %6611 = vmatpush1.bf16.msra.mxu0 %v6083_v8  ;;  %6775 = vmatpush1.bf16.msra.mxu1 %v6085_v28  ;;  %v9633_v8 = vpack.c.bf16 %v6996_v40, %v6995_v39  ;;  %v6092_v28 = vrot.slane %v13166_v20, %v13186_v54  ;;  %v6826_v9 = vpop.permute.xlu1 %6825  ;;  %v13299_v14 = vpop.permute.xlu0 %6849 }
 0xa6c   :  { %9612 = vmatprep.subr.bf16.mxu0 %v9611_v5  ;;  %v9635_v5 = vpack.c.bf16 %v7014_v41, %v7013_v29  ;;  %v9651_v29 = vpack.c.bf16 %v7038_v52, %v7037_v38  ;;  %v6938_v41 = vmul.f32 %v13197_v18, %v13360_v32 }
 0xa6e   :  { %6613 = vmatmul.mubr.bf16.vlgmr.msra.gmra.mrb[144].mxu0 %v13139_v42  ;;  %6777 = vmatmul.mubr.bf16.vlgmr.msra.gmra.mrb[116].mxu1 %v13139_v42  ;;  %v7008_v42 = vld [vmem:[%s14391_s8 + $0xb8] sm:$0xff] }
 0xa6f   :  { %9614 = vmatpush3.bf16.msra.mxu0 %v9613_v2  ;;  %7177 = vmatprep.mubr.f32.mxu0 %v6922_v34  ;;  %v9623_v3 = vpack.c.bf16 %v7008_v42, %v7007_v24  ;;  %v7016_v2 = vld [vmem:[%s14391_s8 + $0xf8] sm:$0xff]  ;;  %v9739_v34 = vadd.f32 %v13157_v36, %v6092_v28  ;;  %v6874_v36 = vsel %vm4235_vm13, %v6866_v37, %v13182_v47  ;;  %v6804_v4 = vpop.permute.xlu1 %6803  ;;  %v7018_v47 = vld [vmem:[%s14391_s8 + $0x108] sm:$0xff]  ;;  %v6828_v44 = vpop.permute.xlu0 %6827 }
 0xa70   :  { %9616 = vmatprep.subr.bf16.mxu0 %v9615_v55  ;;  %v9637_v55 = vpack.c.bf16 %v6998_v10, %v6997_v25  ;;  %v9639_v63 = vpack.c.bf16 %v7016_v2, %v7015_v62  ;;  %v13336_v26 = vsel %vm5454_vm1, %v6874_v36, %v13194_v33  ;;  %v7020_v33 = vld [vmem:[%s14391_s8 + $0x118] sm:$0xff]  ;;  %v9653_v25 = vpack.c.bf16 %v7022_v6, %v7021_v61  ;;  %v7042_v37 = vld [vmem:[%s14391_s8 + $0x1c8] sm:$0xff] }
 0xa71   :  { %v13320_v24 = vrot.slane %v9739_v34, %v13186_v54  ;;  %v6930_v45 = vmul.f32 %v13197_v18, %v13336_v26  ;;  %v6870_v10 = vsel %vm5445_vm14, %v14387_v12, %v6804_v4  ;;  %v7041_v12 = vld [vmem:[%s14391_s8 + $0x1c0] sm:$0xff]  ;;  %v7026_v4 = vld [vmem:[%s14391_s8 + $0x148] sm:$0xff] }
 0xa72   :  { %v9659_v36 = vpack.c.bf16 %v7042_v37, %v7041_v12  ;;  %v7030_v61 = vld [vmem:[%s14391_s8 + $0x168] sm:$0xff] }
 0xa73   :  { %9618 = vmatpush3.bf16.msra.mxu0 %v9617_v22  ;;  %v7000_v22 = vld [vmem:[%s14391_s8 + $0x78] sm:$0xff]  ;;  %v6852_v13 = vpop.permute.xlu1 %6851  ;;  %v6806_v39 = vpop.permute.xlu0 %6805  ;;  %v6929_v40 = vmul.f32 %v13320_v24, %v13336_v26  ;;  %v6937_v62 = vmul.f32 %v13320_v24, %v13360_v32 }
 0xa74   :  { %9620 = vmatprep.subr.bf16.mxu0 %v9619_v46  ;;  %v7033_v46 = vld [vmem:[%s14391_s8 + $0x180] sm:$0xff]  ;;  %v9641_v0 = vpack.c.bf16 %v7000_v22, %v6999_v59  ;;  %v6878_v59 = vsel %vm4235_vm13, %v6870_v10, %v6828_v44 }
 0xa75   :  { %v9643_v42 = vpack.c.bf16 %v7034_v31, %v7033_v46  ;;  %v6871_v46 = vsel %vm5445_vm14, %v14388_v15, %v6806_v39  ;;  %v7043_v15 = vld [vmem:[%s14391_s8 + $0x1d0] sm:$0xff] }
 0xa77   :  { %9622 = vmatpush3.bf16.msra.mxu0 %v9621_v1  ;;  %v7017_v1 = vld [vmem:[%s14391_s8 + $0x100] sm:$0xff] }
 0xa78   :  { %9624 = vmatprep.subr.bf16.mxu0 %v9623_v3  ;;  %v7035_v3 = vld [vmem:[%s14391_s8 + $0x190] sm:$0xff]  ;;  %v9645_v16 = vpack.c.bf16 %v7018_v47, %v7017_v1  ;;  %v7044_v1 = vld [vmem:[%s14391_s8 + $0x1d8] sm:$0xff]  ;;  %v13430_v47 = vsel %vm5454_vm1, %v6878_v59, %v6852_v13  ;;  %v7045_v13 = vld [vmem:[%s14391_s8 + $0x1e0] sm:$0xff] }
 0xa79   :  { %v6961_v39 = vmul.f32 %v13320_v24, %v13430_v47  ;;  %v7049_v59 = vld [vmem:[%s14391_s8 + $0x200] sm:$0xff] }
 0xa7b   :  { %9626 = vmatpush3.bf16.msra.mxu0 %v9625_v21  ;;  %v6921_v21 = vmul.f32 %v13320_v24, %v13206_v57 }
 0xa7c   :  { %9628 = vmatprep.subr.bf16.mxu0 %v9627_v27  ;;  %v9647_v27 = vpack.c.bf16 %v7036_v50, %v7035_v3 }
 0xa7f   :  { %9630 = vmatpush3.bf16.msra.mxu0 %v9629_v17  ;;  %v9649_v17 = vpack.c.bf16 %v7020_v33, %v7019_v60  ;;  %v7028_v60 = vld [vmem:[%s14391_s8 + $0x158] sm:$0xff]  ;;  %v6104_v33 = vrot.slane %v13166_v20, %v6103_v49 }
 0xa80   :  { %9632 = vmatprep.subr.bf16.mxu0 %v9631_v11  ;;  %v6869_v11 = vsel %vm5445_vm14, %v14386_v56, %v6802_v23  ;;  %v7039_v56 = vld [vmem:[%s14391_s8 + $0x1b0] sm:$0xff]  ;;  %v7040_v23 = vld [vmem:[%s14391_s8 + $0x1b8] sm:$0xff] }
 0xa81   :  { %v6877_v28 = vsel %vm4235_vm13, %v6869_v11, %v6826_v9  ;;  %v9655_v2 = vpack.c.bf16 %v7040_v23, %v7039_v56  ;;  %v7024_v9 = vld [vmem:[%s14391_s8 + $0x138] sm:$0xff]  ;;  %v6100_v11 = vrot.slane %v13166_v20, %v6099_v58  ;;  %v9742_v6 = vadd.f32 %v13163_v7, %v6104_v33  ;;  %v7047_v56 = vld [vmem:[%s14391_s8 + $0x1f0] sm:$0xff]  ;;  %v7053_v58 = vld [vmem:[%s14391_s8 + $0x220] sm:$0xff] }
 0xa82   :  { %v13407_v34 = vsel %vm5454_vm1, %v6877_v28, %v13299_v14  ;;  %v7025_v14 = vld [vmem:[%s14391_s8 + $0x140] sm:$0xff]  ;;  %v7048_v23 = vld [vmem:[%s14391_s8 + $0x1f8] sm:$0xff] }
 0xa83   :  { %9634 = vmatpush3.bf16.msra.mxu0 %v9633_v8  ;;  %v13384_v8 = vsel %vm5454_vm1, %v6876_v51, %v13268_v30  ;;  %v7023_v30 = vld [vmem:[%s14391_s8 + $0x130] sm:$0xff]  ;;  %v9661_v50 = vpack.c.bf16 %v7026_v4, %v7025_v14  ;;  %v6953_v48 = vmul.f32 %v13320_v24, %v13407_v34  ;;  %v9741_v7 = vadd.f32 %v13159_v35, %v6100_v11  ;;  %v7065_v35 = vld [vmem:[%s14391_s8 + $0x280] sm:$0xff]  ;;  %v7052_v49 = vld [vmem:[%s14391_s8 + $0x218] sm:$0xff] }
 0xa84   :  { %9636 = vmatprep.subr.bf16.mxu0 %v9635_v5  ;;  %v6830_v5 = vpop.permute.xlu1 %6829  ;;  %v9657_v22 = vpack.c.bf16 %v7024_v9, %v7023_v30  ;;  %v6945_v31 = vmul.f32 %v13320_v24, %v13384_v8  ;;  %v9671_v10 = vpack.c.bf16 %v7048_v23, %v7047_v56  ;;  %v13488_v30 = vrot.slane %v9742_v6, %v13186_v54  ;;  %v7076_v56 = vld [vmem:[%s14391_s8 + $0x2d8] sm:$0xff] }
 0xa85   :  { %v6879_v3 = vsel %vm4235_vm13, %v6871_v46, %v6830_v5  ;;  %v13499_v37 = vrot.slane %v9741_v7, %v13186_v54 }
 0xa86   :  { %v6924_v46 = vmul.f32 %v13488_v30, %v13206_v57  ;;  %v6956_v6 = vmul.f32 %v13488_v30, %v13407_v34 }
 0xa87   :  { %9638 = vmatpush3.bf16.msra.mxu0 %v9637_v55  ;;  %v6946_v55 = vmul.f32 %v13197_v18, %v13384_v8  ;;  %v6923_v14 = vmul.f32 %v13499_v37, %v13206_v57  ;;  %v6939_v33 = vmul.f32 %v13499_v37, %v13360_v32 }
 0xa88   :  { %9640 = vmatprep.subr.bf16.mxu0 %v9639_v63  ;;  %v6854_v63 = vpop.permute.xlu0 %6853 }
 0xa89   :  { %v13454_v38 = vsel %vm5454_vm1, %v6879_v3, %v6854_v63 }
 0xa8b   :  { %9642 = vmatpush3.bf16.msra.mxu0 %v9641_v0  ;;  %v6808_v0 = vpop.permute.xlu1 %6807 }
 0xa8c   :  { %9644 = vmatprep.subr.bf16.mxu0 %v9643_v42  ;;  %v6954_v42 = vmul.f32 %v13197_v18, %v13407_v34  ;;  %v6872_v44 = vsel %vm5445_vm14, %v14389_v19, %v6808_v0  ;;  %v6962_v19 = vmul.f32 %v13197_v18, %v13430_v47  ;;  %v7051_v0 = vld [vmem:[%s14391_s8 + $0x210] sm:$0xff] }
 0xa8d   :  { %v9681_v3 = vpack.c.bf16 %v7052_v49, %v7051_v0 }
 0xa8e   :  { %7178 = vmatmul.mubr.f32.vlgmr.msra.gmra.mrb[148].mxu0 %v6921_v21  ;;  %v9663_v21 = vpack.c.bf16 %v7044_v1, %v7043_v15  ;;  %v7069_v15 = vld [vmem:[%s14391_s8 + $0x2a0] sm:$0xff]  ;;  %v7070_v1 = vld [vmem:[%s14391_s8 + $0x2a8] sm:$0xff] }
 0xa8f   :  { %7182 = vmatprep.mubr.f32.mxu0 %v6930_v45  ;;  %9646 = vmatpush3.bf16.msra.mxu0 %v9645_v16  ;;  %v6832_v16 = vpop.permute.xlu0 %6831  ;;  %v7046_v45 = vld [vmem:[%s14391_s8 + $0x1e8] sm:$0xff]  ;;  %v6856_v51 = vpop.permute.xlu1 %6855 }
 0xa90   :  { %9648 = vmatprep.subr.bf16.mxu0 %v9647_v27  ;;  %v7027_v27 = vld [vmem:[%s14391_s8 + $0x150] sm:$0xff]  ;;  %v6880_v52 = vsel %vm4235_vm13, %v6872_v44, %v6832_v16  ;;  %v9683_v44 = vpack.c.bf16 %v7070_v1, %v7069_v15  ;;  %v7054_v16 = vld [vmem:[%s14391_s8 + $0x228] sm:$0xff] }
 0xa91   :  { %v13476_v28 = vsel %vm5454_vm1, %v6880_v52, %v6856_v51  ;;  %v6948_v52 = vmul.f32 %v13488_v30, %v13384_v8  ;;  %v7073_v51 = vld [vmem:[%s14391_s8 + $0x2c0] sm:$0xff]  ;;  %v7098_v15 = vld [vmem:[%s14391_s8 + $0x388] sm:$0xff] }
 0xa92   :  { %7183 = vmatmul.mubr.f32.gmra.mrb[150].mxu0 %v6929_v40  ;;  %v9667_v40 = vpack.c.bf16 %v7046_v45, %v7045_v13  ;;  %v6978_v9 = vmul.f32 %v13197_v18, %v13476_v28  ;;  %v6977_v63 = vmul.f32 %v13320_v24, %v13476_v28  ;;  %v7055_v13 = vld [vmem:[%s14391_s8 + $0x230] sm:$0xff]  ;;  %v7056_v45 = vld [vmem:[%s14391_s8 + $0x238] sm:$0xff]  ;;  %v6979_v0 = vmul.f32 %v13499_v37, %v13476_v28 }
 0xa93   :  { %7187 = vmatprep.mubr.f32.mxu0 %v6938_v41  ;;  %9650 = vmatpush3.bf16.msra.mxu0 %v9649_v17  ;;  %v9665_v17 = vpack.c.bf16 %v7028_v60, %v7027_v27  ;;  %v6970_v41 = vmul.f32 %v13197_v18, %v13454_v38  ;;  %v7072_v27 = vld [vmem:[%s14391_s8 + $0x2b8] sm:$0xff]  ;;  %v9685_v60 = vpack.c.bf16 %v7054_v16, %v7053_v58 }
 0xa94   :  { %9652 = vmatprep.subr.bf16.mxu0 %v9651_v29  ;;  %v7029_v29 = vld [vmem:[%s14391_s8 + $0x160] sm:$0xff]  ;;  %v9689_v11 = vpack.c.bf16 %v7056_v45, %v7055_v13 }
 0xa95   :  { %v9669_v5 = vpack.c.bf16 %v7030_v61, %v7029_v29  ;;  %v7057_v29 = vld [vmem:[%s14391_s8 + $0x240] sm:$0xff]  ;;  %v7058_v61 = vld [vmem:[%s14391_s8 + $0x248] sm:$0xff] }
 0xa96   :  { %7188 = vmatmul.mubr.f32.gmra.mrb[152].mxu0 %v6937_v62  ;;  %v7031_v62 = vld [vmem:[%s14391_s8 + $0x170] sm:$0xff]  ;;  %v9693_v23 = vpack.c.bf16 %v7058_v61, %v7057_v29 }
 0xa97   :  { %7192 = vmatprep.mubr.f32.mxu0 %v6946_v55  ;;  %9654 = vmatpush3.bf16.msra.mxu0 %v9653_v25  ;;  %v6969_v25 = vmul.f32 %v13320_v24, %v13454_v38  ;;  %v7066_v55 = vld [vmem:[%s14391_s8 + $0x288] sm:$0xff]  ;;  %v7068_v24 = vld [vmem:[%s14391_s8 + $0x298] sm:$0xff] }
 0xa98   :  { %9656 = vmatprep.subr.bf16.mxu0 %v9655_v2  ;;  %v7032_v2 = vld [vmem:[%s14391_s8 + $0x178] sm:$0xff]  ;;  %v9675_v18 = vpack.c.bf16 %v7066_v55, %v7065_v35  ;;  %v6972_v35 = vmul.f32 %v13488_v30, %v13454_v38  ;;  %v6971_v55 = vmul.f32 %v13499_v37, %v13454_v38 }
 0xa99   :  { %v9673_v12 = vpack.c.bf16 %v7032_v2, %v7031_v62  ;;  %v6964_v62 = vmul.f32 %v13488_v30, %v13430_v47 }
 0xa9a   :  { %7193 = vmatmul.mubr.f32.gmra.mrb[154].mxu0 %v6945_v31  ;;  %v7067_v31 = vld [vmem:[%s14391_s8 + $0x290] sm:$0xff] }
 0xa9b   :  { %7197 = vmatprep.mubr.f32.mxu0 %v6954_v42  ;;  %9658 = vmatpush3.bf16.msra.mxu0 %v9657_v22  ;;  %v7050_v22 = vld [vmem:[%s14391_s8 + $0x208] sm:$0xff]  ;;  %v9679_v4 = vpack.c.bf16 %v7068_v24, %v7067_v31  ;;  %v6932_v42 = vmul.f32 %v13488_v30, %v13336_v26  ;;  %v7079_v31 = vld [vmem:[%s14391_s8 + $0x2f0] sm:$0xff] }
 0xa9c   :  { %9660 = vmatprep.subr.bf16.mxu0 %v9659_v36  ;;  %v9677_v36 = vpack.c.bf16 %v7050_v22, %v7049_v59  ;;  %v7061_v22 = vld [vmem:[%s14391_s8 + $0x260] sm:$0xff] }
 0xa9e   :  { %7198 = vmatmul.mubr.f32.gmra.mrb[156].mxu0 %v6953_v48  ;;  %v6940_v48 = vmul.f32 %v13488_v30, %v13360_v32 }
 0xa9f   :  { %7202 = vmatprep.mubr.f32.mxu0 %v6962_v19  ;;  %9662 = vmatpush3.bf16.msra.mxu0 %v9661_v50  ;;  %v6931_v50 = vmul.f32 %v13499_v37, %v13336_v26 }
 0xaa0   :  { %9664 = vmatprep.subr.bf16.mxu0 %v9663_v21  ;;  %v7071_v21 = vld [vmem:[%s14391_s8 + $0x2b0] sm:$0xff] }
 0xaa1   :  { %v9687_v19 = vpack.c.bf16 %v7072_v27, %v7071_v21 }
 0xaa2   :  { %7203 = vmatmul.mubr.f32.gmra.mrb[158].mxu0 %v6961_v39  ;;  %v6947_v39 = vmul.f32 %v13499_v37, %v13384_v8 }
 0xaa3   :  { %7207 = vmatprep.mubr.f32.mxu0 %v6970_v41  ;;  %9666 = vmatpush3.bf16.msra.mxu0 %v9665_v17  ;;  %v7074_v17 = vld [vmem:[%s14391_s8 + $0x2c8] sm:$0xff]  ;;  %v7075_v41 = vld [vmem:[%s14391_s8 + $0x2d0] sm:$0xff] }
 0xaa4   :  { %9668 = vmatprep.subr.bf16.mxu0 %v9667_v40  ;;  %v9691_v40 = vpack.c.bf16 %v7074_v17, %v7073_v51  ;;  %v9695_v7 = vpack.c.bf16 %v7076_v56, %v7075_v41  ;;  %v7081_v51 = vld [vmem:[%s14391_s8 + $0x300] sm:$0xff]  ;;  %v7082_v17 = vld [vmem:[%s14391_s8 + $0x308] sm:$0xff]  ;;  %v7083_v56 = vld [vmem:[%s14391_s8 + $0x310] sm:$0xff] }
 0xaa5   :  { %v9709_v61 = vpack.c.bf16 %v7082_v17, %v7081_v51 }
 0xaa6   :  { %7208 = vmatmul.mubr.f32.gmra.mrb[160].mxu0 %v6969_v25  ;;  %v7059_v25 = vld [vmem:[%s14391_s8 + $0x250] sm:$0xff] }
 0xaa7   :  { %7212 = vmatprep.mubr.f32.mxu0 %v6978_v9  ;;  %9670 = vmatpush3.bf16.msra.mxu0 %v9669_v5  ;;  %v6955_v5 = vmul.f32 %v13499_v37, %v13407_v34  ;;  %v6963_v9 = vmul.f32 %v13499_v37, %v13430_v47 }
 0xaa8   :  { %9672 = vmatprep.subr.bf16.mxu0 %v9671_v10  ;;  %v7060_v10 = vld [vmem:[%s14391_s8 + $0x258] sm:$0xff] }
 0xaa9   :  { %v9697_v2 = vpack.c.bf16 %v7060_v10, %v7059_v25  ;;  %v7102_v25 = vld [vmem:[%s14391_s8 + $0x3a8] sm:$0xff] }
 0xaaa   :  { %7213 = vmatmul.mubr.f32.gmra.mrb[162].mxu0 %v6977_v63  ;;  %v7078_v63 = vld [vmem:[%s14391_s8 + $0x2e8] sm:$0xff] }
 0xaab   :  { %9674 = vmatpush3.bf16.msra.mxu0 %v9673_v12  ;;  %7282 = vmatprep.mubr.f32.mxu0 %v6924_v46  ;;  %v7077_v12 = vld [vmem:[%s14391_s8 + $0x2e0] sm:$0xff]  ;;  %v7062_v46 = vld [vmem:[%s14391_s8 + $0x268] sm:$0xff] }
 0xaac   :  { %9676 = vmatprep.subr.bf16.mxu0 %v9675_v18  ;;  %v6980_v18 = vmul.f32 %v13488_v30, %v13476_v28  ;;  %v9699_v59 = vpack.c.bf16 %v7078_v63, %v7077_v12  ;;  %v9701_v24 = vpack.c.bf16 %v7062_v46, %v7061_v22  ;;  %v7063_v30 = vld [vmem:[%s14391_s8 + $0x270] sm:$0xff]  ;;  %v7104_v63 = vld [vmem:[%s14391_s8 + $0x3b8] sm:$0xff] }
 0xaad   :  { %v7103_v12 = vld [vmem:[%s14391_s8 + $0x3b0] sm:$0xff] }
 0xaae   :  { %7283 = vmatmul.mubr.f32.vlgmr.msra.gmra.mrb[164].mxu0 %v6923_v14  ;;  %v7064_v14 = vld [vmem:[%s14391_s8 + $0x278] sm:$0xff]  ;;  %v9719_v22 = vpack.c.bf16 %v7104_v63, %v7103_v12  ;;  %v7087_v46 = vld [vmem:[%s14391_s8 + $0x330] sm:$0xff] }
 0xaaf   :  { %7287 = vmatprep.mubr.f32.mxu0 %v6932_v42  ;;  %9678 = vmatpush3.bf16.msra.mxu0 %v9677_v36  ;;  %v7080_v36 = vld [vmem:[%s14391_s8 + $0x2f8] sm:$0xff]  ;;  %v9705_v49 = vpack.c.bf16 %v7064_v14, %v7063_v30  ;;  %v7097_v42 = vld [vmem:[%s14391_s8 + $0x380] sm:$0xff]  ;;  %v7106_v30 = vld [vmem:[%s14391_s8 + $0x3c8] sm:$0xff] }
 0xab0   :  { %9680 = vmatprep.subr.bf16.mxu0 %v9679_v4  ;;  %v9703_v4 = vpack.c.bf16 %v7080_v36, %v7079_v31  ;;  %v9707_v1 = vpack.c.bf16 %v7098_v15, %v7097_v42  ;;  %v7088_v31 = vld [vmem:[%s14391_s8 + $0x338] sm:$0xff]  ;;  %v7105_v36 = vld [vmem:[%s14391_s8 + $0x3c0] sm:$0xff]  ;;  %v7090_v42 = vld [vmem:[%s14391_s8 + $0x348] sm:$0xff]  ;;  %v6119_v15 = vsub.s32 7, %v14390_v53 }
 0xab1   :  { %v9721_v14 = vpack.c.bf16 %v7088_v31, %v7087_v46 }
 0xab2   :  { %7288 = vmatmul.mubr.f32.gmra.mrb[166].mxu0 %v6931_v50  ;;  %v6111_v50 = vsub.s32 5, %v14390_v53 }
 0xab3   :  { %7292 = vmatprep.mubr.f32.mxu0 %v6940_v48  ;;  %9682 = vmatpush3.bf16.msra.mxu0 %v9681_v3  ;;  %v6107_v3 = vsub.s32 4, %v14390_v53 }
 0xab4   :  { %9684 = vmatprep.subr.bf16.mxu0 %v9683_v44  ;;  %v6112_v44 = vrot.slane %v13166_v20, %v6111_v50  ;;  %v7108_v50 = vld [vmem:[%s14391_s8 + $0x3d8] sm:$0xff] }
 0xab5   :  { %v6108_v37 = vrot.slane %v13166_v20, %v6107_v3  ;;  %v7107_v3 = vld [vmem:[%s14391_s8 + $0x3d0] sm:$0xff] }
 0xab6   :  { %7293 = vmatmul.mubr.f32.gmra.mrb[168].mxu0 %v6939_v33 }
 0xab7   :  { %7297 = vmatprep.mubr.f32.mxu0 %v6948_v52  ;;  %9686 = vmatpush3.bf16.msra.mxu0 %v9685_v60 }
 0xab8   :  { %9688 = vmatprep.subr.bf16.mxu0 %v9687_v19 }
 0xaba   :  { %7298 = vmatmul.mubr.f32.gmra.mrb[170].mxu0 %v6947_v39  ;;  %v7099_v39 = vld [vmem:[%s14391_s8 + $0x390] sm:$0xff] }
 0xabb   :  { %7302 = vmatprep.mubr.f32.mxu0 %v6956_v6  ;;  %9690 = vmatpush3.bf16.msra.mxu0 %v9689_v11 }
 0xabc   :  { %9692 = vmatprep.subr.bf16.mxu0 %v9691_v40  ;;  %v7100_v40 = vld [vmem:[%s14391_s8 + $0x398] sm:$0xff] }
 0xabd   :  { %v9711_v41 = vpack.c.bf16 %v7100_v40, %v7099_v39 }
 0xabe   :  { %7303 = vmatmul.mubr.f32.gmra.mrb[172].mxu0 %v6955_v5 }
 0xabf   :  { %7307 = vmatprep.mubr.f32.mxu0 %v6964_v62  ;;  %9694 = vmatpush3.bf16.msra.mxu0 %v9693_v23  ;;  %v7084_v23 = vld [vmem:[%s14391_s8 + $0x318] sm:$0xff] }
 0xac0   :  { %9696 = vmatprep.subr.bf16.mxu0 %v9695_v7  ;;  %v7101_v7 = vld [vmem:[%s14391_s8 + $0x3a0] sm:$0xff]  ;;  %v9713_v10 = vpack.c.bf16 %v7084_v23, %v7083_v56  ;;  %v7112_v56 = vld [vmem:[%s14391_s8 + $0x3f8] sm:$0xff] }
 0xac2   :  { %7308 = vmatmul.mubr.f32.gmra.mrb[174].mxu0 %v6963_v9  ;;  %v7085_v9 = vld [vmem:[%s14391_s8 + $0x320] sm:$0xff] }
 0xac3   :  { %7312 = vmatprep.mubr.f32.mxu0 %v6972_v35  ;;  %9698 = vmatpush3.bf16.msra.mxu0 %v9697_v2  ;;  %v9715_v2 = vpack.c.bf16 %v7102_v25, %v7101_v7  ;;  %v7086_v35 = vld [vmem:[%s14391_s8 + $0x328] sm:$0xff]  ;;  %v7095_v25 = vld [vmem:[%s14391_s8 + $0x370] sm:$0xff] }
 0xac4   :  { %9700 = vmatprep.subr.bf16.mxu0 %v9699_v59 }
 0xac6   :  { %7313 = vmatmul.mubr.f32.gmra.mrb[176].mxu0 %v6971_v55 }
 0xac7   :  { %7317 = vmatprep.mubr.f32.mxu0 %v6980_v18  ;;  %9702 = vmatpush3.bf16.msra.mxu0 %v9701_v24  ;;  %v9717_v18 = vpack.c.bf16 %v7086_v35, %v7085_v9 }
 0xac8   :  { %9704 = vmatprep.subr.bf16.mxu0 %v9703_v4 }
 0xaca   :  { %7318 = vmatmul.mubr.f32.gmra.mrb[178].mxu0 %v6979_v0  ;;  %v9723_v0 = vpack.c.bf16 %v7106_v30, %v7105_v36 }
 0xacb   :  { %9706 = vmatpush3.bf16.msra.mxu0 %v9705_v49  ;;  %v7089_v49 = vld [vmem:[%s14391_s8 + $0x340] sm:$0xff] }
 0xacc   :  { %9708 = vmatprep.subr.bf16.mxu0 %v9707_v1 }
 0xb41   :  { %v6614_v58 = vpop.f32.mrb[144].mxu0  ;;  %v13635_v16 = vpop.f32.mrb[116].mxu1 }
 0xb42   :  { %v9743_v48 = vadd.f32 %v6614_v58, %v6108_v37  ;;  %v6616_v21 = vpop.f32.mrb[145].mxu0  ;;  %v13637_v27 = vpop.f32.mrb[117].mxu1  ;;  %v9725_v37 = vpack.c.bf16 %v7090_v42, %v7089_v49 }
 0xb43   :  { %v9744_v60 = vadd.f32 %v6616_v21, %v6112_v44  ;;  %v6618_v33 = vpop.f32.mrb[146].mxu0  ;;  %v6782_v19 = vpop.f32.mrb[118].mxu1  ;;  %v6115_v44 = vsub.s32 6, %v14390_v53  ;;  %v7091_v21 = vld [vmem:[%s14391_s8 + $0x350] sm:$0xff] }
 0xb44   :  { %v13640_v13 = vrot.slane %v9743_v48, %v13186_v54  ;;  %v6619_v45 = vpop.f32.mrb[147].mxu0  ;;  %v6783_v52 = vpop.f32.mrb[119].mxu1  ;;  %v9727_v48 = vpack.c.bf16 %v7108_v50, %v7107_v3  ;;  %v6120_v33 = vrot.slane %v13166_v20, %v6119_v15 }
 0xb45   :  { %v13649_v11 = vrot.slane %v9744_v60, %v13186_v54  ;;  %v7092_v60 = vld [vmem:[%s14391_s8 + $0x358] sm:$0xff]  ;;  %v7109_v45 = vld [vmem:[%s14391_s8 + $0x3e0] sm:$0xff]  ;;  %v7110_v52 = vld [vmem:[%s14391_s8 + $0x3e8] sm:$0xff]  ;;  %v6116_v17 = vrot.slane %v13166_v20, %v6115_v44 }
 0xb46   :  { %v6925_v6 = vmul.f32 %v13640_v13, %v13206_v57  ;;  %v6933_v62 = vmul.f32 %v13640_v13, %v13336_v26  ;;  %v6941_v59 = vmul.f32 %v13640_v13, %v13360_v32  ;;  %v6949_v4 = vmul.f32 %v13640_v13, %v13384_v8  ;;  %v7111_v20 = vld [vmem:[%s14391_s8 + $0x3f0] sm:$0xff] }
 0xb47   :  { %v6926_v29 = vmul.f32 %v13649_v11, %v13206_v57  ;;  %v6934_v5 = vmul.f32 %v13649_v11, %v13336_v26  ;;  %v6942_v55 = vmul.f32 %v13649_v11, %v13360_v32  ;;  %v6950_v24 = vmul.f32 %v13649_v11, %v13384_v8 }
 0xb48   :  { %v6958_v1 = vmul.f32 %v13649_v11, %v13407_v34  ;;  %v6957_v58 = vmul.f32 %v13640_v13, %v13407_v34  ;;  %v6966_v19 = vmul.f32 %v13649_v11, %v13430_v47  ;;  %v9729_v51 = vpack.c.bf16 %v7092_v60, %v7091_v21 }
 0xb49   :  { %7387 = vmatprep.mubr.f32.mxu0 %v6926_v29  ;;  %v6965_v39 = vmul.f32 %v13640_v13, %v13430_v47  ;;  %v9731_v40 = vpack.c.bf16 %v7110_v52, %v7109_v45  ;;  %v7093_v29 = vld [vmem:[%s14391_s8 + $0x360] sm:$0xff]  ;;  %v9735_v7 = vpack.c.bf16 %v7112_v56, %v7111_v20  ;;  %v6981_v63 = vmul.f32 %v13640_v13, %v13476_v28 }
 0xb4a   :  { %7388 = vmatmul.mubr.f32.vlgmr.msra.gmra.mrb[180].mxu0 %v6925_v6  ;;  %v9746_v6 = vadd.f32 %v13637_v27, %v6120_v33  ;;  %v6973_v27 = vmul.f32 %v13640_v13, %v13454_v38 }
 0xb4b   :  { %9710 = vmatpush3.bf16.msra.mxu0 %v9709_v61  ;;  %7392 = vmatprep.mubr.f32.mxu0 %v6934_v5  ;;  %v7094_v61 = vld [vmem:[%s14391_s8 + $0x368] sm:$0xff]  ;;  %v9745_v5 = vadd.f32 %v13635_v16, %v6116_v17  ;;  %v6982_v16 = vmul.f32 %v13649_v11, %v13476_v28 }
 0xb4c   :  { %9712 = vmatprep.subr.bf16.mxu0 %v9711_v41  ;;  %v6974_v41 = vmul.f32 %v13649_v11, %v13454_v38  ;;  %v9733_v23 = vpack.c.bf16 %v7094_v61, %v7093_v29 }
 0xb4d   :  { %v6916_v12 = vrot.slane %v9745_v5, %v13186_v54 }
 0xb4e   :  { %7393 = vmatmul.mubr.f32.gmra.mrb[182].mxu0 %v6933_v62  ;;  %v13770_v62 = vrot.slane %v9746_v6, %v13186_v54 }
 0xb4f   :  { %9714 = vmatpush3.bf16.msra.mxu0 %v9713_v10  ;;  %7397 = vmatprep.mubr.f32.mxu0 %v6942_v55  ;;  %v7096_v10 = vld [vmem:[%s14391_s8 + $0x378] sm:$0xff]  ;;  %v6927_v46 = vmul.f32 %v6916_v12, %v13206_v57  ;;  %v6935_v13 = vmul.f32 %v6916_v12, %v13336_v26  ;;  %s10612_s8 = smov [#allocation28]  }
 0xb50   :  { %9716 = vmatprep.subr.bf16.mxu0 %v9715_v2  ;;  %v9737_v55 = vpack.c.bf16 %v7096_v10, %v7095_v25  ;;  %v6952_v15 = vmul.f32 %v13770_v62, %v13384_v8  ;;  %v6968_v21 = vmul.f32 %v13770_v62, %v13430_v47  ;;  %v6976_v45 = vmul.f32 %v13770_v62, %v13454_v38  ;;  %s7883_s30 = sshll.u32 %s10612_s8, 4  ;;  %s7884_s30 = int_to_ptr.vmem [resolvable:$true] %s7883_s30 }
 0xb51   :  { %s10539_s12 = scalar_lea.vmem %s7884_s30, 2048  ;;  %p10544_p9 = scmp.lt.s32.totalorder %s7884_s30, %s7884_s30 }
 0xb52   :  { %7398 = vmatmul.mubr.f32.gmra.mrb[184].mxu0 %v6941_v59  ;;  %v6928_v59 = vmul.f32 %v13770_v62, %v13206_v57  ;;  %v6943_v57 = vmul.f32 %v6916_v12, %v13360_v32  ;;  %p10540_p8 = scmp.ne.s32.totalorder %s7884_s30, %s10539_s12  ;;  %p10545_p10 = scmp.lt.s32.totalorder %s10539_s12, %s10539_s12 }
 0xb53   :  { %9718 = vmatpush3.bf16.msra.mxu0 %v9717_v18  ;;  %7402 = vmatprep.mubr.f32.mxu0 %v6950_v24  ;;  %v6936_v24 = vmul.f32 %v13770_v62, %v13336_v26  ;;  %v6951_v26 = vmul.f32 %v6916_v12, %v13384_v8  ;;  %v6967_v8 = vmul.f32 %v6916_v12, %v13430_v47 }
 0xb54   :  { %9720 = vmatprep.subr.bf16.mxu0 %v9719_v22  ;;  %v6983_v47 = vmul.f32 %v6916_v12, %v13476_v28  ;;  %p10546_p11 = por %p10545_p10, %p10544_p9 }
 0xb56   :  { %7403 = vmatmul.mubr.f32.gmra.mrb[186].mxu0 %v6949_v4  ;;  %v6944_v4 = vmul.f32 %v13770_v62, %v13360_v32  ;;  %v6959_v32 = vmul.f32 %v6916_v12, %v13407_v34  ;;  %p10547_p12 = pnand %p10546_p11, %p10540_p8 }
 0xb57   :  { %9722 = vmatpush3.bf16.msra.mxu0 %v9721_v14  ;;  %7407 = vmatprep.mubr.f32.mxu0 %v6958_v1 }
 0xb58   :  { %9724 = vmatprep.subr.bf16.mxu0 %v9723_v0 }
 0xb5a   :  { %7408 = vmatmul.mubr.f32.gmra.mrb[188].mxu0 %v6957_v58 }
 0xb5b   :  { %9726 = vmatpush3.bf16.msra.mxu0 %v9725_v37  ;;  %7412 = vmatprep.mubr.f32.mxu0 %v6966_v19  ;;  %v6960_v37 = vmul.f32 %v13770_v62, %v13407_v34  ;;  %v6975_v34 = vmul.f32 %v6916_v12, %v13454_v38 }
 0xb5c   :  { %9728 = vmatprep.subr.bf16.mxu0 %v9727_v48 }
 0xb5e   :  { %7413 = vmatmul.mubr.f32.gmra.mrb[190].mxu0 %v6965_v39  ;;  %v6984_v39 = vmul.f32 %v13770_v62, %v13476_v28 }
 0xb5f   :  { %9730 = vmatpush3.bf16.msra.mxu0 %v9729_v51  ;;  %7417 = vmatprep.mubr.f32.mxu0 %v6974_v41 }
 0xb60   :  { %9732 = vmatprep.subr.bf16.mxu0 %v9731_v40 }
 0xb61   :  { %v9171_v2 = vpop.f32.mrb[148].mxu0 }
 0xb62   :  { %v9172_v9 = vpop.f32.mrb[149].mxu0  ;;  %7418 = vmatmul.mubr.f32.gmra.mrb[192].mxu0 %v6973_v27 }
 0xb63   :  { %v13774_v35 = vadd.f32 %v9172_v9, %v9171_v2  ;;  %9734 = vmatpush3.bf16.msra.mxu0 %v9733_v23  ;;  %7422 = vmatprep.mubr.f32.mxu0 %v6982_v16 }
 0xb64   :  { %9736 = vmatprep.subr.bf16.mxu0 %v9735_v7 }
 0xb65   :  { %v9174_v18 = vpop.f32.mrb[150].mxu0 }
 0xb66   :  { %v9175_v22 = vpop.f32.mrb[151].mxu0  ;;  %7423 = vmatmul.mubr.f32.gmra.mrb[194].mxu0 %v6981_v63 }
 0xb67   :  { %v9176_v11 = vadd.f32 %v9175_v22, %v9174_v18  ;;  %9738 = vmatpush3.bf16.msra.mxu0 %v9737_v55  ;;  %7492 = vmatprep.mubr.f32.mxu0 %v6928_v59 }
 0xb69   :  { %v9177_v31 = vpop.f32.mrb[152].mxu0 }
 0xb6a   :  { %v9178_v36 = vpop.f32.mrb[153].mxu0  ;;  %7493 = vmatmul.mubr.f32.vlgmr.msra.gmra.mrb[196].mxu0 %v6927_v46 }
 0xb6b   :  { %v9179_v30 = vadd.f32 %v9178_v36, %v9177_v31  ;;  %7497 = vmatprep.mubr.f32.mxu0 %v6936_v24 }
 0xb6d   :  { %v9180_v14 = vpop.f32.mrb[154].mxu0 }
 0xb6e   :  { %v9181_v0 = vpop.f32.mrb[155].mxu0  ;;  %7498 = vmatmul.mubr.f32.gmra.mrb[198].mxu0 %v6935_v13  ;;  %v10184_v13 = vld [vmem:[#allocation22 + $0x8] sm:$0xff]  }
 0xb6f   :  { %v9182_v49 = vadd.f32 %v9181_v0, %v9180_v14  ;;  %7502 = vmatprep.mubr.f32.mxu0 %v6944_v4  ;;  %v10187_v14 = vld [vmem:[#allocation25 + $0x4] ss:$8 sps:$4 sm:$0xff]  }
 0xb71   :  { %v9183_v42 = vpop.f32.mrb[156].mxu0 }
 0xb72   :  { %v9184_v1 = vpop.f32.mrb[157].mxu0  ;;  %7503 = vmatmul.mubr.f32.gmra.mrb[200].mxu0 %v6943_v57 }
 0xb73   :  { %v9185_v3 = vadd.f32 %v9184_v1, %v9183_v42  ;;  %7507 = vmatprep.mubr.f32.mxu0 %v6952_v15 }
 0xb75   :  { %v9186_v50 = vpop.f32.mrb[158].mxu0 }
 0xb76   :  { %v9187_v44 = vpop.f32.mrb[159].mxu0  ;;  %7508 = vmatmul.mubr.f32.gmra.mrb[202].mxu0 %v6951_v26 }
 0xb77   :  { %v9188_v58 = vadd.f32 %v9187_v44, %v9186_v50  ;;  %7512 = vmatprep.mubr.f32.mxu0 %v6960_v37 }
 0xb79   :  { %v9189_v48 = vpop.f32.mrb[160].mxu0 }
 0xb7a   :  { %v9190_v60 = vpop.f32.mrb[161].mxu0  ;;  %7513 = vmatmul.mubr.f32.gmra.mrb[204].mxu0 %v6959_v32 }
 0xb7b   :  { %v9191_v33 = vadd.f32 %v9190_v60, %v9189_v48  ;;  %7517 = vmatprep.mubr.f32.mxu0 %v6968_v21 }
 0xb7d   :  { %v9192_v19 = vpop.f32.mrb[162].mxu0 }
 0xb7e   :  { %v9193_v52 = vpop.f32.mrb[163].mxu0  ;;  %7518 = vmatmul.mubr.f32.gmra.mrb[206].mxu0 %v6967_v8 }
 0xb7f   :  { %v9194_v51 = vadd.f32 %v9193_v52, %v9192_v19  ;;  %7522 = vmatprep.mubr.f32.mxu0 %v6976_v45 }
 0xb81   :  { %v9227_v17 = vpop.f32.mrb[164].mxu0 }
 0xb82   :  { %v9228_v40 = vpop.f32.mrb[165].mxu0  ;;  %7523 = vmatmul.mubr.f32.gmra.mrb[208].mxu0 %v6975_v34 }
 0xb83   :  { %v9229_v29 = vadd.f32 %v9228_v40, %v9227_v17  ;;  %7527 = vmatprep.mubr.f32.mxu0 %v6984_v39 }
 0xb85   :  { %v7285_v61 = vadd.f32 %v9229_v29, %v13774_v35  ;;  %v9230_v6 = vpop.f32.mrb[166].mxu0 }
 0xb86   :  { %v9231_v41 = vpop.f32.mrb[167].mxu0  ;;  %7528 = vmatmul.mubr.f32.gmra.mrb[210].mxu0 %v6983_v47 }
 0xb87   :  { %v9232_v20 = vadd.f32 %v9231_v41, %v9230_v6 }
 0xb89   :  { %v7290_v56 = vadd.f32 %v9232_v20, %v9176_v11  ;;  %v9233_v23 = vpop.f32.mrb[168].mxu0 }
 0xb8a   :  { %v9234_v5 = vpop.f32.mrb[169].mxu0 }
 0xb8b   :  { %v9235_v38 = vadd.f32 %v9234_v5, %v9233_v23 }
 0xb8d   :  { %v7295_v27 = vadd.f32 %v9235_v38, %v9179_v30  ;;  %v9236_v7 = vpop.f32.mrb[170].mxu0  ;;  %v10183_v30 = vld [vmem:[#allocation22] sm:$0xff]  }
 0xb8e   :  { %v9237_v25 = vpop.f32.mrb[171].mxu0  ;;  %9583 = vmatprep.subr.bf16.mxu1 %v10183_v30 }
 0xb8f   :  { %v9238_v10 = vadd.f32 %v9237_v25, %v9236_v7  ;;  %9584 = vmatpush3.bf16.msra.mxu1 %v10183_v30  ;;  %v10188_v30 = vld [vmem:[#allocation25 + $0x10] ss:$8 sps:$4 sm:$0xff]  }
 0xb90   :  { %9585 = vmatprep.subr.bf16.mxu1 %v10184_v13 }
 0xb91   :  { %v7300_v62 = vadd.f32 %v9238_v10, %v9182_v49  ;;  %v9239_v2 = vpop.f32.mrb[172].mxu0 }
 0xb92   :  { %v9240_v16 = vpop.f32.mrb[173].mxu0 }
 0xb93   :  { %v9241_v9 = vadd.f32 %v9240_v16, %v9239_v2  ;;  %9586 = vmatpush3.bf16.msra.mxu1 %v10184_v13 }
 0xb94   :  { %7757 = vmatprep.subr.bf16.mxu1 %v10187_v14  ;;  %v10193_v14 = vld [vmem:[#allocation25 + $0x24] ss:$8 sps:$4 sm:$0xff]  }
 0xb95   :  { %v7305_v55 = vadd.f32 %v9241_v9, %v9185_v3  ;;  %v9242_v28 = vpop.f32.mrb[174].mxu0 }
 0xb96   :  { %v9243_v12 = vpop.f32.mrb[175].mxu0 }
 0xb97   :  { %v9244_v35 = vadd.f32 %v9243_v12, %v9242_v28 }
 0xb99   :  { %v7310_v63 = vadd.f32 %v9244_v35, %v9188_v58  ;;  %v9245_v18 = vpop.f32.mrb[176].mxu0 }
 0xb9a   :  { %v9246_v59 = vpop.f32.mrb[177].mxu0 }
 0xb9b   :  { %v9247_v22 = vadd.f32 %v9246_v59, %v9245_v18  ;;  %v10185_v59 = vld [vmem:[#allocation25] ss:$8 sps:$4 sm:$0xff]  }
 0xb9d   :  { %v7315_v11 = vadd.f32 %v9247_v22, %v9191_v33  ;;  %v9248_v46 = vpop.f32.mrb[178].mxu0 }
 0xb9e   :  { %v9249_v31 = vpop.f32.mrb[179].mxu0 }
 0xb9f   :  { %v9250_v24 = vadd.f32 %v9249_v31, %v9248_v46  ;;  %v10190_v46 = vld [vmem:[#allocation25 + $0x14] ss:$8 sps:$4 sm:$0xff]  }
 0xba1   :  { %v7320_v36 = vadd.f32 %v9250_v24, %v9194_v51 }
 0xc1d   :  { %v9283_v4 = vpop.f32.mrb[180].mxu0 }
 0xc1e   :  { %v9284_v0 = vpop.f32.mrb[181].mxu0 }
 0xc1f   :  { %v9285_v49 = vadd.f32 %v9284_v0, %v9283_v4 }
 0xc21   :  { %v7390_v57 = vadd.f32 %v9285_v49, %v7285_v61  ;;  %v9286_v42 = vpop.f32.mrb[182].mxu0 }
 0xc22   :  { %v9287_v15 = vpop.f32.mrb[183].mxu0 }
 0xc23   :  { %v9288_v1 = vadd.f32 %v9287_v15, %v9286_v42 }
 0xc25   :  { %v7395_v3 = vadd.f32 %v9288_v1, %v7290_v56  ;;  %v9289_v26 = vpop.f32.mrb[184].mxu0  ;;  %v10196_v1 = vld [vmem:[#allocation25 + $0x34] ss:$8 sps:$4 sm:$0xff]  }
 0xc26   :  { %v9290_v50 = vpop.f32.mrb[185].mxu0 }
 0xc27   :  { %v9291_v37 = vadd.f32 %v9290_v50, %v9289_v26 }
 0xc29   :  { %v7400_v44 = vadd.f32 %v9291_v37, %v7295_v27  ;;  %v9292_v58 = vpop.f32.mrb[186].mxu0  ;;  %v10194_v37 = vld [vmem:[#allocation25 + $0x30] ss:$8 sps:$4 sm:$0xff]  }
 0xc2a   :  { %v9293_v32 = vpop.f32.mrb[187].mxu0 }
 0xc2b   :  { %v9294_v48 = vadd.f32 %v9293_v32, %v9292_v58  ;;  %v10199_v58 = vld [vmem:[#allocation25 + $0x44] ss:$8 sps:$4 sm:$0xff]  }
 0xc2d   :  { %v7405_v21 = vadd.f32 %v9294_v48, %v7300_v62  ;;  %v9295_v60 = vpop.f32.mrb[188].mxu0  ;;  %v10197_v48 = vld [vmem:[#allocation25 + $0x40] ss:$8 sps:$4 sm:$0xff]  }
 0xc2e   :  { %v9296_v33 = vpop.f32.mrb[189].mxu0 }
 0xc2f   :  { %v9297_v8 = vadd.f32 %v9296_v33, %v9295_v60  ;;  %v10202_v60 = vld [vmem:[#allocation25 + $0x54] ss:$8 sps:$4 sm:$0xff]   ;;  %v10200_v33 = vld [vmem:[#allocation25 + $0x50] ss:$8 sps:$4 sm:$0xff]  }
 0xc31   :  { %v7410_v19 = vadd.f32 %v9297_v8, %v7305_v55  ;;  %v9298_v45 = vpop.f32.mrb[190].mxu0  ;;  %v10203_v8 = vld [vmem:[#allocation25 + $0x60] ss:$8 sps:$4 sm:$0xff]  }
 0xc32   :  { %v9299_v52 = vpop.f32.mrb[191].mxu0 }
 0xc33   :  { %v9300_v51 = vadd.f32 %v9299_v52, %v9298_v45  ;;  %v10208_v45 = vld [vmem:[#allocation25 + $0x74] ss:$8 sps:$4 sm:$0xff]   ;;  %v10611_v52 = vmov 0  }
 0xc35   :  { %v7415_v34 = vadd.f32 %v9300_v51, %v7310_v63  ;;  %v9301_v17 = vpop.f32.mrb[192].mxu0  ;;  %v10206_v51 = vld [vmem:[#allocation25 + $0x70] ss:$8 sps:$4 sm:$0xff]  }
 0xc36   :  { %v9302_v39 = vpop.f32.mrb[193].mxu0 }
 0xc37   :  { %v9303_v40 = vadd.f32 %v9302_v39, %v9301_v17 }
 0xc39   :  { %v7420_v29 = vadd.f32 %v9303_v40, %v7315_v11  ;;  %v9304_v47 = vpop.f32.mrb[194].mxu0 }
 0xc3a   :  { %v9305_v61 = vpop.f32.mrb[195].mxu0 }
 0xc3b   :  { %v9306_v6 = vadd.f32 %v9305_v61, %v9304_v47 }
 0xc3d   :  { %v7425_v41 = vadd.f32 %v9306_v6, %v7320_v36  ;;  %v9339_v20 = vpop.f32.mrb[196].mxu0 }
 0xc3e   :  { %v9340_v56 = vpop.f32.mrb[197].mxu0 }
 0xc3f   :  { %v9341_v23 = vadd.f32 %v9340_v56, %v9339_v20 }
 0xc41   :  { %v7495_v5 = vadd.f32 %v9341_v23, %v7390_v57  ;;  %v9342_v38 = vpop.f32.mrb[198].mxu0  ;;  %v10191_v57 = vld [vmem:[#allocation25 + $0x20] ss:$8 sps:$4 sm:$0xff]  }
 0xc42   :  { %v9343_v27 = vpop.f32.mrb[199].mxu0 }
 0xc43   :  { %v9344_v7 = vadd.f32 %v9343_v27, %v9342_v38 }
 0xc45   :  { %v7500_v25 = vadd.f32 %v9344_v7, %v7395_v3  ;;  %v9345_v10 = vpop.f32.mrb[200].mxu0 }
 0xc46   :  { %v9346_v62 = vpop.f32.mrb[201].mxu0 }
 0xc47   :  { %v9347_v2 = vadd.f32 %v9346_v62, %v9345_v10  ;;  %v7533_v16 = vpack.c.bf16 %v7500_v25, %v7495_v5 }
 0xc49   :  { %v7505_v9 = vadd.f32 %v9347_v2, %v7400_v44  ;;  %v9348_v55 = vpop.f32.mrb[202].mxu0  ;;  %9587 = vmatprep.mubr.msk.bf16.mxu1 %vm5445_vm14, %v7533_v16 }
 0xc4a   :  { %v9349_v28 = vpop.f32.mrb[203].mxu0 }
 0xc4b   :  { %v9350_v12 = vadd.f32 %v9349_v28, %v9348_v55 }
 0xc4d   :  { %v7510_v35 = vadd.f32 %v9350_v12, %v7405_v21  ;;  %v9351_v63 = vpop.f32.mrb[204].mxu0 }
 0xc4e   :  { %v9352_v18 = vpop.f32.mrb[205].mxu0 }
 0xc4f   :  { %v7534_v22 = vpack.c.bf16 %v7510_v35, %v7505_v9  ;;  %v9353_v11 = vadd.f32 %v9352_v18, %v9351_v63 }
 0xc51   :  { %v7515_v31 = vadd.f32 %v9353_v11, %v7410_v19  ;;  %v9354_v24 = vpop.f32.mrb[206].mxu0  ;;  %9588 = vmatmul.mubr.msk.bf16.vlgmr.msra.gmra.mrb[120].mxu1 %vm5445_vm14, %v7534_v22  ;;  %v10205_v19 = vld [vmem:[#allocation25 + $0x64] ss:$8 sps:$4 sm:$0xff]   ;;  %v7665_v22 = vld [vmem:[#allocation27] sm:$0x3] }
 0xc52   :  { %v9355_v36 = vpop.f32.mrb[207].mxu0  ;;  %7758 = vmatpush1.bf16.msra.mxu1 %v10185_v59  ;;  %v13809_v11 = vrot.slane %v7665_v22, %v13186_v54 }
 0xc53   :  { %v9356_v13 = vadd.f32 %v9355_v36, %v9354_v24  ;;  %7759 = vmatprep.subr.bf16.mxu1 %v10190_v46  ;;  %v13813_v46 = vrot.slane %v7665_v22, %v6095_v43 }
 0xc55   :  { %v7520_v4 = vadd.f32 %v9356_v13, %v7415_v34  ;;  %v9357_v0 = vpop.f32.mrb[208].mxu0  ;;  %v8447_v34 = vld [vmem:[#allocation24] ss:$0 sm:$0xff] }
 0xc56   :  { %v9358_v49 = vpop.f32.mrb[209].mxu0  ;;  %7760 = vmatpush1.bf16.msra.mxu1 %v10188_v30 }
 0xc57   :  { %v9359_v42 = vadd.f32 %v9358_v49, %v9357_v0  ;;  %v7535_v15 = vpack.c.bf16 %v7520_v4, %v7515_v31  ;;  %7761 = vmatprep.subr.bf16.mxu1 %v10193_v14  ;;  %v14392_v14 = vld [vmem:[#allocation44_spill] sm:$0xff] }
 0xc59   :  { %v7525_v3 = vadd.f32 %v9359_v42, %v7420_v29  ;;  %v9360_v26 = vpop.f32.mrb[210].mxu0  ;;  %9591 = vmatprep.mubr.msk.bf16.mxu1 %vm5445_vm14, %v7535_v15  ;;  %v14394_v15 = vld [vmem:[#allocation42_spill] sm:$0xff] }
 0xc5a   :  { %v9361_v50 = vpop.f32.mrb[211].mxu0  ;;  %7762 = vmatpush1.bf16.msra.mxu1 %v10191_v57  ;;  %v14393_v57 = vld [vmem:[#allocation43_spill] sm:$0xff] }
 0xc5b   :  { %v9362_v44 = vadd.f32 %v9361_v50, %v9360_v26  ;;  %7763 = vmatprep.subr.bf16.mxu1 %v10196_v1  ;;  %v14395_v1 = vld [vmem:[#allocation41_spill] sm:$0xff] }
 0xc5d   :  { %v7530_v32 = vadd.f32 %v9362_v44, %v7425_v41 }
 0xc5e   :  { %7764 = vmatpush1.bf16.msra.mxu1 %v10194_v37 }
 0xc5f   :  { %v7536_v21 = vpack.c.bf16 %v7530_v32, %v7525_v3  ;;  %7765 = vmatprep.subr.bf16.mxu1 %v10199_v58 }
 0xc61   :  { %9592 = vmatmul.mubr.msk.bf16.gmra.mrb[124].mxu1 %vm5445_vm14, %v7536_v21 }
 0xc62   :  { %7766 = vmatpush1.bf16.msra.mxu1 %v10197_v48  ;;  %7789 = vmatprep.mubr.bf16.mxu1 %v10611_v52 }
 0xc63   :  { %7767 = vmatprep.subr.bf16.mxu1 %v10202_v60 }
 0xc66   :  { %7768 = vmatpush1.bf16.msra.mxu1 %v10200_v33 }
 0xc67   :  { %7769 = vmatprep.subr.bf16.mxu1 %v10205_v19 }
 0xc6a   :  { %7770 = vmatpush1.bf16.msra.mxu1 %v10203_v8 }
 0xc6b   :  { %7771 = vmatprep.subr.bf16.mxu1 %v10208_v45 }
 0xc6e   :  { %7772 = vmatpush1.bf16.msra.mxu1 %v10206_v51 }
 0xd24   :  { %v9589_v17 = vpop.f32.mrb[120].mxu1 }
 0xd25   :  { %v7615_v39 = vadd.f32 %v9589_v17, %v8447_v34  ;;  %v7606_v40 = vpop.f32.mrb[121].mxu1 }
 0xd26   :  { %v7607_v29 = vadd.f32 %v8447_v34, %v7606_v40  ;;  %v9590_v47 = vpop.f32.mrb[122].mxu1 }
 0xd27   :  { %v7618_v61 = vadd.f32 %v9590_v47, %v8447_v34  ;;  %v7609_v6 = vpop.f32.mrb[123].mxu1  ;;  %v7639_v20 = vmax.f32 %v7615_v39, 0.0 }
 0xd28   :  { %v7610_v41 = vadd.f32 %v8447_v34, %v7609_v6  ;;  %v7637_v23 = vmax.f32 %v7607_v29, 0.0 }
 0xd29   :  { %v7640_v56 = vmax.f32 %v7618_v61, 0.0 }
 0xd2a   :  { %v7638_v5 = vmax.f32 %v7610_v41, 0.0 }
 0xd2b   :  { %v7646_v38 = vpack.c.bf16 %v7640_v56, %v7639_v20 }
 0xd2c   :  { %v7645_v27 = vpack.c.bf16 %v7638_v5, %v7637_v23 }
 0xd2e   :  { %7790 = vmatmul.mubr.bf16.vlgmr.msra.gmra.mrb[128].mxu1 %v7645_v27 }
 0xd2f   :  { %7799 = vmatprep.mubr.bf16.mxu1 %v10611_v52 }
 0xd34   :  { %v9593_v7 = vpop.f32.mrb[124].mxu1 }
 0xd35   :  { %v7631_v25 = vadd.f32 %v9593_v7, %v8447_v34  ;;  %v7622_v10 = vpop.f32.mrb[125].mxu1 }
 0xd36   :  { %v7623_v62 = vadd.f32 %v8447_v34, %v7622_v10  ;;  %v9594_v2 = vpop.f32.mrb[126].mxu1  ;;  %7800 = vmatmul.mubr.bf16.gmra.mrb[132].mxu1 %v7646_v38 }
 0xd37   :  { %v7634_v16 = vadd.f32 %v9594_v2, %v8447_v34  ;;  %v7625_v9 = vpop.f32.mrb[127].mxu1  ;;  %7809 = vmatprep.mubr.bf16.mxu1 %v10611_v52  ;;  %v7643_v28 = vmax.f32 %v7631_v25, 0.0 }
 0xd38   :  { %v7626_v55 = vadd.f32 %v8447_v34, %v7625_v9  ;;  %v7641_v35 = vmax.f32 %v7623_v62, 0.0 }
 0xd39   :  { %v7644_v12 = vmax.f32 %v7634_v16, 0.0 }
 0xd3a   :  { %v7642_v63 = vmax.f32 %v7626_v55, 0.0 }
 0xd3b   :  { %v7648_v18 = vpack.c.bf16 %v7644_v12, %v7643_v28 }
 0xd3c   :  { %v7647_v59 = vpack.c.bf16 %v7642_v63, %v7641_v35 }
 0xd3e   :  { %7810 = vmatmul.mubr.bf16.gmra.mrb[136].mxu1 %v7647_v59 }
 0xd3f   :  { %7819 = vmatprep.mubr.bf16.mxu1 %v10611_v52 }
 0xd46   :  { %7820 = vmatmul.mubr.bf16.gmra.mrb[140].mxu1 %v7648_v18 }
 0xe01   :  { %v7791_v31 = vpop.f32.mrb[128].mxu1 }
 0xe02   :  { %v7792_v24 = vadd.f32 %v7791_v31, %v13809_v11  ;;  %v7793_v36 = vpop.f32.mrb[129].mxu1 }
 0xe03   :  { %v7794_v30 = vadd.f32 %v7793_v36, %v13813_v46  ;;  %v7795_v13 = vpop.f32.mrb[130].mxu1 }
 0xe04   :  { %v7830_v4 = vmul.f32 %v7792_v24, %v14392_v14  ;;  %v7796_v0 = vadd.f32 %v7795_v13, %v13809_v11  ;;  %v7797_v49 = vpop.f32.mrb[131].mxu1 }
 0xe05   :  { %v7831_v42 = vmul.f32 %v7794_v30, %v14393_v57  ;;  %v7798_v54 = vadd.f32 %v7797_v49, %v13813_v46 }
 0xe06   :  { %v7846_v53 = vadd.f32 %v7830_v4, %v14394_v15  ;;  %v7832_v43 = vmul.f32 %v7796_v0, %v14392_v14 }
 0xe07   :  { %v7847_v3 = vadd.f32 %v7831_v42, %v14395_v1  ;;  %v7833_v26 = vmul.f32 %v7798_v54, %v14393_v57 }
 0xe08   :  { %7862 = vst [vmem:[#allocation28] sm:$0xff] %v7846_v53  ;;  %v7848_v50 = vadd.f32 %v7832_v43, %v14394_v15 }
 0xe09   :  { %7863 = vst [vmem:[#allocation28 + $0x8] sm:$0xff] %v7847_v3  ;;  %v7849_v37 = vadd.f32 %v7833_v26, %v14395_v1  ;;  %v7801_v44 = vpop.f32.mrb[132].mxu1 }
 0xe0a   :  { %7864 = vst [vmem:[#allocation28 + $0x10] sm:$0xff] %v7848_v50  ;;  %v7802_v58 = vadd.f32 %v7801_v44, %v13809_v11  ;;  %v7803_v32 = vpop.f32.mrb[133].mxu1 }
 0xe0b   :  { %7865 = vst [vmem:[#allocation28 + $0x18] sm:$0xff] %v7849_v37  ;;  %v7804_v48 = vadd.f32 %v7803_v32, %v13813_v46  ;;  %v7805_v21 = vpop.f32.mrb[134].mxu1 }
 0xe0c   :  { %v7834_v60 = vmul.f32 %v7802_v58, %v14392_v14  ;;  %v7806_v33 = vadd.f32 %v7805_v21, %v13809_v11  ;;  %v7807_v8 = vpop.f32.mrb[135].mxu1 }
 0xe0d   :  { %v7835_v19 = vmul.f32 %v7804_v48, %v14393_v57  ;;  %v7808_v45 = vadd.f32 %v7807_v8, %v13813_v46 }
 0xe0e   :  { %v7850_v52 = vadd.f32 %v7834_v60, %v14394_v15  ;;  %v7836_v51 = vmul.f32 %v7806_v33, %v14392_v14 }
 0xe0f   :  { %v7851_v34 = vadd.f32 %v7835_v19, %v14395_v1  ;;  %v7837_v17 = vmul.f32 %v7808_v45, %v14393_v57 }
 0xe10   :  { %7866 = vst [vmem:[#allocation28 + $0x20] sm:$0xff] %v7850_v52  ;;  %v7852_v39 = vadd.f32 %v7836_v51, %v14394_v15 }
 0xe11   :  { %7867 = vst [vmem:[#allocation28 + $0x28] sm:$0xff] %v7851_v34  ;;  %v7853_v40 = vadd.f32 %v7837_v17, %v14395_v1  ;;  %v7811_v29 = vpop.f32.mrb[136].mxu1 }
 0xe12   :  { %7868 = vst [vmem:[#allocation28 + $0x30] sm:$0xff] %v7852_v39  ;;  %v7812_v47 = vadd.f32 %v7811_v29, %v13809_v11  ;;  %v7813_v61 = vpop.f32.mrb[137].mxu1 }
 0xe13   :  { %7869 = vst [vmem:[#allocation28 + $0x38] sm:$0xff] %v7853_v40  ;;  %v7814_v6 = vadd.f32 %v7813_v61, %v13813_v46  ;;  %v7815_v41 = vpop.f32.mrb[138].mxu1 }
 0xe14   :  { %v7838_v20 = vmul.f32 %v7812_v47, %v14392_v14  ;;  %v7816_v56 = vadd.f32 %v7815_v41, %v13809_v11  ;;  %v7817_v23 = vpop.f32.mrb[139].mxu1 }
 0xe15   :  { %v7839_v5 = vmul.f32 %v7814_v6, %v14393_v57  ;;  %v7818_v38 = vadd.f32 %v7817_v23, %v13813_v46 }
 0xe16   :  { %v7854_v27 = vadd.f32 %v7838_v20, %v14394_v15  ;;  %v7840_v7 = vmul.f32 %v7816_v56, %v14392_v14 }
 0xe17   :  { %v7855_v25 = vadd.f32 %v7839_v5, %v14395_v1  ;;  %v7841_v10 = vmul.f32 %v7818_v38, %v14393_v57 }
 0xe18   :  { %7870 = vst [vmem:[#allocation28 + $0x40] sm:$0xff] %v7854_v27  ;;  %v7856_v62 = vadd.f32 %v7840_v7, %v14394_v15 }
 0xe19   :  { %7871 = vst [vmem:[#allocation28 + $0x48] sm:$0xff] %v7855_v25  ;;  %v7857_v2 = vadd.f32 %v7841_v10, %v14395_v1  ;;  %v7821_v16 = vpop.f32.mrb[140].mxu1 }
 0xe1a   :  { %7872 = vst [vmem:[#allocation28 + $0x50] sm:$0xff] %v7856_v62  ;;  %v7822_v9 = vadd.f32 %v7821_v16, %v13809_v11  ;;  %v7823_v55 = vpop.f32.mrb[141].mxu1 }
 0xe1b   :  { %7873 = vst [vmem:[#allocation28 + $0x58] sm:$0xff] %v7857_v2  ;;  %v7824_v28 = vadd.f32 %v7823_v55, %v13813_v46  ;;  %v7825_v12 = vpop.f32.mrb[142].mxu1 }
 0xe1c   :  { %v7842_v35 = vmul.f32 %v7822_v9, %v14392_v14  ;;  %v7826_v63 = vadd.f32 %v7825_v12, %v13809_v11  ;;  %v7827_v18 = vpop.f32.mrb[143].mxu1 }
 0xe1d   :  { %v7843_v59 = vmul.f32 %v7824_v28, %v14393_v57  ;;  %v7828_v22 = vadd.f32 %v7827_v18, %v13813_v46 }
 0xe1e   :  { %v7858_v31 = vadd.f32 %v7842_v35, %v14394_v15  ;;  %v7844_v24 = vmul.f32 %v7826_v63, %v14392_v14 }
 0xe1f   :  { %v7859_v36 = vadd.f32 %v7843_v59, %v14395_v1  ;;  %v7845_v30 = vmul.f32 %v7828_v22, %v14393_v57 }
 0xe20   :  { %7874 = vst [vmem:[#allocation28 + $0x60] sm:$0xff] %v7858_v31  ;;  %v7860_v13 = vadd.f32 %v7844_v24, %v14394_v15 }
 0xe21   :  { %7875 = vst [vmem:[#allocation28 + $0x68] sm:$0xff] %v7859_v36  ;;  %v7861_v11 = vadd.f32 %v7845_v30, %v14395_v1 }
 0xe22   :  { %7876 = vst [vmem:[#allocation28 + $0x70] sm:$0xff] %v7860_v13 }
 0xe23   :  { %7877 = vst [vmem:[#allocation28 + $0x78] sm:$0xff] %v7861_v11 }
 0xe24   :  { %10550 = shalt.err (!%p10547_p12)
}
 0xe25   :  { %s14396_s10 = sld [smem:[#allocation102_spill]] }
 0xe2b   :  { %s10551_s23 = scalar_lea.hbm %s14396_s10, 2048 }
 0xe2c   :  { %p10552_p13 = scmp.ne.s32.totalorder %s14396_s10, %s10551_s23  ;;  %p10555_p0 = scmp.lt.u32.totalorder %s10551_s23, %s14396_s10 }
 0xe2e   :  { %p10557_p1 = pnand %p10555_p0, %p10552_p13 }
 0xe30   :  { %10560 = shalt.err (!%p10557_p1)
}
 0xe31   :  { %7889 = dma.vmem_to_hbm [thread:$0]  %s7884_s30, 2048, %s14396_s10, [#allocation6], %s14069_s25, %s14069_s25, %s14068_s4  }
 0xe32   :  { %10579 = dma.done.wait [#allocation6], 2048  }
 0xe33   :  { %10580 = vsyncadd [#allocation6], 4294965248 }
 0xe34   :  { %7893 = vsyncpa [#allocation5], 1 }
 0xe35   :  { %7894 = vsyncpa [#allocation8], 1 }
 0xe36   :  { %7895 = vsyncpa [#allocation11], 1 }
 0xe37   :  { %7896 = vsyncpa [#allocation14], 1 }
 0xe38   :  { %7897 = vsyncpa [#allocation17], 1 }
 0xe39   :  { %7898 = vsyncpa [#allocation20], 1 }
 0xe3a   :  { %7899 = vsyncpa [#allocation23], 1 }
 0xe3b   :  { %7900 = vsyncpa [#allocation26], 1 }
 0xe3c   :  { %7901 = vsyncpa [#allocation6], 1 }
 0xe3d   :  { %7902 = vsyncmov [#allocation3] }
 0xe40   :  { %s7903_s2 = vpop.sfrf %7902 }
 0xe41   :  { %p8470_p2 = scmp.ne.s32.totalorder %s7903_s2, 0 }
 0xe43   :  { %7907 = shalt.err (%p8470_p2)  }

</bundles_post_ra>
